<compile_context>
chip_gen: v6e
topology: v6e:2x2x1
jax: 0.10.0
libtpu: 0.0.40
codegen_flags: <defaults>
</compile_context>

<pallas_src>
import jax
import jax.numpy as jnp
from jax.experimental import pallas as pl
from jax.experimental.pallas import tpu as pltpu


HIDDEN = 32          # base_model.config.hidden_size (small synthetic value)
BATCH = 2
NUM_CLASSES = 2
OUT_PAD = 128        # lane-dense padded width of the final layer's output


def mlp_head_kernel(a_ref, b_ref,
                    w0a_ref, w0b_ref, b0_ref,
                    w1_ref, b1_ref,
                    w2_ref, b2_ref,
                    w3_ref, b3_ref,
                    o_ref):
    """Fused 4-layer MLP head: bf16 weight stream, f32 accumulation."""
    a = a_ref[...].astype(jnp.bfloat16)                               # [B, H]
    b = b_ref[...].astype(jnp.bfloat16)                               # [B, H]

    # fc0 on the split weight halves (replaces cat([a, b]) @ W0).
    h = (jnp.dot(a, w0a_ref[...], preferred_element_type=jnp.float32)
         + jnp.dot(b, w0b_ref[...], preferred_element_type=jnp.float32))
    h = jnp.maximum(h + b0_ref[...], 0.0)                             # drop1(eval)+relu

    h = jnp.dot(h.astype(jnp.bfloat16), w1_ref[...],
                preferred_element_type=jnp.float32)                   # [B, 1024]
    h = jnp.maximum(h + b1_ref[...], 0.0)                             # drop2(eval)+relu

    h = jnp.dot(h.astype(jnp.bfloat16), w2_ref[...],
                preferred_element_type=jnp.float32)                   # [B, 512]
    h = jnp.maximum(h + b2_ref[...], 0.0)                             # drop3(eval)+relu

    out = jnp.dot(h.astype(jnp.bfloat16), w3_ref[...],
                  preferred_element_type=jnp.float32)                 # [B, 128] (padded)
    o_ref[...] = out + b3_ref[...]


def sotanet_head(a_pool, b_pool, params):
    """Run the fused Pallas MLP head on the two pooler outputs."""
    B = a_pool.shape[0]
    w0a, w0b, b0, w1, b1, w2, b2, w3p, b3p = params
    args = (a_pool, b_pool, w0a, w0b, b0, w1, b1, w2, b2, w3p, b3p)

    # Everything fits comfortably in VMEM (bf16 weights ~5.5 MiB); a single
    # grid point with full-array blocks keeps the whole chain fused.
    def full_spec(arr):
        nd = arr.ndim
        return pl.BlockSpec(arr.shape, lambda *_: (0,) * nd)

    out_padded = pl.pallas_call(
        mlp_head_kernel,
        out_shape=jax.ShapeDtypeStruct((B, OUT_PAD), jnp.float32),
        grid=(),
        in_specs=[full_spec(x) for x in args],
        out_specs=pl.BlockSpec((B, OUT_PAD), lambda: (0, 0)),
        compiler_params=pltpu.CompilerParams(
            vmem_limit_bytes=32 * 1024 * 1024),
    )(*args)

    return out_padded[:, :NUM_CLASSES]                # drop the zero lane padding


def init_params(key, hidden):
    """Synthetic parameters matching nn.Linear init, stored for the kernel.

    Weights are cast to bf16 (HBM-traffic halving); fc0 is pre-split into the
    a-/b-halves; fc3 is zero-padded to 128 output lanes.
    """
    sizes = [(2 * hidden, 2048), (2048, 1024), (1024, 512), (512, NUM_CLASSES)]
    raw = []
    for fan_in, fan_out in sizes:
        kw, kb, key = jax.random.split(key, 3)
        bound = 1.0 / jnp.sqrt(fan_in)
        w = jax.random.uniform(kw, (fan_in, fan_out), jnp.float32, -bound, bound)
        b = jax.random.uniform(kb, (1, fan_out), jnp.float32, -bound, bound)
        raw += [w, b]
    w0, b0, w1, b1, w2, b2, w3, b3 = raw

    w0a = w0[:hidden].astype(jnp.bfloat16)            # rows multiplied by a_pool
    w0b = w0[hidden:].astype(jnp.bfloat16)            # rows multiplied by b_pool

    w3p = jnp.zeros((512, OUT_PAD), jnp.float32).at[:, :NUM_CLASSES].set(w3)
    w3p = w3p.astype(jnp.bfloat16)
    b3p = jnp.zeros((1, OUT_PAD), jnp.float32).at[:, :NUM_CLASSES].set(b3)

    return (w0a, w0b, b0,
            w1.astype(jnp.bfloat16), b1,
            w2.astype(jnp.bfloat16), b2,
            w3p, b3p)


def reference_head(a_pool, b_pool, params):
    """Pure-JAX reference with the same mixed-precision semantics."""
    w0a, w0b, b0, w1, b1, w2, b2, w3p, b3p = params
    x = jnp.concatenate([a_pool, b_pool], axis=1).astype(jnp.bfloat16)
    w0 = jnp.concatenate([w0a, w0b], axis=0)
    h = jnp.maximum(jnp.dot(x, w0, preferred_element_type=jnp.float32) + b0, 0.0)
    h = jnp.maximum(jnp.dot(h.astype(jnp.bfloat16), w1,
                            preferred_element_type=jnp.float32) + b1, 0.0)
    h = jnp.maximum(jnp.dot(h.astype(jnp.bfloat16), w2,
                            preferred_element_type=jnp.float32) + b2, 0.0)
    out = jnp.dot(h.astype(jnp.bfloat16), w3p,
                  preferred_element_type=jnp.float32) + b3p
    return out[:, :NUM_CLASSES]


if __name__ == "__main__":
    key = jax.random.PRNGKey(0)
    ka, kb, kp = jax.random.split(key, 3)

    # Synthetic pooler outputs from the (not re-implemented) base model.
    a_pool = jax.random.normal(ka, (BATCH, HIDDEN), jnp.float32)
    b_pool = jax.random.normal(kb, (BATCH, HIDDEN), jnp.float32)

    params = init_params(kp, HIDDEN)

    out = sotanet_head(a_pool, b_pool, params)
    out = jax.block_until_ready(out)

    ref = reference_head(a_pool, b_pool, params)
    assert out.shape == (BATCH, NUM_CLASSES)
    assert jnp.allclose(out, ref, atol=1e-2, rtol=1e-2), "mismatch vs reference"

    print("KERNEL_OK")
</pallas_src>

<mosaic_0001>
module attributes {stable_mosaic.version = 11 : i64} {
  func.func @mlp_head_kernel(%arg0: memref<2x32xf32, #tpu.memory_space<vmem>>, %arg1: memref<2x32xf32, #tpu.memory_space<vmem>>, %arg2: memref<32x2048xbf16, #tpu.memory_space<vmem>>, %arg3: memref<32x2048xbf16, #tpu.memory_space<vmem>>, %arg4: memref<1x2048xf32, #tpu.memory_space<vmem>>, %arg5: memref<2048x1024xbf16, #tpu.memory_space<vmem>>, %arg6: memref<1x1024xf32, #tpu.memory_space<vmem>>, %arg7: memref<1024x512xbf16, #tpu.memory_space<vmem>>, %arg8: memref<1x512xf32, #tpu.memory_space<vmem>>, %arg9: memref<512x128xbf16, #tpu.memory_space<vmem>>, %arg10: memref<1x128xf32, #tpu.memory_space<vmem>>, %arg11: memref<2x128xf32, #tpu.memory_space<vmem>>) attributes {dimension_semantics = [], scalar_prefetch = 0 : i64, scratch_operands = 0 : i64, tpu.core_type = #tpu.core_type<tc>} {
    %c0 = arith.constant 0 : index
    %c0_0 = arith.constant 0 : index
    %0 = vector.load %arg0[%c0, %c0_0] : memref<2x32xf32, #tpu.memory_space<vmem>>, vector<2x32xf32>
    %1 = arith.truncf %0 : vector<2x32xf32> to vector<2x32xbf16>
    %c0_1 = arith.constant 0 : index
    %c0_2 = arith.constant 0 : index
    %2 = vector.load %arg1[%c0_1, %c0_2] : memref<2x32xf32, #tpu.memory_space<vmem>>, vector<2x32xf32>
    %3 = arith.truncf %2 : vector<2x32xf32> to vector<2x32xbf16>
    %c0_3 = arith.constant 0 : index
    %c0_4 = arith.constant 0 : index
    %4 = vector.load %arg2[%c0_3, %c0_4] : memref<32x2048xbf16, #tpu.memory_space<vmem>>, vector<32x2048xbf16>
    %cst = arith.constant dense<0.000000e+00> : vector<2x2048xf32>
    %5 = tpu.matmul %1, %4, %cst {dimension_numbers = #tpu.dot_dimension_numbers<[1], [0], [0], [1], [0, 0, 1, 1], [], []>} : vector<2x32xbf16>, vector<32x2048xbf16>, vector<2x2048xf32> -> vector<2x2048xf32>
    %c0_5 = arith.constant 0 : index
    %c0_6 = arith.constant 0 : index
    %6 = vector.load %arg3[%c0_5, %c0_6] : memref<32x2048xbf16, #tpu.memory_space<vmem>>, vector<32x2048xbf16>
    %cst_7 = arith.constant dense<0.000000e+00> : vector<2x2048xf32>
    %7 = tpu.matmul %3, %6, %cst_7 {dimension_numbers = #tpu.dot_dimension_numbers<[1], [0], [0], [1], [0, 0, 1, 1], [], []>} : vector<2x32xbf16>, vector<32x2048xbf16>, vector<2x2048xf32> -> vector<2x2048xf32>
    %8 = arith.addf %5, %7 : vector<2x2048xf32>
    %c0_8 = arith.constant 0 : index
    %c0_9 = arith.constant 0 : index
    %9 = vector.load %arg4[%c0_8, %c0_9] : memref<1x2048xf32, #tpu.memory_space<vmem>>, vector<1x2048xf32>
    %10 = vector.broadcast %9 : vector<1x2048xf32> to vector<2x2048xf32>
    %11 = arith.addf %8, %10 : vector<2x2048xf32>
    %cst_10 = arith.constant 0.000000e+00 : f32
    %12 = vector.broadcast %cst_10 : f32 to vector<2x2048xf32>
    %13 = arith.maximumf %11, %12 : vector<2x2048xf32>
    %14 = arith.truncf %13 : vector<2x2048xf32> to vector<2x2048xbf16>
    %c0_11 = arith.constant 0 : index
    %c0_12 = arith.constant 0 : index
    %15 = vector.load %arg5[%c0_11, %c0_12] : memref<2048x1024xbf16, #tpu.memory_space<vmem>>, vector<2048x1024xbf16>
    %cst_13 = arith.constant dense<0.000000e+00> : vector<2x1024xf32>
    %16 = tpu.matmul %14, %15, %cst_13 {dimension_numbers = #tpu.dot_dimension_numbers<[1], [0], [0], [1], [0, 0, 1, 1], [], []>} : vector<2x2048xbf16>, vector<2048x1024xbf16>, vector<2x1024xf32> -> vector<2x1024xf32>
    %c0_14 = arith.constant 0 : index
    %c0_15 = arith.constant 0 : index
    %17 = vector.load %arg6[%c0_14, %c0_15] : memref<1x1024xf32, #tpu.memory_space<vmem>>, vector<1x1024xf32>
    %18 = vector.broadcast %17 : vector<1x1024xf32> to vector<2x1024xf32>
    %19 = arith.addf %16, %18 : vector<2x1024xf32>
    %cst_16 = arith.constant 0.000000e+00 : f32
    %20 = vector.broadcast %cst_16 : f32 to vector<2x1024xf32>
    %21 = arith.maximumf %19, %20 : vector<2x1024xf32>
    %22 = arith.truncf %21 : vector<2x1024xf32> to vector<2x1024xbf16>
    %c0_17 = arith.constant 0 : index
    %c0_18 = arith.constant 0 : index
    %23 = vector.load %arg7[%c0_17, %c0_18] : memref<1024x512xbf16, #tpu.memory_space<vmem>>, vector<1024x512xbf16>
    %cst_19 = arith.constant dense<0.000000e+00> : vector<2x512xf32>
    %24 = tpu.matmul %22, %23, %cst_19 {dimension_numbers = #tpu.dot_dimension_numbers<[1], [0], [0], [1], [0, 0, 1, 1], [], []>} : vector<2x1024xbf16>, vector<1024x512xbf16>, vector<2x512xf32> -> vector<2x512xf32>
    %c0_20 = arith.constant 0 : index
    %c0_21 = arith.constant 0 : index
    %25 = vector.load %arg8[%c0_20, %c0_21] : memref<1x512xf32, #tpu.memory_space<vmem>>, vector<1x512xf32>
    %26 = vector.broadcast %25 : vector<1x512xf32> to vector<2x512xf32>
    %27 = arith.addf %24, %26 : vector<2x512xf32>
    %cst_22 = arith.constant 0.000000e+00 : f32
    %28 = vector.broadcast %cst_22 : f32 to vector<2x512xf32>
    %29 = arith.maximumf %27, %28 : vector<2x512xf32>
    %30 = arith.truncf %29 : vector<2x512xf32> to vector<2x512xbf16>
    %c0_23 = arith.constant 0 : index
    %c0_24 = arith.constant 0 : index
    %31 = vector.load %arg9[%c0_23, %c0_24] : memref<512x128xbf16, #tpu.memory_space<vmem>>, vector<512x128xbf16>
    %cst_25 = arith.constant dense<0.000000e+00> : vector<2x128xf32>
    %32 = tpu.matmul %30, %31, %cst_25 {dimension_numbers = #tpu.dot_dimension_numbers<[1], [0], [0], [1], [0, 0, 1, 1], [], []>} : vector<2x512xbf16>, vector<512x128xbf16>, vector<2x128xf32> -> vector<2x128xf32>
    %c0_26 = arith.constant 0 : index
    %c0_27 = arith.constant 0 : index
    %33 = vector.load %arg10[%c0_26, %c0_27] : memref<1x128xf32, #tpu.memory_space<vmem>>, vector<1x128xf32>
    %34 = vector.broadcast %33 : vector<1x128xf32> to vector<2x128xf32>
    %35 = arith.addf %32, %34 : vector<2x128xf32>
    %c0_28 = arith.constant 0 : index
    %c0_29 = arith.constant 0 : index
    %36 = vector.load %arg11[%c0_28, %c0_29] : memref<2x128xf32, #tpu.memory_space<vmem>>, vector<2x128xf32>
    tpu.vector_store %arg11[%c0_28, %c0_29], %35 {strides = array<i32>} : memref<2x128xf32, #tpu.memory_space<vmem>>, vector<2x128xf32>,
    return
  }
}

</mosaic_0001>

<bundles_post_ra>
// kernel: tpu_custom_call.1
= control target key start
LH: loop header
LB: loop body
LE: loop exit
PB: predicated region body
PF: predicated region fallthrough
CT: control target
= control target key end

     0   :  { %16 = vsyncpa [#allocation3], 0  ;;  %s13823_s0 = inlined_call_operand.hbm [shape: f32[2,32], index: 0, kind: input, shape index: {}]   ;;  %s13824_s1 = inlined_call_operand.hbm [shape: f32[2,32], index: 1, kind: input, shape index: {}]   ;;  %s13825_s2 = inlined_call_operand.hbm [shape: bf16[32,2048], index: 2, kind: input, shape index: {}]   ;;  %s13826_s3 = inlined_call_operand.hbm [shape: bf16[32,2048], index: 3, kind: input, shape index: {}]   ;;  %s13827_s4 = inlined_call_operand.hbm [shape: f32[1,2048], index: 4, kind: input, shape index: {}]   ;;  %s13828_s5 = inlined_call_operand.hbm [shape: bf16[2048,1024], index: 5, kind: input, shape index: {}]   ;;  %s13829_s6 = inlined_call_operand.hbm [shape: f32[1,1024], index: 6, kind: input, shape index: {}]   ;;  %s13830_s7 = inlined_call_operand.hbm [shape: bf16[1024,512], index: 7, kind: input, shape index: {}]   ;;  %s13831_s8 = inlined_call_operand.hbm [shape: f32[1,512], index: 8, kind: input, shape index: {}]   ;;  %s13832_s9 = inlined_call_operand.hbm [shape: bf16[512,128], index: 9, kind: input, shape index: {}]   ;;  %s13833_s10 = inlined_call_operand.hbm [shape: f32[1,128], index: 10, kind: input, shape index: {}]   ;;  %s13834_s11 = inlined_call_operand.hbm [shape: f32[2,128], index: 11, kind: output, shape index: {}]  }
   0x1   :  { %17 = vsyncpa [#allocation6], 0 }
   0x2   :  { %18 = vsyncpa [#allocation9], 0 }
   0x3   :  { %19 = vsyncpa [#allocation12], 0 }
   0x4   :  { %20 = vsyncpa [#allocation15], 0 }
   0x5   :  { %21 = vsyncpa [#allocation18], 0 }
   0x6   :  { %22 = vsyncpa [#allocation4], 0  ;;  %s13262_s17 = smov [#allocation5]  }
   0x7   :  { %s39_s18 = sshll.u32 %s13262_s17, 4  ;;  %s40_s18 = int_to_ptr.vmem [resolvable:$true] %s39_s18 }
   0x8   :  { %s13016_s19 = scalar_lea.vmem %s40_s18, 32  ;;  %p13021_p1 = scmp.lt.s32.totalorder %s40_s18, %s40_s18 }
   0x9   :  { %p13017_p0 = scmp.ne.s32.totalorder %s40_s18, %s13016_s19  ;;  %p13022_p2 = scmp.lt.s32.totalorder %s13016_s19, %s13016_s19 }
   0xb   :  { %p13023_p3 = por %p13022_p2, %p13021_p1 }
   0xd   :  { %p13024_p4 = pnand %p13023_p3, %p13017_p0 }
   0xf   :  { %13027 = shalt.err (!%p13024_p4)
}
  0x10   :  { %42 = dma.hbm_to_vmem [thread:$0]  %s13824_s1, 32, %s40_s18, [#allocation6]  }
  0x11   :  { %s13263_s22 = smov [#allocation8]   ;;  %s13264_s24 = smov [#allocation11]  }
  0x12   :  { %s60_s23 = sshll.u32 %s13263_s22, 4  ;;  %s82_s25 = sshll.u32 %s13264_s24, 4  ;;  %s61_s23 = int_to_ptr.vmem [resolvable:$true] %s60_s23  ;;  %s83_s25 = int_to_ptr.vmem [resolvable:$true] %s82_s25 }
  0x13   :  { %s13036_s26 = scalar_lea.vmem %s61_s23, 4096  ;;  %p13041_p6 = scmp.lt.s32.totalorder %s61_s23, %s61_s23 }
  0x14   :  { %p13037_p5 = scmp.ne.s32.totalorder %s61_s23, %s13036_s26  ;;  %p13042_p7 = scmp.lt.s32.totalorder %s13036_s26, %s13036_s26 }
  0x16   :  { %p13043_p8 = por %p13042_p7, %p13041_p6 }
  0x18   :  { %p13044_p9 = pnand %p13043_p8, %p13037_p5 }
  0x1a   :  { %13047 = shalt.err (!%p13044_p9)
}
  0x1b   :  { %s13265_s27 = smov 1024   ;;  %s13266_s28 = smov 64  }
  0x1c   :  { %66 = dma.hbm_to_vmem [thread:$0]  %s13826_s3, 4096, %s61_s23, [#allocation9], %s13265_s27, %s13265_s27, %s13266_s28  }
  0x1d   :  { %s13056_s1 = scalar_lea.vmem %s83_s25, 131072  ;;  %p13061_p11 = scmp.lt.s32.totalorder %s83_s25, %s83_s25 }
  0x1e   :  { %p13057_p10 = scmp.ne.s32.totalorder %s83_s25, %s13056_s1  ;;  %p13062_p12 = scmp.lt.s32.totalorder %s13056_s1, %s13056_s1 }
  0x20   :  { %p13063_p13 = por %p13062_p12, %p13061_p11 }
  0x22   :  { %p13064_p0 = pnand %p13063_p13, %p13057_p10 }
  0x24   :  { %13067 = shalt.err (!%p13064_p0)
}
  0x25   :  { %s13267_s12 = smov 512   ;;  %s13268_s13 = smov 32  }
  0x26   :  { %88 = dma.hbm_to_vmem [thread:$0]  %s13828_s5, 131072, %s83_s25, [#allocation12], %s13267_s12, %s13267_s12, %s13268_s13  }
  0x27   :  { %s13269_s16 = smov [#allocation14]  }
  0x28   :  { %s104_s17 = sshll.u32 %s13269_s16, 4  ;;  %s105_s17 = int_to_ptr.vmem [resolvable:$true] %s104_s17 }
  0x29   :  { %s13076_s18 = scalar_lea.vmem %s105_s17, 32768  ;;  %p13081_p2 = scmp.lt.s32.totalorder %s105_s17, %s105_s17 }
  0x2a   :  { %p13077_p1 = scmp.ne.s32.totalorder %s105_s17, %s13076_s18  ;;  %p13082_p3 = scmp.lt.s32.totalorder %s13076_s18, %s13076_s18 }
  0x2c   :  { %p13083_p4 = por %p13082_p3, %p13081_p2 }
  0x2e   :  { %p13084_p5 = pnand %p13083_p4, %p13077_p1 }
  0x30   :  { %13087 = shalt.err (!%p13084_p5)
}
  0x31   :  { %s13270_s3 = smov 256   ;;  %s13271_s19 = smov 16  }
  0x32   :  { %110 = dma.hbm_to_vmem [thread:$0]  %s13830_s7, 32768, %s105_s17, [#allocation15], %s13270_s3, %s13270_s3, %s13271_s19  }
  0x33   :  { %s13272_s22 = smov [#allocation17]   ;;  %s13273_s5 = smov [#allocation2]  }
  0x34   :  { %s126_s23 = sshll.u32 %s13272_s22, 4  ;;  %s29_s24 = sshll.u32 %s13273_s5, 4  ;;  %s127_s23 = int_to_ptr.vmem [resolvable:$true] %s126_s23  ;;  %s30_s24 = int_to_ptr.vmem [resolvable:$true] %s29_s24 }
  0x35   :  { %s13096_s25 = scalar_lea.vmem %s127_s23, 4096  ;;  %p13101_p7 = scmp.lt.s32.totalorder %s127_s23, %s127_s23 }
  0x36   :  { %p13097_p6 = scmp.ne.s32.totalorder %s127_s23, %s13096_s25  ;;  %p13102_p8 = scmp.lt.s32.totalorder %s13096_s25, %s13096_s25 }
  0x38   :  { %p13103_p9 = por %p13102_p8, %p13101_p7 }
  0x3a   :  { %p13104_p10 = pnand %p13103_p9, %p13097_p6 }
  0x3c   :  { %13107 = shalt.err (!%p13104_p10)
}
  0x3d   :  { %s13274_s26 = smov 4   ;;  %s13116_s7 = scalar_lea.vmem %s30_s24, 32 }
  0x3e   :  { %132 = dma.hbm_to_vmem [thread:$0]  %s13832_s9, 4096, %s127_s23, [#allocation18], %s13266_s28, %s13266_s28, %s13274_s26  }
  0x3f   :  { %p13117_p11 = scmp.ne.s32.totalorder %s30_s24, %s13116_s7  ;;  %p13121_p12 = scmp.lt.s32.totalorder %s30_s24, %s30_s24 }
  0x40   :  { %p13122_p13 = scmp.lt.s32.totalorder %s13116_s7, %s13116_s7 }
  0x42   :  { %p13123_p0 = por %p13122_p13, %p13121_p12 }
  0x44   :  { %p13124_p1 = pnand %p13123_p0, %p13117_p11 }
  0x46   :  { %13127 = shalt.err (!%p13124_p1)
}
  0x47   :  { %32 = dma.hbm_to_vmem [thread:$0]  %s13823_s0, 32, %s30_s24, [#allocation3]  }
  0x48   :  { %s13275_s13 = smov [#allocation7]   ;;  %s13276_s15 = smov [#allocation10]  }
  0x49   :  { %s48_s14 = sshll.u32 %s13275_s13, 4  ;;  %s73_s16 = sshll.u32 %s13276_s15, 4  ;;  %s49_s14 = int_to_ptr.vmem [resolvable:$true] %s48_s14  ;;  %s74_s16 = int_to_ptr.vmem [resolvable:$true] %s73_s16 }
  0x4a   :  { %s13136_s17 = scalar_lea.vmem %s49_s14, 4096  ;;  %p13141_p3 = scmp.lt.s32.totalorder %s49_s14, %s49_s14 }
  0x4b   :  { %p13137_p2 = scmp.ne.s32.totalorder %s49_s14, %s13136_s17  ;;  %p13142_p4 = scmp.lt.s32.totalorder %s13136_s17, %s13136_s17 }
  0x4d   :  { %p13143_p5 = por %p13142_p4, %p13141_p3 }
  0x4f   :  { %p13144_p6 = pnand %p13143_p5, %p13137_p2 }
  0x51   :  { %13147 = shalt.err (!%p13144_p6)
}
  0x52   :  { %54 = dma.hbm_to_vmem [thread:$0]  %s13825_s2, 4096, %s49_s14, [#allocation6], %s13265_s27, %s13265_s27, %s13266_s28  }
  0x53   :  { %s13156_s0 = scalar_lea.vmem %s74_s16, 256  ;;  %p13161_p8 = scmp.lt.s32.totalorder %s74_s16, %s74_s16 }
  0x54   :  { %p13157_p7 = scmp.ne.s32.totalorder %s74_s16, %s13156_s0  ;;  %p13162_p9 = scmp.lt.s32.totalorder %s13156_s0, %s13156_s0 }
  0x56   :  { %p13163_p10 = por %p13162_p9, %p13161_p8 }
  0x58   :  { %p13164_p11 = pnand %p13163_p10, %p13157_p7 }
  0x5a   :  { %13167 = shalt.err (!%p13164_p11)
}
  0x5b   :  { %76 = dma.hbm_to_vmem [thread:$0]  %s13827_s4, 256, %s74_s16, [#allocation9]  }
  0x5c   :  { %s13277_s20 = smov [#allocation13]   ;;  %s13278_s22 = smov [#allocation16]  }
  0x5d   :  { %s95_s21 = sshll.u32 %s13277_s20, 4  ;;  %s117_s23 = sshll.u32 %s13278_s22, 4  ;;  %s96_s21 = int_to_ptr.vmem [resolvable:$true] %s95_s21  ;;  %s118_s23 = int_to_ptr.vmem [resolvable:$true] %s117_s23 }
  0x5e   :  { %s13176_s5 = scalar_lea.vmem %s96_s21, 128  ;;  %p13181_p13 = scmp.lt.s32.totalorder %s96_s21, %s96_s21 }
  0x5f   :  { %p13177_p12 = scmp.ne.s32.totalorder %s96_s21, %s13176_s5  ;;  %p13182_p0 = scmp.lt.s32.totalorder %s13176_s5, %s13176_s5 }
  0x61   :  { %p13183_p1 = por %p13182_p0, %p13181_p13 }
  0x63   :  { %p13184_p2 = pnand %p13183_p1, %p13177_p12 }
  0x65   :  { %13187 = shalt.err (!%p13184_p2)
}
  0x66   :  { %98 = dma.hbm_to_vmem [thread:$0]  %s13829_s6, 128, %s96_s21, [#allocation12]  }
  0x67   :  { %s13196_s28 = scalar_lea.vmem %s118_s23, 64  ;;  %p13201_p4 = scmp.lt.s32.totalorder %s118_s23, %s118_s23 }
  0x68   :  { %p13197_p3 = scmp.ne.s32.totalorder %s118_s23, %s13196_s28  ;;  %p13202_p5 = scmp.lt.s32.totalorder %s13196_s28, %s13196_s28 }
  0x6a   :  { %p13203_p6 = por %p13202_p5, %p13201_p4 }
  0x6c   :  { %p13204_p7 = pnand %p13203_p6, %p13197_p3 }
  0x6e   :  { %13207 = shalt.err (!%p13204_p7)
}
  0x6f   :  { %120 = dma.hbm_to_vmem [thread:$0]  %s13831_s8, 64, %s118_s23, [#allocation15]  }
  0x70   :  { %s13279_s25 = smov [#allocation19]  }
  0x71   :  { %s139_s26 = sshll.u32 %s13279_s25, 4  ;;  %s140_s26 = int_to_ptr.vmem [resolvable:$true] %s139_s26 }
  0x72   :  { %s13216_s29 = scalar_lea.vmem %s140_s26, 16  ;;  %s13220_s30 = scalar_lea.vmem %s140_s26, 32 }
  0x73   :  { %p13217_p8 = scmp.ne.s32.totalorder %s140_s26, %s13216_s29  ;;  %p13221_p9 = scmp.lt.s32.totalorder %s140_s26, %s140_s26 }
  0x74   :  { %p13222_p10 = scmp.lt.s32.totalorder %s13220_s30, %s13216_s29 }
  0x76   :  { %p13223_p11 = por %p13222_p10, %p13221_p9 }
  0x78   :  { %p13224_p12 = pnand %p13223_p11, %p13217_p8 }
  0x7a   :  { %13227 = shalt.err (!%p13224_p12)
}
  0x7b   :  { %142 = dma.hbm_to_vmem [thread:$0]  %s13833_s10, 16, %s140_s26, [#allocation18]  }
  0x7c   :  { %13248 = dma.done.wait [#allocation3], 32  }
  0x7d   :  { %13249 = vsyncadd [#allocation3], 4294967264 }
  0x7e   :  { %13250 = dma.done.wait [#allocation6], 4128  }
  0x7f   :  { %13251 = vsyncadd [#allocation6], 4294963168 }
  0x80   :  { %13252 = dma.done.wait [#allocation9], 4352  }
  0x81   :  { %13253 = vsyncadd [#allocation9], 4294962944 }
  0x82   :  { %13254 = dma.done.wait [#allocation12], 131200  }
  0x83   :  { %13255 = vsyncadd [#allocation12], 4294836096 }
  0x84   :  { %13256 = dma.done.wait [#allocation15], 32832  }
  0x85   :  { %13257 = vsyncadd [#allocation15], 4294934464 }
  0x86   :  { %13258 = dma.done.wait [#allocation18], 4112  }
  0x87   :  { %13259 = vsyncadd [#allocation18], 4294963184  ;;  %v13280_v0 = vmov 0   ;;  %v229_v1 = vld [vmem:[#allocation8 + $0x80] sm:$0xff]  ;;  %v230_v3 = vld [vmem:[#allocation8 + $0x88] sm:$0xff]  ;;  %vm405_vm0 = vcmask 261120  }
  0x88   :  { %441 = vmatprep.mubr.bf16.mxu0 %v13280_v0  ;;  %482 = vmatprep.mubr.bf16.mxu1 %v13280_v0  ;;  %v237_v2 = vld [vmem:[#allocation8 + $0xc0] sm:$0xff]  ;;  %v238_v5 = vld [vmem:[#allocation8 + $0xc8] sm:$0xff]  ;;  %v231_v15 = vld [vmem:[#allocation8 + $0x90] sm:$0xff]  ;;  %s13281_s8 = smov [#allocation20]  }
  0x89   :  { %v11149_v4 = vcombine.high %v229_v1, %v237_v2  ;;  %v11148_v6 = vcombine.low %v229_v1, %v237_v2  ;;  %v213_v7 = vld [vmem:[#allocation8] sm:$0xff]  ;;  %v11151_v9 = vcombine.high %v230_v3, %v238_v5  ;;  %v11150_v10 = vcombine.low %v230_v3, %v238_v5  ;;  %v214_v12 = vld [vmem:[#allocation8 + $0x8] sm:$0xff]  ;;  %v239_v16 = vld [vmem:[#allocation8 + $0xd0] sm:$0xff]  ;;  %s11118_s10 = sshll.u32 %s13281_s8, 4  ;;  %s11119_s10 = int_to_ptr.vmem [resolvable:$true] %s11118_s10 }
  0x8a   :  { %v221_v8 = vld [vmem:[#allocation8 + $0x40] sm:$0xff]  ;;  %v222_v13 = vld [vmem:[#allocation8 + $0x48] sm:$0xff]  ;;  %v232_v17 = vld [vmem:[#allocation8 + $0x98] sm:$0xff]  ;;  %v11153_v22 = vcombine.high %v231_v15, %v239_v16  ;;  %v11152_v29 = vcombine.low %v231_v15, %v239_v16  ;;  %s13228_s1 = scalar_lea.vmem %s11119_s10, 32  ;;  %p13233_p0 = scmp.lt.s32.totalorder %s11119_s10, %s11119_s10 }
  0x8b   :  { %v11133_v11 = vcombine.high %v213_v7, %v221_v8  ;;  %421 = vmatprep.subr.bf16.mxu0 %v11149_v4  ;;  %v11135_v14 = vcombine.high %v214_v12, %v222_v13  ;;  %462 = vmatprep.subr.bf16.mxu1 %v11151_v9  ;;  %v11132_v18 = vcombine.low %v213_v7, %v221_v8  ;;  %v179_v19 = vld [vmem:[#allocation5] sm:$0x3]  ;;  %v215_v24 = vld [vmem:[#allocation8 + $0x10] sm:$0xff]  ;;  %v233_v33 = vld [vmem:[#allocation8 + $0xa0] sm:$0xff]  ;;  %p13229_p13 = scmp.ne.s32.totalorder %s11119_s10, %s13228_s1  ;;  %p13234_p1 = scmp.lt.s32.totalorder %s13228_s1, %s13228_s1 }
  0x8c   :  { %422 = vmatpush1.bf16.msra.mxu0 %v11148_v6  ;;  %v240_v20 = vld [vmem:[#allocation8 + $0xd8] sm:$0xff]  ;;  %463 = vmatpush1.bf16.msra.mxu1 %v11150_v10  ;;  %v11134_v21 = vcombine.low %v214_v12, %v222_v13  ;;  %v223_v25 = vld [vmem:[#allocation8 + $0x50] sm:$0xff]  ;;  %v13385_v26 = vpack.c.bf16 %v179_v19, %v179_v19  ;;  %v241_v34 = vld [vmem:[#allocation8 + $0xe0] sm:$0xff] }
  0x8d   :  { %423 = vmatprep.subr.bf16.mxu0 %v11133_v11  ;;  %464 = vmatprep.subr.bf16.mxu1 %v11135_v14  ;;  %v11155_v23 = vcombine.high %v232_v17, %v240_v20  ;;  %v216_v27 = vld [vmem:[#allocation8 + $0x18] sm:$0xff]  ;;  %v11154_v30 = vcombine.low %v232_v17, %v240_v20  ;;  %v11137_v31 = vcombine.high %v215_v24, %v223_v25  ;;  %v234_v35 = vld [vmem:[#allocation8 + $0xa8] sm:$0xff]  ;;  %v217_v41 = vld [vmem:[#allocation8 + $0x20] sm:$0xff]  ;;  %p13235_p2 = por %p13234_p1, %p13233_p0 }
  0x8e   :  { %v224_v28 = vld [vmem:[#allocation8 + $0x58] sm:$0xff]  ;;  %v242_v36 = vld [vmem:[#allocation8 + $0xe8] sm:$0xff]  ;;  %v11136_v37 = vcombine.low %v215_v24, %v223_v25  ;;  %v11157_v39 = vcombine.high %v233_v33, %v241_v34  ;;  %v225_v42 = vld [vmem:[#allocation8 + $0x60] sm:$0xff]  ;;  %v11156_v45 = vcombine.low %v233_v33, %v241_v34 }
  0x8f   :  { %v11139_v32 = vcombine.high %v216_v27, %v224_v28  ;;  %v11138_v38 = vcombine.low %v216_v27, %v224_v28  ;;  %v11159_v40 = vcombine.high %v234_v35, %v242_v36  ;;  %v218_v43 = vld [vmem:[#allocation8 + $0x28] sm:$0xff]  ;;  %v11158_v46 = vcombine.low %v234_v35, %v242_v36  ;;  %v235_v49 = vld [vmem:[#allocation8 + $0xb0] sm:$0xff]  ;;  %v236_v51 = vld [vmem:[#allocation8 + $0xb8] sm:$0xff]  ;;  %p13236_p3 = pnand %p13235_p2, %p13229_p13 }
  0x90   :  { %424 = vmatpush1.bf16.msra.mxu0 %v11132_v18  ;;  %465 = vmatpush1.bf16.msra.mxu1 %v11134_v21  ;;  %v226_v44 = vld [vmem:[#allocation8 + $0x68] sm:$0xff]  ;;  %v11141_v47 = vcombine.high %v217_v41, %v225_v42  ;;  %v243_v50 = vld [vmem:[#allocation8 + $0xf0] sm:$0xff]  ;;  %v244_v52 = vld [vmem:[#allocation8 + $0xf8] sm:$0xff]  ;;  %v11140_v53 = vcombine.low %v217_v41, %v225_v42 }
  0x91   :  { %503 = vmatprep.subr.bf16.mxu0 %v11153_v22  ;;  %544 = vmatprep.subr.bf16.mxu1 %v11155_v23  ;;  %v11143_v48 = vcombine.high %v218_v43, %v226_v44  ;;  %v11142_v54 = vcombine.low %v218_v43, %v226_v44  ;;  %v11161_v55 = vcombine.high %v235_v49, %v243_v50  ;;  %v219_v57 = vld [vmem:[#allocation8 + $0x30] sm:$0xff]  ;;  %v220_v59 = vld [vmem:[#allocation8 + $0x38] sm:$0xff]  ;;  %v197_v2 = vld [vmem:[#allocation7 + $0x80] sm:$0xff] }
  0x92   :  { %v11163_v56 = vcombine.high %v236_v51, %v244_v52  ;;  %v227_v58 = vld [vmem:[#allocation8 + $0x70] sm:$0xff]  ;;  %v228_v60 = vld [vmem:[#allocation8 + $0x78] sm:$0xff]  ;;  %v11160_v61 = vcombine.low %v235_v49, %v243_v50  ;;  %v11162_v62 = vcombine.low %v236_v51, %v244_v52  ;;  %v205_v3 = vld [vmem:[#allocation7 + $0xc0] sm:$0xff] }
  0x93   :  { %11164 = vmatmul.mubr.msk.bf16.vlgmr.msra.gmra.mxu0 %vm405_vm0, %v13385_v26  ;;  %11165 = vmatmul.mubr.msk.bf16.vlgmr.msra.gmra.mxu1 %vm405_vm0, %v13385_v26  ;;  %v11145_v63 = vcombine.high %v219_v57, %v227_v58  ;;  %v11147_v1 = vcombine.high %v220_v59, %v228_v60  ;;  %v198_v4 = vld [vmem:[#allocation7 + $0x88] sm:$0xff]  ;;  %v11144_v6 = vcombine.low %v219_v57, %v227_v58  ;;  %v181_v7 = vld [vmem:[#allocation7] sm:$0xff]  ;;  %v199_v15 = vld [vmem:[#allocation7 + $0x90] sm:$0xff] }
  0x94   :  { %504 = vmatpush1.bf16.msra.mxu0 %v11152_v29  ;;  %545 = vmatpush1.bf16.msra.mxu1 %v11154_v30  ;;  %v206_v5 = vld [vmem:[#allocation7 + $0xc8] sm:$0xff]  ;;  %v11146_v8 = vcombine.low %v220_v59, %v228_v60  ;;  %v11189_v9 = vcombine.high %v197_v2, %v205_v3  ;;  %v189_v10 = vld [vmem:[#allocation7 + $0x40] sm:$0xff]  ;;  %v11188_v14 = vcombine.low %v197_v2, %v205_v3  ;;  %v207_v16 = vld [vmem:[#allocation7 + $0xd0] sm:$0xff] }
  0x95   :  { %505 = vmatprep.subr.bf16.mxu0 %v11137_v31  ;;  %546 = vmatprep.subr.bf16.mxu1 %v11139_v32  ;;  %v182_v11 = vld [vmem:[#allocation7 + $0x8] sm:$0xff]  ;;  %v11191_v13 = vcombine.high %v198_v4, %v206_v5  ;;  %v11190_v17 = vcombine.low %v198_v4, %v206_v5  ;;  %v11173_v18 = vcombine.high %v181_v7, %v189_v10  ;;  %v200_v19 = vld [vmem:[#allocation7 + $0x98] sm:$0xff]  ;;  %v183_v24 = vld [vmem:[#allocation7 + $0x10] sm:$0xff] }
  0x96   :  { %523 = vmatprep.mubr.bf16.mxu0 %v13280_v0  ;;  %564 = vmatprep.mubr.bf16.mxu1 %v13280_v0  ;;  %v190_v12 = vld [vmem:[#allocation7 + $0x48] sm:$0xff]  ;;  %v208_v20 = vld [vmem:[#allocation7 + $0xd8] sm:$0xff]  ;;  %v11172_v23 = vcombine.low %v181_v7, %v189_v10  ;;  %v191_v25 = vld [vmem:[#allocation7 + $0x50] sm:$0xff]  ;;  %v11193_v28 = vcombine.high %v199_v15, %v207_v16 }
  0x97   :  { %v11175_v21 = vcombine.high %v182_v11, %v190_v12  ;;  %v177_v22 = vld [vmem:[#allocation2] sm:$0x3]  ;;  %v11174_v27 = vcombine.low %v182_v11, %v190_v12  ;;  %v11195_v31 = vcombine.high %v200_v19, %v208_v20  ;;  %v201_v33 = vld [vmem:[#allocation7 + $0xa0] sm:$0xff]  ;;  %v11194_v35 = vcombine.low %v200_v19, %v208_v20  ;;  %v203_v49 = vld [vmem:[#allocation7 + $0xb0] sm:$0xff] }
  0x98   :  { %506 = vmatpush1.bf16.msra.mxu0 %v11136_v37  ;;  %547 = vmatpush1.bf16.msra.mxu1 %v11138_v38  ;;  %v184_v29 = vld [vmem:[#allocation7 + $0x18] sm:$0xff]  ;;  %v13411_v32 = vpack.c.bf16 %v177_v22, %v177_v22  ;;  %v209_v34 = vld [vmem:[#allocation7 + $0xe0] sm:$0xff]  ;;  %v11177_v36 = vcombine.high %v183_v24, %v191_v25  ;;  %v202_v37 = vld [vmem:[#allocation7 + $0xa8] sm:$0xff] }
  0x99   :  { %585 = vmatprep.subr.bf16.mxu0 %v11157_v39  ;;  %626 = vmatprep.subr.bf16.mxu1 %v11159_v40  ;;  %v192_v30 = vld [vmem:[#allocation7 + $0x58] sm:$0xff]  ;;  %v210_v38 = vld [vmem:[#allocation7 + $0xe8] sm:$0xff]  ;;  %v11176_v40 = vcombine.low %v183_v24, %v191_v25  ;;  %v185_v41 = vld [vmem:[#allocation7 + $0x20] sm:$0xff]  ;;  %v11197_v44 = vcombine.high %v201_v33, %v209_v34 }
  0x9a   :  { %v11179_v39 = vcombine.high %v184_v29, %v192_v30  ;;  %v193_v42 = vld [vmem:[#allocation7 + $0x60] sm:$0xff]  ;;  %v11178_v43 = vcombine.low %v184_v29, %v192_v30  ;;  %v211_v50 = vld [vmem:[#allocation7 + $0xf0] sm:$0xff]  ;;  %v11198_v51 = vcombine.low %v202_v37, %v210_v38 }
  0x9b   :  { %11166 = vmatmul.mubr.msk.bf16.vlgmr.msra.gmra.mxu0 %vm405_vm0, %v13385_v26  ;;  %11167 = vmatmul.mubr.msk.bf16.vlgmr.msra.gmra.mxu1 %vm405_vm0, %v13385_v26  ;;  %v11181_v52 = vcombine.high %v185_v41, %v193_v42  ;;  %v187_v57 = vld [vmem:[#allocation7 + $0x30] sm:$0xff]  ;;  %v11201_v60 = vcombine.high %v203_v49, %v211_v50 }
  0x9c   :  { %586 = vmatpush1.bf16.msra.mxu0 %v11156_v45  ;;  %627 = vmatpush1.bf16.msra.mxu1 %v11158_v46  ;;  %v186_v45 = vld [vmem:[#allocation7 + $0x28] sm:$0xff]  ;;  %v195_v58 = vld [vmem:[#allocation7 + $0x70] sm:$0xff] }
  0x9d   :  { %587 = vmatprep.subr.bf16.mxu0 %v11141_v47  ;;  %628 = vmatprep.subr.bf16.mxu1 %v11143_v48  ;;  %v194_v46 = vld [vmem:[#allocation7 + $0x68] sm:$0xff]  ;;  %v11199_v47 = vcombine.high %v202_v37, %v210_v38  ;;  %v11196_v48 = vcombine.low %v201_v33, %v209_v34  ;;  %v1416_v2 = vld [vmem:[#allocation11 + $0x1c0] sm:$0xff]  ;;  %v11185_v5 = vcombine.high %v187_v57, %v195_v58 }
  0x9e   :  { %605 = vmatprep.mubr.bf16.mxu0 %v13280_v0  ;;  %646 = vmatprep.mubr.bf16.mxu1 %v13280_v0  ;;  %v11182_v59 = vcombine.low %v186_v45, %v194_v46  ;;  %v1420_v3 = vld [vmem:[#allocation11 + $0x1e0] sm:$0xff] }
  0x9f   :  { %v1548_v7 = vld [vmem:[#allocation11 + $0x5e0] sm:$0xff] }
  0xa0   :  { %588 = vmatpush1.bf16.msra.mxu0 %v11140_v53  ;;  %629 = vmatpush1.bf16.msra.mxu1 %v11142_v54  ;;  %v204_v53 = vld [vmem:[#allocation7 + $0xb8] sm:$0xff]  ;;  %v1408_v10 = vld [vmem:[#allocation11 + $0x180] sm:$0xff] }
  0xa1   :  { %667 = vmatprep.subr.bf16.mxu0 %v11161_v55  ;;  %708 = vmatprep.subr.bf16.mxu1 %v11163_v56  ;;  %v212_v54 = vld [vmem:[#allocation7 + $0xf8] sm:$0xff]  ;;  %v11183_v55 = vcombine.high %v186_v45, %v194_v46  ;;  %v11180_v56 = vcombine.low %v185_v41, %v193_v42  ;;  %v1412_v11 = vld [vmem:[#allocation11 + $0x1a0] sm:$0xff] }
  0xa2   :  { %v11202_v4 = vcombine.low %v204_v53, %v212_v54  ;;  %v1404_v19 = vld [vmem:[#allocation11 + $0x160] sm:$0xff] }
  0xa3   :  { %11168 = vmatmul.mubr.msk.bf16.vlgmr.msra.gmra.mxu0 %vm405_vm0, %v13385_v26  ;;  %11169 = vmatmul.mubr.msk.bf16.vlgmr.msra.gmra.mxu1 %vm405_vm0, %v13385_v26  ;;  %v1528_v22 = vld [vmem:[#allocation11 + $0x540] sm:$0xff] }
  0xa4   :  { %668 = vmatpush1.bf16.msra.mxu0 %v11160_v61  ;;  %709 = vmatpush1.bf16.msra.mxu1 %v11162_v62  ;;  %v188_v61 = vld [vmem:[#allocation7 + $0x38] sm:$0xff]  ;;  %v1392_v25 = vld [vmem:[#allocation11 + $0x100] sm:$0xff] }
  0xa5   :  { %669 = vmatprep.subr.bf16.mxu0 %v11145_v63  ;;  %710 = vmatprep.subr.bf16.mxu1 %v11147_v1  ;;  %v196_v62 = vld [vmem:[#allocation7 + $0x78] sm:$0xff]  ;;  %v11203_v63 = vcombine.high %v204_v53, %v212_v54  ;;  %v11200_v1 = vcombine.low %v203_v49, %v211_v50  ;;  %v1520_v30 = vld [vmem:[#allocation11 + $0x500] sm:$0xff] }
  0xa6   :  { %687 = vmatprep.mubr.bf16.mxu0 %v13280_v0  ;;  %728 = vmatprep.mubr.bf16.mxu1 %v13280_v0  ;;  %v11186_v12 = vcombine.low %v188_v61, %v196_v62  ;;  %v1384_v34 = vld [vmem:[#allocation11 + $0xc0] sm:$0xff] }
  0xa7   :  { %v1512_v37 = vld [vmem:[#allocation11 + $0x4c0] sm:$0xff] }
  0xa8   :  { %670 = vmatpush1.bf16.msra.mxu0 %v11144_v6  ;;  %711 = vmatpush1.bf16.msra.mxu1 %v11146_v8  ;;  %v1544_v6 = vld [vmem:[#allocation11 + $0x5c0] sm:$0xff]  ;;  %v11187_v8 = vcombine.high %v188_v61, %v196_v62 }
  0xa9   :  { %912 = vmatprep.subr.bf16.mxu0 %v11189_v9  ;;  %953 = vmatprep.subr.bf16.mxu1 %v11191_v13  ;;  %v11184_v9 = vcombine.low %v187_v57, %v195_v58  ;;  %v11269_v13 = vcombine.high %v1416_v2, %v1420_v3  ;;  %v11396_v20 = vcombine.low %v1544_v6, %v1548_v7  ;;  %v1516_v38 = vld [vmem:[#allocation11 + $0x4e0] sm:$0xff] }
  0xaa   :  { %v1376_v41 = vld [vmem:[#allocation11 + $0x80] sm:$0xff] }
  0xab   :  { %11170 = vmatmul.mubr.msk.bf16.vlgmr.msra.gmra.mxu0 %vm405_vm0, %v13385_v26  ;;  %11171 = vmatmul.mubr.msk.bf16.vlgmr.msra.gmra.mxu1 %vm405_vm0, %v13385_v26  ;;  %v11192_v26 = vcombine.low %v199_v15, %v207_v16  ;;  %v1540_v15 = vld [vmem:[#allocation11 + $0x5a0] sm:$0xff]  ;;  %v11397_v16 = vcombine.high %v1544_v6, %v1548_v7 }
  0xac   :  { %913 = vmatpush1.bf16.msra.mxu0 %v11188_v14  ;;  %954 = vmatpush1.bf16.msra.mxu1 %v11190_v17  ;;  %v1536_v14 = vld [vmem:[#allocation11 + $0x580] sm:$0xff]  ;;  %v11268_v17 = vcombine.low %v1416_v2, %v1420_v3 }
  0xad   :  { %914 = vmatprep.subr.bf16.mxu0 %v11173_v18  ;;  %955 = vmatprep.subr.bf16.mxu1 %v11175_v21  ;;  %v1400_v18 = vld [vmem:[#allocation11 + $0x140] sm:$0xff]  ;;  %v11261_v21 = vcombine.high %v1408_v10, %v1412_v11  ;;  %v11389_v24 = vcombine.high %v1536_v14, %v1540_v15 }
  0xae   :  { %932 = vmatprep.mubr.bf16.mxu0 %v13280_v0  ;;  %973 = vmatprep.mubr.bf16.mxu1 %v13280_v0  ;;  %v11253_v29 = vcombine.high %v1400_v18, %v1404_v19  ;;  %v11252_v33 = vcombine.low %v1400_v18, %v1404_v19  ;;  %v1380_v42 = vld [vmem:[#allocation11 + $0xa0] sm:$0xff] }
  0xaf   :  { %v1504_v45 = vld [vmem:[#allocation11 + $0x480] sm:$0xff] }
  0xb0   :  { %915 = vmatpush1.bf16.msra.mxu0 %v11172_v23  ;;  %956 = vmatpush1.bf16.msra.mxu1 %v11174_v27  ;;  %v1532_v23 = vld [vmem:[#allocation11 + $0x560] sm:$0xff] }
  0xb1   :  { %994 = vmatprep.subr.bf16.mxu0 %v11193_v28  ;;  %1035 = vmatprep.subr.bf16.mxu1 %v11195_v31  ;;  %v1396_v27 = vld [vmem:[#allocation11 + $0x120] sm:$0xff]  ;;  %v11388_v28 = vcombine.low %v1536_v14, %v1540_v15 }
  0xb2   :  { %v1524_v31 = vld [vmem:[#allocation11 + $0x520] sm:$0xff] }
  0xb3   :  { %11204 = vmatmul.mubr.msk.bf16.vlgmr.msra.gmra.mxu0 %vm405_vm0, %v13411_v32  ;;  %11205 = vmatmul.mubr.msk.bf16.vlgmr.msra.gmra.mxu1 %vm405_vm0, %v13411_v32  ;;  %v1508_v46 = vld [vmem:[#allocation11 + $0x4a0] sm:$0xff] }
  0xb4   :  { %995 = vmatpush1.bf16.msra.mxu0 %v11192_v26  ;;  %1036 = vmatpush1.bf16.msra.mxu1 %v11194_v35  ;;  %v11381_v26 = vcombine.high %v1528_v22, %v1532_v23  ;;  %v1388_v35 = vld [vmem:[#allocation11 + $0xe0] sm:$0xff] }
  0xb5   :  { %996 = vmatprep.subr.bf16.mxu0 %v11177_v36  ;;  %1037 = vmatprep.subr.bf16.mxu1 %v11179_v39  ;;  %v11380_v36 = vcombine.low %v1528_v22, %v1532_v23  ;;  %v11373_v39 = vcombine.high %v1520_v30, %v1524_v31  ;;  %v1368_v49 = vld [vmem:[#allocation11 + $0x40] sm:$0xff] }
  0xb6   :  { %1014 = vmatprep.mubr.bf16.mxu0 %v13280_v0  ;;  %1055 = vmatprep.mubr.bf16.mxu1 %v13280_v0  ;;  %v1372_v50 = vld [vmem:[#allocation11 + $0x60] sm:$0xff] }
  0xb7   :  { %v1496_v53 = vld [vmem:[#allocation11 + $0x440] sm:$0xff] }
  0xb8   :  { %997 = vmatpush1.bf16.msra.mxu0 %v11176_v40  ;;  %1038 = vmatpush1.bf16.msra.mxu1 %v11178_v43  ;;  %v11244_v40 = vcombine.low %v1392_v25, %v1396_v27  ;;  %v11372_v43 = vcombine.low %v1520_v30, %v1524_v31  ;;  %v1500_v54 = vld [vmem:[#allocation11 + $0x460] sm:$0xff] }
  0xb9   :  { %1076 = vmatprep.subr.bf16.mxu0 %v11197_v44  ;;  %1117 = vmatprep.subr.bf16.mxu1 %v11199_v47  ;;  %v11237_v44 = vcombine.high %v1384_v34, %v1388_v35  ;;  %v11365_v47 = vcombine.high %v1512_v37, %v1516_v38  ;;  %v1360_v57 = vld [vmem:[#allocation11] sm:$0xff] }
  0xba   :  { %v1364_v58 = vld [vmem:[#allocation11 + $0x20] sm:$0xff] }
  0xbb   :  { %11206 = vmatmul.mubr.msk.bf16.vlgmr.msra.gmra.mxu0 %vm405_vm0, %v13411_v32  ;;  %11207 = vmatmul.mubr.msk.bf16.vlgmr.msra.gmra.mxu1 %vm405_vm0, %v13411_v32  ;;  %v1488_v61 = vld [vmem:[#allocation11 + $0x400] sm:$0xff] }
  0xbc   :  { %1077 = vmatpush1.bf16.msra.mxu0 %v11196_v48  ;;  %1118 = vmatpush1.bf16.msra.mxu1 %v11198_v51  ;;  %v11236_v48 = vcombine.low %v1384_v34, %v1388_v35  ;;  %v11364_v51 = vcombine.low %v1512_v37, %v1516_v38  ;;  %v1492_v62 = vld [vmem:[#allocation11 + $0x420] sm:$0xff] }
  0xbd   :  { %1078 = vmatprep.subr.bf16.mxu0 %v11181_v52  ;;  %1119 = vmatprep.subr.bf16.mxu1 %v11183_v55  ;;  %v11229_v52 = vcombine.high %v1376_v41, %v1380_v42  ;;  %v11357_v55 = vcombine.high %v1504_v45, %v1508_v46  ;;  %v1480_v2 = vld [vmem:[#allocation11 + $0x3c0] sm:$0xff] }
  0xbe   :  { %1096 = vmatprep.mubr.bf16.mxu0 %v13280_v0  ;;  %1137 = vmatprep.mubr.bf16.mxu1 %v13280_v0  ;;  %v1484_v3 = vld [vmem:[#allocation11 + $0x3e0] sm:$0xff] }
  0xbf   :  { %v1608_v6 = vld [vmem:[#allocation11 + $0x7c0] sm:$0xff] }
  0xc0   :  { %1079 = vmatpush1.bf16.msra.mxu0 %v11180_v56  ;;  %1120 = vmatpush1.bf16.msra.mxu1 %v11182_v59  ;;  %v11228_v56 = vcombine.low %v1376_v41, %v1380_v42  ;;  %v11356_v59 = vcombine.low %v1504_v45, %v1508_v46  ;;  %v1612_v7 = vld [vmem:[#allocation11 + $0x7e0] sm:$0xff] }
  0xc1   :  { %1158 = vmatprep.subr.bf16.mxu0 %v11201_v60  ;;  %1199 = vmatprep.subr.bf16.mxu1 %v11203_v63  ;;  %v11221_v60 = vcombine.high %v1368_v49, %v1372_v50  ;;  %v11349_v63 = vcombine.high %v1496_v53, %v1500_v54  ;;  %v1600_v14 = vld [vmem:[#allocation11 + $0x780] sm:$0xff] }
  0xc2   :  { %v1604_v15 = vld [vmem:[#allocation11 + $0x7a0] sm:$0xff] }
  0xc3   :  { %11208 = vmatmul.mubr.msk.bf16.vlgmr.msra.gmra.mxu0 %vm405_vm0, %v13411_v32  ;;  %11209 = vmatmul.mubr.msk.bf16.vlgmr.msra.gmra.mxu1 %vm405_vm0, %v13411_v32  ;;  %v1464_v18 = vld [vmem:[#allocation11 + $0x340] sm:$0xff] }
  0xc4   :  { %1159 = vmatpush1.bf16.msra.mxu0 %v11200_v1  ;;  %1200 = vmatpush1.bf16.msra.mxu1 %v11202_v4  ;;  %v11220_v1 = vcombine.low %v1368_v49, %v1372_v50  ;;  %v11348_v4 = vcombine.low %v1496_v53, %v1500_v54  ;;  %v1468_v19 = vld [vmem:[#allocation11 + $0x360] sm:$0xff] }
  0xc5   :  { %1160 = vmatprep.subr.bf16.mxu0 %v11185_v5  ;;  %1201 = vmatprep.subr.bf16.mxu1 %v11187_v8  ;;  %v11213_v5 = vcombine.high %v1360_v57, %v1364_v58  ;;  %v11341_v8 = vcombine.high %v1488_v61, %v1492_v62  ;;  %v1592_v22 = vld [vmem:[#allocation11 + $0x740] sm:$0xff] }
  0xc6   :  { %1178 = vmatprep.mubr.bf16.mxu0 %v13280_v0  ;;  %1219 = vmatprep.mubr.bf16.mxu1 %v13280_v0  ;;  %v11260_v0 = vcombine.low %v1408_v10, %v1412_v11  ;;  %v1472_v10 = vld [vmem:[#allocation11 + $0x380] sm:$0xff] }
  0xc7   :  { %v1476_v11 = vld [vmem:[#allocation11 + $0x3a0] sm:$0xff] }
  0xc8   :  { %1161 = vmatpush1.bf16.msra.mxu0 %v11184_v9  ;;  %1202 = vmatpush1.bf16.msra.mxu1 %v11186_v12  ;;  %v11212_v9 = vcombine.low %v1360_v57, %v1364_v58  ;;  %v11340_v12 = vcombine.low %v1488_v61, %v1492_v62  ;;  %v1596_v23 = vld [vmem:[#allocation11 + $0x760] sm:$0xff] }
  0xc9   :  { %7546 = vmatprep.subr.bf16.mxu0 %v11269_v13  ;;  %7587 = vmatprep.subr.bf16.mxu1 %v11397_v16  ;;  %v11333_v13 = vcombine.high %v1480_v2, %v1484_v3  ;;  %v11461_v16 = vcombine.high %v1608_v6, %v1612_v7  ;;  %v1584_v30 = vld [vmem:[#allocation11 + $0x700] sm:$0xff] }
  0xca   :  { %v1588_v31 = vld [vmem:[#allocation11 + $0x720] sm:$0xff] }
  0xcb   :  { %11210 = vmatmul.mubr.msk.bf16.vlgmr.msra.gmra.mxu0 %vm405_vm0, %v13411_v32  ;;  %11211 = vmatmul.mubr.msk.bf16.vlgmr.msra.gmra.mxu1 %vm405_vm0, %v13411_v32  ;;  %v11245_v32 = vcombine.high %v1392_v25, %v1396_v27  ;;  %v1456_v25 = vld [vmem:[#allocation11 + $0x300] sm:$0xff] }
  0xcc   :  { %7547 = vmatpush1.bf16.msra.mxu0 %v11268_v17  ;;  %7588 = vmatpush1.bf16.msra.mxu1 %v11396_v20  ;;  %v11332_v17 = vcombine.low %v1480_v2, %v1484_v3  ;;  %v11460_v20 = vcombine.low %v1608_v6, %v1612_v7  ;;  %v1460_v27 = vld [vmem:[#allocation11 + $0x320] sm:$0xff] }
  0xcd   :  { %7548 = vmatprep.subr.bf16.mxu0 %v11261_v21  ;;  %7589 = vmatprep.subr.bf16.mxu1 %v11389_v24  ;;  %v11325_v21 = vcombine.high %v1472_v10, %v1476_v11  ;;  %v11453_v24 = vcombine.high %v1600_v14, %v1604_v15  ;;  %v1448_v34 = vld [vmem:[#allocation11 + $0x2c0] sm:$0xff] }
  0xce   :  { %v1452_v35 = vld [vmem:[#allocation11 + $0x2e0] sm:$0xff] }
  0xcf   :  { %v1576_v37 = vld [vmem:[#allocation11 + $0x6c0] sm:$0xff] }
  0xd0   :  { %7549 = vmatpush1.bf16.msra.mxu0 %v11260_v0  ;;  %7590 = vmatpush1.bf16.msra.mxu1 %v11388_v28  ;;  %v11324_v0 = vcombine.low %v1472_v10, %v1476_v11  ;;  %v11452_v28 = vcombine.low %v1600_v14, %v1604_v15  ;;  %v1580_v38 = vld [vmem:[#allocation11 + $0x6e0] sm:$0xff] }
  0xd1   :  { %7550 = vmatprep.subr.bf16.mxu0 %v11253_v29  ;;  %7591 = vmatprep.subr.bf16.mxu1 %v11381_v26  ;;  %v11317_v29 = vcombine.high %v1464_v18, %v1468_v19  ;;  %v11445_v26 = vcombine.high %v1592_v22, %v1596_v23  ;;  %v1440_v41 = vld [vmem:[#allocation11 + $0x280] sm:$0xff] }
  0xd2   :  { %v1444_v42 = vld [vmem:[#allocation11 + $0x2a0] sm:$0xff] }
  0xd3   :  { %v1568_v45 = vld [vmem:[#allocation11 + $0x680] sm:$0xff] }
  0xd4   :  { %7551 = vmatpush1.bf16.msra.mxu0 %v11252_v33  ;;  %7592 = vmatpush1.bf16.msra.mxu1 %v11380_v36  ;;  %v11316_v33 = vcombine.low %v1464_v18, %v1468_v19  ;;  %v11444_v36 = vcombine.low %v1592_v22, %v1596_v23  ;;  %v1572_v46 = vld [vmem:[#allocation11 + $0x6a0] sm:$0xff] }
  0xd5   :  { %7552 = vmatprep.subr.bf16.mxu0 %v11245_v32  ;;  %7593 = vmatprep.subr.bf16.mxu1 %v11373_v39  ;;  %v11309_v32 = vcombine.high %v1456_v25, %v1460_v27  ;;  %v11437_v39 = vcombine.high %v1584_v30, %v1588_v31  ;;  %v1432_v49 = vld [vmem:[#allocation11 + $0x240] sm:$0xff]  ;;  %v11420_v62 = vcombine.low %v1568_v45, %v1572_v46 }
  0xd6   :  { %v1436_v50 = vld [vmem:[#allocation11 + $0x260] sm:$0xff] }
  0xd7   :  { %v1560_v53 = vld [vmem:[#allocation11 + $0x640] sm:$0xff]  ;;  %v11284_v7 = vcombine.low %v1432_v49, %v1436_v50 }
  0xd8   :  { %7553 = vmatpush1.bf16.msra.mxu0 %v11244_v40  ;;  %7594 = vmatpush1.bf16.msra.mxu1 %v11372_v43  ;;  %v11308_v40 = vcombine.low %v1456_v25, %v1460_v27  ;;  %v11436_v43 = vcombine.low %v1584_v30, %v1588_v31  ;;  %v1564_v54 = vld [vmem:[#allocation11 + $0x660] sm:$0xff] }
  0xd9   :  { %7554 = vmatprep.subr.bf16.mxu0 %v11237_v44  ;;  %7595 = vmatprep.subr.bf16.mxu1 %v11365_v47  ;;  %v11301_v44 = vcombine.high %v1448_v34, %v1452_v35  ;;  %v11429_v47 = vcombine.high %v1576_v37, %v1580_v38  ;;  %v1424_v57 = vld [vmem:[#allocation11 + $0x200] sm:$0xff] }
  0xda   :  { %v1428_v58 = vld [vmem:[#allocation11 + $0x220] sm:$0xff] }
  0xdb   :  { %v13439_v61 = vld [vmem:[#allocation11 + $0xdc0] sm:$0xff]  ;;  %v11276_v11 = vcombine.low %v1424_v57, %v1428_v58 }
  0xdc   :  { %7555 = vmatpush1.bf16.msra.mxu0 %v11236_v48  ;;  %7596 = vmatpush1.bf16.msra.mxu1 %v11364_v51  ;;  %v11300_v48 = vcombine.low %v1448_v34, %v1452_v35  ;;  %v11428_v51 = vcombine.low %v1576_v37, %v1580_v38  ;;  %v1556_v2 = vld [vmem:[#allocation11 + $0x620] sm:$0xff]  ;;  %v1232_v35 = vlaneseq }
  0xdd   :  { %7556 = vmatprep.subr.bf16.mxu0 %v11229_v52  ;;  %7597 = vmatprep.subr.bf16.mxu1 %v11357_v55  ;;  %v11293_v52 = vcombine.high %v1440_v41, %v1444_v42  ;;  %v11421_v55 = vcombine.high %v1568_v45, %v1572_v46  ;;  %v13441_v3 = vld [vmem:[#allocation11 + $0xde0] sm:$0xff]  ;;  %v13477_v46 = vld [vmem:[#allocation10] sm:$0xff] }
  0xde   :  { %v11652_v6 = vcombine.low %v13439_v61, %v13441_v3  ;;  %v11653_v14 = vcombine.high %v13439_v61, %v13441_v3 }
  0xe0   :  { %7557 = vmatpush1.bf16.msra.mxu0 %v11228_v56  ;;  %7598 = vmatpush1.bf16.msra.mxu1 %v11356_v59  ;;  %v11292_v56 = vcombine.low %v1440_v41, %v1444_v42  ;;  %v13435_v59 = vld [vmem:[#allocation11 + $0x9c0] sm:$0xff] }
  0xe1   :  { %7558 = vmatprep.subr.bf16.mxu0 %v11221_v60  ;;  %7599 = vmatprep.subr.bf16.mxu1 %v11349_v63  ;;  %v13437_v60 = vld [vmem:[#allocation11 + $0x9e0] sm:$0xff]  ;;  %v11285_v63 = vcombine.high %v1432_v49, %v1436_v50 }
  0xe4   :  { %7559 = vmatpush1.bf16.msra.mxu0 %v11220_v1  ;;  %7600 = vmatpush1.bf16.msra.mxu1 %v11348_v4  ;;  %v1552_v1 = vld [vmem:[#allocation11 + $0x600] sm:$0xff]  ;;  %v11413_v4 = vcombine.high %v1560_v53, %v1564_v54 }
  0xe5   :  { %7560 = vmatprep.subr.bf16.mxu0 %v11213_v5  ;;  %7601 = vmatprep.subr.bf16.mxu1 %v11341_v8  ;;  %v11524_v5 = vcombine.low %v13435_v59, %v13437_v60  ;;  %v11412_v8 = vcombine.low %v1560_v53, %v1564_v54  ;;  %v11405_v10 = vcombine.high %v1552_v1, %v1556_v2 }
  0xe8   :  { %7561 = vmatpush1.bf16.msra.mxu0 %v11212_v9  ;;  %7602 = vmatpush1.bf16.msra.mxu1 %v11340_v12  ;;  %v11277_v9 = vcombine.high %v1424_v57, %v1428_v58  ;;  %v11404_v12 = vcombine.low %v1552_v1, %v1556_v2 }
  0xe9   :  { %7562 = vmatprep.subr.bf16.mxu0 %v11333_v13  ;;  %7603 = vmatprep.subr.bf16.mxu1 %v11461_v16  ;;  %v11525_v13 = vcombine.high %v13435_v59, %v13437_v60  ;;  %v1776_v59 = vld [vmem:[#allocation11 + $0xd00] sm:$0xff] }
  0xea   :  { %v1780_v60 = vld [vmem:[#allocation11 + $0xd20] sm:$0xff] }
  0xec   :  { %7563 = vmatpush2.bf16.msra.mxu0 %v11332_v17  ;;  %7604 = vmatpush2.bf16.msra.mxu1 %v11460_v20 }
  0xed   :  { %7564 = vmatprep.subr.bf16.mxu0 %v11325_v21  ;;  %7605 = vmatprep.subr.bf16.mxu1 %v11453_v24 }
  0xf0   :  { %7565 = vmatpush2.bf16.msra.mxu0 %v11324_v0  ;;  %7606 = vmatpush2.bf16.msra.mxu1 %v11452_v28 }
  0xf1   :  { %7566 = vmatprep.subr.bf16.mxu0 %v11317_v29  ;;  %7607 = vmatprep.subr.bf16.mxu1 %v11445_v26 }
  0xf4   :  { %7567 = vmatpush2.bf16.msra.mxu0 %v11316_v33  ;;  %7608 = vmatpush2.bf16.msra.mxu1 %v11444_v36 }
  0xf5   :  { %7568 = vmatprep.subr.bf16.mxu0 %v11309_v32  ;;  %7609 = vmatprep.subr.bf16.mxu1 %v11437_v39  ;;  %v1233_v39 = vshrl.u32 %v1232_v35, 7 }
  0xf7   :  { %v13481_v49 = vsub.s32 1, %v1233_v39 }
  0xf8   :  { %7569 = vmatpush2.bf16.msra.mxu0 %v11308_v40  ;;  %7610 = vmatpush2.bf16.msra.mxu1 %v11436_v43 }
  0xf9   :  { %7570 = vmatprep.subr.bf16.mxu0 %v11301_v44  ;;  %7611 = vmatprep.subr.bf16.mxu1 %v11429_v47  ;;  %v13475_v44 = vsub.s32 0, %v1233_v39  ;;  %v13479_v47 = vsub.s32 2, %v1233_v39  ;;  %v1239_v58 = vrot.slane %v13477_v46, %v13481_v49 }
  0xfb   :  { %v1235_v53 = vrot.slane %v13477_v46, %v13475_v44 }
  0xfc   :  { %7571 = vmatpush2.bf16.msra.mxu0 %v11300_v48  ;;  %7612 = vmatpush2.bf16.msra.mxu1 %v11428_v51  ;;  %v13483_v51 = vsub.s32 3, %v1233_v39 }
  0xfd   :  { %7572 = vmatprep.subr.bf16.mxu0 %v11293_v52  ;;  %7613 = vmatprep.subr.bf16.mxu1 %v11421_v55  ;;  %v1243_v55 = vrot.slane %v13477_v46, %v13479_v47 }
  0xfe   :  { %v1247_v1 = vrot.slane %v13477_v46, %v13483_v51 }
 0x100   :  { %7573 = vmatpush2.bf16.msra.mxu0 %v11292_v56  ;;  %7614 = vmatpush2.bf16.msra.mxu1 %v11420_v62 }
 0x101   :  { %7574 = vmatprep.subr.bf16.mxu0 %v11285_v63  ;;  %7615 = vmatprep.subr.bf16.mxu1 %v11413_v4 }
 0x104   :  { %7575 = vmatpush2.bf16.msra.mxu0 %v11284_v7  ;;  %7616 = vmatpush2.bf16.msra.mxu1 %v11412_v8  ;;  %v13493_v8 = vsub.s32 4, %v1233_v39 }
 0x105   :  { %7576 = vmatprep.subr.bf16.mxu0 %v11277_v9  ;;  %7617 = vmatprep.subr.bf16.mxu1 %v11405_v10 }
 0x108   :  { %7577 = vmatpush2.bf16.msra.mxu0 %v11276_v11  ;;  %7618 = vmatpush2.bf16.msra.mxu1 %v11404_v12  ;;  %v13495_v12 = vsub.s32 6, %v1233_v39 }
 0x109   :  { %7628 = vmatprep.subr.bf16.mxu0 %v11525_v13  ;;  %7669 = vmatprep.subr.bf16.mxu1 %v11653_v14 }
 0x153   :  { %v443_v15 = vpop.f32.mrf.mxu0  ;;  %v484_v16 = vpop.f32.mrf.mxu1 }
 0x155   :  { %v445_v17 = vpop.f32.mrf.mxu0  ;;  %v486_v18 = vpop.f32.mrf.mxu1 }
 0x157   :  { %v447_v19 = vpop.f32.mrf.mxu0  ;;  %v488_v20 = vpop.f32.mrf.mxu1 }
 0x158   :  { %v13499_v19 = vsub.s32 7, %v1233_v39 }
 0x159   :  { %v448_v21 = vpop.f32.mrf.mxu0  ;;  %v489_v22 = vpop.f32.mrf.mxu1 }
 0x15b   :  { %v13451_v23 = vpop.f32.mrf.mxu0  ;;  %v13453_v24 = vpop.f32.mrf.mxu1 }
 0x15d   :  { %v13455_v0 = vpop.f32.mrf.mxu0  ;;  %v13457_v25 = vpop.f32.mrf.mxu1 }
 0x15f   :  { %v529_v27 = vpop.f32.mrf.mxu0  ;;  %v570_v28 = vpop.f32.mrf.mxu1 }
 0x160   :  { %v1251_v28 = vrot.slane %v13477_v46, %v13493_v8 }
 0x161   :  { %v530_v29 = vpop.f32.mrf.mxu0  ;;  %v571_v30 = vpop.f32.mrf.mxu1 }
 0x162   :  { %v1664_v29 = vld [vmem:[#allocation11 + $0x980] sm:$0xff] }
 0x163   :  { %v13459_v31 = vpop.f32.mrf.mxu0  ;;  %v13461_v26 = vpop.f32.mrf.mxu1 }
 0x165   :  { %v13463_v33 = vpop.f32.mrf.mxu0  ;;  %v13465_v34 = vpop.f32.mrf.mxu1 }
 0x167   :  { %v611_v36 = vpop.f32.mrf.mxu0  ;;  %v652_v32 = vpop.f32.mrf.mxu1 }
 0x168   :  { %v1259_v36 = vrot.slane %v13477_v46, %v13495_v12  ;;  %v1792_v32 = vld [vmem:[#allocation11 + $0xd80] sm:$0xff] }
 0x169   :  { %v612_v37 = vpop.f32.mrf.mxu0  ;;  %v653_v38 = vpop.f32.mrf.mxu1 }
 0x16a   :  { %v1796_v37 = vld [vmem:[#allocation11 + $0xda0] sm:$0xff] }
 0x16b   :  { %v13467_v40 = vpop.f32.mrf.mxu0  ;;  %v13469_v41 = vpop.f32.mrf.mxu1 }
 0x16d   :  { %v13471_v42 = vpop.f32.mrf.mxu0  ;;  %v13473_v43 = vpop.f32.mrf.mxu1 }
 0x16f   :  { %v693_v45 = vpop.f32.mrf.mxu0  ;;  %v734_v48 = vpop.f32.mrf.mxu1 }
 0x171   :  { %v694_v50 = vpop.f32.mrf.mxu0  ;;  %v735_v52 = vpop.f32.mrf.mxu1 }
 0x172   :  { %v1263_v50 = vrot.slane %v13477_v46, %v13499_v19 }
 0x173   :  { %v934_v54 = vpop.f32.mrf.mxu0  ;;  %v975_v57 = vpop.f32.mrf.mxu1 }
 0x174   :  { %v935_v56 = vadd.f32 %v934_v54, %v443_v15  ;;  %v976_v62 = vadd.f32 %v975_v57, %v484_v16  ;;  %v13497_v15 = vsub.s32 5, %v1233_v39 }
 0x175   :  { %v936_v63 = vpop.f32.mrf.mxu0  ;;  %v977_v7 = vpop.f32.mrf.mxu1 }
 0x176   :  { %v1312_v2 = vadd.f32 %v1235_v53, %v935_v56  ;;  %v937_v4 = vadd.f32 %v936_v63, %v445_v17  ;;  %v1314_v9 = vadd.f32 %v1243_v55, %v976_v62  ;;  %v978_v10 = vadd.f32 %v977_v7, %v486_v18  ;;  %v1668_v18 = vld [vmem:[#allocation11 + $0x9a0] sm:$0xff] }
 0x177   :  { %v938_v11 = vpop.f32.mrf.mxu0  ;;  %v979_v14 = vpop.f32.mrf.mxu1  ;;  %v1255_v48 = vrot.slane %v13477_v46, %v13497_v15  ;;  %v11517_v56 = vcombine.high %v1664_v29, %v1668_v18  ;;  %v11645_v63 = vcombine.high %v1792_v32, %v1796_v37  ;;  %v1660_v46 = vld [vmem:[#allocation11 + $0x960] sm:$0xff] }
 0x178   :  { %v1313_v13 = vadd.f32 %v1239_v58, %v937_v4  ;;  %v1328_v16 = vmax.f32 %v1312_v2, 0.0  ;;  %v1315_v20 = vadd.f32 %v1247_v1, %v978_v10  ;;  %v1330_v22 = vmax.f32 %v1314_v9, 0.0  ;;  %v1656_v1 = vld [vmem:[#allocation11 + $0x940] sm:$0xff] }
 0x179   :  { %v939_v21 = vpop.f32.mrf.mxu0  ;;  %v980_v17 = vpop.f32.mrf.mxu1  ;;  %v1784_v7 = vld [vmem:[#allocation11 + $0xd40] sm:$0xff]  ;;  %v11644_v14 = vcombine.low %v1792_v32, %v1796_v37  ;;  %v11508_v3 = vcombine.low %v1656_v1, %v1660_v46 }
 0x17a   :  { %v1329_v27 = vmax.f32 %v1313_v13, 0.0  ;;  %v1331_v30 = vmax.f32 %v1315_v20, 0.0  ;;  %v13512_v52 = vpack.c.bf16 %v1328_v16, %v1328_v16  ;;  %v13517_v57 = vpack.c.bf16 %v1330_v22, %v1330_v22  ;;  %v1788_v9 = vld [vmem:[#allocation11 + $0xd60] sm:$0xff] }
 0x17b   :  { %v1016_v35 = vpop.f32.mrf.mxu0  ;;  %v1057_v45 = vpop.f32.mrf.mxu1  ;;  %v11509_v16 = vcombine.high %v1656_v1, %v1660_v46  ;;  %v11637_v22 = vcombine.high %v1784_v7, %v1788_v9  ;;  %v1652_v17 = vld [vmem:[#allocation11 + $0x920] sm:$0xff] }
 0x17c   :  { %v13505_v38 = vpack.c.bf16 %v1329_v27, %v1329_v27  ;;  %v1017_v39 = vadd.f32 %v1016_v35, %v13451_v23  ;;  %v13514_v53 = vpack.c.bf16 %v1331_v30, %v1331_v30  ;;  %v1058_v54 = vadd.f32 %v1057_v45, %v13453_v24  ;;  %v1648_v27 = vld [vmem:[#allocation11 + $0x900] sm:$0xff] }
 0x17d   :  { %v1018_v55 = vpop.f32.mrf.mxu0  ;;  %v1059_v62 = vpop.f32.mrf.mxu1  ;;  %v11501_v32 = vcombine.high %v1648_v27, %v1652_v17  ;;  %v1644_v45 = vld [vmem:[#allocation11 + $0x8e0] sm:$0xff] }
 0x17e   :  { %v13519_v58 = vadd.f32 %v1251_v28, %v1017_v39  ;;  %v1019_v23 = vadd.f32 %v1018_v55, %v13455_v0  ;;  %7578 = vmatprep.mubr.bf16.mxu0 %v13505_v38  ;;  %v13523_v2 = vadd.f32 %v1259_v36, %v1058_v54  ;;  %v1060_v4 = vadd.f32 %v1059_v62, %v13457_v25  ;;  %v1640_v39 = vld [vmem:[#allocation11 + $0x8c0] sm:$0xff] }
 0x17f   :  { %7619 = vmatprep.mubr.bf16.mxu1 %v13514_v53  ;;  %v1020_v24 = vpop.f32.mrf.mxu0  ;;  %7579 = vmatmul.mubr.bf16.vlgmr.msra.gmra.mxu0 %v13512_v52  ;;  %v1061_v11 = vpop.f32.mrf.mxu1  ;;  %v11516_v0 = vcombine.low %v1664_v29, %v1668_v18  ;;  %v1772_v54 = vld [vmem:[#allocation11 + $0xce0] sm:$0xff]  ;;  %v11500_v55 = vcombine.low %v1648_v27, %v1652_v17  ;;  %v11628_v62 = vcombine.low %v1776_v59, %v1780_v60 }
 0x180   :  { %v1317_v10 = vadd.f32 %v1255_v48, %v1019_v23  ;;  %7620 = vmatmul.mubr.bf16.vlgmr.msra.gmra.mxu1 %v13517_v57  ;;  %7629 = vmatpush1.bf16.msra.mxu0 %v11524_v5  ;;  %v1319_v13 = vadd.f32 %v1263_v50, %v1060_v4  ;;  %v1768_v50 = vld [vmem:[#allocation11 + $0xcc0] sm:$0xff] }
 0x181   :  { %7670 = vmatpush1.bf16.msra.mxu1 %v11652_v6  ;;  %v1021_v25 = vpop.f32.mrf.mxu0  ;;  %7630 = vmatprep.subr.bf16.mxu0 %v11517_v56  ;;  %v1062_v21 = vpop.f32.mrf.mxu1  ;;  %v11636_v6 = vcombine.low %v1784_v7, %v1788_v9  ;;  %v13551_v56 = vld [vmem:[#allocation10 + $0x8] sm:$0xff]  ;;  %v11621_v4 = vcombine.high %v1768_v50, %v1772_v54  ;;  %v1632_v24 = vld [vmem:[#allocation11 + $0x880] sm:$0xff] }
 0x182   :  { %v1333_v20 = vmax.f32 %v1317_v10, 0.0  ;;  %7671 = vmatprep.subr.bf16.mxu1 %v11645_v63  ;;  %v1335_v28 = vmax.f32 %v1319_v13, 0.0  ;;  %v11493_v63 = vcombine.high %v1640_v39, %v1644_v45  ;;  %v1283_v46 = vrot.slane %v13551_v56, %v13493_v8  ;;  %v1636_v7 = vld [vmem:[#allocation11 + $0x8a0] sm:$0xff] }
 0x183   :  { %v1098_v30 = vpop.f32.mrf.mxu0  ;;  %v1139_v61 = vpop.f32.mrf.mxu1  ;;  %v1291_v10 = vrot.slane %v13551_v56, %v13495_v12  ;;  %v1760_v11 = vld [vmem:[#allocation11 + $0xc80] sm:$0xff]  ;;  %v1295_v27 = vrot.slane %v13551_v56, %v13499_v19  ;;  %v11485_v17 = vcombine.high %v1632_v24, %v1636_v7 }
 0x184   :  { %v13535_v5 = vpack.c.bf16 %v1333_v20, %v1333_v20  ;;  %v13538_v29 = vadd.f32 %v1098_v30, %v13459_v31  ;;  %7631 = vmatpush1.bf16.msra.mxu0 %v11516_v0  ;;  %v13540_v18 = vpack.c.bf16 %v1335_v28, %v1335_v28  ;;  %v13543_v35 = vadd.f32 %v1139_v61, %v13461_v26  ;;  %v1764_v0 = vld [vmem:[#allocation11 + $0xca0] sm:$0xff] }
 0x185   :  { %7672 = vmatpush1.bf16.msra.mxu1 %v11644_v14  ;;  %v13545_v36 = vpop.f32.mrf.mxu0  ;;  %7632 = vmatprep.subr.bf16.mxu0 %v11509_v16  ;;  %v13547_v37 = vpop.f32.mrf.mxu1  ;;  %v11629_v31 = vcombine.high %v1776_v59, %v1780_v60  ;;  %v1287_v14 = vrot.slane %v13551_v56, %v13497_v15  ;;  %v11492_v16 = vcombine.low %v1640_v39, %v1644_v45  ;;  %v1624_v60 = vld [vmem:[#allocation11 + $0x840] sm:$0xff] }
 0x186   :  { %7660 = vmatprep.mubr.bf16.mxu0 %v13535_v5  ;;  %7673 = vmatprep.subr.bf16.mxu1 %v11637_v22  ;;  %v11620_v20 = vcombine.low %v1768_v50, %v1772_v54  ;;  %v11613_v59 = vcombine.high %v1760_v11, %v1764_v0  ;;  %v1628_v61 = vld [vmem:[#allocation11 + $0x860] sm:$0xff]  ;;  %v11484_v45 = vcombine.low %v1632_v24, %v1636_v7 }
 0x187   :  { %7701 = vmatprep.mubr.bf16.mxu1 %v13540_v18  ;;  %v1102_v48 = vpop.f32.mrf.mxu0  ;;  %v1143_v26 = vpop.f32.mrf.mxu1  ;;  %v11477_v54 = vcombine.high %v1624_v60, %v1628_v61 }
 0x188   :  { %7633 = vmatpush1.bf16.msra.mxu0 %v11508_v3 }
 0x189   :  { %7674 = vmatpush1.bf16.msra.mxu1 %v11636_v6  ;;  %v1103_v23 = vpop.f32.mrf.mxu0  ;;  %7634 = vmatprep.subr.bf16.mxu0 %v11501_v32  ;;  %v1144_v1 = vpop.f32.mrf.mxu1  ;;  %v1752_v6 = vld [vmem:[#allocation11 + $0xc40] sm:$0xff] }
 0x18a   :  { %7675 = vmatprep.subr.bf16.mxu1 %v11629_v31  ;;  %v1756_v32 = vld [vmem:[#allocation11 + $0xc60] sm:$0xff] }
 0x18b   :  { %v1180_v9 = vpop.f32.mrf.mxu0  ;;  %v1221_v25 = vpop.f32.mrf.mxu1  ;;  %v1616_v23 = vld [vmem:[#allocation11 + $0x800] sm:$0xff] }
 0x18c   :  { %v1181_v13 = vadd.f32 %v1180_v9, %v13467_v40  ;;  %7635 = vmatpush1.bf16.msra.mxu0 %v11500_v55  ;;  %v1222_v21 = vadd.f32 %v1221_v25, %v13469_v41  ;;  %v11605_v55 = vcombine.high %v1752_v6, %v1756_v32  ;;  %v1748_v1 = vld [vmem:[#allocation11 + $0xc20] sm:$0xff] }
 0x18d   :  { %7676 = vmatpush1.bf16.msra.mxu1 %v11628_v62  ;;  %v1182_v22 = vpop.f32.mrf.mxu0  ;;  %7636 = vmatprep.subr.bf16.mxu0 %v11493_v63  ;;  %v1223_v30 = vpop.f32.mrf.mxu1  ;;  %v1620_v62 = vld [vmem:[#allocation11 + $0x820] sm:$0xff] }
 0x18e   :  { %v13563_v28 = vadd.f32 %v1283_v46, %v1181_v13  ;;  %v1183_v40 = vadd.f32 %v1182_v22, %v13471_v42  ;;  %7677 = vmatprep.subr.bf16.mxu1 %v11621_v4  ;;  %v13566_v3 = vadd.f32 %v1291_v10, %v1222_v21  ;;  %v1224_v41 = vadd.f32 %v1223_v30, %v13473_v43  ;;  %v1744_v63 = vld [vmem:[#allocation11 + $0xc00] sm:$0xff] }
 0x18f   :  { %v1184_v31 = vpop.f32.mrf.mxu0  ;;  %v1225_v48 = vpop.f32.mrf.mxu1  ;;  %v11612_v42 = vcombine.low %v1760_v11, %v1764_v0  ;;  %v11476_v46 = vcombine.low %v1624_v60, %v1628_v61  ;;  %v11604_v4 = vcombine.low %v1752_v6, %v1756_v32  ;;  %v11469_v24 = vcombine.high %v1616_v23, %v1620_v62  ;;  %v1736_v9 = vld [vmem:[#allocation11 + $0xbc0] sm:$0xff] }
 0x190   :  { %v13569_v39 = vadd.f32 %v1287_v14, %v1183_v40  ;;  %7637 = vmatpush1.bf16.msra.mxu0 %v11492_v16  ;;  %v13571_v50 = vadd.f32 %v1295_v27, %v1224_v41  ;;  %v11597_v7 = vcombine.high %v1744_v63, %v1748_v1  ;;  %v1740_v10 = vld [vmem:[#allocation11 + $0xbe0] sm:$0xff]  ;;  %v11468_v13 = vcombine.low %v1616_v23, %v1620_v62 }
 0x191   :  { %7678 = vmatpush1.bf16.msra.mxu1 %v11620_v20  ;;  %7638 = vmatprep.subr.bf16.mxu0 %v11485_v17  ;;  %v1185_v26 = vpop.f32.mrf.mxu0  ;;  %v1226_v43 = vpop.f32.mrf.mxu1  ;;  %v1864_v11 = vld [vmem:[#allocation11 + $0xfc0] sm:$0xff]  ;;  %v11596_v25 = vcombine.low %v1744_v63, %v1748_v1  ;;  %v11589_v14 = vcombine.high %v1736_v9, %v1740_v10  ;;  %v11588_v17 = vcombine.low %v1736_v9, %v1740_v10 }
 0x192   :  { %7679 = vmatprep.subr.bf16.mxu1 %v11613_v59  ;;  %v1868_v0 = vld [vmem:[#allocation11 + $0xfe0] sm:$0xff] }
 0x193   :  { %v11717_v16 = vcombine.high %v1864_v11, %v1868_v0  ;;  %v1728_v20 = vld [vmem:[#allocation11 + $0xb80] sm:$0xff]  ;;  %v11716_v40 = vcombine.low %v1864_v11, %v1868_v0 }
 0x194   :  { %7639 = vmatpush1.bf16.msra.mxu0 %v11484_v45  ;;  %v1732_v21 = vld [vmem:[#allocation11 + $0xba0] sm:$0xff] }
 0x195   :  { %7680 = vmatpush1.bf16.msra.mxu1 %v11612_v42  ;;  %7640 = vmatprep.subr.bf16.mxu0 %v11477_v54  ;;  %v1856_v22 = vld [vmem:[#allocation11 + $0xf80] sm:$0xff]  ;;  %v11581_v30 = vcombine.high %v1728_v20, %v1732_v21  ;;  %v11580_v32 = vcombine.low %v1728_v20, %v1732_v21 }
 0x196   :  { %7681 = vmatprep.subr.bf16.mxu1 %v11605_v55  ;;  %v1860_v27 = vld [vmem:[#allocation11 + $0xfa0] sm:$0xff] }
 0x197   :  { %v11709_v59 = vcombine.high %v1856_v22, %v1860_v27  ;;  %v1720_v60 = vld [vmem:[#allocation11 + $0xb40] sm:$0xff]  ;;  %v11708_v31 = vcombine.low %v1856_v22, %v1860_v27 }
 0x198   :  { %7641 = vmatpush1.bf16.msra.mxu0 %v11476_v46  ;;  %v1724_v61 = vld [vmem:[#allocation11 + $0xb60] sm:$0xff] }
 0x199   :  { %7682 = vmatpush1.bf16.msra.mxu1 %v11604_v4  ;;  %7642 = vmatprep.subr.bf16.mxu0 %v11469_v24  ;;  %v1848_v41 = vld [vmem:[#allocation11 + $0xf40] sm:$0xff]  ;;  %v11573_v45 = vcombine.high %v1720_v60, %v1724_v61  ;;  %v11572_v23 = vcombine.low %v1720_v60, %v1724_v61 }
 0x19a   :  { %7683 = vmatprep.subr.bf16.mxu1 %v11597_v7  ;;  %v1852_v6 = vld [vmem:[#allocation11 + $0xf60] sm:$0xff] }
 0x19b   :  { %v11701_v48 = vcombine.high %v1848_v41, %v1852_v6  ;;  %v1712_v42 = vld [vmem:[#allocation11 + $0xb00] sm:$0xff]  ;;  %v11700_v62 = vcombine.low %v1848_v41, %v1852_v6 }
 0x19c   :  { %7643 = vmatpush1.bf16.msra.mxu0 %v11468_v13  ;;  %v1716_v54 = vld [vmem:[#allocation11 + $0xb20] sm:$0xff] }
 0x19d   :  { %7684 = vmatpush1.bf16.msra.mxu1 %v11596_v25  ;;  %7644 = vmatprep.subr.bf16.mxu0 %v11589_v14  ;;  %v1840_v26 = vld [vmem:[#allocation11 + $0xf00] sm:$0xff]  ;;  %v11565_v43 = vcombine.high %v1712_v42, %v1716_v54  ;;  %v11564_v7 = vcombine.low %v1712_v42, %v1716_v54  ;;  %v1142_v54 = vadd.f32 %v13547_v37, %v13465_v34  ;;  %v1332_v34 = vmax.f32 %v13519_v58, 0.0 }
 0x19e   :  { %7685 = vmatprep.subr.bf16.mxu1 %v11717_v16  ;;  %v1844_v55 = vld [vmem:[#allocation11 + $0xf20] sm:$0xff] }
 0x19f   :  { %v11693_v63 = vcombine.high %v1840_v26, %v1844_v55  ;;  %v1704_v1 = vld [vmem:[#allocation11 + $0xac0] sm:$0xff]  ;;  %v11692_v9 = vcombine.low %v1840_v26, %v1844_v55  ;;  %v1279_v26 = vrot.slane %v13551_v56, %v13483_v51 }
 0x1a0   :  { %7645 = vmatpush2.bf16.msra.mxu0 %v11588_v17  ;;  %v1708_v46 = vld [vmem:[#allocation11 + $0xae0] sm:$0xff] }
 0x1a1   :  { %7686 = vmatpush2.bf16.msra.mxu1 %v11716_v40  ;;  %7646 = vmatprep.subr.bf16.mxu0 %v11581_v30  ;;  %v1832_v4 = vld [vmem:[#allocation11 + $0xec0] sm:$0xff]  ;;  %v11557_v10 = vcombine.high %v1704_v1, %v1708_v46  ;;  %v11556_v16 = vcombine.low %v1704_v1, %v1708_v46 }
 0x1a2   :  { %7687 = vmatprep.subr.bf16.mxu1 %v11709_v59  ;;  %v1836_v24 = vld [vmem:[#allocation11 + $0xee0] sm:$0xff] }
 0x1a3   :  { %v11685_v11 = vcombine.high %v1832_v4, %v1836_v24  ;;  %v1696_v0 = vld [vmem:[#allocation11 + $0xa80] sm:$0xff]  ;;  %v11684_v20 = vcombine.low %v1832_v4, %v1836_v24  ;;  %v1323_v4 = vadd.f32 %v1279_v26, %v1142_v54 }
 0x1a4   :  { %7647 = vmatpush2.bf16.msra.mxu0 %v11580_v32  ;;  %v1700_v13 = vld [vmem:[#allocation11 + $0xaa0] sm:$0xff] }
 0x1a5   :  { %7688 = vmatpush2.bf16.msra.mxu1 %v11708_v31  ;;  %7648 = vmatprep.subr.bf16.mxu0 %v11573_v45  ;;  %v1824_v25 = vld [vmem:[#allocation11 + $0xe80] sm:$0xff]  ;;  %v11549_v21 = vcombine.high %v1696_v0, %v1700_v13  ;;  %v11548_v59 = vcombine.low %v1696_v0, %v1700_v13  ;;  %v1101_v31 = vadd.f32 %v13545_v36, %v13463_v33 }
 0x1a6   :  { %7689 = vmatprep.subr.bf16.mxu1 %v11701_v48  ;;  %v1828_v14 = vld [vmem:[#allocation11 + $0xea0] sm:$0xff]  ;;  %v1271_v45 = vrot.slane %v13551_v56, %v13481_v49 }
 0x1a7   :  { %v11677_v22 = vcombine.high %v1824_v25, %v1828_v14  ;;  %v1688_v27 = vld [vmem:[#allocation11 + $0xa40] sm:$0xff]  ;;  %v11676_v60 = vcombine.low %v1824_v25, %v1828_v14  ;;  %v1339_v25 = vmax.f32 %v1323_v4, 0.0 }
 0x1a8   :  { %7649 = vmatpush2.bf16.msra.mxu0 %v11572_v23  ;;  %v1692_v17 = vld [vmem:[#allocation11 + $0xa60] sm:$0xff] }
 0x1a9   :  { %7690 = vmatpush2.bf16.msra.mxu1 %v11700_v62  ;;  %7650 = vmatprep.subr.bf16.mxu0 %v11565_v43  ;;  %v1816_v40 = vld [vmem:[#allocation11 + $0xe40] sm:$0xff]  ;;  %v11541_v61 = vcombine.high %v1688_v27, %v1692_v17  ;;  %v11540_v55 = vcombine.low %v1688_v27, %v1692_v17 }
 0x1aa   :  { %7691 = vmatprep.subr.bf16.mxu1 %v11693_v63  ;;  %v1820_v30 = vld [vmem:[#allocation11 + $0xe60] sm:$0xff]  ;;  %v1321_v63 = vadd.f32 %v1271_v45, %v1101_v31 }
 0x1ab   :  { %v11669_v41 = vcombine.high %v1816_v40, %v1820_v30  ;;  %v1680_v6 = vld [vmem:[#allocation11 + $0xa00] sm:$0xff]  ;;  %v11668_v23 = vcombine.low %v1816_v40, %v1820_v30 }
 0x1ac   :  { %7651 = vmatpush2.bf16.msra.mxu0 %v11564_v7  ;;  %v1684_v32 = vld [vmem:[#allocation11 + $0xa20] sm:$0xff] }
 0x1ad   :  { %7692 = vmatpush2.bf16.msra.mxu1 %v11692_v9  ;;  %7652 = vmatprep.subr.bf16.mxu0 %v11557_v10  ;;  %v1808_v48 = vld [vmem:[#allocation11 + $0xe00] sm:$0xff]  ;;  %v11533_v62 = vcombine.high %v1680_v6, %v1684_v32  ;;  %v11532_v24 = vcombine.low %v1680_v6, %v1684_v32  ;;  %v1334_v9 = vmax.f32 %v13523_v2, 0.0 }
 0x1ae   :  { %7693 = vmatprep.subr.bf16.mxu1 %v11685_v11  ;;  %v1812_v42 = vld [vmem:[#allocation11 + $0xe20] sm:$0xff]  ;;  %v1337_v11 = vmax.f32 %v1321_v63, 0.0 }
 0x1af   :  { %v11661_v43 = vcombine.high %v1808_v48, %v1812_v42  ;;  %v1928_v33 = vld [vmem:[#allocation11 + $0x11c0] sm:$0xff]  ;;  %v11660_v37 = vcombine.low %v1808_v48, %v1812_v42 }
 0x1b0   :  { %7653 = vmatpush2.bf16.msra.mxu0 %v11556_v16  ;;  %v1932_v36 = vld [vmem:[#allocation11 + $0x11e0] sm:$0xff]  ;;  %v13587_v40 = vpack.c.bf16 %v1337_v11, %v1337_v11 }
 0x1b1   :  { %7694 = vmatpush2.bf16.msra.mxu1 %v11684_v20  ;;  %7654 = vmatprep.subr.bf16.mxu0 %v11549_v21  ;;  %v2056_v1 = vld [vmem:[#allocation11 + $0x15c0] sm:$0xff]  ;;  %v11781_v7 = vcombine.high %v1928_v33, %v1932_v36  ;;  %v11780_v14 = vcombine.low %v1928_v33, %v1932_v36  ;;  %v13583_v21 = vpack.c.bf16 %v1332_v34, %v1332_v34 }
 0x1b2   :  { %7695 = vmatprep.subr.bf16.mxu1 %v11677_v22  ;;  %v2060_v46 = vld [vmem:[#allocation11 + $0x15e0] sm:$0xff]  ;;  %v13585_v22 = vpack.c.bf16 %v1334_v9, %v1334_v9 }
 0x1b3   :  { %v11909_v10 = vcombine.high %v2056_v1, %v2060_v46  ;;  %v1920_v0 = vld [vmem:[#allocation11 + $0x1180] sm:$0xff]  ;;  %v11908_v58 = vcombine.low %v2056_v1, %v2060_v46 }
 0x1b4   :  { %7655 = vmatpush2.bf16.msra.mxu0 %v11548_v59  ;;  %v1924_v13 = vld [vmem:[#allocation11 + $0x11a0] sm:$0xff] }
 0x1b5   :  { %7696 = vmatpush2.bf16.msra.mxu1 %v11676_v60  ;;  %7656 = vmatprep.subr.bf16.mxu0 %v11541_v61  ;;  %v2048_v16 = vld [vmem:[#allocation11 + $0x1580] sm:$0xff]  ;;  %v11773_v27 = vcombine.high %v1920_v0, %v1924_v13  ;;  %v13590_v61 = vpack.c.bf16 %v1339_v25, %v1339_v25 }
 0x1b6   :  { %7697 = vmatprep.subr.bf16.mxu1 %v11669_v41  ;;  %v2052_v20 = vld [vmem:[#allocation11 + $0x15a0] sm:$0xff]  ;;  %v11772_v41 = vcombine.low %v1920_v0, %v1924_v13 }
 0x1b7   :  { %v1912_v2 = vld [vmem:[#allocation11 + $0x1140] sm:$0xff]  ;;  %v11901_v30 = vcombine.high %v2048_v16, %v2052_v20  ;;  %v11900_v6 = vcombine.low %v2048_v16, %v2052_v20 }
 0x1b8   :  { %7657 = vmatpush2.bf16.msra.mxu0 %v11540_v55  ;;  %v1916_v17 = vld [vmem:[#allocation11 + $0x1160] sm:$0xff] }
 0x1b9   :  { %7698 = vmatpush2.bf16.msra.mxu1 %v11668_v23  ;;  %7658 = vmatprep.subr.bf16.mxu0 %v11533_v62  ;;  %v2040_v59 = vld [vmem:[#allocation11 + $0x1540] sm:$0xff]  ;;  %v11765_v32 = vcombine.high %v1912_v2, %v1916_v17  ;;  %v11764_v26 = vcombine.low %v1912_v2, %v1916_v17 }
 0x1ba   :  { %7699 = vmatprep.subr.bf16.mxu1 %v11661_v43  ;;  %v2044_v60 = vld [vmem:[#allocation11 + $0x1560] sm:$0xff] }
 0x1bb   :  { %v11893_v31 = vcombine.high %v2040_v59, %v2044_v60  ;;  %v1904_v45 = vld [vmem:[#allocation11 + $0x1100] sm:$0xff]  ;;  %v11892_v55 = vcombine.low %v2040_v59, %v2044_v60 }
 0x1bc   :  { %7659 = vmatpush2.bf16.msra.mxu0 %v11532_v24  ;;  %v1908_v48 = vld [vmem:[#allocation11 + $0x1120] sm:$0xff] }
 0x1bd   :  { %7700 = vmatpush2.bf16.msra.mxu1 %v11660_v37  ;;  %7710 = vmatprep.subr.bf16.mxu0 %v11781_v7  ;;  %v2032_v42 = vld [vmem:[#allocation11 + $0x1500] sm:$0xff]  ;;  %v11757_v23 = vcombine.high %v1904_v45, %v1908_v48  ;;  %v11756_v1 = vcombine.low %v1904_v45, %v1908_v48 }
 0x1be   :  { %7751 = vmatprep.subr.bf16.mxu1 %v11909_v10  ;;  %v2036_v54 = vld [vmem:[#allocation11 + $0x1520] sm:$0xff] }
 0x1bf   :  { %7661 = vmatmul.mubr.bf16.vlgmr.msra.gmra.mxu0 %v13583_v21  ;;  %v11885_v62 = vcombine.high %v2032_v42, %v2036_v54  ;;  %v1896_v43 = vld [vmem:[#allocation11 + $0x10c0] sm:$0xff]  ;;  %v11884_v46 = vcombine.low %v2032_v42, %v2036_v54 }
 0x1c0   :  { %7702 = vmatmul.mubr.bf16.vlgmr.msra.gmra.mxu1 %v13585_v22  ;;  %7711 = vmatpush1.bf16.msra.mxu0 %v11780_v14  ;;  %v1900_v33 = vld [vmem:[#allocation11 + $0x10e0] sm:$0xff] }
 0x1c1   :  { %7742 = vmatprep.mubr.bf16.mxu0 %v13587_v40  ;;  %7752 = vmatpush1.bf16.msra.mxu1 %v11908_v58  ;;  %v2024_v36 = vld [vmem:[#allocation11 + $0x14c0] sm:$0xff]  ;;  %v11749_v4 = vcombine.high %v1896_v43, %v1900_v33  ;;  %v11748_v10 = vcombine.low %v1896_v43, %v1900_v33 }
 0x1c2   :  { %7783 = vmatprep.mubr.bf16.mxu1 %v13590_v61  ;;  %7712 = vmatprep.subr.bf16.mxu0 %v11773_v27  ;;  %v2028_v63 = vld [vmem:[#allocation11 + $0x14e0] sm:$0xff] }
 0x1c3   :  { %7753 = vmatprep.subr.bf16.mxu1 %v11901_v30  ;;  %v11877_v24 = vcombine.high %v2024_v36, %v2028_v63  ;;  %v1888_v34 = vld [vmem:[#allocation11 + $0x1080] sm:$0xff]  ;;  %v11876_v11 = vcombine.low %v2024_v36, %v2028_v63 }
 0x1c4   :  { %7713 = vmatpush1.bf16.msra.mxu0 %v11772_v41  ;;  %v1892_v37 = vld [vmem:[#allocation11 + $0x10a0] sm:$0xff] }
 0x1c5   :  { %7754 = vmatpush1.bf16.msra.mxu1 %v11900_v6  ;;  %7714 = vmatprep.subr.bf16.mxu0 %v11765_v32  ;;  %v2016_v7 = vld [vmem:[#allocation11 + $0x1480] sm:$0xff]  ;;  %v11741_v0 = vcombine.high %v1888_v34, %v1892_v37  ;;  %v11740_v58 = vcombine.low %v1888_v34, %v1892_v37 }
 0x1c6   :  { %7755 = vmatprep.subr.bf16.mxu1 %v11893_v31  ;;  %v2020_v9 = vld [vmem:[#allocation11 + $0x14a0] sm:$0xff] }
 0x1c7   :  { %v11869_v13 = vcombine.high %v2016_v7, %v2020_v9  ;;  %v1880_v25 = vld [vmem:[#allocation11 + $0x1040] sm:$0xff]  ;;  %v11868_v27 = vcombine.low %v2016_v7, %v2020_v9 }
 0x1c8   :  { %7715 = vmatpush1.bf16.msra.mxu0 %v11764_v26  ;;  %v1884_v14 = vld [vmem:[#allocation11 + $0x1060] sm:$0xff] }
 0x1c9   :  { %7756 = vmatpush1.bf16.msra.mxu1 %v11892_v55  ;;  %7716 = vmatprep.subr.bf16.mxu0 %v11757_v23  ;;  %v2008_v16 = vld [vmem:[#allocation11 + $0x1440] sm:$0xff]  ;;  %v11733_v2 = vcombine.high %v1880_v25, %v1884_v14  ;;  %v11732_v6 = vcombine.low %v1880_v25, %v1884_v14 }
 0x1ca   :  { %7757 = vmatprep.subr.bf16.mxu1 %v11885_v62  ;;  %v2012_v20 = vld [vmem:[#allocation11 + $0x1460] sm:$0xff] }
 0x1cb   :  { %v11861_v17 = vcombine.high %v2008_v16, %v2012_v20  ;;  %v1872_v30 = vld [vmem:[#allocation11 + $0x1000] sm:$0xff]  ;;  %v11860_v32 = vcombine.low %v2008_v16, %v2012_v20 }
 0x1cc   :  { %7717 = vmatpush1.bf16.msra.mxu0 %v11756_v1  ;;  %v1876_v59 = vld [vmem:[#allocation11 + $0x1020] sm:$0xff] }
 0x1cd   :  { %7758 = vmatpush1.bf16.msra.mxu1 %v11884_v46  ;;  %7718 = vmatprep.subr.bf16.mxu0 %v11749_v4  ;;  %v2000_v60 = vld [vmem:[#allocation11 + $0x1400] sm:$0xff]  ;;  %v11725_v31 = vcombine.high %v1872_v30, %v1876_v59  ;;  %v11724_v55 = vcombine.low %v1872_v30, %v1876_v59 }
 0x1ce   :  { %7759 = vmatprep.subr.bf16.mxu1 %v11877_v24  ;;  %v2004_v41 = vld [vmem:[#allocation11 + $0x1420] sm:$0xff] }
 0x1cf   :  { %v11853_v45 = vcombine.high %v2000_v60, %v2004_v41  ;;  %v1992_v48 = vld [vmem:[#allocation11 + $0x13c0] sm:$0xff]  ;;  %v11852_v23 = vcombine.low %v2000_v60, %v2004_v41 }
 0x1d0   :  { %7719 = vmatpush1.bf16.msra.mxu0 %v11748_v10  ;;  %v1996_v42 = vld [vmem:[#allocation11 + $0x13e0] sm:$0xff] }
 0x1d1   :  { %7760 = vmatpush1.bf16.msra.mxu1 %v11876_v11  ;;  %7720 = vmatprep.subr.bf16.mxu0 %v11741_v0  ;;  %v2120_v54 = vld [vmem:[#allocation11 + $0x17c0] sm:$0xff]  ;;  %v11845_v62 = vcombine.high %v1992_v48, %v1996_v42  ;;  %v11844_v46 = vcombine.low %v1992_v48, %v1996_v42 }
 0x1d2   :  { %7761 = vmatprep.subr.bf16.mxu1 %v11869_v13  ;;  %v2124_v26 = vld [vmem:[#allocation11 + $0x17e0] sm:$0xff] }
 0x1d3   :  { %v11973_v43 = vcombine.high %v2120_v54, %v2124_v26  ;;  %v1984_v33 = vld [vmem:[#allocation11 + $0x1380] sm:$0xff]  ;;  %v11972_v4 = vcombine.low %v2120_v54, %v2124_v26 }
 0x1d4   :  { %7721 = vmatpush1.bf16.msra.mxu0 %v11740_v58  ;;  %v1988_v36 = vld [vmem:[#allocation11 + $0x13a0] sm:$0xff] }
 0x1d5   :  { %7762 = vmatpush1.bf16.msra.mxu1 %v11868_v27  ;;  %7722 = vmatprep.subr.bf16.mxu0 %v11733_v2  ;;  %v2112_v63 = vld [vmem:[#allocation11 + $0x1780] sm:$0xff]  ;;  %v11837_v24 = vcombine.high %v1984_v33, %v1988_v36  ;;  %v11836_v11 = vcombine.low %v1984_v33, %v1988_v36 }
 0x1d6   :  { %7763 = vmatprep.subr.bf16.mxu1 %v11861_v17  ;;  %v2116_v1 = vld [vmem:[#allocation11 + $0x17a0] sm:$0xff] }
 0x1d7   :  { %v11965_v34 = vcombine.high %v2112_v63, %v2116_v1  ;;  %v1976_v37 = vld [vmem:[#allocation11 + $0x1340] sm:$0xff]  ;;  %v11964_v0 = vcombine.low %v2112_v63, %v2116_v1 }
 0x1d8   :  { %7723 = vmatpush1.bf16.msra.mxu0 %v11732_v6  ;;  %v1980_v7 = vld [vmem:[#allocation11 + $0x1360] sm:$0xff] }
 0x1d9   :  { %7764 = vmatpush1.bf16.msra.mxu1 %v11860_v32  ;;  %7724 = vmatprep.subr.bf16.mxu0 %v11725_v31  ;;  %v2104_v9 = vld [vmem:[#allocation11 + $0x1740] sm:$0xff]  ;;  %v11829_v13 = vcombine.high %v1976_v37, %v1980_v7  ;;  %v11828_v27 = vcombine.low %v1976_v37, %v1980_v7  ;;  %v1275_v7 = vrot.slane %v13551_v56, %v13479_v47 }
 0x1da   :  { %7765 = vmatprep.subr.bf16.mxu1 %v11853_v45  ;;  %v2108_v10 = vld [vmem:[#allocation11 + $0x1760] sm:$0xff] }
 0x1db   :  { %v11957_v25 = vcombine.high %v2104_v9, %v2108_v10  ;;  %v1968_v14 = vld [vmem:[#allocation11 + $0x1300] sm:$0xff]  ;;  %v11956_v2 = vcombine.low %v2104_v9, %v2108_v10 }
 0x1dc   :  { %7725 = vmatpush1.bf16.msra.mxu0 %v11724_v55  ;;  %v1972_v16 = vld [vmem:[#allocation11 + $0x1320] sm:$0xff] }
 0x1dd   :  { %7766 = vmatpush1.bf16.msra.mxu1 %v11852_v23  ;;  %7726 = vmatprep.subr.bf16.mxu0 %v11845_v62  ;;  %v2096_v20 = vld [vmem:[#allocation11 + $0x1700] sm:$0xff]  ;;  %v11821_v17 = vcombine.high %v1968_v14, %v1972_v16  ;;  %v11820_v32 = vcombine.low %v1968_v14, %v1972_v16 }
 0x1de   :  { %7767 = vmatprep.subr.bf16.mxu1 %v11973_v43  ;;  %v2100_v58 = vld [vmem:[#allocation11 + $0x1720] sm:$0xff] }
 0x1df   :  { %v11949_v30 = vcombine.high %v2096_v20, %v2100_v58  ;;  %v1960_v59 = vld [vmem:[#allocation11 + $0x12c0] sm:$0xff]  ;;  %v11948_v31 = vcombine.low %v2096_v20, %v2100_v58  ;;  %v1322_v58 = vadd.f32 %v1275_v7, %v13543_v35 }
 0x1e0   :  { %7727 = vmatpush2.bf16.msra.mxu0 %v11844_v46  ;;  %v1964_v60 = vld [vmem:[#allocation11 + $0x12e0] sm:$0xff] }
 0x1e1   :  { %7768 = vmatpush2.bf16.msra.mxu1 %v11972_v4  ;;  %7728 = vmatprep.subr.bf16.mxu0 %v11837_v24  ;;  %v2088_v41 = vld [vmem:[#allocation11 + $0x16c0] sm:$0xff]  ;;  %v11813_v45 = vcombine.high %v1960_v59, %v1964_v60  ;;  %v11812_v23 = vcombine.low %v1960_v59, %v1964_v60  ;;  %v1267_v24 = vrot.slane %v13551_v56, %v13475_v44 }
 0x1e2   :  { %7769 = vmatprep.subr.bf16.mxu1 %v11965_v34  ;;  %v2092_v6 = vld [vmem:[#allocation11 + $0x16e0] sm:$0xff] }
 0x1e3   :  { %v11941_v48 = vcombine.high %v2088_v41, %v2092_v6  ;;  %v1952_v42 = vld [vmem:[#allocation11 + $0x1280] sm:$0xff]  ;;  %v11940_v62 = vcombine.low %v2088_v41, %v2092_v6  ;;  %v1320_v14 = vadd.f32 %v1267_v24, %v13538_v29  ;;  %v1338_v29 = vmax.f32 %v1322_v58, 0.0 }
 0x1e4   :  { %7729 = vmatpush2.bf16.msra.mxu0 %v11836_v11  ;;  %v1956_v54 = vld [vmem:[#allocation11 + $0x12a0] sm:$0xff] }
 0x1e5   :  { %7770 = vmatpush2.bf16.msra.mxu1 %v11964_v0  ;;  %7730 = vmatprep.subr.bf16.mxu0 %v11829_v13  ;;  %v2080_v26 = vld [vmem:[#allocation11 + $0x1680] sm:$0xff]  ;;  %v11805_v43 = vcombine.high %v1952_v42, %v1956_v54  ;;  %v11804_v4 = vcombine.low %v1952_v42, %v1956_v54  ;;  %v1336_v60 = vmax.f32 %v1320_v14, 0.0 }
 0x1e6   :  { %7771 = vmatprep.subr.bf16.mxu1 %v11957_v25  ;;  %v2084_v55 = vld [vmem:[#allocation11 + $0x16a0] sm:$0xff] }
 0x1e7   :  { %v11933_v33 = vcombine.high %v2080_v26, %v2084_v55  ;;  %v1944_v36 = vld [vmem:[#allocation11 + $0x1240] sm:$0xff]  ;;  %v11932_v34 = vcombine.low %v2080_v26, %v2084_v55  ;;  %v13603_v55 = vpack.c.bf16 %v1336_v60, %v1336_v60 }
 0x1e8   :  { %7731 = vmatpush2.bf16.msra.mxu0 %v11828_v27  ;;  %v1948_v63 = vld [vmem:[#allocation11 + $0x1260] sm:$0xff] }
 0x1e9   :  { %7772 = vmatpush2.bf16.msra.mxu1 %v11956_v2  ;;  %7732 = vmatprep.subr.bf16.mxu0 %v11821_v17  ;;  %v2072_v1 = vld [vmem:[#allocation11 + $0x1640] sm:$0xff]  ;;  %v11797_v37 = vcombine.high %v1944_v36, %v1948_v63  ;;  %v11796_v25 = vcombine.low %v1944_v36, %v1948_v63 }
 0x1ea   :  { %7773 = vmatprep.subr.bf16.mxu1 %v11949_v30  ;;  %v2076_v46 = vld [vmem:[#allocation11 + $0x1660] sm:$0xff] }
 0x1eb   :  { %v11925_v9 = vcombine.high %v2072_v1, %v2076_v46  ;;  %v1936_v10 = vld [vmem:[#allocation11 + $0x1200] sm:$0xff]  ;;  %v11924_v16 = vcombine.low %v2072_v1, %v2076_v46 }
 0x1ec   :  { %7733 = vmatpush2.bf16.msra.mxu0 %v11820_v32  ;;  %v1940_v11 = vld [vmem:[#allocation11 + $0x1220] sm:$0xff] }
 0x1ed   :  { %7774 = vmatpush2.bf16.msra.mxu1 %v11948_v31  ;;  %7734 = vmatprep.subr.bf16.mxu0 %v11813_v45  ;;  %v2064_v0 = vld [vmem:[#allocation11 + $0x1600] sm:$0xff]  ;;  %v11789_v20 = vcombine.high %v1936_v10, %v1940_v11  ;;  %v11788_v59 = vcombine.low %v1936_v10, %v1940_v11  ;;  %v1341_v31 = vmax.f32 %v13569_v39, 0.0 }
 0x1ee   :  { %7775 = vmatprep.subr.bf16.mxu1 %v11941_v48  ;;  %v2068_v13 = vld [vmem:[#allocation11 + $0x1620] sm:$0xff]  ;;  %v1343_v48 = vmax.f32 %v13571_v50, 0.0 }
 0x1ef   :  { %v11917_v27 = vcombine.high %v2064_v0, %v2068_v13  ;;  %v2184_v2 = vld [vmem:[#allocation11 + $0x19c0] sm:$0xff]  ;;  %v11916_v41 = vcombine.low %v2064_v0, %v2068_v13  ;;  %v13607_v39 = vpack.c.bf16 %v1341_v31, %v1341_v31 }
 0x1f0   :  { %7735 = vmatpush2.bf16.msra.mxu0 %v11812_v23  ;;  %v2188_v56 = vld [vmem:[#allocation11 + $0x19e0] sm:$0xff]  ;;  %v13610_v46 = vpack.c.bf16 %v1343_v48, %v1343_v48 }
 0x1f1   :  { %7776 = vmatpush2.bf16.msra.mxu1 %v11940_v62  ;;  %7736 = vmatprep.subr.bf16.mxu0 %v11805_v43  ;;  %v2312_v17 = vld [vmem:[#allocation11 + $0x1dc0] sm:$0xff]  ;;  %v12037_v6 = vcombine.high %v2184_v2, %v2188_v56  ;;  %v12036_v42 = vcombine.low %v2184_v2, %v2188_v56  ;;  %v13605_v62 = vpack.c.bf16 %v1338_v29, %v1338_v29 }
 0x1f2   :  { %7777 = vmatprep.subr.bf16.mxu1 %v11933_v33  ;;  %v2316_v30 = vld [vmem:[#allocation11 + $0x1de0] sm:$0xff] }
 0x1f3   :  { %v12165_v32 = vcombine.high %v2312_v17, %v2316_v30  ;;  %v2176_v45 = vld [vmem:[#allocation11 + $0x1980] sm:$0xff]  ;;  %v12164_v23 = vcombine.low %v2312_v17, %v2316_v30 }
 0x1f4   :  { %7737 = vmatpush2.bf16.msra.mxu0 %v11804_v4  ;;  %v2180_v35 = vld [vmem:[#allocation11 + $0x19a0] sm:$0xff] }
 0x1f5   :  { %7778 = vmatpush2.bf16.msra.mxu1 %v11932_v34  ;;  %7738 = vmatprep.subr.bf16.mxu0 %v11797_v37  ;;  %v2304_v54 = vld [vmem:[#allocation11 + $0x1d80] sm:$0xff]  ;;  %v12029_v43 = vcombine.high %v2176_v45, %v2180_v35  ;;  %v12028_v4 = vcombine.low %v2176_v45, %v2180_v35 }
 0x1f6   :  { %7779 = vmatprep.subr.bf16.mxu1 %v11925_v9  ;;  %v2308_v26 = vld [vmem:[#allocation11 + $0x1da0] sm:$0xff] }
 0x1f7   :  { %v2168_v33 = vld [vmem:[#allocation11 + $0x1940] sm:$0xff]  ;;  %v12157_v50 = vcombine.high %v2304_v54, %v2308_v26  ;;  %v12156_v24 = vcombine.low %v2304_v54, %v2308_v26 }
 0x1f8   :  { %7739 = vmatpush2.bf16.msra.mxu0 %v11796_v25  ;;  %v2172_v36 = vld [vmem:[#allocation11 + $0x1960] sm:$0xff] }
 0x1f9   :  { %7780 = vmatpush2.bf16.msra.mxu1 %v11924_v16  ;;  %7740 = vmatprep.subr.bf16.mxu0 %v11789_v20  ;;  %v2296_v63 = vld [vmem:[#allocation11 + $0x1d40] sm:$0xff]  ;;  %v12021_v34 = vcombine.high %v2168_v33, %v2172_v36  ;;  %v12020_v0 = vcombine.low %v2168_v33, %v2172_v36 }
 0x1fa   :  { %7781 = vmatprep.subr.bf16.mxu1 %v11917_v27  ;;  %v2300_v1 = vld [vmem:[#allocation11 + $0x1d60] sm:$0xff] }
 0x1fb   :  { %v12149_v37 = vcombine.high %v2296_v63, %v2300_v1  ;;  %v2160_v7 = vld [vmem:[#allocation11 + $0x1900] sm:$0xff]  ;;  %v12148_v13 = vcombine.low %v2296_v63, %v2300_v1 }
 0x1fc   :  { %7741 = vmatpush2.bf16.msra.mxu0 %v11788_v59  ;;  %v2164_v9 = vld [vmem:[#allocation11 + $0x1920] sm:$0xff] }
 0x1fd   :  { %7782 = vmatpush2.bf16.msra.mxu1 %v11916_v41  ;;  %7792 = vmatprep.subr.bf16.mxu0 %v12037_v6  ;;  %v2288_v10 = vld [vmem:[#allocation11 + $0x1d00] sm:$0xff]  ;;  %v12013_v25 = vcombine.high %v2160_v7, %v2164_v9  ;;  %v12012_v2 = vcombine.low %v2160_v7, %v2164_v9 }
 0x1fe   :  { %7833 = vmatprep.subr.bf16.mxu1 %v12165_v32  ;;  %v2292_v11 = vld [vmem:[#allocation11 + $0x1d20] sm:$0xff] }
 0x1ff   :  { %7743 = vmatmul.mubr.bf16.vlgmr.msra.gmra.mxu0 %v13603_v55  ;;  %v12141_v14 = vcombine.high %v2288_v10, %v2292_v11  ;;  %v2152_v16 = vld [vmem:[#allocation11 + $0x18c0] sm:$0xff]  ;;  %v12140_v56 = vcombine.low %v2288_v10, %v2292_v11 }
 0x200   :  { %7784 = vmatmul.mubr.bf16.vlgmr.msra.gmra.mxu1 %v13605_v62  ;;  %7793 = vmatpush1.bf16.msra.mxu0 %v12036_v42  ;;  %v2156_v20 = vld [vmem:[#allocation11 + $0x18e0] sm:$0xff] }
 0x201   :  { %7824 = vmatprep.mubr.bf16.mxu0 %v13607_v39  ;;  %7834 = vmatpush1.bf16.msra.mxu1 %v12164_v23  ;;  %v2280_v58 = vld [vmem:[#allocation11 + $0x1cc0] sm:$0xff]  ;;  %v12005_v17 = vcombine.high %v2152_v16, %v2156_v20  ;;  %v12004_v29 = vcombine.low %v2152_v16, %v2156_v20 }
 0x202   :  { %7865 = vmatprep.mubr.bf16.mxu1 %v13610_v46  ;;  %7794 = vmatprep.subr.bf16.mxu0 %v12029_v43  ;;  %v2284_v27 = vld [vmem:[#allocation11 + $0x1ce0] sm:$0xff] }
 0x203   :  { %7835 = vmatprep.subr.bf16.mxu1 %v12157_v50  ;;  %v12133_v30 = vcombine.high %v2280_v58, %v2284_v27  ;;  %v2144_v59 = vld [vmem:[#allocation11 + $0x1880] sm:$0xff]  ;;  %v12132_v32 = vcombine.low %v2280_v58, %v2284_v27 }
 0x204   :  { %7795 = vmatpush1.bf16.msra.mxu0 %v12028_v4  ;;  %v2148_v60 = vld [vmem:[#allocation11 + $0x18a0] sm:$0xff] }
 0x205   :  { %7836 = vmatpush1.bf16.msra.mxu1 %v12156_v24  ;;  %7796 = vmatprep.subr.bf16.mxu0 %v12021_v34  ;;  %v2272_v41 = vld [vmem:[#allocation11 + $0x1c80] sm:$0xff]  ;;  %v11997_v31 = vcombine.high %v2144_v59, %v2148_v60  ;;  %v11996_v26 = vcombine.low %v2144_v59, %v2148_v60 }
 0x206   :  { %7837 = vmatprep.subr.bf16.mxu1 %v12149_v37  ;;  %v2276_v6 = vld [vmem:[#allocation11 + $0x1ca0] sm:$0xff] }
 0x207   :  { %v12125_v45 = vcombine.high %v2272_v41, %v2276_v6  ;;  %v2136_v35 = vld [vmem:[#allocation11 + $0x1840] sm:$0xff]  ;;  %v12124_v23 = vcombine.low %v2272_v41, %v2276_v6 }
 0x208   :  { %7797 = vmatpush1.bf16.msra.mxu0 %v12020_v0  ;;  %v2140_v48 = vld [vmem:[#allocation11 + $0x1860] sm:$0xff] }
 0x209   :  { %7838 = vmatpush1.bf16.msra.mxu1 %v12148_v13  ;;  %7798 = vmatprep.subr.bf16.mxu0 %v12013_v25  ;;  %v2264_v42 = vld [vmem:[#allocation11 + $0x1c40] sm:$0xff]  ;;  %v11989_v43 = vcombine.high %v2136_v35, %v2140_v48  ;;  %v11988_v4 = vcombine.low %v2136_v35, %v2140_v48 }
 0x20a   :  { %7839 = vmatprep.subr.bf16.mxu1 %v12141_v14  ;;  %v2268_v54 = vld [vmem:[#allocation11 + $0x1c60] sm:$0xff] }
 0x20b   :  { %v12117_v33 = vcombine.high %v2264_v42, %v2268_v54  ;;  %v2128_v36 = vld [vmem:[#allocation11 + $0x1800] sm:$0xff]  ;;  %v12116_v24 = vcombine.low %v2264_v42, %v2268_v54 }
 0x20c   :  { %7799 = vmatpush1.bf16.msra.mxu0 %v12012_v2  ;;  %v2132_v50 = vld [vmem:[#allocation11 + $0x1820] sm:$0xff] }
 0x20d   :  { %7840 = vmatpush1.bf16.msra.mxu1 %v12140_v56  ;;  %7800 = vmatprep.subr.bf16.mxu0 %v12005_v17  ;;  %v2256_v63 = vld [vmem:[#allocation11 + $0x1c00] sm:$0xff]  ;;  %v11981_v34 = vcombine.high %v2128_v36, %v2132_v50  ;;  %v11980_v0 = vcombine.low %v2128_v36, %v2132_v50 }
 0x20e   :  { %7841 = vmatprep.subr.bf16.mxu1 %v12133_v30  ;;  %v2260_v1 = vld [vmem:[#allocation11 + $0x1c20] sm:$0xff] }
 0x20f   :  { %v12109_v37 = vcombine.high %v2256_v63, %v2260_v1  ;;  %v2248_v7 = vld [vmem:[#allocation11 + $0x1bc0] sm:$0xff]  ;;  %v12108_v13 = vcombine.low %v2256_v63, %v2260_v1 }
 0x210   :  { %7801 = vmatpush1.bf16.msra.mxu0 %v12004_v29  ;;  %v2252_v9 = vld [vmem:[#allocation11 + $0x1be0] sm:$0xff] }
 0x211   :  { %7842 = vmatpush1.bf16.msra.mxu1 %v12132_v32  ;;  %7802 = vmatprep.subr.bf16.mxu0 %v11997_v31  ;;  %v2376_v10 = vld [vmem:[#allocation11 + $0x1fc0] sm:$0xff]  ;;  %v12101_v25 = vcombine.high %v2248_v7, %v2252_v9  ;;  %v12100_v2 = vcombine.low %v2248_v7, %v2252_v9 }
 0x212   :  { %7843 = vmatprep.subr.bf16.mxu1 %v12125_v45  ;;  %v2380_v11 = vld [vmem:[#allocation11 + $0x1fe0] sm:$0xff] }
 0x213   :  { %v12229_v14 = vcombine.high %v2376_v10, %v2380_v11  ;;  %v2240_v16 = vld [vmem:[#allocation11 + $0x1b80] sm:$0xff]  ;;  %v12228_v56 = vcombine.low %v2376_v10, %v2380_v11 }
 0x214   :  { %7803 = vmatpush1.bf16.msra.mxu0 %v11996_v26  ;;  %v2244_v20 = vld [vmem:[#allocation11 + $0x1ba0] sm:$0xff] }
 0x215   :  { %7844 = vmatpush1.bf16.msra.mxu1 %v12124_v23  ;;  %7804 = vmatprep.subr.bf16.mxu0 %v11989_v43  ;;  %v2368_v58 = vld [vmem:[#allocation11 + $0x1f80] sm:$0xff]  ;;  %v12093_v17 = vcombine.high %v2240_v16, %v2244_v20  ;;  %v12092_v29 = vcombine.low %v2240_v16, %v2244_v20 }
 0x216   :  { %7845 = vmatprep.subr.bf16.mxu1 %v12117_v33  ;;  %v2372_v27 = vld [vmem:[#allocation11 + $0x1fa0] sm:$0xff] }
 0x217   :  { %v12221_v30 = vcombine.high %v2368_v58, %v2372_v27  ;;  %v2232_v59 = vld [vmem:[#allocation11 + $0x1b40] sm:$0xff]  ;;  %v12220_v32 = vcombine.low %v2368_v58, %v2372_v27 }
 0x218   :  { %7805 = vmatpush1.bf16.msra.mxu0 %v11988_v4  ;;  %v2236_v60 = vld [vmem:[#allocation11 + $0x1b60] sm:$0xff] }
 0x219   :  { %7846 = vmatpush1.bf16.msra.mxu1 %v12116_v24  ;;  %7806 = vmatprep.subr.bf16.mxu0 %v11981_v34  ;;  %v2360_v41 = vld [vmem:[#allocation11 + $0x1f40] sm:$0xff]  ;;  %v12085_v31 = vcombine.high %v2232_v59, %v2236_v60  ;;  %v12084_v26 = vcombine.low %v2232_v59, %v2236_v60 }
 0x21a   :  { %7847 = vmatprep.subr.bf16.mxu1 %v12109_v37  ;;  %v2364_v6 = vld [vmem:[#allocation11 + $0x1f60] sm:$0xff] }
 0x21b   :  { %v12213_v45 = vcombine.high %v2360_v41, %v2364_v6  ;;  %v2224_v35 = vld [vmem:[#allocation11 + $0x1b00] sm:$0xff]  ;;  %v12212_v23 = vcombine.low %v2360_v41, %v2364_v6 }
 0x21c   :  { %7807 = vmatpush1.bf16.msra.mxu0 %v11980_v0  ;;  %v2228_v48 = vld [vmem:[#allocation11 + $0x1b20] sm:$0xff] }
 0x21d   :  { %7848 = vmatpush1.bf16.msra.mxu1 %v12108_v13  ;;  %7808 = vmatprep.subr.bf16.mxu0 %v12101_v25  ;;  %v2352_v42 = vld [vmem:[#allocation11 + $0x1f00] sm:$0xff]  ;;  %v12077_v43 = vcombine.high %v2224_v35, %v2228_v48  ;;  %v12076_v4 = vcombine.low %v2224_v35, %v2228_v48  ;;  %v1417_v35 = vld [vmem:[#allocation11 + $0x1c8] sm:$0xff] }
 0x21e   :  { %7849 = vmatprep.subr.bf16.mxu1 %v12229_v14  ;;  %v2356_v54 = vld [vmem:[#allocation11 + $0x1f20] sm:$0xff]  ;;  %v1421_v48 = vld [vmem:[#allocation11 + $0x1e8] sm:$0xff] }
 0x21f   :  { %v12205_v33 = vcombine.high %v2352_v42, %v2356_v54  ;;  %v2216_v36 = vld [vmem:[#allocation11 + $0x1ac0] sm:$0xff]  ;;  %v12204_v24 = vcombine.low %v2352_v42, %v2356_v54  ;;  %v1545_v42 = vld [vmem:[#allocation11 + $0x5c8] sm:$0xff] }
 0x220   :  { %7809 = vmatpush2.bf16.msra.mxu0 %v12100_v2  ;;  %v2220_v50 = vld [vmem:[#allocation11 + $0x1ae0] sm:$0xff]  ;;  %v1549_v54 = vld [vmem:[#allocation11 + $0x5e8] sm:$0xff] }
 0x221   :  { %7850 = vmatpush2.bf16.msra.mxu1 %v12228_v56  ;;  %7810 = vmatprep.subr.bf16.mxu0 %v12093_v17  ;;  %v2344_v63 = vld [vmem:[#allocation11 + $0x1ec0] sm:$0xff]  ;;  %v12069_v34 = vcombine.high %v2216_v36, %v2220_v50  ;;  %v12068_v0 = vcombine.low %v2216_v36, %v2220_v50  ;;  %v1342_v50 = vmax.f32 %v13566_v3, 0.0 }
 0x222   :  { %7851 = vmatprep.subr.bf16.mxu1 %v12221_v30  ;;  %v2348_v1 = vld [vmem:[#allocation11 + $0x1ee0] sm:$0xff] }
 0x223   :  { %v12197_v37 = vcombine.high %v2344_v63, %v2348_v1  ;;  %v2208_v7 = vld [vmem:[#allocation11 + $0x1a80] sm:$0xff]  ;;  %v12196_v13 = vcombine.low %v2344_v63, %v2348_v1  ;;  %v11399_v63 = vcombine.high %v1545_v42, %v1549_v54  ;;  %v1409_v1 = vld [vmem:[#allocation11 + $0x188] sm:$0xff] }
 0x224   :  { %7811 = vmatpush2.bf16.msra.mxu0 %v12092_v29  ;;  %v2212_v9 = vld [vmem:[#allocation11 + $0x1aa0] sm:$0xff] }
 0x225   :  { %7852 = vmatpush2.bf16.msra.mxu1 %v12220_v32  ;;  %7812 = vmatprep.subr.bf16.mxu0 %v12085_v31  ;;  %v2336_v10 = vld [vmem:[#allocation11 + $0x1e80] sm:$0xff]  ;;  %v12061_v25 = vcombine.high %v2208_v7, %v2212_v9  ;;  %v12060_v2 = vcombine.low %v2208_v7, %v2212_v9  ;;  %v1541_v7 = vld [vmem:[#allocation11 + $0x5a8] sm:$0xff] }
 0x226   :  { %7853 = vmatprep.subr.bf16.mxu1 %v12213_v45  ;;  %v2340_v11 = vld [vmem:[#allocation11 + $0x1ea0] sm:$0xff] }
 0x227   :  { %v12189_v14 = vcombine.high %v2336_v10, %v2340_v11  ;;  %v2200_v16 = vld [vmem:[#allocation11 + $0x1a40] sm:$0xff]  ;;  %v12188_v56 = vcombine.low %v2336_v10, %v2340_v11  ;;  %v13620_v10 = vpack.c.bf16 %v1342_v50, %v1342_v50  ;;  %v1385_v50 = vld [vmem:[#allocation11 + $0xc8] sm:$0xff] }
 0x228   :  { %7813 = vmatpush2.bf16.msra.mxu0 %v12084_v26  ;;  %v2204_v20 = vld [vmem:[#allocation11 + $0x1a60] sm:$0xff] }
 0x229   :  { %7854 = vmatpush2.bf16.msra.mxu1 %v12212_v23  ;;  %7814 = vmatprep.subr.bf16.mxu0 %v12077_v43  ;;  %v2328_v58 = vld [vmem:[#allocation11 + $0x1e40] sm:$0xff]  ;;  %v12053_v17 = vcombine.high %v2200_v16, %v2204_v20  ;;  %v12052_v29 = vcombine.low %v2200_v16, %v2204_v20  ;;  %v1340_v23 = vmax.f32 %v13563_v28, 0.0  ;;  %v11398_v28 = vcombine.low %v1545_v42, %v1549_v54  ;;  %v1529_v16 = vld [vmem:[#allocation11 + $0x548] sm:$0xff] }
 0x22a   :  { %7855 = vmatprep.subr.bf16.mxu1 %v12205_v33  ;;  %v2332_v27 = vld [vmem:[#allocation11 + $0x1e60] sm:$0xff]  ;;  %v11271_v33 = vcombine.high %v1417_v35, %v1421_v48  ;;  %v1533_v20 = vld [vmem:[#allocation11 + $0x568] sm:$0xff] }
 0x22b   :  { %v12181_v30 = vcombine.high %v2328_v58, %v2332_v27  ;;  %v2192_v59 = vld [vmem:[#allocation11 + $0x1a00] sm:$0xff]  ;;  %v12180_v32 = vcombine.low %v2328_v58, %v2332_v27  ;;  %v13618_v9 = vpack.c.bf16 %v1340_v23, %v1340_v23  ;;  %v11382_v23 = vcombine.low %v1529_v16, %v1533_v20 }
 0x22c   :  { %7815 = vmatpush2.bf16.msra.mxu0 %v12076_v4  ;;  %v2196_v60 = vld [vmem:[#allocation11 + $0x1a20] sm:$0xff]  ;;  %v1413_v4 = vld [vmem:[#allocation11 + $0x1a8] sm:$0xff] }
 0x22d   :  { %7856 = vmatpush2.bf16.msra.mxu1 %v12204_v24  ;;  %7816 = vmatprep.subr.bf16.mxu0 %v12069_v34  ;;  %v2320_v41 = vld [vmem:[#allocation11 + $0x1e00] sm:$0xff]  ;;  %v12045_v31 = vcombine.high %v2192_v59, %v2196_v60  ;;  %v12044_v26 = vcombine.low %v2192_v59, %v2196_v60  ;;  %v11270_v24 = vcombine.low %v1417_v35, %v1421_v48  ;;  %v1525_v35 = vld [vmem:[#allocation11 + $0x528] sm:$0xff] }
 0x22e   :  { %7857 = vmatprep.subr.bf16.mxu1 %v12197_v37  ;;  %v2324_v6 = vld [vmem:[#allocation11 + $0x1e20] sm:$0xff]  ;;  %v1537_v37 = vld [vmem:[#allocation11 + $0x588] sm:$0xff]  ;;  %v11263_v11 = vcombine.high %v1409_v1, %v1413_v4 }
 0x22f   :  { %v12173_v45 = vcombine.high %v2320_v41, %v2324_v6  ;;  %v12172_v43 = vcombine.low %v2320_v41, %v2324_v6  ;;  %v2384_v36 = vld [vmem:[#allocation13] sm:$0xff]  ;;  %v11383_v6 = vcombine.high %v1529_v16, %v1533_v20  ;;  %v1369_v20 = vld [vmem:[#allocation11 + $0x48] sm:$0xff] }
 0x230   :  { %7817 = vmatpush2.bf16.msra.mxu0 %v12068_v0  ;;  %v2389_v34 = vrot.slane %v2384_v36, %v13475_v44  ;;  %v2393_v3 = vrot.slane %v2384_v36, %v13481_v49  ;;  %v1401_v0 = vld [vmem:[#allocation11 + $0x148] sm:$0xff] }
 0x231   :  { %7858 = vmatpush2.bf16.msra.mxu1 %v12196_v13  ;;  %7818 = vmatprep.subr.bf16.mxu0 %v12061_v25  ;;  %v1405_v13 = vld [vmem:[#allocation11 + $0x168] sm:$0xff] }
 0x232   :  { %7859 = vmatprep.subr.bf16.mxu1 %v12189_v14  ;;  %v11391_v14 = vcombine.high %v1537_v37, %v1541_v7  ;;  %v11254_v54 = vcombine.low %v1401_v0, %v1405_v13 }
 0x234   :  { %7819 = vmatpush2.bf16.msra.mxu0 %v12060_v2  ;;  %v11262_v2 = vcombine.low %v1409_v1, %v1413_v4  ;;  %v1513_v1 = vld [vmem:[#allocation11 + $0x4c8] sm:$0xff] }
 0x235   :  { %7860 = vmatpush2.bf16.msra.mxu1 %v12188_v56  ;;  %7820 = vmatprep.subr.bf16.mxu0 %v12053_v17  ;;  %v11390_v17 = vcombine.low %v1537_v37, %v1541_v7  ;;  %v1517_v4 = vld [vmem:[#allocation11 + $0x4e8] sm:$0xff] }
 0x236   :  { %7861 = vmatprep.subr.bf16.mxu1 %v12181_v30  ;;  %v11255_v30 = vcombine.high %v1401_v0, %v1405_v13  ;;  %v11367_v7 = vcombine.high %v1513_v1, %v1517_v4  ;;  %v1509_v0 = vld [vmem:[#allocation11 + $0x4a8] sm:$0xff] }
 0x238   :  { %7821 = vmatpush2.bf16.msra.mxu0 %v12052_v29  ;;  %v1393_v29 = vld [vmem:[#allocation11 + $0x108] sm:$0xff] }
 0x239   :  { %7862 = vmatpush2.bf16.msra.mxu1 %v12180_v32  ;;  %7822 = vmatprep.subr.bf16.mxu0 %v12045_v31  ;;  %v1397_v32 = vld [vmem:[#allocation11 + $0x128] sm:$0xff] }
 0x23a   :  { %7863 = vmatprep.subr.bf16.mxu1 %v12173_v45  ;;  %v1521_v45 = vld [vmem:[#allocation11 + $0x508] sm:$0xff] }
 0x23b   :  { %v11375_v36 = vcombine.high %v1521_v45, %v1525_v35 }
 0x23c   :  { %7823 = vmatpush2.bf16.msra.mxu0 %v12044_v26 }
 0x23d   :  { %7864 = vmatpush2.bf16.msra.mxu1 %v12172_v43  ;;  %7874 = vmatprep.subr.bf16.mxu0 %v11271_v33  ;;  %v11247_v43 = vcombine.high %v1393_v29, %v1397_v32 }
 0x23e   :  { %7915 = vmatprep.subr.bf16.mxu1 %v11399_v63  ;;  %v1389_v63 = vld [vmem:[#allocation11 + $0xe8] sm:$0xff] }
 0x23f   :  { %7825 = vmatmul.mubr.bf16.vlgmr.msra.gmra.mxu0 %v13618_v9  ;;  %v7580_v25 = vpop.f32.mrf.mxu0  ;;  %v11239_v37 = vcombine.high %v1385_v50, %v1389_v63  ;;  %v11238_v13 = vcombine.low %v1385_v50, %v1389_v63 }
 0x240   :  { %7866 = vmatmul.mubr.bf16.vlgmr.msra.gmra.mxu1 %v13620_v10  ;;  %v7581_v58 = vadd.f32 %v7580_v25, %v2389_v34  ;;  %v7621_v27 = vpop.f32.mrf.mxu1  ;;  %7875 = vmatpush1.bf16.msra.mxu0 %v11270_v24  ;;  %v11246_v24 = vcombine.low %v1393_v29, %v1397_v32  ;;  %v11374_v34 = vcombine.low %v1521_v45, %v1525_v35  ;;  %v1489_v29 = vld [vmem:[#allocation11 + $0x408] sm:$0xff] }
 0x241   :  { %7906 = vmatprep.mubr.bf16.mxu0 %v13505_v38  ;;  %7916 = vmatpush1.bf16.msra.mxu1 %v11398_v28  ;;  %v7582_v56 = vpop.f32.mrf.mxu0  ;;  %v1377_v28 = vld [vmem:[#allocation11 + $0x88] sm:$0xff]  ;;  %v11366_v25 = vcombine.low %v1513_v1, %v1517_v4 }
 0x242   :  { %v13626_v59 = vadd.f32 %v7621_v27, %v7581_v58  ;;  %7947 = vmatprep.mubr.bf16.mxu1 %v13514_v53  ;;  %v7583_v60 = vadd.f32 %v7582_v56, %v2393_v3  ;;  %v7623_v41 = vpop.f32.mrf.mxu1  ;;  %7876 = vmatprep.subr.bf16.mxu0 %v11263_v11  ;;  %v1381_v3 = vld [vmem:[#allocation11 + $0xa8] sm:$0xff] }
 0x243   :  { %7917 = vmatprep.subr.bf16.mxu1 %v11391_v14  ;;  %v7584_v31 = vpop.f32.mrf.mxu0  ;;  %v1505_v11 = vld [vmem:[#allocation11 + $0x488] sm:$0xff]  ;;  %v11231_v14 = vcombine.high %v1377_v28, %v1381_v3  ;;  %v11230_v56 = vcombine.low %v1377_v28, %v1381_v3 }
 0x244   :  { %v13629_v48 = vadd.f32 %v7623_v41, %v7583_v60  ;;  %v7625_v42 = vpop.f32.mrf.mxu1  ;;  %7877 = vmatpush1.bf16.msra.mxu0 %v11262_v2  ;;  %v11359_v16 = vcombine.high %v1505_v11, %v1509_v0  ;;  %v1373_v58 = vld [vmem:[#allocation11 + $0x68] sm:$0xff] }
 0x245   :  { %7918 = vmatpush1.bf16.msra.mxu1 %v11390_v17  ;;  %v7585_v26 = vpop.f32.mrf.mxu0  ;;  %7878 = vmatprep.subr.bf16.mxu0 %v11255_v30  ;;  %v1497_v27 = vld [vmem:[#allocation11 + $0x448] sm:$0xff]  ;;  %v11358_v17 = vcombine.low %v1505_v11, %v1509_v0  ;;  %v11223_v30 = vcombine.high %v1369_v20, %v1373_v58  ;;  %v11222_v31 = vcombine.low %v1369_v20, %v1373_v58 }
 0x246   :  { %v7626_v33 = vpop.f32.mrf.mxu1  ;;  %7919 = vmatprep.subr.bf16.mxu1 %v11383_v6  ;;  %v1501_v2 = vld [vmem:[#allocation11 + $0x468] sm:$0xff] }
 0x247   :  { %v11351_v60 = vcombine.high %v1497_v27, %v1501_v2  ;;  %v1361_v41 = vld [vmem:[#allocation11 + $0x8] sm:$0xff]  ;;  %v11350_v45 = vcombine.low %v1497_v27, %v1501_v2 }
 0x248   :  { %7879 = vmatpush1.bf16.msra.mxu0 %v11254_v54  ;;  %v1365_v6 = vld [vmem:[#allocation11 + $0x28] sm:$0xff] }
 0x249   :  { %7920 = vmatpush1.bf16.msra.mxu1 %v11382_v23  ;;  %7880 = vmatprep.subr.bf16.mxu0 %v11247_v43  ;;  %v1493_v32 = vld [vmem:[#allocation11 + $0x428] sm:$0xff]  ;;  %v11215_v35 = vcombine.high %v1361_v41, %v1365_v6  ;;  %v11214_v33 = vcombine.low %v1361_v41, %v1365_v6 }
 0x24a   :  { %7921 = vmatprep.subr.bf16.mxu1 %v11375_v36  ;;  %v11343_v42 = vcombine.high %v1489_v29, %v1493_v32  ;;  %v1481_v54 = vld [vmem:[#allocation11 + $0x3c8] sm:$0xff]  ;;  %v11342_v36 = vcombine.low %v1489_v29, %v1493_v32 }
 0x24b   :  { %v1485_v26 = vld [vmem:[#allocation11 + $0x3e8] sm:$0xff] }
 0x24c   :  { %7881 = vmatpush1.bf16.msra.mxu0 %v11246_v24  ;;  %v1609_v23 = vld [vmem:[#allocation11 + $0x7c8] sm:$0xff]  ;;  %v11335_v50 = vcombine.high %v1481_v54, %v1485_v26 }
 0x24d   :  { %7922 = vmatpush1.bf16.msra.mxu1 %v11374_v34  ;;  %7882 = vmatprep.subr.bf16.mxu0 %v11239_v37  ;;  %v1613_v43 = vld [vmem:[#allocation11 + $0x7e8] sm:$0xff]  ;;  %v11334_v37 = vcombine.low %v1481_v54, %v1485_v26 }
 0x24e   :  { %7923 = vmatprep.subr.bf16.mxu1 %v11367_v7  ;;  %v11463_v63 = vcombine.high %v1609_v23, %v1613_v43  ;;  %v1473_v1 = vld [vmem:[#allocation11 + $0x388] sm:$0xff]  ;;  %v11462_v7 = vcombine.low %v1609_v23, %v1613_v43 }
 0x24f   :  { %v1477_v4 = vld [vmem:[#allocation11 + $0x3a8] sm:$0xff] }
 0x250   :  { %7883 = vmatpush1.bf16.msra.mxu0 %v11238_v13  ;;  %v1601_v24 = vld [vmem:[#allocation11 + $0x788] sm:$0xff]  ;;  %v11327_v28 = vcombine.high %v1473_v1, %v1477_v4 }
 0x251   :  { %7924 = vmatpush1.bf16.msra.mxu1 %v11366_v25  ;;  %7884 = vmatprep.subr.bf16.mxu0 %v11231_v14  ;;  %v1605_v34 = vld [vmem:[#allocation11 + $0x7a8] sm:$0xff]  ;;  %v11326_v14 = vcombine.low %v1473_v1, %v1477_v4 }
 0x252   :  { %7925 = vmatprep.subr.bf16.mxu1 %v11359_v16  ;;  %v11455_v3 = vcombine.high %v1601_v24, %v1605_v34  ;;  %v1465_v11 = vld [vmem:[#allocation11 + $0x348] sm:$0xff]  ;;  %v11454_v16 = vcombine.low %v1601_v24, %v1605_v34 }
 0x253   :  { %v1469_v0 = vld [vmem:[#allocation11 + $0x368] sm:$0xff] }
 0x254   :  { %7885 = vmatpush1.bf16.msra.mxu0 %v11230_v56  ;;  %v1593_v13 = vld [vmem:[#allocation11 + $0x748] sm:$0xff]  ;;  %v11319_v20 = vcombine.high %v1465_v11, %v1469_v0 }
 0x255   :  { %7926 = vmatpush1.bf16.msra.mxu1 %v11358_v17  ;;  %7886 = vmatprep.subr.bf16.mxu0 %v11223_v30  ;;  %v1597_v25 = vld [vmem:[#allocation11 + $0x768] sm:$0xff]  ;;  %v11318_v30 = vcombine.low %v1465_v11, %v1469_v0 }
 0x256   :  { %7927 = vmatprep.subr.bf16.mxu1 %v11351_v60  ;;  %v11447_v58 = vcombine.high %v1593_v13, %v1597_v25  ;;  %v1457_v27 = vld [vmem:[#allocation11 + $0x308] sm:$0xff]  ;;  %v11446_v60 = vcombine.low %v1593_v13, %v1597_v25 }
 0x257   :  { %v1461_v2 = vld [vmem:[#allocation11 + $0x328] sm:$0xff] }
 0x258   :  { %7887 = vmatpush1.bf16.msra.mxu0 %v11222_v31  ;;  %v1585_v56 = vld [vmem:[#allocation11 + $0x708] sm:$0xff]  ;;  %v11311_v41 = vcombine.high %v1457_v27, %v1461_v2 }
 0x259   :  { %7928 = vmatpush1.bf16.msra.mxu1 %v11350_v45  ;;  %7888 = vmatprep.subr.bf16.mxu0 %v11215_v35  ;;  %v1589_v17 = vld [vmem:[#allocation11 + $0x728] sm:$0xff]  ;;  %v11310_v35 = vcombine.low %v1457_v27, %v1461_v2 }
 0x25a   :  { %7929 = vmatprep.subr.bf16.mxu1 %v11343_v42  ;;  %v11439_v6 = vcombine.high %v1585_v56, %v1589_v17  ;;  %v1449_v29 = vld [vmem:[#allocation11 + $0x2c8] sm:$0xff]  ;;  %v11438_v42 = vcombine.low %v1585_v56, %v1589_v17 }
 0x25b   :  { %v1453_v32 = vld [vmem:[#allocation11 + $0x2e8] sm:$0xff] }
 0x25c   :  { %7889 = vmatpush1.bf16.msra.mxu0 %v11214_v33  ;;  %v1577_v31 = vld [vmem:[#allocation11 + $0x6c8] sm:$0xff]  ;;  %v11303_v54 = vcombine.high %v1449_v29, %v1453_v32 }
 0x25d   :  { %7930 = vmatpush1.bf16.msra.mxu1 %v11342_v36  ;;  %7890 = vmatprep.subr.bf16.mxu0 %v11335_v50  ;;  %v1581_v45 = vld [vmem:[#allocation11 + $0x6e8] sm:$0xff]  ;;  %v11302_v50 = vcombine.low %v1449_v29, %v1453_v32 }
 0x25e   :  { %7931 = vmatprep.subr.bf16.mxu1 %v11463_v63  ;;  %v11431_v26 = vcombine.high %v1577_v31, %v1581_v45  ;;  %v1441_v23 = vld [vmem:[#allocation11 + $0x288] sm:$0xff]  ;;  %v11430_v63 = vcombine.low %v1577_v31, %v1581_v45 }
 0x25f   :  { %v1445_v43 = vld [vmem:[#allocation11 + $0x2a8] sm:$0xff] }
 0x260   :  { %7891 = vmatpush2.bf16.msra.mxu0 %v11334_v37  ;;  %v1569_v33 = vld [vmem:[#allocation11 + $0x688] sm:$0xff]  ;;  %v11295_v1 = vcombine.high %v1441_v23, %v1445_v43 }
 0x261   :  { %7932 = vmatpush2.bf16.msra.mxu1 %v11462_v7  ;;  %7892 = vmatprep.subr.bf16.mxu0 %v11327_v28  ;;  %v1573_v36 = vld [vmem:[#allocation11 + $0x6a8] sm:$0xff]  ;;  %v11294_v28 = vcombine.low %v1441_v23, %v1445_v43 }
 0x262   :  { %7933 = vmatprep.subr.bf16.mxu1 %v11455_v3  ;;  %v11423_v4 = vcombine.high %v1569_v33, %v1573_v36  ;;  %v1433_v24 = vld [vmem:[#allocation11 + $0x248] sm:$0xff]  ;;  %v11422_v3 = vcombine.low %v1569_v33, %v1573_v36 }
 0x263   :  { %v1437_v34 = vld [vmem:[#allocation11 + $0x268] sm:$0xff] }
 0x264   :  { %7893 = vmatpush2.bf16.msra.mxu0 %v11326_v14  ;;  %v1561_v37 = vld [vmem:[#allocation11 + $0x648] sm:$0xff]  ;;  %v11287_v11 = vcombine.high %v1433_v24, %v1437_v34 }
 0x265   :  { %7934 = vmatpush2.bf16.msra.mxu1 %v11454_v16  ;;  %7894 = vmatprep.subr.bf16.mxu0 %v11319_v20  ;;  %v1565_v7 = vld [vmem:[#allocation11 + $0x668] sm:$0xff]  ;;  %v11286_v20 = vcombine.low %v1433_v24, %v1437_v34 }
 0x266   :  { %7935 = vmatprep.subr.bf16.mxu1 %v11447_v58  ;;  %v11415_v0 = vcombine.high %v1561_v37, %v1565_v7  ;;  %v1425_v13 = vld [vmem:[#allocation11 + $0x208] sm:$0xff]  ;;  %v11414_v58 = vcombine.low %v1561_v37, %v1565_v7 }
 0x267   :  { %v1429_v25 = vld [vmem:[#allocation11 + $0x228] sm:$0xff] }
 0x268   :  { %7895 = vmatpush2.bf16.msra.mxu0 %v11318_v30  ;;  %v1553_v14 = vld [vmem:[#allocation11 + $0x608] sm:$0xff]  ;;  %v11279_v27 = vcombine.high %v1425_v13, %v1429_v25 }
 0x269   :  { %7936 = vmatpush2.bf16.msra.mxu1 %v11446_v60  ;;  %7896 = vmatprep.subr.bf16.mxu0 %v11311_v41  ;;  %v1557_v16 = vld [vmem:[#allocation11 + $0x628] sm:$0xff]  ;;  %v11278_v41 = vcombine.low %v1425_v13, %v1429_v25 }
 0x26a   :  { %7937 = vmatprep.subr.bf16.mxu1 %v11439_v6  ;;  %v11407_v2 = vcombine.high %v1553_v14, %v1557_v16  ;;  %v1673_v56 = vld [vmem:[#allocation11 + $0x9c8] sm:$0xff]  ;;  %v11406_v6 = vcombine.low %v1553_v14, %v1557_v16 }
 0x26b   :  { %v1677_v17 = vld [vmem:[#allocation11 + $0x9e8] sm:$0xff] }
 0x26c   :  { %7897 = vmatpush2.bf16.msra.mxu0 %v11310_v35  ;;  %v1801_v30 = vld [vmem:[#allocation11 + $0xdc8] sm:$0xff]  ;;  %v11527_v29 = vcombine.high %v1673_v56, %v1677_v17  ;;  %v11526_v35 = vcombine.low %v1673_v56, %v1677_v17 }
 0x26d   :  { %7938 = vmatpush2.bf16.msra.mxu1 %v11438_v42  ;;  %7898 = vmatprep.subr.bf16.mxu0 %v11303_v54  ;;  %v1805_v60 = vld [vmem:[#allocation11 + $0xde8] sm:$0xff] }
 0x26e   :  { %7939 = vmatprep.subr.bf16.mxu1 %v11431_v26  ;;  %v11655_v32 = vcombine.high %v1801_v30, %v1805_v60  ;;  %v1665_v31 = vld [vmem:[#allocation11 + $0x988] sm:$0xff]  ;;  %v11654_v26 = vcombine.low %v1801_v30, %v1805_v60 }
 0x26f   :  { %v1669_v45 = vld [vmem:[#allocation11 + $0x9a8] sm:$0xff] }
 0x270   :  { %7899 = vmatpush2.bf16.msra.mxu0 %v11302_v50  ;;  %v1793_v42 = vld [vmem:[#allocation11 + $0xd88] sm:$0xff]  ;;  %v11519_v23 = vcombine.high %v1665_v31, %v1669_v45  ;;  %v11518_v34 = vcombine.low %v1665_v31, %v1669_v45 }
 0x271   :  { %7940 = vmatpush2.bf16.msra.mxu1 %v11430_v63  ;;  %7900 = vmatprep.subr.bf16.mxu0 %v11295_v1  ;;  %v1797_v54 = vld [vmem:[#allocation11 + $0xda8] sm:$0xff] }
 0x272   :  { %7941 = vmatprep.subr.bf16.mxu1 %v11423_v4  ;;  %v1657_v43 = vld [vmem:[#allocation11 + $0x948] sm:$0xff]  ;;  %v11647_v50 = vcombine.high %v1793_v42, %v1797_v54  ;;  %v11646_v7 = vcombine.low %v1793_v42, %v1797_v54 }
 0x273   :  { %v1661_v33 = vld [vmem:[#allocation11 + $0x968] sm:$0xff] }
 0x274   :  { %7901 = vmatpush2.bf16.msra.mxu0 %v11294_v28  ;;  %v1785_v63 = vld [vmem:[#allocation11 + $0xd48] sm:$0xff]  ;;  %v11511_v28 = vcombine.high %v1657_v43, %v1661_v33 }
 0x275   :  { %7942 = vmatpush2.bf16.msra.mxu1 %v11422_v3  ;;  %7902 = vmatprep.subr.bf16.mxu0 %v11287_v11  ;;  %v1789_v1 = vld [vmem:[#allocation11 + $0xd68] sm:$0xff] }
 0x276   :  { %7943 = vmatprep.subr.bf16.mxu1 %v11415_v0  ;;  %v1649_v13 = vld [vmem:[#allocation11 + $0x908] sm:$0xff]  ;;  %v11638_v17 = vcombine.low %v1785_v63, %v1789_v1 }
 0x277   :  { %v1653_v25 = vld [vmem:[#allocation11 + $0x928] sm:$0xff] }
 0x278   :  { %7903 = vmatpush2.bf16.msra.mxu0 %v11286_v20  ;;  %v1777_v16 = vld [vmem:[#allocation11 + $0xd08] sm:$0xff]  ;;  %v11503_v30 = vcombine.high %v1649_v13, %v1653_v25  ;;  %v11502_v31 = vcombine.low %v1649_v13, %v1653_v25 }
 0x279   :  { %7944 = vmatpush2.bf16.msra.mxu1 %v11414_v58  ;;  %7904 = vmatprep.subr.bf16.mxu0 %v11279_v27  ;;  %v1781_v20 = vld [vmem:[#allocation11 + $0xd28] sm:$0xff] }
 0x27a   :  { %7945 = vmatprep.subr.bf16.mxu1 %v11407_v2  ;;  %v11510_v2 = vcombine.low %v1657_v43, %v1661_v33  ;;  %v11631_v60 = vcombine.high %v1777_v16, %v1781_v20  ;;  %v11630_v45 = vcombine.low %v1777_v16, %v1781_v20  ;;  %v1633_v54 = vld [vmem:[#allocation11 + $0x888] sm:$0xff] }
 0x27b   :  { %v1765_v43 = vld [vmem:[#allocation11 + $0xca8] sm:$0xff] }
 0x27c   :  { %7905 = vmatpush2.bf16.msra.mxu0 %v11278_v41  ;;  %v1641_v41 = vld [vmem:[#allocation11 + $0x8c8] sm:$0xff] }
 0x27d   :  { %7946 = vmatpush2.bf16.msra.mxu1 %v11406_v6  ;;  %7956 = vmatprep.subr.bf16.mxu0 %v11527_v29  ;;  %v1645_v6 = vld [vmem:[#allocation11 + $0x8e8] sm:$0xff] }
 0x27e   :  { %7997 = vmatprep.subr.bf16.mxu1 %v11655_v32  ;;  %v1769_v29 = vld [vmem:[#allocation11 + $0xcc8] sm:$0xff]  ;;  %v11494_v33 = vcombine.low %v1641_v41, %v1645_v6 }
 0x27f   :  { %v7662_v36 = vpop.f32.mrf.mxu0  ;;  %7907 = vmatmul.mubr.bf16.vlgmr.msra.gmra.mxu0 %v13512_v52  ;;  %v1773_v32 = vld [vmem:[#allocation11 + $0xce8] sm:$0xff] }
 0x280   :  { %v7663_v4 = vadd.f32 %v7662_v36, %v13626_v59  ;;  %v7703_v24 = vpop.f32.mrf.mxu1  ;;  %7948 = vmatmul.mubr.bf16.vlgmr.msra.gmra.mxu1 %v13517_v57  ;;  %7957 = vmatpush1.bf16.msra.mxu0 %v11526_v35  ;;  %v11639_v59 = vcombine.high %v1785_v63, %v1789_v1  ;;  %v11495_v35 = vcombine.high %v1641_v41, %v1645_v6  ;;  %v1625_v1 = vld [vmem:[#allocation11 + $0x848] sm:$0xff] }
 0x281   :  { %7988 = vmatprep.mubr.bf16.mxu0 %v13535_v5  ;;  %7998 = vmatpush1.bf16.msra.mxu1 %v11654_v26  ;;  %v7664_v37 = vpop.f32.mrf.mxu0  ;;  %v11623_v42 = vcombine.high %v1769_v29, %v1773_v32  ;;  %v1637_v26 = vld [vmem:[#allocation11 + $0x8a8] sm:$0xff]  ;;  %v11622_v36 = vcombine.low %v1769_v29, %v1773_v32 }
 0x282   :  { %v13635_v3 = vadd.f32 %v7703_v24, %v7663_v4  ;;  %8029 = vmatprep.mubr.bf16.mxu1 %v13540_v18  ;;  %v7665_v11 = vadd.f32 %v7664_v37, %v13629_v48  ;;  %v7705_v0 = vpop.f32.mrf.mxu1  ;;  %7958 = vmatprep.subr.bf16.mxu0 %v11519_v23  ;;  %v1761_v23 = vld [vmem:[#allocation11 + $0xc88] sm:$0xff]  ;;  %v11486_v37 = vcombine.low %v1633_v54, %v1637_v26 }
 0x283   :  { %v7666_v14 = vpop.f32.mrf.mxu0  ;;  %7999 = vmatprep.subr.bf16.mxu1 %v11647_v50  ;;  %v11487_v50 = vcombine.high %v1633_v54, %v1637_v26  ;;  %v11615_v63 = vcombine.high %v1761_v23, %v1765_v43  ;;  %v1629_v4 = vld [vmem:[#allocation11 + $0x868] sm:$0xff] }
 0x284   :  { %v13639_v58 = vadd.f32 %v7705_v0, %v7665_v11  ;;  %v7707_v27 = vpop.f32.mrf.mxu1  ;;  %7959 = vmatpush1.bf16.msra.mxu0 %v11518_v34  ;;  %v1753_v24 = vld [vmem:[#allocation11 + $0xc48] sm:$0xff]  ;;  %v11478_v14 = vcombine.low %v1625_v1, %v1629_v4 }
 0x285   :  { %8000 = vmatpush1.bf16.msra.mxu1 %v11646_v7  ;;  %v7667_v56 = vpop.f32.mrf.mxu0  ;;  %7960 = vmatprep.subr.bf16.mxu0 %v11511_v28  ;;  %v1757_v34 = vld [vmem:[#allocation11 + $0xc68] sm:$0xff]  ;;  %v11614_v7 = vcombine.low %v1761_v23, %v1765_v43  ;;  %v11479_v28 = vcombine.high %v1625_v1, %v1629_v4 }
 0x286   :  { %v7708_v48 = vpop.f32.mrf.mxu1  ;;  %8001 = vmatprep.subr.bf16.mxu1 %v11639_v59  ;;  %v11607_v11 = vcombine.high %v1753_v24, %v1757_v34  ;;  %v1617_v0 = vld [vmem:[#allocation11 + $0x808] sm:$0xff]  ;;  %v11606_v16 = vcombine.low %v1753_v24, %v1757_v34 }
 0x287   :  { %v1621_v59 = vld [vmem:[#allocation11 + $0x828] sm:$0xff] }
 0x288   :  { %7961 = vmatpush1.bf16.msra.mxu0 %v11510_v2  ;;  %v1745_v13 = vld [vmem:[#allocation11 + $0xc08] sm:$0xff]  ;;  %v11471_v20 = vcombine.high %v1617_v0, %v1621_v59  ;;  %v11470_v48 = vcombine.low %v1617_v0, %v1621_v59 }
 0x289   :  { %8002 = vmatpush1.bf16.msra.mxu1 %v11638_v17  ;;  %7962 = vmatprep.subr.bf16.mxu0 %v11503_v30  ;;  %v1749_v25 = vld [vmem:[#allocation11 + $0xc28] sm:$0xff] }
 0x28a   :  { %8003 = vmatprep.subr.bf16.mxu1 %v11631_v60  ;;  %v11599_v27 = vcombine.high %v1745_v13, %v1749_v25  ;;  %v1737_v2 = vld [vmem:[#allocation11 + $0xbc8] sm:$0xff]  ;;  %v11598_v60 = vcombine.low %v1745_v13, %v1749_v25 }
 0x28b   :  { %v1741_v56 = vld [vmem:[#allocation11 + $0xbe8] sm:$0xff] }
 0x28c   :  { %7963 = vmatpush1.bf16.msra.mxu0 %v11502_v31  ;;  %v1865_v17 = vld [vmem:[#allocation11 + $0xfc8] sm:$0xff]  ;;  %v11591_v41 = vcombine.high %v1737_v2, %v1741_v56 }
 0x28d   :  { %8004 = vmatpush1.bf16.msra.mxu1 %v11630_v45  ;;  %7964 = vmatprep.subr.bf16.mxu0 %v11495_v35  ;;  %v1869_v30 = vld [vmem:[#allocation11 + $0xfe8] sm:$0xff]  ;;  %v11590_v35 = vcombine.low %v1737_v2, %v1741_v56 }
 0x28e   :  { %8005 = vmatprep.subr.bf16.mxu1 %v11623_v42  ;;  %v11719_v6 = vcombine.high %v1865_v17, %v1869_v30  ;;  %v1729_v29 = vld [vmem:[#allocation11 + $0xb88] sm:$0xff]  ;;  %v11718_v42 = vcombine.low %v1865_v17, %v1869_v30 }
 0x28f   :  { %v1733_v32 = vld [vmem:[#allocation11 + $0xba8] sm:$0xff] }
 0x290   :  { %7965 = vmatpush1.bf16.msra.mxu0 %v11494_v33  ;;  %v1857_v31 = vld [vmem:[#allocation11 + $0xf88] sm:$0xff]  ;;  %v11583_v54 = vcombine.high %v1729_v29, %v1733_v32 }
 0x291   :  { %8006 = vmatpush1.bf16.msra.mxu1 %v11622_v36  ;;  %7966 = vmatprep.subr.bf16.mxu0 %v11487_v50  ;;  %v1861_v45 = vld [vmem:[#allocation11 + $0xfa8] sm:$0xff]  ;;  %v11582_v50 = vcombine.low %v1729_v29, %v1733_v32 }
 0x292   :  { %8007 = vmatprep.subr.bf16.mxu1 %v11615_v63  ;;  %v11711_v26 = vcombine.high %v1857_v31, %v1861_v45  ;;  %v1721_v23 = vld [vmem:[#allocation11 + $0xb48] sm:$0xff]  ;;  %v11710_v63 = vcombine.low %v1857_v31, %v1861_v45 }
 0x293   :  { %v1725_v43 = vld [vmem:[#allocation11 + $0xb68] sm:$0xff] }
 0x294   :  { %7967 = vmatpush1.bf16.msra.mxu0 %v11486_v37  ;;  %v1849_v33 = vld [vmem:[#allocation11 + $0xf48] sm:$0xff]  ;;  %v11575_v1 = vcombine.high %v1721_v23, %v1725_v43 }
 0x295   :  { %8008 = vmatpush1.bf16.msra.mxu1 %v11614_v7  ;;  %7968 = vmatprep.subr.bf16.mxu0 %v11479_v28  ;;  %v1853_v36 = vld [vmem:[#allocation11 + $0xf68] sm:$0xff]  ;;  %v11574_v28 = vcombine.low %v1721_v23, %v1725_v43 }
 0x296   :  { %8009 = vmatprep.subr.bf16.mxu1 %v11607_v11  ;;  %v11703_v4 = vcombine.high %v1849_v33, %v1853_v36  ;;  %v1713_v24 = vld [vmem:[#allocation11 + $0xb08] sm:$0xff]  ;;  %v11702_v11 = vcombine.low %v1849_v33, %v1853_v36 }
 0x297   :  { %v1717_v34 = vld [vmem:[#allocation11 + $0xb28] sm:$0xff] }
 0x298   :  { %7969 = vmatpush1.bf16.msra.mxu0 %v11478_v14  ;;  %v1841_v37 = vld [vmem:[#allocation11 + $0xf08] sm:$0xff]  ;;  %v11567_v0 = vcombine.high %v1713_v24, %v1717_v34 }
 0x299   :  { %8010 = vmatpush1.bf16.msra.mxu1 %v11606_v16  ;;  %7970 = vmatprep.subr.bf16.mxu0 %v11471_v20  ;;  %v1845_v7 = vld [vmem:[#allocation11 + $0xf28] sm:$0xff]  ;;  %v11566_v20 = vcombine.low %v1713_v24, %v1717_v34 }
 0x29a   :  { %8011 = vmatprep.subr.bf16.mxu1 %v11599_v27  ;;  %v11695_v59 = vcombine.high %v1841_v37, %v1845_v7  ;;  %v1705_v13 = vld [vmem:[#allocation11 + $0xac8] sm:$0xff]  ;;  %v11694_v27 = vcombine.low %v1841_v37, %v1845_v7 }
 0x29b   :  { %v1709_v25 = vld [vmem:[#allocation11 + $0xae8] sm:$0xff] }
 0x29c   :  { %7971 = vmatpush1.bf16.msra.mxu0 %v11470_v48  ;;  %v1833_v14 = vld [vmem:[#allocation11 + $0xec8] sm:$0xff]  ;;  %v11559_v2 = vcombine.high %v1705_v13, %v1709_v25 }
 0x29d   :  { %8012 = vmatpush1.bf16.msra.mxu1 %v11598_v60  ;;  %7972 = vmatprep.subr.bf16.mxu0 %v11591_v41  ;;  %v1837_v16 = vld [vmem:[#allocation11 + $0xee8] sm:$0xff]  ;;  %v11558_v41 = vcombine.low %v1705_v13, %v1709_v25 }
 0x29e   :  { %8013 = vmatprep.subr.bf16.mxu1 %v11719_v6  ;;  %v11687_v56 = vcombine.high %v1833_v14, %v1837_v16  ;;  %v1697_v17 = vld [vmem:[#allocation11 + $0xa88] sm:$0xff]  ;;  %v11686_v6 = vcombine.low %v1833_v14, %v1837_v16 }
 0x29f   :  { %v1701_v30 = vld [vmem:[#allocation11 + $0xaa8] sm:$0xff] }
 0x2a0   :  { %7973 = vmatpush2.bf16.msra.mxu0 %v11590_v35  ;;  %v1825_v48 = vld [vmem:[#allocation11 + $0xe88] sm:$0xff]  ;;  %v11551_v29 = vcombine.high %v1697_v17, %v1701_v30 }
 0x2a1   :  { %8014 = vmatpush2.bf16.msra.mxu1 %v11718_v42  ;;  %7974 = vmatprep.subr.bf16.mxu0 %v11583_v54  ;;  %v1829_v60 = vld [vmem:[#allocation11 + $0xea8] sm:$0xff]  ;;  %v11550_v54 = vcombine.low %v1697_v17, %v1701_v30 }
 0x2a2   :  { %8015 = vmatprep.subr.bf16.mxu1 %v11711_v26  ;;  %v11679_v32 = vcombine.high %v1825_v48, %v1829_v60  ;;  %v1689_v31 = vld [vmem:[#allocation11 + $0xa48] sm:$0xff]  ;;  %v11678_v26 = vcombine.low %v1825_v48, %v1829_v60 }
 0x2a3   :  { %v1693_v45 = vld [vmem:[#allocation11 + $0xa68] sm:$0xff] }
 0x2a4   :  { %7975 = vmatpush2.bf16.msra.mxu0 %v11582_v50  ;;  %v1817_v35 = vld [vmem:[#allocation11 + $0xe48] sm:$0xff]  ;;  %v11543_v23 = vcombine.high %v1689_v31, %v1693_v45 }
 0x2a5   :  { %8016 = vmatpush2.bf16.msra.mxu1 %v11710_v63  ;;  %7976 = vmatprep.subr.bf16.mxu0 %v11575_v1  ;;  %v1821_v42 = vld [vmem:[#allocation11 + $0xe68] sm:$0xff]  ;;  %v11542_v1 = vcombine.low %v1689_v31, %v1693_v45 }
 0x2a6   :  { %8017 = vmatprep.subr.bf16.mxu1 %v11703_v4  ;;  %v11671_v43 = vcombine.high %v1817_v35, %v1821_v42  ;;  %v1681_v33 = vld [vmem:[#allocation11 + $0xa08] sm:$0xff]  ;;  %v11670_v4 = vcombine.low %v1817_v35, %v1821_v42 }
 0x2a7   :  { %v1685_v36 = vld [vmem:[#allocation11 + $0xa28] sm:$0xff] }
 0x2a8   :  { %7977 = vmatpush2.bf16.msra.mxu0 %v11574_v28  ;;  %v1809_v50 = vld [vmem:[#allocation11 + $0xe08] sm:$0xff]  ;;  %v11535_v24 = vcombine.high %v1681_v33, %v1685_v36 }
 0x2a9   :  { %8018 = vmatpush2.bf16.msra.mxu1 %v11702_v11  ;;  %7978 = vmatprep.subr.bf16.mxu0 %v11567_v0  ;;  %v1813_v63 = vld [vmem:[#allocation11 + $0xe28] sm:$0xff]  ;;  %v11534_v0 = vcombine.low %v1681_v33, %v1685_v36 }
 0x2aa   :  { %8019 = vmatprep.subr.bf16.mxu1 %v11695_v59  ;;  %v11663_v34 = vcombine.high %v1809_v50, %v1813_v63  ;;  %v1929_v37 = vld [vmem:[#allocation11 + $0x11c8] sm:$0xff]  ;;  %v11662_v59 = vcombine.low %v1809_v50, %v1813_v63 }
 0x2ab   :  { %v1933_v7 = vld [vmem:[#allocation11 + $0x11e8] sm:$0xff] }
 0x2ac   :  { %7979 = vmatpush2.bf16.msra.mxu0 %v11566_v20  ;;  %v2057_v28 = vld [vmem:[#allocation11 + $0x15c8] sm:$0xff]  ;;  %v11783_v13 = vcombine.high %v1929_v37, %v1933_v7  ;;  %v11782_v20 = vcombine.low %v1929_v37, %v1933_v7 }
 0x2ad   :  { %8020 = vmatpush2.bf16.msra.mxu1 %v11694_v27  ;;  %7980 = vmatprep.subr.bf16.mxu0 %v11559_v2  ;;  %v2061_v11 = vld [vmem:[#allocation11 + $0x15e8] sm:$0xff] }
 0x2ae   :  { %8021 = vmatprep.subr.bf16.mxu1 %v11687_v56  ;;  %v11911_v25 = vcombine.high %v2057_v28, %v2061_v11  ;;  %v1921_v14 = vld [vmem:[#allocation11 + $0x1188] sm:$0xff]  ;;  %v11910_v56 = vcombine.low %v2057_v28, %v2061_v11 }
 0x2af   :  { %v1925_v16 = vld [vmem:[#allocation11 + $0x11a8] sm:$0xff] }
 0x2b0   :  { %7981 = vmatpush2.bf16.msra.mxu0 %v11558_v41  ;;  %v2049_v27 = vld [vmem:[#allocation11 + $0x1588] sm:$0xff]  ;;  %v11775_v17 = vcombine.high %v1921_v14, %v1925_v16  ;;  %v11774_v45 = vcombine.low %v1921_v14, %v1925_v16 }
 0x2b1   :  { %8022 = vmatpush2.bf16.msra.mxu1 %v11686_v6  ;;  %7982 = vmatprep.subr.bf16.mxu0 %v11551_v29  ;;  %v2053_v2 = vld [vmem:[#allocation11 + $0x15a8] sm:$0xff] }
 0x2b2   :  { %8023 = vmatprep.subr.bf16.mxu1 %v11679_v32  ;;  %v1913_v30 = vld [vmem:[#allocation11 + $0x1148] sm:$0xff]  ;;  %v11903_v41 = vcombine.high %v2049_v27, %v2053_v2  ;;  %v11902_v42 = vcombine.low %v2049_v27, %v2053_v2 }
 0x2b3   :  { %v1917_v48 = vld [vmem:[#allocation11 + $0x1168] sm:$0xff] }
 0x2b4   :  { %7983 = vmatpush2.bf16.msra.mxu0 %v11550_v54  ;;  %v2041_v6 = vld [vmem:[#allocation11 + $0x1548] sm:$0xff]  ;;  %v11767_v54 = vcombine.high %v1913_v30, %v1917_v48 }
 0x2b5   :  { %8024 = vmatpush2.bf16.msra.mxu1 %v11678_v26  ;;  %7984 = vmatprep.subr.bf16.mxu0 %v11543_v23  ;;  %v2045_v29 = vld [vmem:[#allocation11 + $0x1568] sm:$0xff] }
 0x2b6   :  { %8025 = vmatprep.subr.bf16.mxu1 %v11671_v43  ;;  %v1905_v33 = vld [vmem:[#allocation11 + $0x1108] sm:$0xff]  ;;  %v11894_v7 = vcombine.low %v2041_v6, %v2045_v29 }
 0x2b7   :  { %v1909_v36 = vld [vmem:[#allocation11 + $0x1128] sm:$0xff] }
 0x2b8   :  { %7985 = vmatpush2.bf16.msra.mxu0 %v11542_v1  ;;  %v2033_v63 = vld [vmem:[#allocation11 + $0x1508] sm:$0xff]  ;;  %v11759_v28 = vcombine.high %v1905_v33, %v1909_v36  ;;  %v11758_v14 = vcombine.low %v1905_v33, %v1909_v36 }
 0x2b9   :  { %8026 = vmatpush2.bf16.msra.mxu1 %v11670_v4  ;;  %7986 = vmatprep.subr.bf16.mxu0 %v11535_v24  ;;  %v2037_v1 = vld [vmem:[#allocation11 + $0x1528] sm:$0xff] }
 0x2ba   :  { %8027 = vmatprep.subr.bf16.mxu1 %v11663_v34  ;;  %v11766_v34 = vcombine.low %v1913_v30, %v1917_v48  ;;  %v11887_v11 = vcombine.high %v2033_v63, %v2037_v1  ;;  %v11886_v16 = vcombine.low %v2033_v63, %v2037_v1  ;;  %v1889_v2 = vld [vmem:[#allocation11 + $0x1088] sm:$0xff] }
 0x2bb   :  { %v2021_v30 = vld [vmem:[#allocation11 + $0x14a8] sm:$0xff] }
 0x2bc   :  { %7987 = vmatpush2.bf16.msra.mxu0 %v11534_v0  ;;  %v1897_v0 = vld [vmem:[#allocation11 + $0x10c8] sm:$0xff] }
 0x2bd   :  { %8028 = vmatpush2.bf16.msra.mxu1 %v11662_v59  ;;  %8038 = vmatprep.subr.bf16.mxu0 %v11783_v13  ;;  %v1901_v59 = vld [vmem:[#allocation11 + $0x10e8] sm:$0xff] }
 0x2be   :  { %8079 = vmatprep.subr.bf16.mxu1 %v11911_v25  ;;  %v2025_v13 = vld [vmem:[#allocation11 + $0x14c8] sm:$0xff]  ;;  %v11750_v48 = vcombine.low %v1897_v0, %v1901_v59 }
 0x2bf   :  { %v7744_v60 = vpop.f32.mrf.mxu0  ;;  %7989 = vmatmul.mubr.bf16.vlgmr.msra.gmra.mxu0 %v13583_v21  ;;  %v2029_v25 = vld [vmem:[#allocation11 + $0x14e8] sm:$0xff] }
 0x2c0   :  { %v7745_v32 = vadd.f32 %v7744_v60, %v13635_v3  ;;  %v7785_v31 = vpop.f32.mrf.mxu1  ;;  %8030 = vmatmul.mubr.bf16.vlgmr.msra.gmra.mxu1 %v13585_v22  ;;  %8039 = vmatpush1.bf16.msra.mxu0 %v11782_v20  ;;  %v11895_v3 = vcombine.high %v2041_v6, %v2045_v29  ;;  %v11751_v20 = vcombine.high %v1897_v0, %v1901_v59  ;;  %v1881_v29 = vld [vmem:[#allocation11 + $0x1048] sm:$0xff] }
 0x2c1   :  { %8070 = vmatprep.mubr.bf16.mxu0 %v13587_v40  ;;  %8080 = vmatpush1.bf16.msra.mxu1 %v11910_v56  ;;  %v7746_v35 = vpop.f32.mrf.mxu0  ;;  %v11879_v27 = vcombine.high %v2025_v13, %v2029_v25  ;;  %v1893_v56 = vld [vmem:[#allocation11 + $0x10a8] sm:$0xff]  ;;  %v11878_v60 = vcombine.low %v2025_v13, %v2029_v25 }
 0x2c2   :  { %v13645_v26 = vadd.f32 %v7785_v31, %v7745_v32  ;;  %8111 = vmatprep.mubr.bf16.mxu1 %v13590_v61  ;;  %v7747_v23 = vadd.f32 %v7746_v35, %v13639_v58  ;;  %v7787_v43 = vpop.f32.mrf.mxu1  ;;  %8040 = vmatprep.subr.bf16.mxu0 %v11775_v17  ;;  %v2017_v17 = vld [vmem:[#allocation11 + $0x1488] sm:$0xff]  ;;  %v11742_v35 = vcombine.low %v1889_v2, %v1893_v56 }
 0x2c3   :  { %v7748_v50 = vpop.f32.mrf.mxu0  ;;  %8081 = vmatprep.subr.bf16.mxu1 %v11903_v41  ;;  %v11743_v41 = vcombine.high %v1889_v2, %v1893_v56  ;;  %v11871_v6 = vcombine.high %v2017_v17, %v2021_v30  ;;  %v1885_v32 = vld [vmem:[#allocation11 + $0x1068] sm:$0xff] }
 0x2c4   :  { %v13649_v4 = vadd.f32 %v7787_v43, %v7747_v23  ;;  %v7789_v24 = vpop.f32.mrf.mxu1  ;;  %8041 = vmatpush1.bf16.msra.mxu0 %v11774_v45  ;;  %v2009_v31 = vld [vmem:[#allocation11 + $0x1448] sm:$0xff]  ;;  %v11734_v50 = vcombine.low %v1881_v29, %v1885_v32 }
 0x2c5   :  { %8082 = vmatpush1.bf16.msra.mxu1 %v11902_v42  ;;  %v7749_v37 = vpop.f32.mrf.mxu0  ;;  %8042 = vmatprep.subr.bf16.mxu0 %v11767_v54  ;;  %v2013_v45 = vld [vmem:[#allocation11 + $0x1468] sm:$0xff]  ;;  %v11870_v42 = vcombine.low %v2017_v17, %v2021_v30  ;;  %v11735_v54 = vcombine.high %v1881_v29, %v1885_v32 }
 0x2c6   :  { %v7790_v58 = vpop.f32.mrf.mxu1  ;;  %8083 = vmatprep.subr.bf16.mxu1 %v11895_v3  ;;  %v11863_v23 = vcombine.high %v2009_v31, %v2013_v45  ;;  %v1873_v43 = vld [vmem:[#allocation11 + $0x1008] sm:$0xff]  ;;  %v11862_v63 = vcombine.low %v2009_v31, %v2013_v45 }
 0x2c7   :  { %v1877_v3 = vld [vmem:[#allocation11 + $0x1028] sm:$0xff] }
 0x2c8   :  { %8043 = vmatpush1.bf16.msra.mxu0 %v11766_v34  ;;  %v2001_v33 = vld [vmem:[#allocation11 + $0x1408] sm:$0xff]  ;;  %v11727_v1 = vcombine.high %v1873_v43, %v1877_v3  ;;  %v11726_v58 = vcombine.low %v1873_v43, %v1877_v3 }
 0x2c9   :  { %8084 = vmatpush1.bf16.msra.mxu1 %v11894_v7  ;;  %8044 = vmatprep.subr.bf16.mxu0 %v11759_v28  ;;  %v2005_v36 = vld [vmem:[#allocation11 + $0x1428] sm:$0xff] }
 0x2ca   :  { %8085 = vmatprep.subr.bf16.mxu1 %v11887_v11  ;;  %v11855_v24 = vcombine.high %v2001_v33, %v2005_v36  ;;  %v1993_v34 = vld [vmem:[#allocation11 + $0x13c8] sm:$0xff]  ;;  %v11854_v11 = vcombine.low %v2001_v33, %v2005_v36 }
 0x2cb   :  { %v1997_v37 = vld [vmem:[#allocation11 + $0x13e8] sm:$0xff] }
 0x2cc   :  { %8045 = vmatpush1.bf16.msra.mxu0 %v11758_v14  ;;  %v2121_v7 = vld [vmem:[#allocation11 + $0x17c8] sm:$0xff]  ;;  %v11847_v0 = vcombine.high %v1993_v34, %v1997_v37 }
 0x2cd   :  { %8086 = vmatpush1.bf16.msra.mxu1 %v11886_v16  ;;  %8046 = vmatprep.subr.bf16.mxu0 %v11751_v20  ;;  %v2125_v28 = vld [vmem:[#allocation11 + $0x17e8] sm:$0xff]  ;;  %v11846_v20 = vcombine.low %v1993_v34, %v1997_v37 }
 0x2ce   :  { %8087 = vmatprep.subr.bf16.mxu1 %v11879_v27  ;;  %v11975_v59 = vcombine.high %v2121_v7, %v2125_v28  ;;  %v1985_v13 = vld [vmem:[#allocation11 + $0x1388] sm:$0xff]  ;;  %v11974_v27 = vcombine.low %v2121_v7, %v2125_v28 }
 0x2cf   :  { %v1989_v25 = vld [vmem:[#allocation11 + $0x13a8] sm:$0xff] }
 0x2d0   :  { %8047 = vmatpush1.bf16.msra.mxu0 %v11750_v48  ;;  %v2113_v14 = vld [vmem:[#allocation11 + $0x1788] sm:$0xff]  ;;  %v11839_v2 = vcombine.high %v1985_v13, %v1989_v25 }
 0x2d1   :  { %8088 = vmatpush1.bf16.msra.mxu1 %v11878_v60  ;;  %8048 = vmatprep.subr.bf16.mxu0 %v11743_v41  ;;  %v2117_v16 = vld [vmem:[#allocation11 + $0x17a8] sm:$0xff]  ;;  %v11838_v41 = vcombine.low %v1985_v13, %v1989_v25 }
 0x2d2   :  { %8089 = vmatprep.subr.bf16.mxu1 %v11871_v6  ;;  %v11967_v56 = vcombine.high %v2113_v14, %v2117_v16  ;;  %v1977_v17 = vld [vmem:[#allocation11 + $0x1348] sm:$0xff]  ;;  %v11966_v6 = vcombine.low %v2113_v14, %v2117_v16 }
 0x2d3   :  { %v1981_v30 = vld [vmem:[#allocation11 + $0x1368] sm:$0xff] }
 0x2d4   :  { %8049 = vmatpush1.bf16.msra.mxu0 %v11742_v35  ;;  %v2105_v48 = vld [vmem:[#allocation11 + $0x1748] sm:$0xff]  ;;  %v11831_v29 = vcombine.high %v1977_v17, %v1981_v30 }
 0x2d5   :  { %8090 = vmatpush1.bf16.msra.mxu1 %v11870_v42  ;;  %8050 = vmatprep.subr.bf16.mxu0 %v11735_v54  ;;  %v2109_v60 = vld [vmem:[#allocation11 + $0x1768] sm:$0xff]  ;;  %v11830_v54 = vcombine.low %v1977_v17, %v1981_v30 }
 0x2d6   :  { %8091 = vmatprep.subr.bf16.mxu1 %v11863_v23  ;;  %v11959_v32 = vcombine.high %v2105_v48, %v2109_v60  ;;  %v1969_v31 = vld [vmem:[#allocation11 + $0x1308] sm:$0xff]  ;;  %v11958_v23 = vcombine.low %v2105_v48, %v2109_v60 }
 0x2d7   :  { %v1973_v45 = vld [vmem:[#allocation11 + $0x1328] sm:$0xff] }
 0x2d8   :  { %8051 = vmatpush1.bf16.msra.mxu0 %v11734_v50  ;;  %v2097_v35 = vld [vmem:[#allocation11 + $0x1708] sm:$0xff]  ;;  %v11823_v43 = vcombine.high %v1969_v31, %v1973_v45 }
 0x2d9   :  { %8092 = vmatpush1.bf16.msra.mxu1 %v11862_v63  ;;  %8052 = vmatprep.subr.bf16.mxu0 %v11727_v1  ;;  %v2101_v42 = vld [vmem:[#allocation11 + $0x1728] sm:$0xff]  ;;  %v11822_v1 = vcombine.low %v1969_v31, %v1973_v45 }
 0x2da   :  { %8093 = vmatprep.subr.bf16.mxu1 %v11855_v24  ;;  %v11951_v3 = vcombine.high %v2097_v35, %v2101_v42  ;;  %v1961_v33 = vld [vmem:[#allocation11 + $0x12c8] sm:$0xff]  ;;  %v11950_v24 = vcombine.low %v2097_v35, %v2101_v42 }
 0x2db   :  { %v1965_v36 = vld [vmem:[#allocation11 + $0x12e8] sm:$0xff] }
 0x2dc   :  { %8053 = vmatpush1.bf16.msra.mxu0 %v11726_v58  ;;  %v2089_v50 = vld [vmem:[#allocation11 + $0x16c8] sm:$0xff]  ;;  %v11815_v34 = vcombine.high %v1961_v33, %v1965_v36 }
 0x2dd   :  { %8094 = vmatpush1.bf16.msra.mxu1 %v11854_v11  ;;  %8054 = vmatprep.subr.bf16.mxu0 %v11847_v0  ;;  %v2093_v63 = vld [vmem:[#allocation11 + $0x16e8] sm:$0xff]  ;;  %v11814_v0 = vcombine.low %v1961_v33, %v1965_v36 }
 0x2de   :  { %8095 = vmatprep.subr.bf16.mxu1 %v11975_v59  ;;  %v11943_v37 = vcombine.high %v2089_v50, %v2093_v63  ;;  %v1953_v7 = vld [vmem:[#allocation11 + $0x1288] sm:$0xff]  ;;  %v11942_v59 = vcombine.low %v2089_v50, %v2093_v63 }
 0x2df   :  { %v1957_v28 = vld [vmem:[#allocation11 + $0x12a8] sm:$0xff] }
 0x2e0   :  { %8055 = vmatpush2.bf16.msra.mxu0 %v11846_v20  ;;  %v2081_v58 = vld [vmem:[#allocation11 + $0x1688] sm:$0xff]  ;;  %v11807_v13 = vcombine.high %v1953_v7, %v1957_v28 }
 0x2e1   :  { %8096 = vmatpush2.bf16.msra.mxu1 %v11974_v27  ;;  %8056 = vmatprep.subr.bf16.mxu0 %v11839_v2  ;;  %v2085_v11 = vld [vmem:[#allocation11 + $0x16a8] sm:$0xff]  ;;  %v11806_v2 = vcombine.low %v1953_v7, %v1957_v28 }
 0x2e2   :  { %8097 = vmatprep.subr.bf16.mxu1 %v11967_v56  ;;  %v11935_v25 = vcombine.high %v2081_v58, %v2085_v11  ;;  %v1945_v14 = vld [vmem:[#allocation11 + $0x1248] sm:$0xff]  ;;  %v11934_v56 = vcombine.low %v2081_v58, %v2085_v11 }
 0x2e3   :  { %v1949_v16 = vld [vmem:[#allocation11 + $0x1268] sm:$0xff] }
 0x2e4   :  { %8057 = vmatpush2.bf16.msra.mxu0 %v11838_v41  ;;  %v2073_v20 = vld [vmem:[#allocation11 + $0x1648] sm:$0xff]  ;;  %v11799_v17 = vcombine.high %v1945_v14, %v1949_v16 }
 0x2e5   :  { %8098 = vmatpush2.bf16.msra.mxu1 %v11966_v6  ;;  %8058 = vmatprep.subr.bf16.mxu0 %v11831_v29  ;;  %v2077_v27 = vld [vmem:[#allocation11 + $0x1668] sm:$0xff]  ;;  %v11798_v29 = vcombine.low %v1945_v14, %v1949_v16 }
 0x2e6   :  { %8099 = vmatprep.subr.bf16.mxu1 %v11959_v32  ;;  %v11927_v30 = vcombine.high %v2073_v20, %v2077_v27  ;;  %v1937_v48 = vld [vmem:[#allocation11 + $0x1208] sm:$0xff]  ;;  %v11926_v32 = vcombine.low %v2073_v20, %v2077_v27 }
 0x2e7   :  { %v1941_v60 = vld [vmem:[#allocation11 + $0x1228] sm:$0xff] }
 0x2e8   :  { %8059 = vmatpush2.bf16.msra.mxu0 %v11830_v54  ;;  %v2065_v41 = vld [vmem:[#allocation11 + $0x1608] sm:$0xff]  ;;  %v11791_v31 = vcombine.high %v1937_v48, %v1941_v60 }
 0x2e9   :  { %8100 = vmatpush2.bf16.msra.mxu1 %v11958_v23  ;;  %8060 = vmatprep.subr.bf16.mxu0 %v11823_v43  ;;  %v2069_v6 = vld [vmem:[#allocation11 + $0x1628] sm:$0xff]  ;;  %v11790_v43 = vcombine.low %v1937_v48, %v1941_v60 }
 0x2ea   :  { %8101 = vmatprep.subr.bf16.mxu1 %v11951_v3  ;;  %v11919_v45 = vcombine.high %v2065_v41, %v2069_v6  ;;  %v2185_v35 = vld [vmem:[#allocation11 + $0x19c8] sm:$0xff]  ;;  %v11918_v3 = vcombine.low %v2065_v41, %v2069_v6 }
 0x2eb   :  { %v2189_v42 = vld [vmem:[#allocation11 + $0x19e8] sm:$0xff] }
 0x2ec   :  { %8061 = vmatpush2.bf16.msra.mxu0 %v11822_v1  ;;  %v2313_v54 = vld [vmem:[#allocation11 + $0x1dc8] sm:$0xff]  ;;  %v12039_v33 = vcombine.high %v2185_v35, %v2189_v42  ;;  %v12038_v1 = vcombine.low %v2185_v35, %v2189_v42 }
 0x2ed   :  { %8102 = vmatpush2.bf16.msra.mxu1 %v11950_v24  ;;  %8062 = vmatprep.subr.bf16.mxu0 %v11815_v34  ;;  %v2317_v23 = vld [vmem:[#allocation11 + $0x1de8] sm:$0xff] }
 0x2ee   :  { %8103 = vmatprep.subr.bf16.mxu1 %v11943_v37  ;;  %v12167_v36 = vcombine.high %v2313_v54, %v2317_v23  ;;  %v2177_v50 = vld [vmem:[#allocation11 + $0x1988] sm:$0xff]  ;;  %v12166_v37 = vcombine.low %v2313_v54, %v2317_v23 }
 0x2ef   :  { %v2181_v63 = vld [vmem:[#allocation11 + $0x19a8] sm:$0xff] }
 0x2f0   :  { %8063 = vmatpush2.bf16.msra.mxu0 %v11814_v0  ;;  %v2305_v24 = vld [vmem:[#allocation11 + $0x1d88] sm:$0xff]  ;;  %v12031_v7 = vcombine.high %v2177_v50, %v2181_v63  ;;  %v12030_v16 = vcombine.low %v2177_v50, %v2181_v63 }
 0x2f1   :  { %8104 = vmatpush2.bf16.msra.mxu1 %v11942_v59  ;;  %8064 = vmatprep.subr.bf16.mxu0 %v11807_v13  ;;  %v2309_v34 = vld [vmem:[#allocation11 + $0x1da8] sm:$0xff] }
 0x2f2   :  { %8105 = vmatprep.subr.bf16.mxu1 %v11935_v25  ;;  %v2169_v28 = vld [vmem:[#allocation11 + $0x1948] sm:$0xff]  ;;  %v12159_v0 = vcombine.high %v2305_v24, %v2309_v34  ;;  %v12158_v27 = vcombine.low %v2305_v24, %v2309_v34 }
 0x2f3   :  { %v2173_v58 = vld [vmem:[#allocation11 + $0x1968] sm:$0xff] }
 0x2f4   :  { %8065 = vmatpush2.bf16.msra.mxu0 %v11806_v2  ;;  %v2297_v59 = vld [vmem:[#allocation11 + $0x1d48] sm:$0xff]  ;;  %v12023_v2 = vcombine.high %v2169_v28, %v2173_v58 }
 0x2f5   :  { %8106 = vmatpush2.bf16.msra.mxu1 %v11934_v56  ;;  %8066 = vmatprep.subr.bf16.mxu0 %v11799_v17  ;;  %v2301_v13 = vld [vmem:[#allocation11 + $0x1d68] sm:$0xff] }
 0x2f6   :  { %8107 = vmatprep.subr.bf16.mxu1 %v11927_v30  ;;  %v2161_v48 = vld [vmem:[#allocation11 + $0x1908] sm:$0xff]  ;;  %v12150_v42 = vcombine.low %v2297_v59, %v2301_v13 }
 0x2f7   :  { %v2165_v60 = vld [vmem:[#allocation11 + $0x1928] sm:$0xff] }
 0x2f8   :  { %8067 = vmatpush2.bf16.msra.mxu0 %v11798_v29  ;;  %v2289_v6 = vld [vmem:[#allocation11 + $0x1d08] sm:$0xff]  ;;  %v12015_v54 = vcombine.high %v2161_v48, %v2165_v60  ;;  %v12014_v50 = vcombine.low %v2161_v48, %v2165_v60 }
 0x2f9   :  { %8108 = vmatpush2.bf16.msra.mxu1 %v11926_v32  ;;  %8068 = vmatprep.subr.bf16.mxu0 %v11791_v31  ;;  %v2293_v29 = vld [vmem:[#allocation11 + $0x1d28] sm:$0xff] }
 0x2fa   :  { %8109 = vmatprep.subr.bf16.mxu1 %v11919_v45  ;;  %v12022_v45 = vcombine.low %v2169_v28, %v2173_v58  ;;  %v12143_v23 = vcombine.high %v2289_v6, %v2293_v29  ;;  %v12142_v63 = vcombine.low %v2289_v6, %v2293_v29  ;;  %v2145_v34 = vld [vmem:[#allocation11 + $0x1888] sm:$0xff] }
 0x2fb   :  { %v2277_v28 = vld [vmem:[#allocation11 + $0x1ca8] sm:$0xff] }
 0x2fc   :  { %8069 = vmatpush2.bf16.msra.mxu0 %v11790_v43  ;;  %v2153_v43 = vld [vmem:[#allocation11 + $0x18c8] sm:$0xff] }
 0x2fd   :  { %8110 = vmatpush2.bf16.msra.mxu1 %v11918_v3  ;;  %8120 = vmatprep.subr.bf16.mxu0 %v12039_v33  ;;  %v2157_v3 = vld [vmem:[#allocation11 + $0x18e8] sm:$0xff] }
 0x2fe   :  { %8161 = vmatprep.subr.bf16.mxu1 %v12167_v36  ;;  %v2281_v33 = vld [vmem:[#allocation11 + $0x1cc8] sm:$0xff]  ;;  %v12006_v58 = vcombine.low %v2153_v43, %v2157_v3 }
 0x2ff   :  { %v7826_v11 = vpop.f32.mrf.mxu0  ;;  %8071 = vmatmul.mubr.bf16.vlgmr.msra.gmra.mxu0 %v13603_v55  ;;  %v2285_v36 = vld [vmem:[#allocation11 + $0x1ce8] sm:$0xff] }
 0x300   :  { %v7827_v25 = vadd.f32 %v7826_v11, %v13645_v26  ;;  %v7867_v14 = vpop.f32.mrf.mxu1  ;;  %8112 = vmatmul.mubr.bf16.vlgmr.msra.gmra.mxu1 %v13605_v62  ;;  %8121 = vmatpush1.bf16.msra.mxu0 %v12038_v1  ;;  %v12151_v26 = vcombine.high %v2297_v59, %v2301_v13  ;;  %v12007_v1 = vcombine.high %v2153_v43, %v2157_v3  ;;  %v2137_v13 = vld [vmem:[#allocation11 + $0x1848] sm:$0xff] }
 0x301   :  { %8152 = vmatprep.mubr.bf16.mxu0 %v13607_v39  ;;  %8162 = vmatpush1.bf16.msra.mxu1 %v12166_v37  ;;  %v7828_v20 = vpop.f32.mrf.mxu0  ;;  %v12135_v24 = vcombine.high %v2281_v33, %v2285_v36  ;;  %v2149_v37 = vld [vmem:[#allocation11 + $0x18a8] sm:$0xff]  ;;  %v12134_v11 = vcombine.low %v2281_v33, %v2285_v36 }
 0x302   :  { %v13655_v56 = vadd.f32 %v7867_v14, %v7827_v25  ;;  %8193 = vmatprep.mubr.bf16.mxu1 %v13610_v46  ;;  %v7829_v17 = vadd.f32 %v7828_v20, %v13649_v4  ;;  %v7869_v30 = vpop.f32.mrf.mxu1  ;;  %8122 = vmatprep.subr.bf16.mxu0 %v12031_v7  ;;  %v2273_v7 = vld [vmem:[#allocation11 + $0x1c88] sm:$0xff]  ;;  %v11998_v20 = vcombine.low %v2145_v34, %v2149_v37 }
 0x303   :  { %v7830_v41 = vpop.f32.mrf.mxu0  ;;  %8163 = vmatprep.subr.bf16.mxu1 %v12159_v0  ;;  %v11999_v0 = vcombine.high %v2145_v34, %v2149_v37  ;;  %v12127_v59 = vcombine.high %v2273_v7, %v2277_v28  ;;  %v2141_v25 = vld [vmem:[#allocation11 + $0x1868] sm:$0xff] }
 0x304   :  { %v13659_v32 = vadd.f32 %v7869_v30, %v7829_v17  ;;  %v7871_v31 = vpop.f32.mrf.mxu1  ;;  %8123 = vmatpush1.bf16.msra.mxu0 %v12030_v16  ;;  %v2265_v14 = vld [vmem:[#allocation11 + $0x1c48] sm:$0xff]  ;;  %v11990_v41 = vcombine.low %v2137_v13, %v2141_v25 }
 0x305   :  { %8164 = vmatpush1.bf16.msra.mxu1 %v12158_v27  ;;  %v7831_v35 = vpop.f32.mrf.mxu0  ;;  %8124 = vmatprep.subr.bf16.mxu0 %v12023_v2  ;;  %v2269_v16 = vld [vmem:[#allocation11 + $0x1c68] sm:$0xff]  ;;  %v12126_v27 = vcombine.low %v2273_v7, %v2277_v28  ;;  %v11991_v2 = vcombine.high %v2137_v13, %v2141_v25 }
 0x306   :  { %v7872_v4 = vpop.f32.mrf.mxu1  ;;  %8165 = vmatprep.subr.bf16.mxu1 %v12151_v26  ;;  %v12119_v17 = vcombine.high %v2265_v14, %v2269_v16  ;;  %v2129_v30 = vld [vmem:[#allocation11 + $0x1808] sm:$0xff]  ;;  %v12118_v6 = vcombine.low %v2265_v14, %v2269_v16 }
 0x307   :  { %v2133_v26 = vld [vmem:[#allocation11 + $0x1828] sm:$0xff] }
 0x308   :  { %8125 = vmatpush1.bf16.msra.mxu0 %v12022_v45  ;;  %v2257_v48 = vld [vmem:[#allocation11 + $0x1c08] sm:$0xff]  ;;  %v11983_v29 = vcombine.high %v2129_v30, %v2133_v26  ;;  %v11982_v4 = vcombine.low %v2129_v30, %v2133_v26 }
 0x309   :  { %8166 = vmatpush1.bf16.msra.mxu1 %v12150_v42  ;;  %8126 = vmatprep.subr.bf16.mxu0 %v12015_v54  ;;  %v2261_v60 = vld [vmem:[#allocation11 + $0x1c28] sm:$0xff] }
 0x30a   :  { %8167 = vmatprep.subr.bf16.mxu1 %v12143_v23  ;;  %v12111_v31 = vcombine.high %v2257_v48, %v2261_v60  ;;  %v2249_v45 = vld [vmem:[#allocation11 + $0x1bc8] sm:$0xff]  ;;  %v12110_v23 = vcombine.low %v2257_v48, %v2261_v60 }
 0x30b   :  { %v2253_v35 = vld [vmem:[#allocation11 + $0x1be8] sm:$0xff] }
 0x30c   :  { %8127 = vmatpush1.bf16.msra.mxu0 %v12014_v50  ;;  %v2377_v42 = vld [vmem:[#allocation11 + $0x1fc8] sm:$0xff]  ;;  %v12103_v43 = vcombine.high %v2249_v45, %v2253_v35 }
 0x30d   :  { %8168 = vmatpush1.bf16.msra.mxu1 %v12142_v63  ;;  %8128 = vmatprep.subr.bf16.mxu0 %v12007_v1  ;;  %v2381_v54 = vld [vmem:[#allocation11 + $0x1fe8] sm:$0xff]  ;;  %v12102_v1 = vcombine.low %v2249_v45, %v2253_v35 }
 0x30e   :  { %8169 = vmatprep.subr.bf16.mxu1 %v12135_v24  ;;  %v12231_v3 = vcombine.high %v2377_v42, %v2381_v54  ;;  %v2241_v33 = vld [vmem:[#allocation11 + $0x1b88] sm:$0xff]  ;;  %v12230_v24 = vcombine.low %v2377_v42, %v2381_v54 }
 0x30f   :  { %v2245_v36 = vld [vmem:[#allocation11 + $0x1ba8] sm:$0xff] }
 0x310   :  { %8129 = vmatpush1.bf16.msra.mxu0 %v12006_v58  ;;  %v2369_v50 = vld [vmem:[#allocation11 + $0x1f88] sm:$0xff]  ;;  %v12095_v34 = vcombine.high %v2241_v33, %v2245_v36 }
 0x311   :  { %8170 = vmatpush1.bf16.msra.mxu1 %v12134_v11  ;;  %8130 = vmatprep.subr.bf16.mxu0 %v11999_v0  ;;  %v2373_v63 = vld [vmem:[#allocation11 + $0x1fa8] sm:$0xff]  ;;  %v12094_v0 = vcombine.low %v2241_v33, %v2245_v36 }
 0x312   :  { %8171 = vmatprep.subr.bf16.mxu1 %v12127_v59  ;;  %v12223_v37 = vcombine.high %v2369_v50, %v2373_v63  ;;  %v2233_v7 = vld [vmem:[#allocation11 + $0x1b48] sm:$0xff]  ;;  %v12222_v59 = vcombine.low %v2369_v50, %v2373_v63 }
 0x313   :  { %v2237_v28 = vld [vmem:[#allocation11 + $0x1b68] sm:$0xff] }
 0x314   :  { %8131 = vmatpush1.bf16.msra.mxu0 %v11998_v20  ;;  %v2361_v58 = vld [vmem:[#allocation11 + $0x1f48] sm:$0xff]  ;;  %v12087_v13 = vcombine.high %v2233_v7, %v2237_v28 }
 0x315   :  { %8172 = vmatpush1.bf16.msra.mxu1 %v12126_v27  ;;  %8132 = vmatprep.subr.bf16.mxu0 %v11991_v2  ;;  %v2365_v11 = vld [vmem:[#allocation11 + $0x1f68] sm:$0xff]  ;;  %v12086_v2 = vcombine.low %v2233_v7, %v2237_v28 }
 0x316   :  { %8173 = vmatprep.subr.bf16.mxu1 %v12119_v17  ;;  %v12215_v25 = vcombine.high %v2361_v58, %v2365_v11  ;;  %v2225_v14 = vld [vmem:[#allocation11 + $0x1b08] sm:$0xff]  ;;  %v12214_v17 = vcombine.low %v2361_v58, %v2365_v11 }
 0x317   :  { %v2229_v16 = vld [vmem:[#allocation11 + $0x1b28] sm:$0xff] }
 0x318   :  { %8133 = vmatpush1.bf16.msra.mxu0 %v11990_v41  ;;  %v2353_v20 = vld [vmem:[#allocation11 + $0x1f08] sm:$0xff]  ;;  %v12079_v30 = vcombine.high %v2225_v14, %v2229_v16 }
 0x319   :  { %8174 = vmatpush1.bf16.msra.mxu1 %v12118_v6  ;;  %8134 = vmatprep.subr.bf16.mxu0 %v11983_v29  ;;  %v2357_v27 = vld [vmem:[#allocation11 + $0x1f28] sm:$0xff]  ;;  %v12078_v29 = vcombine.low %v2225_v14, %v2229_v16 }
 0x31a   :  { %8175 = vmatprep.subr.bf16.mxu1 %v12111_v31  ;;  %v12207_v26 = vcombine.high %v2353_v20, %v2357_v27  ;;  %v2217_v48 = vld [vmem:[#allocation11 + $0x1ac8] sm:$0xff]  ;;  %v12206_v31 = vcombine.low %v2353_v20, %v2357_v27  ;;  %v1418_v20 = vld [vmem:[#allocation11 + $0x1d0] sm:$0xff] }
 0x31b   :  { %v2221_v60 = vld [vmem:[#allocation11 + $0x1ae8] sm:$0xff]  ;;  %v1422_v27 = vld [vmem:[#allocation11 + $0x1f0] sm:$0xff] }
 0x31c   :  { %8135 = vmatpush1.bf16.msra.mxu0 %v11982_v4  ;;  %v2345_v41 = vld [vmem:[#allocation11 + $0x1ec8] sm:$0xff]  ;;  %v12071_v45 = vcombine.high %v2217_v48, %v2221_v60 }
 0x31d   :  { %8176 = vmatpush1.bf16.msra.mxu1 %v12110_v23  ;;  %8136 = vmatprep.subr.bf16.mxu0 %v12103_v43  ;;  %v2349_v6 = vld [vmem:[#allocation11 + $0x1ee8] sm:$0xff]  ;;  %v12070_v43 = vcombine.low %v2217_v48, %v2221_v60  ;;  %v11273_v48 = vcombine.high %v1418_v20, %v1422_v27 }
 0x31e   :  { %8177 = vmatprep.subr.bf16.mxu1 %v12231_v3  ;;  %v12199_v35 = vcombine.high %v2345_v41, %v2349_v6  ;;  %v2209_v42 = vld [vmem:[#allocation11 + $0x1a88] sm:$0xff]  ;;  %v12198_v3 = vcombine.low %v2345_v41, %v2349_v6  ;;  %v1410_v41 = vld [vmem:[#allocation11 + $0x190] sm:$0xff] }
 0x31f   :  { %v2213_v54 = vld [vmem:[#allocation11 + $0x1aa8] sm:$0xff]  ;;  %v1414_v6 = vld [vmem:[#allocation11 + $0x1b0] sm:$0xff] }
 0x320   :  { %8137 = vmatpush2.bf16.msra.mxu0 %v12102_v1  ;;  %v2337_v4 = vld [vmem:[#allocation11 + $0x1e88] sm:$0xff]  ;;  %v12063_v33 = vcombine.high %v2209_v42, %v2213_v54 }
 0x321   :  { %8178 = vmatpush2.bf16.msra.mxu1 %v12230_v24  ;;  %8138 = vmatprep.subr.bf16.mxu0 %v12095_v34  ;;  %v2341_v23 = vld [vmem:[#allocation11 + $0x1ea8] sm:$0xff]  ;;  %v12062_v34 = vcombine.low %v2209_v42, %v2213_v54  ;;  %v1542_v42 = vld [vmem:[#allocation11 + $0x5b0] sm:$0xff] }
 0x322   :  { %8179 = vmatprep.subr.bf16.mxu1 %v12223_v37  ;;  %v12191_v36 = vcombine.high %v2337_v4, %v2341_v23  ;;  %v2201_v50 = vld [vmem:[#allocation11 + $0x1a48] sm:$0xff]  ;;  %v12190_v37 = vcombine.low %v2337_v4, %v2341_v23  ;;  %v11265_v23 = vcombine.high %v1410_v41, %v1414_v6 }
 0x323   :  { %v2205_v63 = vld [vmem:[#allocation11 + $0x1a68] sm:$0xff] }
 0x324   :  { %8139 = vmatpush2.bf16.msra.mxu0 %v12094_v0  ;;  %v2329_v1 = vld [vmem:[#allocation11 + $0x1e48] sm:$0xff]  ;;  %v12055_v7 = vcombine.high %v2201_v50, %v2205_v63 }
 0x325   :  { %8180 = vmatpush2.bf16.msra.mxu1 %v12222_v59  ;;  %8140 = vmatprep.subr.bf16.mxu0 %v12087_v13  ;;  %v2333_v24 = vld [vmem:[#allocation11 + $0x1e68] sm:$0xff]  ;;  %v12054_v13 = vcombine.low %v2201_v50, %v2205_v63  ;;  %v1530_v50 = vld [vmem:[#allocation11 + $0x550] sm:$0xff] }
 0x326   :  { %8181 = vmatprep.subr.bf16.mxu1 %v12215_v25  ;;  %v12183_v28 = vcombine.high %v2329_v1, %v2333_v24  ;;  %v2193_v58 = vld [vmem:[#allocation11 + $0x1a08] sm:$0xff]  ;;  %v12182_v25 = vcombine.low %v2329_v1, %v2333_v24  ;;  %v1534_v63 = vld [vmem:[#allocation11 + $0x570] sm:$0xff] }
 0x327   :  { %v2197_v11 = vld [vmem:[#allocation11 + $0x1a28] sm:$0xff] }
 0x328   :  { %8141 = vmatpush2.bf16.msra.mxu0 %v12086_v2  ;;  %v2321_v0 = vld [vmem:[#allocation11 + $0x1e08] sm:$0xff]  ;;  %v12047_v14 = vcombine.high %v2193_v58, %v2197_v11  ;;  %v1546_v2 = vld [vmem:[#allocation11 + $0x5d0] sm:$0xff] }
 0x329   :  { %8182 = vmatpush2.bf16.msra.mxu1 %v12214_v17  ;;  %8142 = vmatprep.subr.bf16.mxu0 %v12079_v30  ;;  %v2325_v59 = vld [vmem:[#allocation11 + $0x1e28] sm:$0xff]  ;;  %v1550_v17 = vld [vmem:[#allocation11 + $0x5f0] sm:$0xff]  ;;  %v12046_v30 = vcombine.low %v2193_v58, %v2197_v11 }
 0x32a   :  { %8183 = vmatprep.subr.bf16.mxu1 %v12207_v26  ;;  %v12175_v16 = vcombine.high %v2321_v0, %v2325_v59  ;;  %v12174_v26 = vcombine.low %v2321_v0, %v2325_v59  ;;  %v11401_v60 = vcombine.high %v1546_v2, %v1550_v17  ;;  %v11400_v54 = vcombine.low %v1546_v2, %v1550_v17 }
 0x32b   :  { %v11385_v59 = vcombine.high %v1530_v50, %v1534_v63 }
 0x32c   :  { %8143 = vmatpush2.bf16.msra.mxu0 %v12078_v29  ;;  %v13005_v29 = vld [vmem:[#allocation13] sm:$0xff] }
 0x32d   :  { %8184 = vmatpush2.bf16.msra.mxu1 %v12206_v31  ;;  %8144 = vmatprep.subr.bf16.mxu0 %v12071_v45  ;;  %v2397_v31 = vrot.slane %v13005_v29, %v13479_v47  ;;  %v11272_v45 = vcombine.low %v1418_v20, %v1422_v27  ;;  %v2401_v4 = vrot.slane %v13005_v29, %v13483_v51  ;;  %v1526_v20 = vld [vmem:[#allocation11 + $0x530] sm:$0xff] }
 0x32e   :  { %8185 = vmatprep.subr.bf16.mxu1 %v12199_v35  ;;  %v1538_v35 = vld [vmem:[#allocation11 + $0x590] sm:$0xff] }
 0x32f   :  { %v1390_v29 = vld [vmem:[#allocation11 + $0xf0] sm:$0xff] }
 0x330   :  { %8145 = vmatpush2.bf16.msra.mxu0 %v12070_v43  ;;  %v1402_v43 = vld [vmem:[#allocation11 + $0x150] sm:$0xff] }
 0x331   :  { %8186 = vmatpush2.bf16.msra.mxu1 %v12198_v3  ;;  %8146 = vmatprep.subr.bf16.mxu0 %v12063_v33  ;;  %v1406_v3 = vld [vmem:[#allocation11 + $0x170] sm:$0xff] }
 0x332   :  { %8187 = vmatprep.subr.bf16.mxu1 %v12191_v36  ;;  %v11393_v36 = vcombine.high %v1538_v35, %v1542_v42  ;;  %v11256_v17 = vcombine.low %v1402_v43, %v1406_v3 }
 0x334   :  { %8147 = vmatpush2.bf16.msra.mxu0 %v12062_v34  ;;  %v11264_v34 = vcombine.low %v1410_v41, %v1414_v6  ;;  %v1386_v6 = vld [vmem:[#allocation11 + $0xd0] sm:$0xff] }
 0x335   :  { %8188 = vmatpush2.bf16.msra.mxu1 %v12190_v37  ;;  %8148 = vmatprep.subr.bf16.mxu0 %v12055_v7  ;;  %v11392_v7 = vcombine.low %v1538_v35, %v1542_v42 }
 0x336   :  { %8189 = vmatprep.subr.bf16.mxu1 %v12183_v28  ;;  %v11257_v28 = vcombine.high %v1402_v43, %v1406_v3  ;;  %v1382_v43 = vld [vmem:[#allocation11 + $0xb0] sm:$0xff] }
 0x337   :  { %v1506_v3 = vld [vmem:[#allocation11 + $0x490] sm:$0xff] }
 0x338   :  { %8149 = vmatpush2.bf16.msra.mxu0 %v12054_v13  ;;  %v1394_v13 = vld [vmem:[#allocation11 + $0x110] sm:$0xff] }
 0x339   :  { %8190 = vmatpush2.bf16.msra.mxu1 %v12182_v25  ;;  %8150 = vmatprep.subr.bf16.mxu0 %v12047_v14  ;;  %v1398_v25 = vld [vmem:[#allocation11 + $0x130] sm:$0xff] }
 0x33a   :  { %8191 = vmatprep.subr.bf16.mxu1 %v12175_v16  ;;  %v1522_v16 = vld [vmem:[#allocation11 + $0x510] sm:$0xff]  ;;  %v11248_v35 = vcombine.low %v1394_v13, %v1398_v25 }
 0x33b   :  { %v11377_v41 = vcombine.high %v1522_v16, %v1526_v20  ;;  %v11376_v42 = vcombine.low %v1522_v16, %v1526_v20  ;;  %v1494_v16 = vld [vmem:[#allocation11 + $0x430] sm:$0xff] }
 0x33c   :  { %8151 = vmatpush2.bf16.msra.mxu0 %v12046_v30 }
 0x33d   :  { %8192 = vmatpush2.bf16.msra.mxu1 %v12174_v26  ;;  %8202 = vmatprep.subr.bf16.mxu0 %v11273_v48  ;;  %v11384_v26 = vcombine.low %v1530_v50, %v1534_v63  ;;  %v11249_v48 = vcombine.high %v1394_v13, %v1398_v25  ;;  %v1362_v13 = vld [vmem:[#allocation11 + $0x10] sm:$0xff] }
 0x33e   :  { %8243 = vmatprep.subr.bf16.mxu1 %v11401_v60  ;;  %v1366_v25 = vld [vmem:[#allocation11 + $0x30] sm:$0xff] }
 0x33f   :  { %v7908_v33 = vpop.f32.mrf.mxu0  ;;  %8153 = vmatmul.mubr.bf16.vlgmr.msra.gmra.mxu0 %v13618_v9 }
 0x340   :  { %v7909_v1 = vadd.f32 %v7908_v33, %v2397_v31  ;;  %v7949_v24 = vpop.f32.mrf.mxu1  ;;  %8194 = vmatmul.mubr.bf16.vlgmr.msra.gmra.mxu1 %v13620_v10  ;;  %8203 = vmatpush1.bf16.msra.mxu0 %v11272_v45  ;;  %v1514_v31 = vld [vmem:[#allocation11 + $0x4d0] sm:$0xff] }
 0x341   :  { %8234 = vmatprep.mubr.bf16.mxu0 %v13505_v38  ;;  %8244 = vmatpush1.bf16.msra.mxu1 %v11400_v54  ;;  %v7910_v37 = vpop.f32.mrf.mxu0  ;;  %v1518_v45 = vld [vmem:[#allocation11 + $0x4f0] sm:$0xff]  ;;  %v11241_v54 = vcombine.high %v1386_v6, %v1390_v29 }
 0x342   :  { %v13666_v58 = vadd.f32 %v7949_v24, %v7909_v1  ;;  %8275 = vmatprep.mubr.bf16.mxu1 %v13514_v53  ;;  %v7911_v11 = vadd.f32 %v7910_v37, %v2401_v4  ;;  %v7951_v0 = vpop.f32.mrf.mxu1  ;;  %8204 = vmatprep.subr.bf16.mxu0 %v11265_v23  ;;  %v11369_v4 = vcombine.high %v1514_v31, %v1518_v45  ;;  %v1378_v23 = vld [vmem:[#allocation11 + $0x90] sm:$0xff] }
 0x343   :  { %v7912_v14 = vpop.f32.mrf.mxu0  ;;  %8245 = vmatprep.subr.bf16.mxu1 %v11393_v36  ;;  %v1510_v33 = vld [vmem:[#allocation11 + $0x4b0] sm:$0xff]  ;;  %v11240_v36 = vcombine.low %v1386_v6, %v1390_v29  ;;  %v11368_v50 = vcombine.low %v1514_v31, %v1518_v45  ;;  %v11233_v63 = vcombine.high %v1378_v23, %v1382_v43  ;;  %v11216_v6 = vcombine.low %v1362_v13, %v1366_v25 }
 0x344   :  { %v13669_v27 = vadd.f32 %v7951_v0, %v7911_v11  ;;  %v7953_v2 = vpop.f32.mrf.mxu1  ;;  %8205 = vmatpush1.bf16.msra.mxu0 %v11264_v34  ;;  %v11361_v1 = vcombine.high %v1506_v3, %v1510_v33  ;;  %v1370_v24 = vld [vmem:[#allocation11 + $0x50] sm:$0xff]  ;;  %v11360_v11 = vcombine.low %v1506_v3, %v1510_v33 }
 0x345   :  { %8246 = vmatpush1.bf16.msra.mxu1 %v11392_v7  ;;  %v7913_v30 = vpop.f32.mrf.mxu0  ;;  %8206 = vmatprep.subr.bf16.mxu0 %v11257_v28  ;;  %v1374_v34 = vld [vmem:[#allocation11 + $0x70] sm:$0xff]  ;;  %v11232_v28 = vcombine.low %v1378_v23, %v1382_v43 }
 0x346   :  { %v7954_v60 = vpop.f32.mrf.mxu1  ;;  %8247 = vmatprep.subr.bf16.mxu1 %v11385_v59  ;;  %v1498_v37 = vld [vmem:[#allocation11 + $0x450] sm:$0xff]  ;;  %v11225_v0 = vcombine.high %v1370_v24, %v1374_v34  ;;  %v11224_v20 = vcombine.low %v1370_v24, %v1374_v34 }
 0x347   :  { %v1502_v7 = vld [vmem:[#allocation11 + $0x470] sm:$0xff] }
 0x348   :  { %8207 = vmatpush1.bf16.msra.mxu0 %v11256_v17  ;;  %v11353_v59 = vcombine.high %v1498_v37, %v1502_v7  ;;  %v1490_v14 = vld [vmem:[#allocation11 + $0x410] sm:$0xff]  ;;  %v11352_v2 = vcombine.low %v1498_v37, %v1502_v7  ;;  %v11217_v17 = vcombine.high %v1362_v13, %v1366_v25 }
 0x349   :  { %8248 = vmatpush1.bf16.msra.mxu1 %v11384_v26  ;;  %8208 = vmatprep.subr.bf16.mxu0 %v11249_v48  ;;  %v11345_v30 = vcombine.high %v1490_v14, %v1494_v16  ;;  %v1482_v26 = vld [vmem:[#allocation11 + $0x3d0] sm:$0xff]  ;;  %v11344_v29 = vcombine.low %v1490_v14, %v1494_v16 }
 0x34a   :  { %8249 = vmatprep.subr.bf16.mxu1 %v11377_v41  ;;  %v1486_v48 = vld [vmem:[#allocation11 + $0x3f0] sm:$0xff] }
 0x34b   :  { %v1610_v60 = vld [vmem:[#allocation11 + $0x7d0] sm:$0xff]  ;;  %v11337_v31 = vcombine.high %v1482_v26, %v1486_v48  ;;  %v11336_v23 = vcombine.low %v1482_v26, %v1486_v48 }
 0x34c   :  { %8209 = vmatpush1.bf16.msra.mxu0 %v11248_v35  ;;  %v1614_v41 = vld [vmem:[#allocation11 + $0x7f0] sm:$0xff] }
 0x34d   :  { %8250 = vmatpush1.bf16.msra.mxu1 %v11376_v42  ;;  %8210 = vmatprep.subr.bf16.mxu0 %v11241_v54  ;;  %v11465_v45 = vcombine.high %v1610_v60, %v1614_v41  ;;  %v1474_v35 = vld [vmem:[#allocation11 + $0x390] sm:$0xff]  ;;  %v11464_v43 = vcombine.low %v1610_v60, %v1614_v41 }
 0x34e   :  { %8251 = vmatprep.subr.bf16.mxu1 %v11369_v4  ;;  %v1478_v42 = vld [vmem:[#allocation11 + $0x3b0] sm:$0xff] }
 0x34f   :  { %v1602_v54 = vld [vmem:[#allocation11 + $0x790] sm:$0xff]  ;;  %v11329_v3 = vcombine.high %v1474_v35, %v1478_v42  ;;  %v11328_v24 = vcombine.low %v1474_v35, %v1478_v42 }
 0x350   :  { %8211 = vmatpush1.bf16.msra.mxu0 %v11240_v36  ;;  %v1606_v4 = vld [vmem:[#allocation11 + $0x7b0] sm:$0xff] }
 0x351   :  { %8252 = vmatpush1.bf16.msra.mxu1 %v11368_v50  ;;  %8212 = vmatprep.subr.bf16.mxu0 %v11233_v63  ;;  %v11457_v33 = vcombine.high %v1602_v54, %v1606_v4  ;;  %v1466_v36 = vld [vmem:[#allocation11 + $0x350] sm:$0xff]  ;;  %v11456_v34 = vcombine.low %v1602_v54, %v1606_v4 }
 0x352   :  { %8253 = vmatprep.subr.bf16.mxu1 %v11361_v1  ;;  %v1470_v50 = vld [vmem:[#allocation11 + $0x370] sm:$0xff] }
 0x353   :  { %v1594_v63 = vld [vmem:[#allocation11 + $0x750] sm:$0xff]  ;;  %v11321_v37 = vcombine.high %v1466_v36, %v1470_v50  ;;  %v11320_v13 = vcombine.low %v1466_v36, %v1470_v50 }
 0x354   :  { %8213 = vmatpush1.bf16.msra.mxu0 %v11232_v28  ;;  %v1598_v1 = vld [vmem:[#allocation11 + $0x770] sm:$0xff] }
 0x355   :  { %8254 = vmatpush1.bf16.msra.mxu1 %v11360_v11  ;;  %8214 = vmatprep.subr.bf16.mxu0 %v11225_v0  ;;  %v11449_v7 = vcombine.high %v1594_v63, %v1598_v1  ;;  %v1458_v28 = vld [vmem:[#allocation11 + $0x310] sm:$0xff]  ;;  %v11448_v25 = vcombine.low %v1594_v63, %v1598_v1 }
 0x356   :  { %8255 = vmatprep.subr.bf16.mxu1 %v11353_v59  ;;  %v1462_v11 = vld [vmem:[#allocation11 + $0x330] sm:$0xff] }
 0x357   :  { %v1586_v0 = vld [vmem:[#allocation11 + $0x710] sm:$0xff]  ;;  %v11313_v14 = vcombine.high %v1458_v28, %v1462_v11  ;;  %v11312_v26 = vcombine.low %v1458_v28, %v1462_v11 }
 0x358   :  { %8215 = vmatpush1.bf16.msra.mxu0 %v11224_v20  ;;  %v1590_v59 = vld [vmem:[#allocation11 + $0x730] sm:$0xff] }
 0x359   :  { %8256 = vmatpush1.bf16.msra.mxu1 %v11352_v2  ;;  %8216 = vmatprep.subr.bf16.mxu0 %v11217_v17  ;;  %v11441_v16 = vcombine.high %v1586_v0, %v1590_v59  ;;  %v1450_v20 = vld [vmem:[#allocation11 + $0x2d0] sm:$0xff]  ;;  %v11440_v48 = vcombine.low %v1586_v0, %v1590_v59 }
 0x35a   :  { %8257 = vmatprep.subr.bf16.mxu1 %v11345_v30  ;;  %v1454_v2 = vld [vmem:[#allocation11 + $0x2f0] sm:$0xff] }
 0x35b   :  { %v1578_v17 = vld [vmem:[#allocation11 + $0x6d0] sm:$0xff]  ;;  %v11305_v60 = vcombine.high %v1450_v20, %v1454_v2  ;;  %v11304_v35 = vcombine.low %v1450_v20, %v1454_v2 }
 0x35c   :  { %8217 = vmatpush1.bf16.msra.mxu0 %v11216_v6  ;;  %v1582_v30 = vld [vmem:[#allocation11 + $0x6f0] sm:$0xff] }
 0x35d   :  { %8258 = vmatpush1.bf16.msra.mxu1 %v11344_v29  ;;  %8218 = vmatprep.subr.bf16.mxu0 %v11337_v31  ;;  %v11433_v41 = vcombine.high %v1578_v17, %v1582_v30  ;;  %v1442_v6 = vld [vmem:[#allocation11 + $0x290] sm:$0xff]  ;;  %v11432_v42 = vcombine.low %v1578_v17, %v1582_v30 }
 0x35e   :  { %8259 = vmatprep.subr.bf16.mxu1 %v11465_v45  ;;  %v1446_v29 = vld [vmem:[#allocation11 + $0x2b0] sm:$0xff] }
 0x35f   :  { %v1570_v31 = vld [vmem:[#allocation11 + $0x690] sm:$0xff]  ;;  %v11297_v54 = vcombine.high %v1442_v6, %v1446_v29  ;;  %v11296_v36 = vcombine.low %v1442_v6, %v1446_v29 }
 0x360   :  { %8219 = vmatpush2.bf16.msra.mxu0 %v11336_v23  ;;  %v1574_v45 = vld [vmem:[#allocation11 + $0x6b0] sm:$0xff] }
 0x361   :  { %8260 = vmatpush2.bf16.msra.mxu1 %v11464_v43  ;;  %8220 = vmatprep.subr.bf16.mxu0 %v11329_v3  ;;  %v11425_v4 = vcombine.high %v1570_v31, %v1574_v45  ;;  %v1434_v23 = vld [vmem:[#allocation11 + $0x250] sm:$0xff]  ;;  %v11424_v50 = vcombine.low %v1570_v31, %v1574_v45 }
 0x362   :  { %8261 = vmatprep.subr.bf16.mxu1 %v11457_v33  ;;  %v1438_v43 = vld [vmem:[#allocation11 + $0x270] sm:$0xff] }
 0x363   :  { %v1562_v3 = vld [vmem:[#allocation11 + $0x650] sm:$0xff]  ;;  %v11289_v63 = vcombine.high %v1434_v23, %v1438_v43  ;;  %v11288_v28 = vcombine.low %v1434_v23, %v1438_v43 }
 0x364   :  { %8221 = vmatpush2.bf16.msra.mxu0 %v11328_v24  ;;  %v1566_v33 = vld [vmem:[#allocation11 + $0x670] sm:$0xff] }
 0x365   :  { %8262 = vmatpush2.bf16.msra.mxu1 %v11456_v34  ;;  %8222 = vmatprep.subr.bf16.mxu0 %v11321_v37  ;;  %v11417_v1 = vcombine.high %v1562_v3, %v1566_v33  ;;  %v1426_v24 = vld [vmem:[#allocation11 + $0x210] sm:$0xff]  ;;  %v11416_v11 = vcombine.low %v1562_v3, %v1566_v33 }
 0x366   :  { %8263 = vmatprep.subr.bf16.mxu1 %v11449_v7  ;;  %v1430_v34 = vld [vmem:[#allocation11 + $0x230] sm:$0xff] }
 0x367   :  { %v1554_v37 = vld [vmem:[#allocation11 + $0x610] sm:$0xff]  ;;  %v11281_v0 = vcombine.high %v1426_v24, %v1430_v34  ;;  %v11280_v20 = vcombine.low %v1426_v24, %v1430_v34 }
 0x368   :  { %8223 = vmatpush2.bf16.msra.mxu0 %v11320_v13  ;;  %v1558_v7 = vld [vmem:[#allocation11 + $0x630] sm:$0xff] }
 0x369   :  { %8264 = vmatpush2.bf16.msra.mxu1 %v11448_v25  ;;  %8224 = vmatprep.subr.bf16.mxu0 %v11313_v14  ;;  %v11409_v59 = vcombine.high %v1554_v37, %v1558_v7  ;;  %v1674_v13 = vld [vmem:[#allocation11 + $0x9d0] sm:$0xff]  ;;  %v11408_v2 = vcombine.low %v1554_v37, %v1558_v7 }
 0x36a   :  { %8265 = vmatprep.subr.bf16.mxu1 %v11441_v16  ;;  %v1678_v25 = vld [vmem:[#allocation11 + $0x9f0] sm:$0xff] }
 0x36b   :  { %v1802_v14 = vld [vmem:[#allocation11 + $0xdd0] sm:$0xff]  ;;  %v11529_v17 = vcombine.high %v1674_v13, %v1678_v25 }
 0x36c   :  { %8225 = vmatpush2.bf16.msra.mxu0 %v11312_v26  ;;  %v1806_v16 = vld [vmem:[#allocation11 + $0xdf0] sm:$0xff] }
 0x36d   :  { %8266 = vmatpush2.bf16.msra.mxu1 %v11440_v48  ;;  %8226 = vmatprep.subr.bf16.mxu0 %v11305_v60  ;;  %v11657_v30 = vcombine.high %v1802_v14, %v1806_v16  ;;  %v1666_v26 = vld [vmem:[#allocation11 + $0x990] sm:$0xff]  ;;  %v11528_v60 = vcombine.low %v1674_v13, %v1678_v25  ;;  %v11656_v29 = vcombine.low %v1802_v14, %v1806_v16 }
 0x36e   :  { %8267 = vmatprep.subr.bf16.mxu1 %v11433_v41  ;;  %v1670_v48 = vld [vmem:[#allocation11 + $0x9b0] sm:$0xff] }
 0x36f   :  { %v1794_v41 = vld [vmem:[#allocation11 + $0xd90] sm:$0xff]  ;;  %v11521_v31 = vcombine.high %v1666_v26, %v1670_v48  ;;  %v11520_v33 = vcombine.low %v1666_v26, %v1670_v48 }
 0x370   :  { %8227 = vmatpush2.bf16.msra.mxu0 %v11304_v35  ;;  %v1798_v6 = vld [vmem:[#allocation11 + $0xdb0] sm:$0xff] }
 0x371   :  { %8268 = vmatpush2.bf16.msra.mxu1 %v11432_v42  ;;  %8228 = vmatprep.subr.bf16.mxu0 %v11297_v54  ;;  %v1658_v45 = vld [vmem:[#allocation11 + $0x950] sm:$0xff]  ;;  %v11649_v54 = vcombine.high %v1794_v41, %v1798_v6 }
 0x372   :  { %8269 = vmatprep.subr.bf16.mxu1 %v11425_v4  ;;  %v1662_v35 = vld [vmem:[#allocation11 + $0x970] sm:$0xff] }
 0x373   :  { %v1786_v4 = vld [vmem:[#allocation11 + $0xd50] sm:$0xff]  ;;  %v11512_v25 = vcombine.low %v1658_v45, %v1662_v35 }
 0x374   :  { %8229 = vmatpush2.bf16.msra.mxu0 %v11296_v36  ;;  %v1790_v23 = vld [vmem:[#allocation11 + $0xd70] sm:$0xff] }
 0x375   :  { %8270 = vmatpush2.bf16.msra.mxu1 %v11424_v50  ;;  %8230 = vmatprep.subr.bf16.mxu0 %v11289_v63  ;;  %v11648_v50 = vcombine.low %v1794_v41, %v1798_v6  ;;  %v11513_v63 = vcombine.high %v1658_v45, %v1662_v35  ;;  %v1650_v37 = vld [vmem:[#allocation11 + $0x910] sm:$0xff]  ;;  %v11640_v16 = vcombine.low %v1786_v4, %v1790_v23 }
 0x376   :  { %8271 = vmatprep.subr.bf16.mxu1 %v11417_v1  ;;  %v1654_v7 = vld [vmem:[#allocation11 + $0x930] sm:$0xff] }
 0x377   :  { %v1770_v26 = vld [vmem:[#allocation11 + $0xcd0] sm:$0xff] }
 0x378   :  { %8231 = vmatpush2.bf16.msra.mxu0 %v11288_v28  ;;  %v1774_v48 = vld [vmem:[#allocation11 + $0xcf0] sm:$0xff] }
 0x379   :  { %8272 = vmatpush2.bf16.msra.mxu1 %v11416_v11  ;;  %8232 = vmatprep.subr.bf16.mxu0 %v11281_v0  ;;  %v1778_v11 = vld [vmem:[#allocation11 + $0xd10] sm:$0xff] }
 0x37a   :  { %8273 = vmatprep.subr.bf16.mxu1 %v11409_v59  ;;  %v1782_v0 = vld [vmem:[#allocation11 + $0xd30] sm:$0xff] }
 0x37b   :  { %v11632_v41 = vcombine.low %v1778_v11, %v1782_v0  ;;  %v1638_v45 = vld [vmem:[#allocation11 + $0x8b0] sm:$0xff] }
 0x37c   :  { %8233 = vmatpush2.bf16.msra.mxu0 %v11280_v20  ;;  %v11505_v20 = vcombine.high %v1650_v37, %v1654_v7  ;;  %v1762_v35 = vld [vmem:[#allocation11 + $0xc90] sm:$0xff] }
 0x37d   :  { %8274 = vmatpush2.bf16.msra.mxu1 %v11408_v2  ;;  %8284 = vmatprep.subr.bf16.mxu0 %v11529_v17  ;;  %v11633_v2 = vcombine.high %v1778_v11, %v1782_v0  ;;  %v1642_v17 = vld [vmem:[#allocation11 + $0x8d0] sm:$0xff] }
 0x37e   :  { %8325 = vmatprep.subr.bf16.mxu1 %v11657_v30  ;;  %v1646_v30 = vld [vmem:[#allocation11 + $0x8f0] sm:$0xff] }
 0x37f   :  { %v7990_v42 = vpop.f32.mrf.mxu0  ;;  %8235 = vmatmul.mubr.bf16.vlgmr.msra.gmra.mxu0 %v13512_v52  ;;  %v11497_v6 = vcombine.high %v1642_v17, %v1646_v30  ;;  %v1750_v11 = vld [vmem:[#allocation11 + $0xc30] sm:$0xff] }
 0x380   :  { %v7991_v43 = vadd.f32 %v7990_v42, %v13666_v58  ;;  %v8031_v3 = vpop.f32.mrf.mxu1  ;;  %8276 = vmatmul.mubr.bf16.vlgmr.msra.gmra.mxu1 %v13517_v57  ;;  %8285 = vmatpush1.bf16.msra.mxu0 %v11528_v60  ;;  %v11641_v58 = vcombine.high %v1786_v4, %v1790_v23  ;;  %v11504_v60 = vcombine.low %v1650_v37, %v1654_v7  ;;  %v1766_v42 = vld [vmem:[#allocation11 + $0xcb0] sm:$0xff] }
 0x381   :  { %8316 = vmatprep.mubr.bf16.mxu0 %v13535_v5  ;;  %8326 = vmatpush1.bf16.msra.mxu1 %v11656_v29  ;;  %v7992_v36 = vpop.f32.mrf.mxu0  ;;  %v11625_v29 = vcombine.high %v1770_v26, %v1774_v48  ;;  %v11624_v4 = vcombine.low %v1770_v26, %v1774_v48  ;;  %v1618_v37 = vld [vmem:[#allocation11 + $0x810] sm:$0xff] }
 0x382   :  { %v13675_v1 = vadd.f32 %v8031_v3, %v7991_v43  ;;  %8357 = vmatprep.mubr.bf16.mxu1 %v13540_v18  ;;  %v7993_v24 = vadd.f32 %v7992_v36, %v13669_v27  ;;  %v8033_v34 = vpop.f32.mrf.mxu1  ;;  %8286 = vmatprep.subr.bf16.mxu0 %v11521_v31  ;;  %v1634_v31 = vld [vmem:[#allocation11 + $0x890] sm:$0xff]  ;;  %v11617_v43 = vcombine.high %v1762_v35, %v1766_v42 }
 0x383   :  { %v7994_v28 = vpop.f32.mrf.mxu0  ;;  %8327 = vmatprep.subr.bf16.mxu1 %v11649_v54  ;;  %v11496_v54 = vcombine.low %v1642_v17, %v1646_v30  ;;  %v11489_v23 = vcombine.high %v1634_v31, %v1638_v45  ;;  %v1626_v3 = vld [vmem:[#allocation11 + $0x850] sm:$0xff] }
 0x384   :  { %v13679_v59 = vadd.f32 %v8033_v34, %v7993_v24  ;;  %v8035_v13 = vpop.f32.mrf.mxu1  ;;  %8287 = vmatpush1.bf16.msra.mxu0 %v11520_v33  ;;  %v1630_v33 = vld [vmem:[#allocation11 + $0x870] sm:$0xff]  ;;  %v11616_v24 = vcombine.low %v1762_v35, %v1766_v42 }
 0x385   :  { %8328 = vmatpush1.bf16.msra.mxu1 %v11648_v50  ;;  %v7995_v14 = vpop.f32.mrf.mxu0  ;;  %8288 = vmatprep.subr.bf16.mxu0 %v11513_v63  ;;  %v1754_v36 = vld [vmem:[#allocation11 + $0xc50] sm:$0xff]  ;;  %v11488_v63 = vcombine.low %v1634_v31, %v1638_v45  ;;  %v11481_v34 = vcombine.high %v1626_v3, %v1630_v33  ;;  %v11480_v0 = vcombine.low %v1626_v3, %v1630_v33 }
 0x386   :  { %v8036_v27 = vpop.f32.mrf.mxu1  ;;  %8329 = vmatprep.subr.bf16.mxu1 %v11641_v58  ;;  %v1758_v50 = vld [vmem:[#allocation11 + $0xc70] sm:$0xff] }
 0x387   :  { %v11609_v58 = vcombine.high %v1754_v36, %v1758_v50  ;;  %v1622_v7 = vld [vmem:[#allocation11 + $0x830] sm:$0xff]  ;;  %v11608_v13 = vcombine.low %v1754_v36, %v1758_v50 }
 0x388   :  { %8289 = vmatpush1.bf16.msra.mxu0 %v11512_v25  ;;  %v1746_v28 = vld [vmem:[#allocation11 + $0xc10] sm:$0xff]  ;;  %v11473_v25 = vcombine.high %v1618_v37, %v1622_v7  ;;  %v11472_v17 = vcombine.low %v1618_v37, %v1622_v7 }
 0x389   :  { %8330 = vmatpush1.bf16.msra.mxu1 %v11640_v16  ;;  %8290 = vmatprep.subr.bf16.mxu0 %v11505_v20  ;;  %v11601_v14 = vcombine.high %v1746_v28, %v1750_v11  ;;  %v1738_v16 = vld [vmem:[#allocation11 + $0xbd0] sm:$0xff]  ;;  %v11600_v30 = vcombine.low %v1746_v28, %v1750_v11 }
 0x38a   :  { %8331 = vmatprep.subr.bf16.mxu1 %v11633_v2  ;;  %v1742_v20 = vld [vmem:[#allocation11 + $0xbf0] sm:$0xff] }
 0x38b   :  { %v1866_v27 = vld [vmem:[#allocation11 + $0xfd0] sm:$0xff]  ;;  %v11593_v26 = vcombine.high %v1738_v16, %v1742_v20  ;;  %v11592_v31 = vcombine.low %v1738_v16, %v1742_v20 }
 0x38c   :  { %8291 = vmatpush1.bf16.msra.mxu0 %v11504_v60  ;;  %v1870_v2 = vld [vmem:[#allocation11 + $0xff0] sm:$0xff] }
 0x38d   :  { %8332 = vmatpush1.bf16.msra.mxu1 %v11632_v41  ;;  %8292 = vmatprep.subr.bf16.mxu0 %v11497_v6  ;;  %v11721_v48 = vcombine.high %v1866_v27, %v1870_v2  ;;  %v1730_v60 = vld [vmem:[#allocation11 + $0xb90] sm:$0xff]  ;;  %v11720_v45 = vcombine.low %v1866_v27, %v1870_v2 }
 0x38e   :  { %8333 = vmatprep.subr.bf16.mxu1 %v11625_v29  ;;  %v1734_v41 = vld [vmem:[#allocation11 + $0xbb0] sm:$0xff] }
 0x38f   :  { %v1858_v6 = vld [vmem:[#allocation11 + $0xf90] sm:$0xff]  ;;  %v11585_v35 = vcombine.high %v1730_v60, %v1734_v41  ;;  %v11584_v3 = vcombine.low %v1730_v60, %v1734_v41 }
 0x390   :  { %8293 = vmatpush1.bf16.msra.mxu0 %v11496_v54  ;;  %v1862_v29 = vld [vmem:[#allocation11 + $0xfb0] sm:$0xff] }
 0x391   :  { %8334 = vmatpush1.bf16.msra.mxu1 %v11624_v4  ;;  %8294 = vmatprep.subr.bf16.mxu0 %v11489_v23  ;;  %v11713_v42 = vcombine.high %v1858_v6, %v1862_v29  ;;  %v1722_v54 = vld [vmem:[#allocation11 + $0xb50] sm:$0xff]  ;;  %v11712_v33 = vcombine.low %v1858_v6, %v1862_v29 }
 0x392   :  { %8335 = vmatprep.subr.bf16.mxu1 %v11617_v43  ;;  %v1726_v4 = vld [vmem:[#allocation11 + $0xb70] sm:$0xff] }
 0x393   :  { %v1850_v23 = vld [vmem:[#allocation11 + $0xf50] sm:$0xff]  ;;  %v11577_v36 = vcombine.high %v1722_v54, %v1726_v4  ;;  %v11576_v37 = vcombine.low %v1722_v54, %v1726_v4 }
 0x394   :  { %8295 = vmatpush1.bf16.msra.mxu0 %v11488_v63  ;;  %v1854_v43 = vld [vmem:[#allocation11 + $0xf70] sm:$0xff] }
 0x395   :  { %8336 = vmatpush1.bf16.msra.mxu1 %v11616_v24  ;;  %8296 = vmatprep.subr.bf16.mxu0 %v11481_v34  ;;  %v11705_v50 = vcombine.high %v1850_v23, %v1854_v43  ;;  %v1714_v63 = vld [vmem:[#allocation11 + $0xb10] sm:$0xff]  ;;  %v11704_v7 = vcombine.low %v1850_v23, %v1854_v43 }
 0x396   :  { %8337 = vmatprep.subr.bf16.mxu1 %v11609_v58  ;;  %v1718_v24 = vld [vmem:[#allocation11 + $0xb30] sm:$0xff] }
 0x397   :  { %v1842_v34 = vld [vmem:[#allocation11 + $0xf10] sm:$0xff]  ;;  %v11569_v28 = vcombine.high %v1714_v63, %v1718_v24  ;;  %v11568_v16 = vcombine.low %v1714_v63, %v1718_v24 }
 0x398   :  { %8297 = vmatpush1.bf16.msra.mxu0 %v11480_v0  ;;  %v1846_v58 = vld [vmem:[#allocation11 + $0xf30] sm:$0xff] }
 0x399   :  { %8338 = vmatpush1.bf16.msra.mxu1 %v11608_v13  ;;  %8298 = vmatprep.subr.bf16.mxu0 %v11473_v25  ;;  %v11697_v11 = vcombine.high %v1842_v34, %v1846_v58  ;;  %v1706_v0 = vld [vmem:[#allocation11 + $0xad0] sm:$0xff]  ;;  %v11696_v20 = vcombine.low %v1842_v34, %v1846_v58 }
 0x39a   :  { %8339 = vmatprep.subr.bf16.mxu1 %v11601_v14  ;;  %v1710_v13 = vld [vmem:[#allocation11 + $0xaf0] sm:$0xff] }
 0x39b   :  { %v1834_v25 = vld [vmem:[#allocation11 + $0xed0] sm:$0xff]  ;;  %v11561_v27 = vcombine.high %v1706_v0, %v1710_v13  ;;  %v11560_v60 = vcombine.low %v1706_v0, %v1710_v13 }
 0x39c   :  { %8299 = vmatpush1.bf16.msra.mxu0 %v11472_v17  ;;  %v1838_v14 = vld [vmem:[#allocation11 + $0xef0] sm:$0xff] }
 0x39d   :  { %8340 = vmatpush1.bf16.msra.mxu1 %v11600_v30  ;;  %8300 = vmatprep.subr.bf16.mxu0 %v11593_v26  ;;  %v11689_v2 = vcombine.high %v1834_v25, %v1838_v14  ;;  %v1698_v17 = vld [vmem:[#allocation11 + $0xa90] sm:$0xff]  ;;  %v11688_v41 = vcombine.low %v1834_v25, %v1838_v14 }
 0x39e   :  { %8341 = vmatprep.subr.bf16.mxu1 %v11721_v48  ;;  %v1702_v30 = vld [vmem:[#allocation11 + $0xab0] sm:$0xff] }
 0x39f   :  { %v1826_v26 = vld [vmem:[#allocation11 + $0xe90] sm:$0xff]  ;;  %v11553_v6 = vcombine.high %v1698_v17, %v1702_v30  ;;  %v11552_v54 = vcombine.low %v1698_v17, %v1702_v30 }
 0x3a0   :  { %8301 = vmatpush2.bf16.msra.mxu0 %v11592_v31  ;;  %v1830_v48 = vld [vmem:[#allocation11 + $0xeb0] sm:$0xff] }
 0x3a1   :  { %8342 = vmatpush2.bf16.msra.mxu1 %v11720_v45  ;;  %8302 = vmatprep.subr.bf16.mxu0 %v11585_v35  ;;  %v11681_v29 = vcombine.high %v1826_v26, %v1830_v48  ;;  %v1690_v31 = vld [vmem:[#allocation11 + $0xa50] sm:$0xff]  ;;  %v11680_v4 = vcombine.low %v1826_v26, %v1830_v48 }
 0x3a2   :  { %8343 = vmatprep.subr.bf16.mxu1 %v11713_v42  ;;  %v1694_v45 = vld [vmem:[#allocation11 + $0xa70] sm:$0xff] }
 0x3a3   :  { %v1818_v35 = vld [vmem:[#allocation11 + $0xe50] sm:$0xff]  ;;  %v11545_v23 = vcombine.high %v1690_v31, %v1694_v45  ;;  %v11544_v63 = vcombine.low %v1690_v31, %v1694_v45 }
 0x3a4   :  { %8303 = vmatpush2.bf16.msra.mxu0 %v11584_v3  ;;  %v1822_v42 = vld [vmem:[#allocation11 + $0xe70] sm:$0xff] }
 0x3a5   :  { %8344 = vmatpush2.bf16.msra.mxu1 %v11712_v33  ;;  %8304 = vmatprep.subr.bf16.mxu0 %v11577_v36  ;;  %v11673_v43 = vcombine.high %v1818_v35, %v1822_v42  ;;  %v1682_v3 = vld [vmem:[#allocation11 + $0xa10] sm:$0xff]  ;;  %v11672_v24 = vcombine.low %v1818_v35, %v1822_v42 }
 0x3a6   :  { %8345 = vmatprep.subr.bf16.mxu1 %v11705_v50  ;;  %v1686_v33 = vld [vmem:[#allocation11 + $0xa30] sm:$0xff] }
 0x3a7   :  { %v1810_v36 = vld [vmem:[#allocation11 + $0xe10] sm:$0xff]  ;;  %v11537_v34 = vcombine.high %v1682_v3, %v1686_v33  ;;  %v11536_v0 = vcombine.low %v1682_v3, %v1686_v33 }
 0x3a8   :  { %8305 = vmatpush2.bf16.msra.mxu0 %v11576_v37  ;;  %v1814_v50 = vld [vmem:[#allocation11 + $0xe30] sm:$0xff] }
 0x3a9   :  { %8346 = vmatpush2.bf16.msra.mxu1 %v11704_v7  ;;  %8306 = vmatprep.subr.bf16.mxu0 %v11569_v28  ;;  %v11665_v58 = vcombine.high %v1810_v36, %v1814_v50  ;;  %v1930_v37 = vld [vmem:[#allocation11 + $0x11d0] sm:$0xff]  ;;  %v11664_v13 = vcombine.low %v1810_v36, %v1814_v50 }
 0x3aa   :  { %8347 = vmatprep.subr.bf16.mxu1 %v11697_v11  ;;  %v1934_v7 = vld [vmem:[#allocation11 + $0x11f0] sm:$0xff] }
 0x3ab   :  { %v2058_v28 = vld [vmem:[#allocation11 + $0x15d0] sm:$0xff]  ;;  %v11785_v25 = vcombine.high %v1930_v37, %v1934_v7 }
 0x3ac   :  { %8307 = vmatpush2.bf16.msra.mxu0 %v11568_v16  ;;  %v2062_v11 = vld [vmem:[#allocation11 + $0x15f0] sm:$0xff] }
 0x3ad   :  { %8348 = vmatpush2.bf16.msra.mxu1 %v11696_v20  ;;  %8308 = vmatprep.subr.bf16.mxu0 %v11561_v27  ;;  %v11913_v14 = vcombine.high %v2058_v28, %v2062_v11  ;;  %v1922_v16 = vld [vmem:[#allocation11 + $0x1190] sm:$0xff]  ;;  %v11784_v27 = vcombine.low %v1930_v37, %v1934_v7  ;;  %v11912_v30 = vcombine.low %v2058_v28, %v2062_v11 }
 0x3ae   :  { %8349 = vmatprep.subr.bf16.mxu1 %v11689_v2  ;;  %v1926_v20 = vld [vmem:[#allocation11 + $0x11b0] sm:$0xff] }
 0x3af   :  { %v2050_v2 = vld [vmem:[#allocation11 + $0x1590] sm:$0xff]  ;;  %v11777_v26 = vcombine.high %v1922_v16, %v1926_v20  ;;  %v11776_v42 = vcombine.low %v1922_v16, %v1926_v20 }
 0x3b0   :  { %8309 = vmatpush2.bf16.msra.mxu0 %v11560_v60  ;;  %v2054_v17 = vld [vmem:[#allocation11 + $0x15b0] sm:$0xff] }
 0x3b1   :  { %8350 = vmatpush2.bf16.msra.mxu1 %v11688_v41  ;;  %8310 = vmatprep.subr.bf16.mxu0 %v11553_v6  ;;  %v1914_v48 = vld [vmem:[#allocation11 + $0x1150] sm:$0xff]  ;;  %v11905_v6 = vcombine.high %v2050_v2, %v2054_v17 }
 0x3b2   :  { %8351 = vmatprep.subr.bf16.mxu1 %v11681_v29  ;;  %v1918_v60 = vld [vmem:[#allocation11 + $0x1170] sm:$0xff] }
 0x3b3   :  { %v2042_v29 = vld [vmem:[#allocation11 + $0x1550] sm:$0xff]  ;;  %v11768_v7 = vcombine.low %v1914_v48, %v1918_v60 }
 0x3b4   :  { %8311 = vmatpush2.bf16.msra.mxu0 %v11552_v54  ;;  %v2046_v31 = vld [vmem:[#allocation11 + $0x1570] sm:$0xff] }
 0x3b5   :  { %8352 = vmatpush2.bf16.msra.mxu1 %v11680_v4  ;;  %8312 = vmatprep.subr.bf16.mxu0 %v11545_v23  ;;  %v11904_v4 = vcombine.low %v2050_v2, %v2054_v17  ;;  %v11769_v23 = vcombine.high %v1914_v48, %v1918_v60  ;;  %v1906_v36 = vld [vmem:[#allocation11 + $0x1110] sm:$0xff]  ;;  %v11896_v11 = vcombine.low %v2042_v29, %v2046_v31 }
 0x3b6   :  { %8353 = vmatprep.subr.bf16.mxu1 %v11673_v43  ;;  %v1910_v50 = vld [vmem:[#allocation11 + $0x1130] sm:$0xff] }
 0x3b7   :  { %v2026_v16 = vld [vmem:[#allocation11 + $0x14d0] sm:$0xff] }
 0x3b8   :  { %8313 = vmatpush2.bf16.msra.mxu0 %v11544_v63  ;;  %v2030_v20 = vld [vmem:[#allocation11 + $0x14f0] sm:$0xff] }
 0x3b9   :  { %8354 = vmatpush2.bf16.msra.mxu1 %v11672_v24  ;;  %8314 = vmatprep.subr.bf16.mxu0 %v11537_v34  ;;  %v2034_v24 = vld [vmem:[#allocation11 + $0x1510] sm:$0xff] }
 0x3ba   :  { %8355 = vmatprep.subr.bf16.mxu1 %v11665_v58  ;;  %v2038_v34 = vld [vmem:[#allocation11 + $0x1530] sm:$0xff] }
 0x3bb   :  { %v11888_v2 = vcombine.low %v2034_v24, %v2038_v34  ;;  %v1894_v48 = vld [vmem:[#allocation11 + $0x10b0] sm:$0xff] }
 0x3bc   :  { %8315 = vmatpush2.bf16.msra.mxu0 %v11536_v0  ;;  %v11761_v0 = vcombine.high %v1906_v36, %v1910_v50  ;;  %v2018_v60 = vld [vmem:[#allocation11 + $0x1490] sm:$0xff] }
 0x3bd   :  { %8356 = vmatpush2.bf16.msra.mxu1 %v11664_v13  ;;  %8366 = vmatprep.subr.bf16.mxu0 %v11785_v25  ;;  %v11889_v13 = vcombine.high %v2034_v24, %v2038_v34  ;;  %v1898_v25 = vld [vmem:[#allocation11 + $0x10d0] sm:$0xff] }
 0x3be   :  { %8407 = vmatprep.subr.bf16.mxu1 %v11913_v14  ;;  %v1902_v14 = vld [vmem:[#allocation11 + $0x10f0] sm:$0xff] }
 0x3bf   :  { %v8072_v41 = vpop.f32.mrf.mxu0  ;;  %8317 = vmatmul.mubr.bf16.vlgmr.msra.gmra.mxu0 %v13583_v21  ;;  %v11753_v17 = vcombine.high %v1898_v25, %v1902_v14  ;;  %v2006_v24 = vld [vmem:[#allocation11 + $0x1430] sm:$0xff] }
 0x3c0   :  { %v8073_v45 = vadd.f32 %v8072_v41, %v13675_v1  ;;  %v8113_v35 = vpop.f32.mrf.mxu1  ;;  %8358 = vmatmul.mubr.bf16.vlgmr.msra.gmra.mxu1 %v13585_v22  ;;  %8367 = vmatpush1.bf16.msra.mxu0 %v11784_v27  ;;  %v11897_v1 = vcombine.high %v2042_v29, %v2046_v31  ;;  %v11760_v27 = vcombine.low %v1906_v36, %v1910_v50  ;;  %v2022_v41 = vld [vmem:[#allocation11 + $0x14b0] sm:$0xff] }
 0x3c1   :  { %8398 = vmatprep.mubr.bf16.mxu0 %v13587_v40  ;;  %8408 = vmatpush1.bf16.msra.mxu1 %v11912_v30  ;;  %v8074_v54 = vpop.f32.mrf.mxu0  ;;  %v11881_v30 = vcombine.high %v2026_v16, %v2030_v20  ;;  %v11880_v29 = vcombine.low %v2026_v16, %v2030_v20  ;;  %v1874_v36 = vld [vmem:[#allocation11 + $0x1010] sm:$0xff] }
 0x3c2   :  { %v13685_v43 = vadd.f32 %v8113_v35, %v8073_v45  ;;  %8439 = vmatprep.mubr.bf16.mxu1 %v13590_v61  ;;  %v8075_v3 = vadd.f32 %v8074_v54, %v13679_v59  ;;  %v8115_v33 = vpop.f32.mrf.mxu1  ;;  %8368 = vmatprep.subr.bf16.mxu0 %v11777_v26  ;;  %v1890_v26 = vld [vmem:[#allocation11 + $0x1090] sm:$0xff]  ;;  %v11873_v45 = vcombine.high %v2018_v60, %v2022_v41 }
 0x3c3   :  { %v8076_v63 = vpop.f32.mrf.mxu0  ;;  %8409 = vmatprep.subr.bf16.mxu1 %v11905_v6  ;;  %v11752_v6 = vcombine.low %v1898_v25, %v1902_v14  ;;  %v11745_v31 = vcombine.high %v1890_v26, %v1894_v48  ;;  %v1882_v35 = vld [vmem:[#allocation11 + $0x1050] sm:$0xff] }
 0x3c4   :  { %v13689_v58 = vadd.f32 %v8115_v33, %v8075_v3  ;;  %v8117_v37 = vpop.f32.mrf.mxu1  ;;  %8369 = vmatpush1.bf16.msra.mxu0 %v11776_v42  ;;  %v1886_v42 = vld [vmem:[#allocation11 + $0x1070] sm:$0xff]  ;;  %v11872_v3 = vcombine.low %v2018_v60, %v2022_v41 }
 0x3c5   :  { %8410 = vmatpush1.bf16.msra.mxu1 %v11904_v4  ;;  %v8077_v28 = vpop.f32.mrf.mxu0  ;;  %8370 = vmatprep.subr.bf16.mxu0 %v11769_v23  ;;  %v2010_v54 = vld [vmem:[#allocation11 + $0x1450] sm:$0xff]  ;;  %v11744_v23 = vcombine.low %v1890_v26, %v1894_v48  ;;  %v11737_v33 = vcombine.high %v1882_v35, %v1886_v42  ;;  %v11736_v34 = vcombine.low %v1882_v35, %v1886_v42 }
 0x3c6   :  { %v8118_v59 = vpop.f32.mrf.mxu1  ;;  %8411 = vmatprep.subr.bf16.mxu1 %v11897_v1  ;;  %v2014_v4 = vld [vmem:[#allocation11 + $0x1470] sm:$0xff] }
 0x3c7   :  { %v11865_v1 = vcombine.high %v2010_v54, %v2014_v4  ;;  %v1878_v50 = vld [vmem:[#allocation11 + $0x1030] sm:$0xff]  ;;  %v11864_v37 = vcombine.low %v2010_v54, %v2014_v4 }
 0x3c8   :  { %8371 = vmatpush1.bf16.msra.mxu0 %v11768_v7  ;;  %v2002_v63 = vld [vmem:[#allocation11 + $0x1410] sm:$0xff]  ;;  %v11729_v7 = vcombine.high %v1874_v36, %v1878_v50  ;;  %v11728_v25 = vcombine.low %v1874_v36, %v1878_v50 }
 0x3c9   :  { %8412 = vmatpush1.bf16.msra.mxu1 %v11896_v11  ;;  %8372 = vmatprep.subr.bf16.mxu0 %v11761_v0  ;;  %v11857_v28 = vcombine.high %v2002_v63, %v2006_v24  ;;  %v1994_v11 = vld [vmem:[#allocation11 + $0x13d0] sm:$0xff]  ;;  %v11856_v14 = vcombine.low %v2002_v63, %v2006_v24 }
 0x3ca   :  { %8413 = vmatprep.subr.bf16.mxu1 %v11889_v13  ;;  %v1998_v0 = vld [vmem:[#allocation11 + $0x13f0] sm:$0xff] }
 0x3cb   :  { %v2122_v59 = vld [vmem:[#allocation11 + $0x17d0] sm:$0xff]  ;;  %v11849_v16 = vcombine.high %v1994_v11, %v1998_v0  ;;  %v11848_v26 = vcombine.low %v1994_v11, %v1998_v0 }
 0x3cc   :  { %8373 = vmatpush1.bf16.msra.mxu0 %v11760_v27  ;;  %v2126_v13 = vld [vmem:[#allocation11 + $0x17f0] sm:$0xff] }
 0x3cd   :  { %8414 = vmatpush1.bf16.msra.mxu1 %v11888_v2  ;;  %8374 = vmatprep.subr.bf16.mxu0 %v11753_v17  ;;  %v11977_v20 = vcombine.high %v2122_v59, %v2126_v13  ;;  %v1986_v27 = vld [vmem:[#allocation11 + $0x1390] sm:$0xff]  ;;  %v11976_v48 = vcombine.low %v2122_v59, %v2126_v13 }
 0x3ce   :  { %8415 = vmatprep.subr.bf16.mxu1 %v11881_v30  ;;  %v1990_v2 = vld [vmem:[#allocation11 + $0x13b0] sm:$0xff] }
 0x3cf   :  { %v2114_v17 = vld [vmem:[#allocation11 + $0x1790] sm:$0xff]  ;;  %v11841_v60 = vcombine.high %v1986_v27, %v1990_v2  ;;  %v11840_v35 = vcombine.low %v1986_v27, %v1990_v2 }
 0x3d0   :  { %8375 = vmatpush1.bf16.msra.mxu0 %v11752_v6  ;;  %v2118_v30 = vld [vmem:[#allocation11 + $0x17b0] sm:$0xff] }
 0x3d1   :  { %8416 = vmatpush1.bf16.msra.mxu1 %v11880_v29  ;;  %8376 = vmatprep.subr.bf16.mxu0 %v11745_v31  ;;  %v11969_v41 = vcombine.high %v2114_v17, %v2118_v30  ;;  %v1978_v6 = vld [vmem:[#allocation11 + $0x1350] sm:$0xff]  ;;  %v11968_v42 = vcombine.low %v2114_v17, %v2118_v30 }
 0x3d2   :  { %8417 = vmatprep.subr.bf16.mxu1 %v11873_v45  ;;  %v1982_v29 = vld [vmem:[#allocation11 + $0x1370] sm:$0xff] }
 0x3d3   :  { %v2106_v31 = vld [vmem:[#allocation11 + $0x1750] sm:$0xff]  ;;  %v11833_v54 = vcombine.high %v1978_v6, %v1982_v29  ;;  %v11832_v36 = vcombine.low %v1978_v6, %v1982_v29 }
 0x3d4   :  { %8377 = vmatpush1.bf16.msra.mxu0 %v11744_v23  ;;  %v2110_v45 = vld [vmem:[#allocation11 + $0x1770] sm:$0xff] }
 0x3d5   :  { %8418 = vmatpush1.bf16.msra.mxu1 %v11872_v3  ;;  %8378 = vmatprep.subr.bf16.mxu0 %v11737_v33  ;;  %v11961_v4 = vcombine.high %v2106_v31, %v2110_v45  ;;  %v1970_v23 = vld [vmem:[#allocation11 + $0x1310] sm:$0xff]  ;;  %v11960_v50 = vcombine.low %v2106_v31, %v2110_v45 }
 0x3d6   :  { %8419 = vmatprep.subr.bf16.mxu1 %v11865_v1  ;;  %v1974_v3 = vld [vmem:[#allocation11 + $0x1330] sm:$0xff] }
 0x3d7   :  { %v2098_v33 = vld [vmem:[#allocation11 + $0x1710] sm:$0xff]  ;;  %v11825_v63 = vcombine.high %v1970_v23, %v1974_v3  ;;  %v11824_v11 = vcombine.low %v1970_v23, %v1974_v3 }
 0x3d8   :  { %8379 = vmatpush1.bf16.msra.mxu0 %v11736_v34  ;;  %v2102_v1 = vld [vmem:[#allocation11 + $0x1730] sm:$0xff] }
 0x3d9   :  { %8420 = vmatpush1.bf16.msra.mxu1 %v11864_v37  ;;  %8380 = vmatprep.subr.bf16.mxu0 %v11729_v7  ;;  %v11953_v24 = vcombine.high %v2098_v33, %v2102_v1  ;;  %v1962_v34 = vld [vmem:[#allocation11 + $0x12d0] sm:$0xff]  ;;  %v11952_v0 = vcombine.low %v2098_v33, %v2102_v1 }
 0x3da   :  { %8421 = vmatprep.subr.bf16.mxu1 %v11857_v28  ;;  %v1966_v37 = vld [vmem:[#allocation11 + $0x12f0] sm:$0xff] }
 0x3db   :  { %v2090_v7 = vld [vmem:[#allocation11 + $0x16d0] sm:$0xff]  ;;  %v11817_v59 = vcombine.high %v1962_v34, %v1966_v37  ;;  %v11816_v27 = vcombine.low %v1962_v34, %v1966_v37 }
 0x3dc   :  { %8381 = vmatpush1.bf16.msra.mxu0 %v11728_v25  ;;  %v2094_v28 = vld [vmem:[#allocation11 + $0x16f0] sm:$0xff] }
 0x3dd   :  { %8422 = vmatpush1.bf16.msra.mxu1 %v11856_v14  ;;  %8382 = vmatprep.subr.bf16.mxu0 %v11849_v16  ;;  %v11945_v13 = vcombine.high %v2090_v7, %v2094_v28  ;;  %v1954_v25 = vld [vmem:[#allocation11 + $0x1290] sm:$0xff]  ;;  %v11944_v2 = vcombine.low %v2090_v7, %v2094_v28 }
 0x3de   :  { %8423 = vmatprep.subr.bf16.mxu1 %v11977_v20  ;;  %v1958_v14 = vld [vmem:[#allocation11 + $0x12b0] sm:$0xff] }
 0x3df   :  { %v2082_v16 = vld [vmem:[#allocation11 + $0x1690] sm:$0xff]  ;;  %v11809_v17 = vcombine.high %v1954_v25, %v1958_v14  ;;  %v11808_v6 = vcombine.low %v1954_v25, %v1958_v14 }
 0x3e0   :  { %8383 = vmatpush2.bf16.msra.mxu0 %v11848_v26  ;;  %v2086_v20 = vld [vmem:[#allocation11 + $0x16b0] sm:$0xff] }
 0x3e1   :  { %8424 = vmatpush2.bf16.msra.mxu1 %v11976_v48  ;;  %8384 = vmatprep.subr.bf16.mxu0 %v11841_v60  ;;  %v11937_v30 = vcombine.high %v2082_v16, %v2086_v20  ;;  %v1946_v26 = vld [vmem:[#allocation11 + $0x1250] sm:$0xff]  ;;  %v11936_v29 = vcombine.low %v2082_v16, %v2086_v20 }
 0x3e2   :  { %8425 = vmatprep.subr.bf16.mxu1 %v11969_v41  ;;  %v1950_v48 = vld [vmem:[#allocation11 + $0x1270] sm:$0xff] }
 0x3e3   :  { %v2074_v60 = vld [vmem:[#allocation11 + $0x1650] sm:$0xff]  ;;  %v11801_v31 = vcombine.high %v1946_v26, %v1950_v48  ;;  %v11800_v23 = vcombine.low %v1946_v26, %v1950_v48 }
 0x3e4   :  { %8385 = vmatpush2.bf16.msra.mxu0 %v11840_v35  ;;  %v2078_v41 = vld [vmem:[#allocation11 + $0x1670] sm:$0xff] }
 0x3e5   :  { %8426 = vmatpush2.bf16.msra.mxu1 %v11968_v42  ;;  %8386 = vmatprep.subr.bf16.mxu0 %v11833_v54  ;;  %v11929_v45 = vcombine.high %v2074_v60, %v2078_v41  ;;  %v1938_v35 = vld [vmem:[#allocation11 + $0x1210] sm:$0xff]  ;;  %v11928_v3 = vcombine.low %v2074_v60, %v2078_v41 }
 0x3e6   :  { %8427 = vmatprep.subr.bf16.mxu1 %v11961_v4  ;;  %v1942_v42 = vld [vmem:[#allocation11 + $0x1230] sm:$0xff] }
 0x3e7   :  { %v2066_v54 = vld [vmem:[#allocation11 + $0x1610] sm:$0xff]  ;;  %v11793_v33 = vcombine.high %v1938_v35, %v1942_v42  ;;  %v11792_v34 = vcombine.low %v1938_v35, %v1942_v42 }
 0x3e8   :  { %8387 = vmatpush2.bf16.msra.mxu0 %v11832_v36  ;;  %v2070_v4 = vld [vmem:[#allocation11 + $0x1630] sm:$0xff] }
 0x3e9   :  { %8428 = vmatpush2.bf16.msra.mxu1 %v11960_v50  ;;  %8388 = vmatprep.subr.bf16.mxu0 %v11825_v63  ;;  %v11921_v1 = vcombine.high %v2066_v54, %v2070_v4  ;;  %v2186_v36 = vld [vmem:[#allocation11 + $0x19d0] sm:$0xff]  ;;  %v11920_v37 = vcombine.low %v2066_v54, %v2070_v4 }
 0x3ea   :  { %8429 = vmatprep.subr.bf16.mxu1 %v11953_v24  ;;  %v2190_v50 = vld [vmem:[#allocation11 + $0x19f0] sm:$0xff] }
 0x3eb   :  { %v2314_v63 = vld [vmem:[#allocation11 + $0x1dd0] sm:$0xff]  ;;  %v12041_v7 = vcombine.high %v2186_v36, %v2190_v50 }
 0x3ec   :  { %8389 = vmatpush2.bf16.msra.mxu0 %v11824_v11  ;;  %v2318_v24 = vld [vmem:[#allocation11 + $0x1df0] sm:$0xff] }
 0x3ed   :  { %8430 = vmatpush2.bf16.msra.mxu1 %v11952_v0  ;;  %8390 = vmatprep.subr.bf16.mxu0 %v11817_v59  ;;  %v12169_v28 = vcombine.high %v2314_v63, %v2318_v24  ;;  %v2178_v11 = vld [vmem:[#allocation11 + $0x1990] sm:$0xff]  ;;  %v12040_v59 = vcombine.low %v2186_v36, %v2190_v50  ;;  %v12168_v14 = vcombine.low %v2314_v63, %v2318_v24 }
 0x3ee   :  { %8431 = vmatprep.subr.bf16.mxu1 %v11945_v13  ;;  %v2182_v0 = vld [vmem:[#allocation11 + $0x19b0] sm:$0xff] }
 0x3ef   :  { %v2306_v13 = vld [vmem:[#allocation11 + $0x1d90] sm:$0xff]  ;;  %v12033_v16 = vcombine.high %v2178_v11, %v2182_v0  ;;  %v12032_v41 = vcombine.low %v2178_v11, %v2182_v0 }
 0x3f0   :  { %8391 = vmatpush2.bf16.msra.mxu0 %v11816_v27  ;;  %v2310_v25 = vld [vmem:[#allocation11 + $0x1db0] sm:$0xff] }
 0x3f1   :  { %8432 = vmatpush2.bf16.msra.mxu1 %v11944_v2  ;;  %8392 = vmatprep.subr.bf16.mxu0 %v11809_v17  ;;  %v2170_v20 = vld [vmem:[#allocation11 + $0x1950] sm:$0xff]  ;;  %v12161_v17 = vcombine.high %v2306_v13, %v2310_v25 }
 0x3f2   :  { %8433 = vmatprep.subr.bf16.mxu1 %v11937_v30  ;;  %v2174_v27 = vld [vmem:[#allocation11 + $0x1970] sm:$0xff] }
 0x3f3   :  { %v2298_v30 = vld [vmem:[#allocation11 + $0x1d50] sm:$0xff]  ;;  %v12024_v50 = vcombine.low %v2170_v20, %v2174_v27 }
 0x3f4   :  { %8393 = vmatpush2.bf16.msra.mxu0 %v11808_v6  ;;  %v2302_v26 = vld [vmem:[#allocation11 + $0x1d70] sm:$0xff] }
 0x3f5   :  { %8434 = vmatpush2.bf16.msra.mxu1 %v11936_v29  ;;  %8394 = vmatprep.subr.bf16.mxu0 %v11801_v31  ;;  %v12160_v29 = vcombine.low %v2306_v13, %v2310_v25  ;;  %v12025_v31 = vcombine.high %v2170_v20, %v2174_v27  ;;  %v2162_v54 = vld [vmem:[#allocation11 + $0x1910] sm:$0xff]  ;;  %v12152_v24 = vcombine.low %v2298_v30, %v2302_v26 }
 0x3f6   :  { %8435 = vmatprep.subr.bf16.mxu1 %v11929_v45  ;;  %v2166_v4 = vld [vmem:[#allocation11 + $0x1930] sm:$0xff] }
 0x3f7   :  { %v2282_v11 = vld [vmem:[#allocation11 + $0x1cd0] sm:$0xff] }
 0x3f8   :  { %8395 = vmatpush2.bf16.msra.mxu0 %v11800_v23  ;;  %v2286_v0 = vld [vmem:[#allocation11 + $0x1cf0] sm:$0xff] }
 0x3f9   :  { %8436 = vmatpush2.bf16.msra.mxu1 %v11928_v3  ;;  %8396 = vmatprep.subr.bf16.mxu0 %v11793_v33  ;;  %v2290_v3 = vld [vmem:[#allocation11 + $0x1d10] sm:$0xff] }
 0x3fa   :  { %8437 = vmatprep.subr.bf16.mxu1 %v11921_v1  ;;  %v2294_v33 = vld [vmem:[#allocation11 + $0x1d30] sm:$0xff] }
 0x3fb   :  { %v12144_v13 = vcombine.low %v2290_v3, %v2294_v33  ;;  %v2150_v20 = vld [vmem:[#allocation11 + $0x18b0] sm:$0xff] }
 0x3fc   :  { %8397 = vmatpush2.bf16.msra.mxu0 %v11792_v34  ;;  %v12017_v34 = vcombine.high %v2162_v54, %v2166_v4  ;;  %v2274_v27 = vld [vmem:[#allocation11 + $0x1c90] sm:$0xff] }
 0x3fd   :  { %8438 = vmatpush2.bf16.msra.mxu1 %v11920_v37  ;;  %8448 = vmatprep.subr.bf16.mxu0 %v12041_v7  ;;  %v12145_v37 = vcombine.high %v2290_v3, %v2294_v33  ;;  %v2154_v7 = vld [vmem:[#allocation11 + $0x18d0] sm:$0xff] }
 0x3fe   :  { %8489 = vmatprep.subr.bf16.mxu1 %v12169_v28  ;;  %v2158_v28 = vld [vmem:[#allocation11 + $0x18f0] sm:$0xff] }
 0x3ff   :  { %v8154_v2 = vpop.f32.mrf.mxu0  ;;  %8399 = vmatmul.mubr.bf16.vlgmr.msra.gmra.mxu0 %v13603_v55  ;;  %v12009_v25 = vcombine.high %v2154_v7, %v2158_v28  ;;  %v2262_v3 = vld [vmem:[#allocation11 + $0x1c30] sm:$0xff] }
 0x400   :  { %v8155_v48 = vadd.f32 %v8154_v2, %v13685_v43  ;;  %v8195_v60 = vpop.f32.mrf.mxu1  ;;  %8440 = vmatmul.mubr.bf16.vlgmr.msra.gmra.mxu1 %v13605_v62  ;;  %8449 = vmatpush1.bf16.msra.mxu0 %v12040_v59  ;;  %v12153_v43 = vcombine.high %v2298_v30, %v2302_v26  ;;  %v12016_v59 = vcombine.low %v2162_v54, %v2166_v4  ;;  %v2278_v2 = vld [vmem:[#allocation11 + $0x1cb0] sm:$0xff] }
 0x401   :  { %8480 = vmatprep.mubr.bf16.mxu0 %v13607_v39  ;;  %8490 = vmatpush1.bf16.msra.mxu1 %v12168_v14  ;;  %v8156_v6 = vpop.f32.mrf.mxu0  ;;  %v12137_v14 = vcombine.high %v2282_v11, %v2286_v0  ;;  %v12136_v30 = vcombine.low %v2282_v11, %v2286_v0  ;;  %v2130_v54 = vld [vmem:[#allocation11 + $0x1810] sm:$0xff] }
 0x402   :  { %v13695_v45 = vadd.f32 %v8195_v60, %v8155_v48  ;;  %8521 = vmatprep.mubr.bf16.mxu1 %v13610_v46  ;;  %v8157_v35 = vadd.f32 %v8156_v6, %v13689_v58  ;;  %v8197_v42 = vpop.f32.mrf.mxu1  ;;  %8450 = vmatprep.subr.bf16.mxu0 %v12033_v16  ;;  %v2146_v16 = vld [vmem:[#allocation11 + $0x1890] sm:$0xff]  ;;  %v12129_v48 = vcombine.high %v2274_v27, %v2278_v2 }
 0x403   :  { %v8158_v23 = vpop.f32.mrf.mxu0  ;;  %8491 = vmatprep.subr.bf16.mxu1 %v12161_v17  ;;  %v12008_v17 = vcombine.low %v2154_v7, %v2158_v28  ;;  %v12001_v26 = vcombine.high %v2146_v16, %v2150_v20  ;;  %v2138_v60 = vld [vmem:[#allocation11 + $0x1850] sm:$0xff] }
 0x404   :  { %v13699_v1 = vadd.f32 %v8197_v42, %v8157_v35  ;;  %v8199_v36 = vpop.f32.mrf.mxu1  ;;  %8451 = vmatpush1.bf16.msra.mxu0 %v12032_v41  ;;  %v2142_v41 = vld [vmem:[#allocation11 + $0x1870] sm:$0xff]  ;;  %v12128_v35 = vcombine.low %v2274_v27, %v2278_v2 }
 0x405   :  { %8492 = vmatpush1.bf16.msra.mxu1 %v12160_v29  ;;  %v8159_v63 = vpop.f32.mrf.mxu0  ;;  %8452 = vmatprep.subr.bf16.mxu0 %v12025_v31  ;;  %v2266_v6 = vld [vmem:[#allocation11 + $0x1c50] sm:$0xff]  ;;  %v12000_v31 = vcombine.low %v2146_v16, %v2150_v20  ;;  %v11993_v42 = vcombine.high %v2138_v60, %v2142_v41  ;;  %v11992_v33 = vcombine.low %v2138_v60, %v2142_v41 }
 0x406   :  { %v8200_v58 = vpop.f32.mrf.mxu1  ;;  %8493 = vmatprep.subr.bf16.mxu1 %v12153_v43  ;;  %v2270_v29 = vld [vmem:[#allocation11 + $0x1c70] sm:$0xff] }
 0x407   :  { %v12121_v43 = vcombine.high %v2266_v6, %v2270_v29  ;;  %v2134_v4 = vld [vmem:[#allocation11 + $0x1830] sm:$0xff]  ;;  %v12120_v36 = vcombine.low %v2266_v6, %v2270_v29 }
 0x408   :  { %8453 = vmatpush1.bf16.msra.mxu0 %v12024_v50  ;;  %v2258_v23 = vld [vmem:[#allocation11 + $0x1c10] sm:$0xff]  ;;  %v11985_v50 = vcombine.high %v2130_v54, %v2134_v4  ;;  %v11984_v7 = vcombine.low %v2130_v54, %v2134_v4 }
 0x409   :  { %8494 = vmatpush1.bf16.msra.mxu1 %v12152_v24  ;;  %8454 = vmatprep.subr.bf16.mxu0 %v12017_v34  ;;  %v12113_v63 = vcombine.high %v2258_v23, %v2262_v3  ;;  %v2250_v24 = vld [vmem:[#allocation11 + $0x1bd0] sm:$0xff]  ;;  %v12112_v28 = vcombine.low %v2258_v23, %v2262_v3 }
 0x40a   :  { %8495 = vmatprep.subr.bf16.mxu1 %v12145_v37  ;;  %v2254_v34 = vld [vmem:[#allocation11 + $0x1bf0] sm:$0xff] }
 0x40b   :  { %v2378_v58 = vld [vmem:[#allocation11 + $0x1fd0] sm:$0xff]  ;;  %v12105_v11 = vcombine.high %v2250_v24, %v2254_v34  ;;  %v12104_v16 = vcombine.low %v2250_v24, %v2254_v34 }
 0x40c   :  { %8455 = vmatpush1.bf16.msra.mxu0 %v12016_v59  ;;  %v2382_v37 = vld [vmem:[#allocation11 + $0x1ff0] sm:$0xff] }
 0x40d   :  { %8496 = vmatpush1.bf16.msra.mxu1 %v12144_v13  ;;  %8456 = vmatprep.subr.bf16.mxu0 %v12009_v25  ;;  %v12233_v0 = vcombine.high %v2378_v58, %v2382_v37  ;;  %v2242_v59 = vld [vmem:[#allocation11 + $0x1b90] sm:$0xff]  ;;  %v12232_v20 = vcombine.low %v2378_v58, %v2382_v37 }
 0x40e   :  { %8497 = vmatprep.subr.bf16.mxu1 %v12137_v14  ;;  %v2246_v13 = vld [vmem:[#allocation11 + $0x1bb0] sm:$0xff] }
 0x40f   :  { %v2370_v25 = vld [vmem:[#allocation11 + $0x1f90] sm:$0xff]  ;;  %v12097_v27 = vcombine.high %v2242_v59, %v2246_v13  ;;  %v12096_v60 = vcombine.low %v2242_v59, %v2246_v13 }
 0x410   :  { %8457 = vmatpush1.bf16.msra.mxu0 %v12008_v17  ;;  %v2374_v14 = vld [vmem:[#allocation11 + $0x1fb0] sm:$0xff] }
 0x411   :  { %8498 = vmatpush1.bf16.msra.mxu1 %v12136_v30  ;;  %8458 = vmatprep.subr.bf16.mxu0 %v12001_v26  ;;  %v12225_v2 = vcombine.high %v2370_v25, %v2374_v14  ;;  %v2234_v17 = vld [vmem:[#allocation11 + $0x1b50] sm:$0xff]  ;;  %v12224_v41 = vcombine.low %v2370_v25, %v2374_v14 }
 0x412   :  { %8499 = vmatprep.subr.bf16.mxu1 %v12129_v48  ;;  %v2238_v30 = vld [vmem:[#allocation11 + $0x1b70] sm:$0xff] }
 0x413   :  { %v2362_v26 = vld [vmem:[#allocation11 + $0x1f50] sm:$0xff]  ;;  %v12089_v6 = vcombine.high %v2234_v17, %v2238_v30  ;;  %v12088_v54 = vcombine.low %v2234_v17, %v2238_v30 }
 0x414   :  { %8459 = vmatpush1.bf16.msra.mxu0 %v12000_v31  ;;  %v2366_v48 = vld [vmem:[#allocation11 + $0x1f70] sm:$0xff] }
 0x415   :  { %8500 = vmatpush1.bf16.msra.mxu1 %v12128_v35  ;;  %8460 = vmatprep.subr.bf16.mxu0 %v11993_v42  ;;  %v12217_v29 = vcombine.high %v2362_v26, %v2366_v48  ;;  %v2226_v31 = vld [vmem:[#allocation11 + $0x1b10] sm:$0xff]  ;;  %v12216_v4 = vcombine.low %v2362_v26, %v2366_v48 }
 0x416   :  { %8501 = vmatprep.subr.bf16.mxu1 %v12121_v43  ;;  %v2230_v35 = vld [vmem:[#allocation11 + $0x1b30] sm:$0xff] }
 0x417   :  { %v2354_v42 = vld [vmem:[#allocation11 + $0x1f10] sm:$0xff]  ;;  %v12081_v23 = vcombine.high %v2226_v31, %v2230_v35  ;;  %v12080_v24 = vcombine.low %v2226_v31, %v2230_v35 }
 0x418   :  { %8461 = vmatpush1.bf16.msra.mxu0 %v11992_v33  ;;  %v2358_v43 = vld [vmem:[#allocation11 + $0x1f30] sm:$0xff] }
 0x419   :  { %8502 = vmatpush1.bf16.msra.mxu1 %v12120_v36  ;;  %8462 = vmatprep.subr.bf16.mxu0 %v11985_v50  ;;  %v12209_v3 = vcombine.high %v2354_v42, %v2358_v43  ;;  %v2218_v33 = vld [vmem:[#allocation11 + $0x1ad0] sm:$0xff]  ;;  %v12208_v34 = vcombine.low %v2354_v42, %v2358_v43 }
 0x41a   :  { %8503 = vmatprep.subr.bf16.mxu1 %v12113_v63  ;;  %v2222_v36 = vld [vmem:[#allocation11 + $0x1af0] sm:$0xff] }
 0x41b   :  { %v2346_v50 = vld [vmem:[#allocation11 + $0x1ed0] sm:$0xff]  ;;  %v12073_v58 = vcombine.high %v2218_v33, %v2222_v36  ;;  %v12072_v59 = vcombine.low %v2218_v33, %v2222_v36 }
 0x41c   :  { %8463 = vmatpush1.bf16.msra.mxu0 %v11984_v7  ;;  %v2350_v63 = vld [vmem:[#allocation11 + $0x1ef0] sm:$0xff] }
 0x41d   :  { %8504 = vmatpush1.bf16.msra.mxu1 %v12112_v28  ;;  %8464 = vmatprep.subr.bf16.mxu0 %v12105_v11  ;;  %v12201_v37 = vcombine.high %v2346_v50, %v2350_v63  ;;  %v2210_v7 = vld [vmem:[#allocation11 + $0x1a90] sm:$0xff]  ;;  %v12200_v13 = vcombine.low %v2346_v50, %v2350_v63 }
 0x41e   :  { %8505 = vmatprep.subr.bf16.mxu1 %v12233_v0  ;;  %v2214_v28 = vld [vmem:[#allocation11 + $0x1ab0] sm:$0xff] }
 0x41f   :  { %v2338_v11 = vld [vmem:[#allocation11 + $0x1e90] sm:$0xff]  ;;  %v12065_v25 = vcombine.high %v2210_v7, %v2214_v28  ;;  %v12064_v17 = vcombine.low %v2210_v7, %v2214_v28  ;;  %v1539_v28 = vld [vmem:[#allocation11 + $0x598] sm:$0xff] }
 0x420   :  { %8465 = vmatpush2.bf16.msra.mxu0 %v12104_v16  ;;  %v2342_v0 = vld [vmem:[#allocation11 + $0x1eb0] sm:$0xff] }
 0x421   :  { %8506 = vmatpush2.bf16.msra.mxu1 %v12232_v20  ;;  %8466 = vmatprep.subr.bf16.mxu0 %v12097_v27  ;;  %v12193_v14 = vcombine.high %v2338_v11, %v2342_v0  ;;  %v2202_v16 = vld [vmem:[#allocation11 + $0x1a50] sm:$0xff]  ;;  %v12192_v30 = vcombine.low %v2338_v11, %v2342_v0  ;;  %v1543_v11 = vld [vmem:[#allocation11 + $0x5b8] sm:$0xff] }
 0x422   :  { %8507 = vmatprep.subr.bf16.mxu1 %v12225_v2  ;;  %v2206_v20 = vld [vmem:[#allocation11 + $0x1a70] sm:$0xff] }
 0x423   :  { %v2330_v27 = vld [vmem:[#allocation11 + $0x1e50] sm:$0xff]  ;;  %v12057_v26 = vcombine.high %v2202_v16, %v2206_v20  ;;  %v12056_v31 = vcombine.low %v2202_v16, %v2206_v20  ;;  %v11395_v20 = vcombine.high %v1539_v28, %v1543_v11 }
 0x424   :  { %8467 = vmatpush2.bf16.msra.mxu0 %v12096_v60  ;;  %v2334_v2 = vld [vmem:[#allocation11 + $0x1e70] sm:$0xff] }
 0x425   :  { %8508 = vmatpush2.bf16.msra.mxu1 %v12224_v41  ;;  %8468 = vmatprep.subr.bf16.mxu0 %v12089_v6  ;;  %v12185_v48 = vcombine.high %v2330_v27, %v2334_v2  ;;  %v2194_v60 = vld [vmem:[#allocation11 + $0x1a10] sm:$0xff]  ;;  %v12184_v35 = vcombine.low %v2330_v27, %v2334_v2  ;;  %v1531_v27 = vld [vmem:[#allocation11 + $0x558] sm:$0xff] }
 0x426   :  { %8509 = vmatprep.subr.bf16.mxu1 %v12217_v29  ;;  %v2198_v41 = vld [vmem:[#allocation11 + $0x1a30] sm:$0xff]  ;;  %v1535_v2 = vld [vmem:[#allocation11 + $0x578] sm:$0xff] }
 0x427   :  { %v2322_v6 = vld [vmem:[#allocation11 + $0x1e10] sm:$0xff]  ;;  %v12049_v42 = vcombine.high %v2194_v60, %v2198_v41  ;;  %v12048_v33 = vcombine.low %v2194_v60, %v2198_v41 }
 0x428   :  { %8469 = vmatpush2.bf16.msra.mxu0 %v12088_v54  ;;  %v2326_v29 = vld [vmem:[#allocation11 + $0x1e30] sm:$0xff]  ;;  %v1419_v54 = vld [vmem:[#allocation11 + $0x1d8] sm:$0xff] }
 0x429   :  { %8510 = vmatpush2.bf16.msra.mxu1 %v12216_v4  ;;  %8470 = vmatprep.subr.bf16.mxu0 %v12081_v23  ;;  %v12177_v43 = vcombine.high %v2322_v6, %v2326_v29  ;;  %v1423_v4 = vld [vmem:[#allocation11 + $0x1f8] sm:$0xff]  ;;  %v12176_v36 = vcombine.low %v2322_v6, %v2326_v29  ;;  %v11387_v29 = vcombine.high %v1531_v27, %v1535_v2 }
 0x42a   :  { %8511 = vmatprep.subr.bf16.mxu1 %v12209_v3  ;;  %v1547_v23 = vld [vmem:[#allocation11 + $0x5d8] sm:$0xff]  ;;  %v11275_v50 = vcombine.high %v1419_v54, %v1423_v4  ;;  %v11274_v7 = vcombine.low %v1419_v54, %v1423_v4 }
 0x42b   :  { %v1551_v3 = vld [vmem:[#allocation11 + $0x5f8] sm:$0xff] }
 0x42c   :  { %8471 = vmatpush2.bf16.msra.mxu0 %v12080_v24  ;;  %v11403_v63 = vcombine.high %v1547_v23, %v1551_v3  ;;  %v1411_v24 = vld [vmem:[#allocation11 + $0x198] sm:$0xff]  ;;  %v11402_v0 = vcombine.low %v1547_v23, %v1551_v3 }
 0x42d   :  { %8512 = vmatpush2.bf16.msra.mxu1 %v12208_v34  ;;  %8472 = vmatprep.subr.bf16.mxu0 %v12073_v58  ;;  %v1415_v34 = vld [vmem:[#allocation11 + $0x1b8] sm:$0xff]  ;;  %v13006_v58 = vld [vmem:[#allocation13] sm:$0xff] }
 0x42e   :  { %8513 = vmatprep.subr.bf16.mxu1 %v12201_v37  ;;  %v2405_v37 = vrot.slane %v13006_v58, %v13493_v8  ;;  %v1527_v54 = vld [vmem:[#allocation11 + $0x538] sm:$0xff] }
 0x430   :  { %8473 = vmatpush2.bf16.msra.mxu0 %v12072_v59  ;;  %v2409_v59 = vrot.slane %v13006_v58, %v13497_v15  ;;  %v11394_v15 = vcombine.low %v1539_v28, %v1543_v11  ;;  %v1519_v58 = vld [vmem:[#allocation11 + $0x4f8] sm:$0xff] }
 0x431   :  { %8514 = vmatpush2.bf16.msra.mxu1 %v12200_v13  ;;  %8474 = vmatprep.subr.bf16.mxu0 %v12065_v25  ;;  %v11267_v13 = vcombine.high %v1411_v24, %v1415_v34  ;;  %v1403_v25 = vld [vmem:[#allocation11 + $0x158] sm:$0xff] }
 0x432   :  { %8515 = vmatprep.subr.bf16.mxu1 %v12193_v14  ;;  %v1407_v14 = vld [vmem:[#allocation11 + $0x178] sm:$0xff] }
 0x433   :  { %v11258_v23 = vcombine.low %v1403_v25, %v1407_v14 }
 0x434   :  { %8475 = vmatpush2.bf16.msra.mxu0 %v12064_v17 }
 0x435   :  { %8516 = vmatpush2.bf16.msra.mxu1 %v12192_v30  ;;  %8476 = vmatprep.subr.bf16.mxu0 %v12057_v26  ;;  %v11266_v30 = vcombine.low %v1411_v24, %v1415_v34  ;;  %v1391_v24 = vld [vmem:[#allocation11 + $0xf8] sm:$0xff] }
 0x436   :  { %8517 = vmatprep.subr.bf16.mxu1 %v12185_v48  ;;  %v11259_v48 = vcombine.high %v1403_v25, %v1407_v14  ;;  %v1515_v34 = vld [vmem:[#allocation11 + $0x4d8] sm:$0xff] }
 0x437   :  { %v11371_v11 = vcombine.high %v1515_v34, %v1519_v58  ;;  %v1511_v25 = vld [vmem:[#allocation11 + $0x4b8] sm:$0xff] }
 0x438   :  { %8477 = vmatpush2.bf16.msra.mxu0 %v12056_v31  ;;  %v1395_v31 = vld [vmem:[#allocation11 + $0x118] sm:$0xff] }
 0x439   :  { %8518 = vmatpush2.bf16.msra.mxu1 %v12184_v35  ;;  %8478 = vmatprep.subr.bf16.mxu0 %v12049_v42  ;;  %v1399_v35 = vld [vmem:[#allocation11 + $0x138] sm:$0xff] }
 0x43a   :  { %8519 = vmatprep.subr.bf16.mxu1 %v12177_v43  ;;  %v1523_v43 = vld [vmem:[#allocation11 + $0x518] sm:$0xff] }
 0x43c   :  { %8479 = vmatpush2.bf16.msra.mxu0 %v12048_v33  ;;  %v11386_v33 = vcombine.low %v1531_v27, %v1535_v2  ;;  %v1371_v2 = vld [vmem:[#allocation11 + $0x58] sm:$0xff] }
 0x43d   :  { %8520 = vmatpush2.bf16.msra.mxu1 %v12176_v36  ;;  %8530 = vmatprep.subr.bf16.mxu0 %v11275_v50  ;;  %v11379_v50 = vcombine.high %v1523_v43, %v1527_v54 }
 0x43e   :  { %8571 = vmatprep.subr.bf16.mxu1 %v11403_v63  ;;  %v1387_v63 = vld [vmem:[#allocation11 + $0xd8] sm:$0xff] }
 0x43f   :  { %v8236_v16 = vpop.f32.mrf.mxu0  ;;  %8481 = vmatmul.mubr.bf16.vlgmr.msra.gmra.mxu0 %v13618_v9  ;;  %v11243_v28 = vcombine.high %v1387_v63, %v1391_v24  ;;  %v11242_v14 = vcombine.low %v1387_v63, %v1391_v24 }
 0x440   :  { %v8237_v17 = vadd.f32 %v8236_v16, %v2405_v37  ;;  %v8277_v8 = vpop.f32.mrf.mxu1  ;;  %8522 = vmatmul.mubr.bf16.vlgmr.msra.gmra.mxu1 %v13620_v10  ;;  %8531 = vmatpush1.bf16.msra.mxu0 %v11274_v7  ;;  %v11250_v37 = vcombine.low %v1395_v31, %v1399_v35  ;;  %v11378_v7 = vcombine.low %v1523_v43, %v1527_v54 }
 0x441   :  { %8562 = vmatprep.mubr.bf16.mxu0 %v13505_v38  ;;  %8572 = vmatpush1.bf16.msra.mxu1 %v11402_v0  ;;  %v8238_v26 = vpop.f32.mrf.mxu0  ;;  %v1379_v0 = vld [vmem:[#allocation11 + $0x98] sm:$0xff]  ;;  %v11370_v16 = vcombine.low %v1515_v34, %v1519_v58 }
 0x442   :  { %v13706_v60 = vadd.f32 %v8277_v8, %v8237_v17  ;;  %8603 = vmatprep.mubr.bf16.mxu1 %v13514_v53  ;;  %v8239_v41 = vadd.f32 %v8238_v26, %v2409_v59  ;;  %v8279_v6 = vpop.f32.mrf.mxu1  ;;  %8532 = vmatprep.subr.bf16.mxu0 %v11267_v13  ;;  %v11251_v53 = vcombine.high %v1395_v31, %v1399_v35  ;;  %v1383_v59 = vld [vmem:[#allocation11 + $0xb8] sm:$0xff] }
 0x443   :  { %v8240_v42 = vpop.f32.mrf.mxu0  ;;  %8573 = vmatprep.subr.bf16.mxu1 %v11395_v20  ;;  %v1507_v13 = vld [vmem:[#allocation11 + $0x498] sm:$0xff]  ;;  %v11235_v20 = vcombine.high %v1379_v0, %v1383_v59  ;;  %v11234_v26 = vcombine.low %v1379_v0, %v1383_v59 }
 0x444   :  { %v13709_v4 = vadd.f32 %v8279_v6, %v8239_v41  ;;  %v8281_v38 = vpop.f32.mrf.mxu1  ;;  %8533 = vmatpush1.bf16.msra.mxu0 %v11266_v30  ;;  %v11363_v27 = vcombine.high %v1507_v13, %v1511_v25  ;;  %v1375_v17 = vld [vmem:[#allocation11 + $0x78] sm:$0xff] }
 0x445   :  { %8574 = vmatpush1.bf16.msra.mxu1 %v11394_v15  ;;  %v8241_v3 = vpop.f32.mrf.mxu0  ;;  %8534 = vmatprep.subr.bf16.mxu0 %v11259_v48  ;;  %v1499_v8 = vld [vmem:[#allocation11 + $0x458] sm:$0xff]  ;;  %v11362_v15 = vcombine.low %v1507_v13, %v1511_v25  ;;  %v11227_v48 = vcombine.high %v1371_v2, %v1375_v17  ;;  %v11226_v42 = vcombine.low %v1371_v2, %v1375_v17 }
 0x446   :  { %v8282_v36 = vpop.f32.mrf.mxu1  ;;  %8575 = vmatprep.subr.bf16.mxu1 %v11387_v29  ;;  %v1503_v30 = vld [vmem:[#allocation11 + $0x478] sm:$0xff] }
 0x447   :  { %v11355_v41 = vcombine.high %v1499_v8, %v1503_v30  ;;  %v1363_v6 = vld [vmem:[#allocation11 + $0x18] sm:$0xff]  ;;  %v11354_v43 = vcombine.low %v1499_v8, %v1503_v30 }
 0x448   :  { %8535 = vmatpush1.bf16.msra.mxu0 %v11258_v23  ;;  %v1367_v29 = vld [vmem:[#allocation11 + $0x38] sm:$0xff] }
 0x449   :  { %8576 = vmatpush1.bf16.msra.mxu1 %v11386_v33  ;;  %8536 = vmatprep.subr.bf16.mxu0 %v11251_v53  ;;  %v1491_v31 = vld [vmem:[#allocation11 + $0x418] sm:$0xff]  ;;  %v11219_v54 = vcombine.high %v1363_v6, %v1367_v29  ;;  %v11218_v36 = vcombine.low %v1363_v6, %v1367_v29 }
 0x44a   :  { %8577 = vmatprep.subr.bf16.mxu1 %v11379_v50  ;;  %v1495_v35 = vld [vmem:[#allocation11 + $0x438] sm:$0xff] }
 0x44b   :  { %v11347_v38 = vcombine.high %v1491_v31, %v1495_v35  ;;  %v1483_v23 = vld [vmem:[#allocation11 + $0x3d8] sm:$0xff]  ;;  %v11346_v50 = vcombine.low %v1491_v31, %v1495_v35 }
 0x44c   :  { %8537 = vmatpush1.bf16.msra.mxu0 %v11250_v37  ;;  %v1487_v3 = vld [vmem:[#allocation11 + $0x3f8] sm:$0xff] }
 0x44d   :  { %8578 = vmatpush1.bf16.msra.mxu1 %v11378_v7  ;;  %8538 = vmatprep.subr.bf16.mxu0 %v11243_v28  ;;  %v1611_v33 = vld [vmem:[#allocation11 + $0x7d8] sm:$0xff]  ;;  %v11339_v63 = vcombine.high %v1483_v23, %v1487_v3  ;;  %v11338_v28 = vcombine.low %v1483_v23, %v1487_v3 }
 0x44e   :  { %8579 = vmatprep.subr.bf16.mxu1 %v11371_v11  ;;  %v1615_v53 = vld [vmem:[#allocation11 + $0x7f8] sm:$0xff] }
 0x44f   :  { %v11467_v24 = vcombine.high %v1611_v33, %v1615_v53  ;;  %v1475_v34 = vld [vmem:[#allocation11 + $0x398] sm:$0xff]  ;;  %v11466_v11 = vcombine.low %v1611_v33, %v1615_v53 }
 0x450   :  { %8539 = vmatpush1.bf16.msra.mxu0 %v11242_v14  ;;  %v1479_v58 = vld [vmem:[#allocation11 + $0x3b8] sm:$0xff] }
 0x451   :  { %8580 = vmatpush1.bf16.msra.mxu1 %v11370_v16  ;;  %8540 = vmatprep.subr.bf16.mxu0 %v11235_v20  ;;  %v1603_v37 = vld [vmem:[#allocation11 + $0x798] sm:$0xff]  ;;  %v11331_v0 = vcombine.high %v1475_v34, %v1479_v58  ;;  %v11330_v20 = vcombine.low %v1475_v34, %v1479_v58 }
 0x452   :  { %8581 = vmatprep.subr.bf16.mxu1 %v11363_v27  ;;  %v1607_v7 = vld [vmem:[#allocation11 + $0x7b8] sm:$0xff] }
 0x453   :  { %v11459_v59 = vcombine.high %v1603_v37, %v1607_v7  ;;  %v1467_v13 = vld [vmem:[#allocation11 + $0x358] sm:$0xff]  ;;  %v11458_v27 = vcombine.low %v1603_v37, %v1607_v7 }
 0x454   :  { %8541 = vmatpush1.bf16.msra.mxu0 %v11234_v26  ;;  %v1471_v25 = vld [vmem:[#allocation11 + $0x378] sm:$0xff] }
 0x455   :  { %8582 = vmatpush1.bf16.msra.mxu1 %v11362_v15  ;;  %8542 = vmatprep.subr.bf16.mxu0 %v11227_v48  ;;  %v1595_v14 = vld [vmem:[#allocation11 + $0x758] sm:$0xff]  ;;  %v11323_v2 = vcombine.high %v1467_v13, %v1471_v25  ;;  %v11322_v48 = vcombine.low %v1467_v13, %v1471_v25 }
 0x456   :  { %8583 = vmatprep.subr.bf16.mxu1 %v11355_v41  ;;  %v1599_v16 = vld [vmem:[#allocation11 + $0x778] sm:$0xff] }
 0x457   :  { %v11451_v17 = vcombine.high %v1595_v14, %v1599_v16  ;;  %v1459_v8 = vld [vmem:[#allocation11 + $0x318] sm:$0xff]  ;;  %v11450_v41 = vcombine.low %v1595_v14, %v1599_v16 }
 0x458   :  { %8543 = vmatpush1.bf16.msra.mxu0 %v11226_v42  ;;  %v1463_v30 = vld [vmem:[#allocation11 + $0x338] sm:$0xff] }
 0x459   :  { %8584 = vmatpush1.bf16.msra.mxu1 %v11354_v43  ;;  %8544 = vmatprep.subr.bf16.mxu0 %v11219_v54  ;;  %v1587_v26 = vld [vmem:[#allocation11 + $0x718] sm:$0xff]  ;;  %v11315_v6 = vcombine.high %v1459_v8, %v1463_v30  ;;  %v11314_v54 = vcombine.low %v1459_v8, %v1463_v30 }
 0x45a   :  { %8585 = vmatprep.subr.bf16.mxu1 %v11347_v38  ;;  %v1591_v15 = vld [vmem:[#allocation11 + $0x738] sm:$0xff] }
 0x45b   :  { %v11443_v29 = vcombine.high %v1587_v26, %v1591_v15  ;;  %v1451_v31 = vld [vmem:[#allocation11 + $0x2d8] sm:$0xff]  ;;  %v11442_v38 = vcombine.low %v1587_v26, %v1591_v15 }
 0x45c   :  { %8545 = vmatpush1.bf16.msra.mxu0 %v11218_v36  ;;  %v1455_v35 = vld [vmem:[#allocation11 + $0x2f8] sm:$0xff] }
 0x45d   :  { %8586 = vmatpush1.bf16.msra.mxu1 %v11346_v50  ;;  %8546 = vmatprep.subr.bf16.mxu0 %v11339_v63  ;;  %v1579_v42 = vld [vmem:[#allocation11 + $0x6d8] sm:$0xff]  ;;  %v11307_v23 = vcombine.high %v1451_v31, %v1455_v35  ;;  %v11306_v63 = vcombine.low %v1451_v31, %v1455_v35 }
 0x45e   :  { %8587 = vmatprep.subr.bf16.mxu1 %v11467_v24  ;;  %v1583_v43 = vld [vmem:[#allocation11 + $0x6f8] sm:$0xff] }
 0x45f   :  { %v11435_v3 = vcombine.high %v1579_v42, %v1583_v43  ;;  %v1443_v33 = vld [vmem:[#allocation11 + $0x298] sm:$0xff]  ;;  %v11434_v24 = vcombine.low %v1579_v42, %v1583_v43 }
 0x460   :  { %8547 = vmatpush2.bf16.msra.mxu0 %v11338_v28  ;;  %v1447_v53 = vld [vmem:[#allocation11 + $0x2b8] sm:$0xff] }
 0x461   :  { %8588 = vmatpush2.bf16.msra.mxu1 %v11466_v11  ;;  %8548 = vmatprep.subr.bf16.mxu0 %v11331_v0  ;;  %v1571_v36 = vld [vmem:[#allocation11 + $0x698] sm:$0xff]  ;;  %v11299_v34 = vcombine.high %v1443_v33, %v1447_v53  ;;  %v11298_v0 = vcombine.low %v1443_v33, %v1447_v53 }
 0x462   :  { %8589 = vmatprep.subr.bf16.mxu1 %v11459_v59  ;;  %v1575_v50 = vld [vmem:[#allocation11 + $0x6b8] sm:$0xff] }
 0x463   :  { %v11427_v58 = vcombine.high %v1571_v36, %v1575_v50  ;;  %v1435_v37 = vld [vmem:[#allocation11 + $0x258] sm:$0xff]  ;;  %v11426_v59 = vcombine.low %v1571_v36, %v1575_v50 }
 0x464   :  { %8549 = vmatpush2.bf16.msra.mxu0 %v11330_v20  ;;  %v1439_v7 = vld [vmem:[#allocation11 + $0x278] sm:$0xff] }
 0x465   :  { %8590 = vmatpush2.bf16.msra.mxu1 %v11458_v27  ;;  %8550 = vmatprep.subr.bf16.mxu0 %v11323_v2  ;;  %v1563_v28 = vld [vmem:[#allocation11 + $0x658] sm:$0xff]  ;;  %v11291_v13 = vcombine.high %v1435_v37, %v1439_v7  ;;  %v11290_v2 = vcombine.low %v1435_v37, %v1439_v7 }
 0x466   :  { %8591 = vmatprep.subr.bf16.mxu1 %v11451_v17  ;;  %v1567_v11 = vld [vmem:[#allocation11 + $0x678] sm:$0xff] }
 0x467   :  { %v11419_v25 = vcombine.high %v1563_v28, %v1567_v11  ;;  %v1427_v14 = vld [vmem:[#allocation11 + $0x218] sm:$0xff]  ;;  %v11418_v17 = vcombine.low %v1563_v28, %v1567_v11 }
 0x468   :  { %8551 = vmatpush2.bf16.msra.mxu0 %v11322_v48  ;;  %v1431_v16 = vld [vmem:[#allocation11 + $0x238] sm:$0xff] }
 0x469   :  { %8592 = vmatpush2.bf16.msra.mxu1 %v11450_v41  ;;  %8552 = vmatprep.subr.bf16.mxu0 %v11315_v6  ;;  %v1555_v20 = vld [vmem:[#allocation11 + $0x618] sm:$0xff]  ;;  %v11283_v8 = vcombine.high %v1427_v14, %v1431_v16  ;;  %v11282_v6 = vcombine.low %v1427_v14, %v1431_v16 }
 0x46a   :  { %8593 = vmatprep.subr.bf16.mxu1 %v11443_v29  ;;  %v1559_v27 = vld [vmem:[#allocation11 + $0x638] sm:$0xff] }
 0x46b   :  { %v11411_v30 = vcombine.high %v1555_v20, %v1559_v27  ;;  %v1675_v26 = vld [vmem:[#allocation11 + $0x9d8] sm:$0xff]  ;;  %v11410_v29 = vcombine.low %v1555_v20, %v1559_v27 }
 0x46c   :  { %8553 = vmatpush2.bf16.msra.mxu0 %v11314_v54  ;;  %v1679_v15 = vld [vmem:[#allocation11 + $0x9f8] sm:$0xff] }
 0x46d   :  { %8594 = vmatpush2.bf16.msra.mxu1 %v11442_v38  ;;  %8554 = vmatprep.subr.bf16.mxu0 %v11307_v23  ;;  %v1803_v48 = vld [vmem:[#allocation11 + $0xdd8] sm:$0xff]  ;;  %v11531_v31 = vcombine.high %v1675_v26, %v1679_v15  ;;  %v11530_v54 = vcombine.low %v1675_v26, %v1679_v15 }
 0x46e   :  { %8595 = vmatprep.subr.bf16.mxu1 %v11435_v3  ;;  %v1807_v41 = vld [vmem:[#allocation11 + $0xdf8] sm:$0xff] }
 0x46f   :  { %v11659_v35 = vcombine.high %v1803_v48, %v1807_v41  ;;  %v1667_v42 = vld [vmem:[#allocation11 + $0x998] sm:$0xff]  ;;  %v11658_v3 = vcombine.low %v1803_v48, %v1807_v41 }
 0x470   :  { %8555 = vmatpush2.bf16.msra.mxu0 %v11306_v63  ;;  %v1671_v43 = vld [vmem:[#allocation11 + $0x9b8] sm:$0xff] }
 0x471   :  { %8596 = vmatpush2.bf16.msra.mxu1 %v11434_v24  ;;  %8556 = vmatprep.subr.bf16.mxu0 %v11299_v34  ;;  %v1795_v38 = vld [vmem:[#allocation11 + $0xd98] sm:$0xff]  ;;  %v11523_v33 = vcombine.high %v1667_v42, %v1671_v43  ;;  %v11522_v7 = vcombine.low %v1667_v42, %v1671_v43 }
 0x472   :  { %8597 = vmatprep.subr.bf16.mxu1 %v11427_v58  ;;  %v1799_v23 = vld [vmem:[#allocation11 + $0xdb8] sm:$0xff] }
 0x473   :  { %v1659_v53 = vld [vmem:[#allocation11 + $0x958] sm:$0xff]  ;;  %v11651_v63 = vcombine.high %v1795_v38, %v1799_v23  ;;  %v11650_v11 = vcombine.low %v1795_v38, %v1799_v23 }
 0x474   :  { %8557 = vmatpush2.bf16.msra.mxu0 %v11298_v0  ;;  %v1663_v36 = vld [vmem:[#allocation11 + $0x978] sm:$0xff] }
 0x475   :  { %8598 = vmatpush2.bf16.msra.mxu1 %v11426_v59  ;;  %8558 = vmatprep.subr.bf16.mxu0 %v11291_v13  ;;  %v1787_v24 = vld [vmem:[#allocation11 + $0xd58] sm:$0xff]  ;;  %v11515_v0 = vcombine.high %v1659_v53, %v1663_v36 }
 0x476   :  { %8599 = vmatprep.subr.bf16.mxu1 %v11419_v25  ;;  %v1791_v34 = vld [vmem:[#allocation11 + $0xd78] sm:$0xff] }
 0x477   :  { %v1651_v25 = vld [vmem:[#allocation11 + $0x918] sm:$0xff] }
 0x478   :  { %8559 = vmatpush2.bf16.msra.mxu0 %v11290_v2  ;;  %v1655_v14 = vld [vmem:[#allocation11 + $0x938] sm:$0xff]  ;;  %v11514_v2 = vcombine.low %v1659_v53, %v1663_v36 }
 0x479   :  { %8600 = vmatpush2.bf16.msra.mxu1 %v11418_v17  ;;  %8560 = vmatprep.subr.bf16.mxu0 %v11283_v8  ;;  %v1779_v16 = vld [vmem:[#allocation11 + $0xd18] sm:$0xff]  ;;  %v11507_v8 = vcombine.high %v1651_v25, %v1655_v14 }
 0x47a   :  { %8601 = vmatprep.subr.bf16.mxu1 %v11411_v30  ;;  %v1783_v20 = vld [vmem:[#allocation11 + $0xd38] sm:$0xff] }
 0x47b   :  { %v11635_v30 = vcombine.high %v1779_v16, %v1783_v20  ;;  %v1643_v26 = vld [vmem:[#allocation11 + $0x8d8] sm:$0xff] }
 0x47c   :  { %8561 = vmatpush2.bf16.msra.mxu0 %v11282_v6  ;;  %v1647_v15 = vld [vmem:[#allocation11 + $0x8f8] sm:$0xff]  ;;  %v11506_v6 = vcombine.low %v1651_v25, %v1655_v14 }
 0x47d   :  { %8602 = vmatpush2.bf16.msra.mxu1 %v11410_v29  ;;  %8612 = vmatprep.subr.bf16.mxu0 %v11531_v31  ;;  %v1771_v48 = vld [vmem:[#allocation11 + $0xcd8] sm:$0xff]  ;;  %v11634_v29 = vcombine.low %v1779_v16, %v1783_v20  ;;  %v11499_v31 = vcombine.high %v1643_v26, %v1647_v15  ;;  %v11498_v23 = vcombine.low %v1643_v26, %v1647_v15 }
 0x47e   :  { %8653 = vmatprep.subr.bf16.mxu1 %v11659_v35  ;;  %v1775_v41 = vld [vmem:[#allocation11 + $0xcf8] sm:$0xff] }
 0x47f   :  { %v8318_v50 = vpop.f32.mrf.mxu0  ;;  %8563 = vmatmul.mubr.bf16.vlgmr.msra.gmra.mxu0 %v13512_v52  ;;  %v11627_v35 = vcombine.high %v1771_v48, %v1775_v41  ;;  %v1635_v42 = vld [vmem:[#allocation11 + $0x898] sm:$0xff] }
 0x480   :  { %v8319_v58 = vadd.f32 %v8318_v50, %v13706_v60  ;;  %v8359_v37 = vpop.f32.mrf.mxu1  ;;  %8604 = vmatmul.mubr.bf16.vlgmr.msra.gmra.mxu1 %v13517_v57  ;;  %8613 = vmatpush1.bf16.msra.mxu0 %v11530_v54  ;;  %v11643_v60 = vcombine.high %v1787_v24, %v1791_v34  ;;  %v1639_v43 = vld [vmem:[#allocation11 + $0x8b8] sm:$0xff] }
 0x481   :  { %8644 = vmatprep.mubr.bf16.mxu0 %v13535_v5  ;;  %8654 = vmatpush1.bf16.msra.mxu1 %v11658_v3  ;;  %v8320_v28 = vpop.f32.mrf.mxu0  ;;  %v1763_v54 = vld [vmem:[#allocation11 + $0xc98] sm:$0xff]  ;;  %v11626_v3 = vcombine.low %v1771_v48, %v1775_v41 }
 0x482   :  { %v13715_v59 = vadd.f32 %v8359_v37, %v8319_v58  ;;  %8685 = vmatprep.mubr.bf16.mxu1 %v13540_v18  ;;  %v8321_v52 = vadd.f32 %v8320_v28, %v13709_v4  ;;  %v8361_v13 = vpop.f32.mrf.mxu1  ;;  %8614 = vmatprep.subr.bf16.mxu0 %v11523_v33  ;;  %v11642_v18 = vcombine.low %v1787_v24, %v1791_v34  ;;  %v1767_v38 = vld [vmem:[#allocation11 + $0xcb8] sm:$0xff] }
 0x483   :  { %v8322_v57 = vpop.f32.mrf.mxu0  ;;  %8655 = vmatprep.subr.bf16.mxu1 %v11651_v63  ;;  %v11491_v33 = vcombine.high %v1635_v42, %v1639_v43  ;;  %v11619_v53 = vcombine.high %v1763_v54, %v1767_v38  ;;  %v1627_v36 = vld [vmem:[#allocation11 + $0x858] sm:$0xff]  ;;  %v11490_v34 = vcombine.low %v1635_v42, %v1639_v43  ;;  %v11618_v58 = vcombine.low %v1763_v54, %v1767_v38 }
 0x484   :  { %v13719_v5 = vadd.f32 %v8361_v13, %v8321_v52  ;;  %v8363_v27 = vpop.f32.mrf.mxu1  ;;  %8615 = vmatpush1.bf16.msra.mxu0 %v11522_v7  ;;  %v1631_v50 = vld [vmem:[#allocation11 + $0x878] sm:$0xff] }
 0x485   :  { %8656 = vmatpush1.bf16.msra.mxu1 %v11650_v11  ;;  %v8323_v17 = vpop.f32.mrf.mxu0  ;;  %8616 = vmatprep.subr.bf16.mxu0 %v11515_v0  ;;  %v1755_v63 = vld [vmem:[#allocation11 + $0xc58] sm:$0xff]  ;;  %v11483_v37 = vcombine.high %v1627_v36, %v1631_v50  ;;  %v11482_v13 = vcombine.low %v1627_v36, %v1631_v50 }
 0x486   :  { %v8364_v4 = vpop.f32.mrf.mxu1  ;;  %8657 = vmatprep.subr.bf16.mxu1 %v11643_v60  ;;  %v1759_v24 = vld [vmem:[#allocation11 + $0xc78] sm:$0xff] }
 0x487   :  { %v11611_v7 = vcombine.high %v1755_v63, %v1759_v24  ;;  %v1619_v28 = vld [vmem:[#allocation11 + $0x818] sm:$0xff]  ;;  %v11610_v60 = vcombine.low %v1755_v63, %v1759_v24 }
 0x488   :  { %8617 = vmatpush1.bf16.msra.mxu0 %v11514_v2  ;;  %v1623_v11 = vld [vmem:[#allocation11 + $0x838] sm:$0xff] }
 0x489   :  { %8658 = vmatpush1.bf16.msra.mxu1 %v11642_v18  ;;  %8618 = vmatprep.subr.bf16.mxu0 %v11507_v8  ;;  %v1747_v0 = vld [vmem:[#allocation11 + $0xc18] sm:$0xff]  ;;  %v11475_v25 = vcombine.high %v1619_v28, %v1623_v11  ;;  %v11474_v2 = vcombine.low %v1619_v28, %v1623_v11 }
 0x48a   :  { %8659 = vmatprep.subr.bf16.mxu1 %v11635_v30  ;;  %v1751_v52 = vld [vmem:[#allocation11 + $0xc38] sm:$0xff] }
 0x48b   :  { %v11603_v14 = vcombine.high %v1747_v0, %v1751_v52  ;;  %v1739_v57 = vld [vmem:[#allocation11 + $0xbd8] sm:$0xff]  ;;  %v11602_v17 = vcombine.low %v1747_v0, %v1751_v52 }
 0x48c   :  { %8619 = vmatpush1.bf16.msra.mxu0 %v11506_v6  ;;  %v1743_v16 = vld [vmem:[#allocation11 + $0xbf8] sm:$0xff] }
 0x48d   :  { %8660 = vmatpush1.bf16.msra.mxu1 %v11634_v29  ;;  %8620 = vmatprep.subr.bf16.mxu0 %v11499_v31  ;;  %v1867_v20 = vld [vmem:[#allocation11 + $0xfd8] sm:$0xff]  ;;  %v11595_v18 = vcombine.high %v1739_v57, %v1743_v16  ;;  %v11594_v48 = vcombine.low %v1739_v57, %v1743_v16 }
 0x48e   :  { %8661 = vmatprep.subr.bf16.mxu1 %v11627_v35  ;;  %v1871_v27 = vld [vmem:[#allocation11 + $0xff8] sm:$0xff] }
 0x48f   :  { %v11723_v8 = vcombine.high %v1867_v20, %v1871_v27  ;;  %v1731_v4 = vld [vmem:[#allocation11 + $0xb98] sm:$0xff]  ;;  %v11722_v41 = vcombine.low %v1867_v20, %v1871_v27 }
 0x490   :  { %8621 = vmatpush1.bf16.msra.mxu0 %v11498_v23  ;;  %v1735_v30 = vld [vmem:[#allocation11 + $0xbb8] sm:$0xff] }
 0x491   :  { %8662 = vmatpush1.bf16.msra.mxu1 %v11626_v3  ;;  %8622 = vmatprep.subr.bf16.mxu0 %v11491_v33  ;;  %v1859_v26 = vld [vmem:[#allocation11 + $0xf98] sm:$0xff]  ;;  %v11587_v6 = vcombine.high %v1731_v4, %v1735_v30  ;;  %v11586_v54 = vcombine.low %v1731_v4, %v1735_v30 }
 0x492   :  { %8663 = vmatprep.subr.bf16.mxu1 %v11619_v53  ;;  %v1863_v15 = vld [vmem:[#allocation11 + $0xfb8] sm:$0xff] }
 0x493   :  { %v11715_v29 = vcombine.high %v1859_v26, %v1863_v15  ;;  %v1723_v31 = vld [vmem:[#allocation11 + $0xb58] sm:$0xff]  ;;  %v11714_v38 = vcombine.low %v1859_v26, %v1863_v15 }
 0x494   :  { %8623 = vmatpush1.bf16.msra.mxu0 %v11490_v34  ;;  %v1727_v35 = vld [vmem:[#allocation11 + $0xb78] sm:$0xff] }
 0x495   :  { %8664 = vmatpush1.bf16.msra.mxu1 %v11618_v58  ;;  %8624 = vmatprep.subr.bf16.mxu0 %v11483_v37  ;;  %v1851_v42 = vld [vmem:[#allocation11 + $0xf58] sm:$0xff]  ;;  %v11579_v23 = vcombine.high %v1723_v31, %v1727_v35  ;;  %v11578_v63 = vcombine.low %v1723_v31, %v1727_v35 }
 0x496   :  { %8665 = vmatprep.subr.bf16.mxu1 %v11611_v7  ;;  %v1855_v43 = vld [vmem:[#allocation11 + $0xf78] sm:$0xff] }
 0x497   :  { %v11707_v3 = vcombine.high %v1851_v42, %v1855_v43  ;;  %v1715_v33 = vld [vmem:[#allocation11 + $0xb18] sm:$0xff]  ;;  %v11706_v24 = vcombine.low %v1851_v42, %v1855_v43 }
 0x498   :  { %8625 = vmatpush1.bf16.msra.mxu0 %v11482_v13  ;;  %v1719_v53 = vld [vmem:[#allocation11 + $0xb38] sm:$0xff] }
 0x499   :  { %8666 = vmatpush1.bf16.msra.mxu1 %v11610_v60  ;;  %8626 = vmatprep.subr.bf16.mxu0 %v11475_v25  ;;  %v1843_v36 = vld [vmem:[#allocation11 + $0xf18] sm:$0xff]  ;;  %v11571_v34 = vcombine.high %v1715_v33, %v1719_v53  ;;  %v11570_v0 = vcombine.low %v1715_v33, %v1719_v53 }
 0x49a   :  { %8667 = vmatprep.subr.bf16.mxu1 %v11603_v14  ;;  %v1847_v50 = vld [vmem:[#allocation11 + $0xf38] sm:$0xff] }
 0x49b   :  { %v11699_v58 = vcombine.high %v1843_v36, %v1847_v50  ;;  %v1707_v37 = vld [vmem:[#allocation11 + $0xad8] sm:$0xff]  ;;  %v11698_v52 = vcombine.low %v1843_v36, %v1847_v50 }
 0x49c   :  { %8627 = vmatpush1.bf16.msra.mxu0 %v11474_v2  ;;  %v1711_v7 = vld [vmem:[#allocation11 + $0xaf8] sm:$0xff] }
 0x49d   :  { %8668 = vmatpush1.bf16.msra.mxu1 %v11602_v17  ;;  %8628 = vmatprep.subr.bf16.mxu0 %v11595_v18  ;;  %v1835_v28 = vld [vmem:[#allocation11 + $0xed8] sm:$0xff]  ;;  %v11563_v13 = vcombine.high %v1707_v37, %v1711_v7  ;;  %v11562_v20 = vcombine.low %v1707_v37, %v1711_v7 }
 0x49e   :  { %8669 = vmatprep.subr.bf16.mxu1 %v11723_v8  ;;  %v1839_v11 = vld [vmem:[#allocation11 + $0xef8] sm:$0xff] }
 0x49f   :  { %v11691_v60 = vcombine.high %v1835_v28, %v1839_v11  ;;  %v1699_v25 = vld [vmem:[#allocation11 + $0xa98] sm:$0xff]  ;;  %v11690_v27 = vcombine.low %v1835_v28, %v1839_v11 }
 0x4a0   :  { %8629 = vmatpush2.bf16.msra.mxu0 %v11594_v48  ;;  %v1703_v14 = vld [vmem:[#allocation11 + $0xab8] sm:$0xff] }
 0x4a1   :  { %8670 = vmatpush2.bf16.msra.mxu1 %v11722_v41  ;;  %8630 = vmatprep.subr.bf16.mxu0 %v11587_v6  ;;  %v1827_v57 = vld [vmem:[#allocation11 + $0xe98] sm:$0xff]  ;;  %v11555_v2 = vcombine.high %v1699_v25, %v1703_v14  ;;  %v11554_v26 = vcombine.low %v1699_v25, %v1703_v14 }
 0x4a2   :  { %8671 = vmatprep.subr.bf16.mxu1 %v11715_v29  ;;  %v1831_v16 = vld [vmem:[#allocation11 + $0xeb8] sm:$0xff] }
 0x4a3   :  { %v11683_v17 = vcombine.high %v1827_v57, %v1831_v16  ;;  %v1691_v18 = vld [vmem:[#allocation11 + $0xa58] sm:$0xff]  ;;  %v11682_v15 = vcombine.low %v1827_v57, %v1831_v16 }
 0x4a4   :  { %8631 = vmatpush2.bf16.msra.mxu0 %v11586_v54  ;;  %v1695_v8 = vld [vmem:[#allocation11 + $0xa78] sm:$0xff] }
 0x4a5   :  { %8672 = vmatpush2.bf16.msra.mxu1 %v11714_v38  ;;  %8632 = vmatprep.subr.bf16.mxu0 %v11579_v23  ;;  %v1819_v4 = vld [vmem:[#allocation11 + $0xe58] sm:$0xff]  ;;  %v11547_v48 = vcombine.high %v1691_v18, %v1695_v8  ;;  %v11546_v42 = vcombine.low %v1691_v18, %v1695_v8 }
 0x4a6   :  { %8673 = vmatprep.subr.bf16.mxu1 %v11707_v3  ;;  %v1823_v30 = vld [vmem:[#allocation11 + $0xe78] sm:$0xff] }
 0x4a7   :  { %v11675_v41 = vcombine.high %v1819_v4, %v1823_v30  ;;  %v1683_v6 = vld [vmem:[#allocation11 + $0xa18] sm:$0xff]  ;;  %v11674_v43 = vcombine.low %v1819_v4, %v1823_v30 }
 0x4a8   :  { %8633 = vmatpush2.bf16.msra.mxu0 %v11578_v63  ;;  %v1687_v29 = vld [vmem:[#allocation11 + $0xa38] sm:$0xff] }
 0x4a9   :  { %8674 = vmatpush2.bf16.msra.mxu1 %v11706_v24  ;;  %8634 = vmatprep.subr.bf16.mxu0 %v11571_v34  ;;  %v1811_v31 = vld [vmem:[#allocation11 + $0xe18] sm:$0xff]  ;;  %v11539_v54 = vcombine.high %v1683_v6, %v1687_v29  ;;  %v11538_v36 = vcombine.low %v1683_v6, %v1687_v29 }
 0x4aa   :  { %8675 = vmatprep.subr.bf16.mxu1 %v11699_v58  ;;  %v1815_v35 = vld [vmem:[#allocation11 + $0xe38] sm:$0xff] }
 0x4ab   :  { %v11667_v38 = vcombine.high %v1811_v31, %v1815_v35  ;;  %v1931_v23 = vld [vmem:[#allocation11 + $0x11d8] sm:$0xff]  ;;  %v11666_v50 = vcombine.low %v1811_v31, %v1815_v35 }
 0x4ac   :  { %8635 = vmatpush2.bf16.msra.mxu0 %v11570_v0  ;;  %v1935_v3 = vld [vmem:[#allocation11 + $0x11f8] sm:$0xff] }
 0x4ad   :  { %8676 = vmatpush2.bf16.msra.mxu1 %v11698_v52  ;;  %8636 = vmatprep.subr.bf16.mxu0 %v11563_v13  ;;  %v2059_v33 = vld [vmem:[#allocation11 + $0x15d8] sm:$0xff]  ;;  %v11787_v63 = vcombine.high %v1931_v23, %v1935_v3  ;;  %v11786_v37 = vcombine.low %v1931_v23, %v1935_v3 }
 0x4ae   :  { %8677 = vmatprep.subr.bf16.mxu1 %v11691_v60  ;;  %v2063_v53 = vld [vmem:[#allocation11 + $0x15f8] sm:$0xff] }
 0x4af   :  { %v11915_v24 = vcombine.high %v2059_v33, %v2063_v53  ;;  %v1923_v34 = vld [vmem:[#allocation11 + $0x1198] sm:$0xff]  ;;  %v11914_v11 = vcombine.low %v2059_v33, %v2063_v53 }
 0x4b0   :  { %8637 = vmatpush2.bf16.msra.mxu0 %v11562_v20  ;;  %v1927_v58 = vld [vmem:[#allocation11 + $0x11b8] sm:$0xff] }
 0x4b1   :  { %8678 = vmatpush2.bf16.msra.mxu1 %v11690_v27  ;;  %8638 = vmatprep.subr.bf16.mxu0 %v11555_v2  ;;  %v2051_v7 = vld [vmem:[#allocation11 + $0x1598] sm:$0xff]  ;;  %v11779_v0 = vcombine.high %v1923_v34, %v1927_v58  ;;  %v11778_v27 = vcombine.low %v1923_v34, %v1927_v58 }
 0x4b2   :  { %8679 = vmatprep.subr.bf16.mxu1 %v11683_v17  ;;  %v2055_v28 = vld [vmem:[#allocation11 + $0x15b8] sm:$0xff] }
 0x4b3   :  { %v1915_v52 = vld [vmem:[#allocation11 + $0x1158] sm:$0xff]  ;;  %v11907_v25 = vcombine.high %v2051_v7, %v2055_v28  ;;  %v11906_v17 = vcombine.low %v2051_v7, %v2055_v28 }
 0x4b4   :  { %8639 = vmatpush2.bf16.msra.mxu0 %v11554_v26  ;;  %v1919_v13 = vld [vmem:[#allocation11 + $0x1178] sm:$0xff] }
 0x4b5   :  { %8680 = vmatpush2.bf16.msra.mxu1 %v11682_v15  ;;  %8640 = vmatprep.subr.bf16.mxu0 %v11547_v48  ;;  %v2043_v14 = vld [vmem:[#allocation11 + $0x1558] sm:$0xff]  ;;  %v11771_v18 = vcombine.high %v1915_v52, %v1919_v13  ;;  %v11770_v6 = vcombine.low %v1915_v52, %v1919_v13 }
 0x4b6   :  { %8681 = vmatprep.subr.bf16.mxu1 %v11675_v41  ;;  %v2047_v57 = vld [vmem:[#allocation11 + $0x1578] sm:$0xff] }
 0x4b7   :  { %v1907_v30 = vld [vmem:[#allocation11 + $0x1118] sm:$0xff] }
 0x4b8   :  { %8641 = vmatpush2.bf16.msra.mxu0 %v11546_v42  ;;  %v1911_v26 = vld [vmem:[#allocation11 + $0x1138] sm:$0xff] }
 0x4b9   :  { %8682 = vmatpush2.bf16.msra.mxu1 %v11674_v43  ;;  %8642 = vmatprep.subr.bf16.mxu0 %v11539_v54  ;;  %v2035_v15 = vld [vmem:[#allocation11 + $0x1518] sm:$0xff]  ;;  %v11763_v31 = vcombine.high %v1907_v30, %v1911_v26  ;;  %v11762_v23 = vcombine.low %v1907_v30, %v1911_v26 }
 0x4ba   :  { %8683 = vmatprep.subr.bf16.mxu1 %v11667_v38  ;;  %v2039_v48 = vld [vmem:[#allocation11 + $0x1538] sm:$0xff] }
 0x4bb   :  { %v11891_v35 = vcombine.high %v2035_v15, %v2039_v48  ;;  %v1899_v42 = vld [vmem:[#allocation11 + $0x10d8] sm:$0xff]  ;;  %v11890_v3 = vcombine.low %v2035_v15, %v2039_v48 }
 0x4bc   :  { %8643 = vmatpush2.bf16.msra.mxu0 %v11538_v36  ;;  %v1903_v43 = vld [vmem:[#allocation11 + $0x10f8] sm:$0xff] }
 0x4bd   :  { %8684 = vmatpush2.bf16.msra.mxu1 %v11666_v50  ;;  %8694 = vmatprep.subr.bf16.mxu0 %v11787_v63  ;;  %v2027_v54 = vld [vmem:[#allocation11 + $0x14d8] sm:$0xff]  ;;  %v11755_v33 = vcombine.high %v1899_v42, %v1903_v43  ;;  %v11754_v34 = vcombine.low %v1899_v42, %v1903_v43 }
 0x4be   :  { %8735 = vmatprep.subr.bf16.mxu1 %v11915_v24  ;;  %v2031_v38 = vld [vmem:[#allocation11 + $0x14f8] sm:$0xff] }
 0x4bf   :  { %v8400_v60 = vpop.f32.mrf.mxu0  ;;  %8645 = vmatmul.mubr.bf16.vlgmr.msra.gmra.mxu0 %v13583_v21  ;;  %v11883_v53 = vcombine.high %v2027_v54, %v2031_v38  ;;  %v1891_v36 = vld [vmem:[#allocation11 + $0x1098] sm:$0xff]  ;;  %v11882_v58 = vcombine.low %v2027_v54, %v2031_v38 }
 0x4c0   :  { %v8401_v16 = vadd.f32 %v8400_v60, %v13715_v59  ;;  %v8441_v20 = vpop.f32.mrf.mxu1  ;;  %8686 = vmatmul.mubr.bf16.vlgmr.msra.gmra.mxu1 %v13585_v22  ;;  %8695 = vmatpush1.bf16.msra.mxu0 %v11786_v37  ;;  %v11899_v59 = vcombine.high %v2043_v14, %v2047_v57  ;;  %v1895_v50 = vld [vmem:[#allocation11 + $0x10b8] sm:$0xff] }
 0x4c1   :  { %8726 = vmatprep.mubr.bf16.mxu0 %v13587_v40  ;;  %8736 = vmatpush1.bf16.msra.mxu1 %v11914_v11  ;;  %v8402_v2 = vpop.f32.mrf.mxu0  ;;  %v2019_v63 = vld [vmem:[#allocation11 + $0x1498] sm:$0xff]  ;;  %v11747_v37 = vcombine.high %v1891_v36, %v1895_v50  ;;  %v11746_v13 = vcombine.low %v1891_v36, %v1895_v50 }
 0x4c2   :  { %v13725_v8 = vadd.f32 %v8441_v20, %v8401_v16  ;;  %8767 = vmatprep.mubr.bf16.mxu1 %v13590_v61  ;;  %v8403_v21 = vadd.f32 %v8402_v2, %v13719_v5  ;;  %v8443_v4 = vpop.f32.mrf.mxu1  ;;  %8696 = vmatprep.subr.bf16.mxu0 %v11779_v0  ;;  %v11898_v61 = vcombine.low %v2043_v14, %v2047_v57  ;;  %v2023_v24 = vld [vmem:[#allocation11 + $0x14b8] sm:$0xff] }
 0x4c3   :  { %v8404_v22 = vpop.f32.mrf.mxu0  ;;  %8737 = vmatprep.subr.bf16.mxu1 %v11907_v25  ;;  %v11875_v7 = vcombine.high %v2019_v63, %v2023_v24  ;;  %v1883_v28 = vld [vmem:[#allocation11 + $0x1058] sm:$0xff]  ;;  %v11874_v60 = vcombine.low %v2019_v63, %v2023_v24 }
 0x4c4   :  { %v13729_v40 = vadd.f32 %v8443_v4, %v8403_v21  ;;  %v8445_v41 = vpop.f32.mrf.mxu1  ;;  %8697 = vmatpush1.bf16.msra.mxu0 %v11778_v27  ;;  %v1887_v11 = vld [vmem:[#allocation11 + $0x1078] sm:$0xff] }
 0x4c5   :  { %8738 = vmatpush1.bf16.msra.mxu1 %v11906_v17  ;;  %v8405_v29 = vpop.f32.mrf.mxu0  ;;  %8698 = vmatprep.subr.bf16.mxu0 %v11771_v18  ;;  %v2011_v0 = vld [vmem:[#allocation11 + $0x1458] sm:$0xff]  ;;  %v11739_v25 = vcombine.high %v1883_v28, %v1887_v11  ;;  %v11738_v2 = vcombine.low %v1883_v28, %v1887_v11 }
 0x4c6   :  { %v8446_v5 = vpop.f32.mrf.mxu1  ;;  %8739 = vmatprep.subr.bf16.mxu1 %v11899_v59  ;;  %v2015_v52 = vld [vmem:[#allocation11 + $0x1478] sm:$0xff] }
 0x4c7   :  { %v11867_v14 = vcombine.high %v2011_v0, %v2015_v52  ;;  %v1875_v57 = vld [vmem:[#allocation11 + $0x1018] sm:$0xff]  ;;  %v11866_v17 = vcombine.low %v2011_v0, %v2015_v52 }
 0x4c8   :  { %8699 = vmatpush1.bf16.msra.mxu0 %v11770_v6  ;;  %v1879_v16 = vld [vmem:[#allocation11 + $0x1038] sm:$0xff] }
 0x4c9   :  { %8740 = vmatpush1.bf16.msra.mxu1 %v11898_v61  ;;  %8700 = vmatprep.subr.bf16.mxu0 %v11763_v31  ;;  %v2003_v20 = vld [vmem:[#allocation11 + $0x1418] sm:$0xff]  ;;  %v11731_v18 = vcombine.high %v1875_v57, %v1879_v16  ;;  %v11730_v22 = vcombine.low %v1875_v57, %v1879_v16 }
 0x4ca   :  { %8741 = vmatprep.subr.bf16.mxu1 %v11891_v35  ;;  %v2007_v27 = vld [vmem:[#allocation11 + $0x1438] sm:$0xff] }
 0x4cb   :  { %v11859_v21 = vcombine.high %v2003_v20, %v2007_v27  ;;  %v1995_v4 = vld [vmem:[#allocation11 + $0x13d8] sm:$0xff]  ;;  %v11858_v15 = vcombine.low %v2003_v20, %v2007_v27 }
 0x4cc   :  { %8701 = vmatpush1.bf16.msra.mxu0 %v11762_v23  ;;  %v1999_v59 = vld [vmem:[#allocation11 + $0x13f8] sm:$0xff] }
 0x4cd   :  { %8742 = vmatpush1.bf16.msra.mxu1 %v11890_v3  ;;  %8702 = vmatprep.subr.bf16.mxu0 %v11755_v33  ;;  %v2123_v30 = vld [vmem:[#allocation11 + $0x17d8] sm:$0xff]  ;;  %v11851_v48 = vcombine.high %v1995_v4, %v1999_v59  ;;  %v11850_v5 = vcombine.low %v1995_v4, %v1999_v59 }
 0x4ce   :  { %8743 = vmatprep.subr.bf16.mxu1 %v11883_v53  ;;  %v2127_v26 = vld [vmem:[#allocation11 + $0x17f8] sm:$0xff] }
 0x4cf   :  { %v11979_v41 = vcombine.high %v2123_v30, %v2127_v26  ;;  %v1987_v6 = vld [vmem:[#allocation11 + $0x1398] sm:$0xff]  ;;  %v11978_v35 = vcombine.low %v2123_v30, %v2127_v26 }
 0x4d0   :  { %8703 = vmatpush1.bf16.msra.mxu0 %v11754_v34  ;;  %v1991_v29 = vld [vmem:[#allocation11 + $0x13b8] sm:$0xff] }
 0x4d1   :  { %8744 = vmatpush1.bf16.msra.mxu1 %v11882_v58  ;;  %8704 = vmatprep.subr.bf16.mxu0 %v11747_v37  ;;  %v2115_v61 = vld [vmem:[#allocation11 + $0x1798] sm:$0xff]  ;;  %v11843_v42 = vcombine.high %v1987_v6, %v1991_v29  ;;  %v11842_v33 = vcombine.low %v1987_v6, %v1991_v29 }
 0x4d2   :  { %8745 = vmatprep.subr.bf16.mxu1 %v11875_v7  ;;  %v2119_v31 = vld [vmem:[#allocation11 + $0x17b8] sm:$0xff] }
 0x4d3   :  { %v11971_v43 = vcombine.high %v2115_v61, %v2119_v31  ;;  %v1979_v54 = vld [vmem:[#allocation11 + $0x1358] sm:$0xff]  ;;  %v11970_v53 = vcombine.low %v2115_v61, %v2119_v31 }
 0x4d4   :  { %8705 = vmatpush1.bf16.msra.mxu0 %v11746_v13  ;;  %v1983_v38 = vld [vmem:[#allocation11 + $0x1378] sm:$0xff] }
 0x4d5   :  { %8746 = vmatpush1.bf16.msra.mxu1 %v11874_v60  ;;  %8706 = vmatprep.subr.bf16.mxu0 %v11739_v25  ;;  %v2107_v23 = vld [vmem:[#allocation11 + $0x1758] sm:$0xff]  ;;  %v11835_v36 = vcombine.high %v1979_v54, %v1983_v38  ;;  %v11834_v37 = vcombine.low %v1979_v54, %v1983_v38 }
 0x4d6   :  { %8747 = vmatprep.subr.bf16.mxu1 %v11867_v14  ;;  %v2111_v3 = vld [vmem:[#allocation11 + $0x1778] sm:$0xff] }
 0x4d7   :  { %v11963_v50 = vcombine.high %v2107_v23, %v2111_v3  ;;  %v1971_v63 = vld [vmem:[#allocation11 + $0x1318] sm:$0xff]  ;;  %v11962_v7 = vcombine.low %v2107_v23, %v2111_v3 }
 0x4d8   :  { %8707 = vmatpush1.bf16.msra.mxu0 %v11738_v2  ;;  %v1975_v24 = vld [vmem:[#allocation11 + $0x1338] sm:$0xff] }
 0x4d9   :  { %8748 = vmatpush1.bf16.msra.mxu1 %v11866_v17  ;;  %8708 = vmatprep.subr.bf16.mxu0 %v11731_v18  ;;  %v2099_v34 = vld [vmem:[#allocation11 + $0x1718] sm:$0xff]  ;;  %v11827_v28 = vcombine.high %v1971_v63, %v1975_v24  ;;  %v11826_v25 = vcombine.low %v1971_v63, %v1975_v24 }
 0x4da   :  { %8749 = vmatprep.subr.bf16.mxu1 %v11859_v21  ;;  %v2103_v58 = vld [vmem:[#allocation11 + $0x1738] sm:$0xff] }
 0x4db   :  { %v11955_v11 = vcombine.high %v2099_v34, %v2103_v58  ;;  %v1963_v0 = vld [vmem:[#allocation11 + $0x12d8] sm:$0xff]  ;;  %v11954_v14 = vcombine.low %v2099_v34, %v2103_v58 }
 0x4dc   :  { %8709 = vmatpush1.bf16.msra.mxu0 %v11730_v22  ;;  %v1967_v52 = vld [vmem:[#allocation11 + $0x12f8] sm:$0xff] }
 0x4dd   :  { %8750 = vmatpush1.bf16.msra.mxu1 %v11858_v15  ;;  %8710 = vmatprep.subr.bf16.mxu0 %v11851_v48  ;;  %v2091_v13 = vld [vmem:[#allocation11 + $0x16d8] sm:$0xff]  ;;  %v11819_v57 = vcombine.high %v1963_v0, %v1967_v52  ;;  %v11818_v18 = vcombine.low %v1963_v0, %v1967_v52 }
 0x4de   :  { %8751 = vmatprep.subr.bf16.mxu1 %v11979_v41  ;;  %v2095_v60 = vld [vmem:[#allocation11 + $0x16f8] sm:$0xff] }
 0x4df   :  { %v11947_v16 = vcombine.high %v2091_v13, %v2095_v60  ;;  %v1955_v20 = vld [vmem:[#allocation11 + $0x1298] sm:$0xff]  ;;  %v11946_v21 = vcombine.low %v2091_v13, %v2095_v60 }
 0x4e0   :  { %8711 = vmatpush2.bf16.msra.mxu0 %v11850_v5  ;;  %v1959_v27 = vld [vmem:[#allocation11 + $0x12b8] sm:$0xff] }
 0x4e1   :  { %8752 = vmatpush2.bf16.msra.mxu1 %v11978_v35  ;;  %8712 = vmatprep.subr.bf16.mxu0 %v11843_v42  ;;  %v2083_v2 = vld [vmem:[#allocation11 + $0x1698] sm:$0xff]  ;;  %v11811_v4 = vcombine.high %v1955_v20, %v1959_v27  ;;  %v11810_v48 = vcombine.low %v1955_v20, %v1959_v27 }
 0x4e2   :  { %8753 = vmatprep.subr.bf16.mxu1 %v11971_v43  ;;  %v2087_v17 = vld [vmem:[#allocation11 + $0x16b8] sm:$0xff] }
 0x4e3   :  { %v11939_v59 = vcombine.high %v2083_v2, %v2087_v17  ;;  %v1947_v30 = vld [vmem:[#allocation11 + $0x1258] sm:$0xff]  ;;  %v11938_v41 = vcombine.low %v2083_v2, %v2087_v17 }
 0x4e4   :  { %8713 = vmatpush2.bf16.msra.mxu0 %v11842_v33  ;;  %v1951_v26 = vld [vmem:[#allocation11 + $0x1278] sm:$0xff] }
 0x4e5   :  { %8754 = vmatpush2.bf16.msra.mxu1 %v11970_v53  ;;  %8714 = vmatprep.subr.bf16.mxu0 %v11835_v36  ;;  %v2075_v22 = vld [vmem:[#allocation11 + $0x1658] sm:$0xff]  ;;  %v11803_v6 = vcombine.high %v1947_v30, %v1951_v26  ;;  %v11802_v42 = vcombine.low %v1947_v30, %v1951_v26 }
 0x4e6   :  { %8755 = vmatprep.subr.bf16.mxu1 %v11963_v50  ;;  %v2079_v15 = vld [vmem:[#allocation11 + $0x1678] sm:$0xff] }
 0x4e7   :  { %v11931_v29 = vcombine.high %v2075_v22, %v2079_v15  ;;  %v1939_v61 = vld [vmem:[#allocation11 + $0x1218] sm:$0xff]  ;;  %v11930_v43 = vcombine.low %v2075_v22, %v2079_v15 }
 0x4e8   :  { %8715 = vmatpush2.bf16.msra.mxu0 %v11834_v37  ;;  %v1943_v31 = vld [vmem:[#allocation11 + $0x1238] sm:$0xff] }
 0x4e9   :  { %8756 = vmatpush2.bf16.msra.mxu1 %v11962_v7  ;;  %8716 = vmatprep.subr.bf16.mxu0 %v11827_v28  ;;  %v2067_v5 = vld [vmem:[#allocation11 + $0x1618] sm:$0xff]  ;;  %v11795_v54 = vcombine.high %v1939_v61, %v1943_v31  ;;  %v11794_v36 = vcombine.low %v1939_v61, %v1943_v31 }
 0x4ea   :  { %8757 = vmatprep.subr.bf16.mxu1 %v11955_v11  ;;  %v2071_v35 = vld [vmem:[#allocation11 + $0x1638] sm:$0xff] }
 0x4eb   :  { %v11923_v38 = vcombine.high %v2067_v5, %v2071_v35  ;;  %v2187_v23 = vld [vmem:[#allocation11 + $0x19d8] sm:$0xff]  ;;  %v11922_v50 = vcombine.low %v2067_v5, %v2071_v35 }
 0x4ec   :  { %8717 = vmatpush2.bf16.msra.mxu0 %v11826_v25  ;;  %v2191_v3 = vld [vmem:[#allocation11 + $0x19f8] sm:$0xff] }
 0x4ed   :  { %8758 = vmatpush2.bf16.msra.mxu1 %v11954_v14  ;;  %8718 = vmatprep.subr.bf16.mxu0 %v11819_v57  ;;  %v2315_v33 = vld [vmem:[#allocation11 + $0x1dd8] sm:$0xff]  ;;  %v12043_v63 = vcombine.high %v2187_v23, %v2191_v3  ;;  %v12042_v37 = vcombine.low %v2187_v23, %v2191_v3 }
 0x4ee   :  { %8759 = vmatprep.subr.bf16.mxu1 %v11947_v16  ;;  %v2319_v53 = vld [vmem:[#allocation11 + $0x1df8] sm:$0xff] }
 0x4ef   :  { %v12171_v24 = vcombine.high %v2315_v33, %v2319_v53  ;;  %v2179_v34 = vld [vmem:[#allocation11 + $0x1998] sm:$0xff]  ;;  %v12170_v11 = vcombine.low %v2315_v33, %v2319_v53 }
 0x4f0   :  { %8719 = vmatpush2.bf16.msra.mxu0 %v11818_v18  ;;  %v2183_v58 = vld [vmem:[#allocation11 + $0x19b8] sm:$0xff] }
 0x4f1   :  { %8760 = vmatpush2.bf16.msra.mxu1 %v11946_v21  ;;  %8720 = vmatprep.subr.bf16.mxu0 %v11811_v4  ;;  %v2307_v7 = vld [vmem:[#allocation11 + $0x1d98] sm:$0xff]  ;;  %v12035_v0 = vcombine.high %v2179_v34, %v2183_v58  ;;  %v12034_v27 = vcombine.low %v2179_v34, %v2183_v58 }
 0x4f2   :  { %8761 = vmatprep.subr.bf16.mxu1 %v11939_v59  ;;  %v2311_v28 = vld [vmem:[#allocation11 + $0x1db8] sm:$0xff] }
 0x4f3   :  { %v2171_v52 = vld [vmem:[#allocation11 + $0x1958] sm:$0xff]  ;;  %v12163_v25 = vcombine.high %v2307_v7, %v2311_v28  ;;  %v12162_v17 = vcombine.low %v2307_v7, %v2311_v28 }
 0x4f4   :  { %8721 = vmatpush2.bf16.msra.mxu0 %v11810_v48  ;;  %v2175_v13 = vld [vmem:[#allocation11 + $0x1978] sm:$0xff] }
 0x4f5   :  { %8762 = vmatpush2.bf16.msra.mxu1 %v11938_v41  ;;  %8722 = vmatprep.subr.bf16.mxu0 %v11803_v6  ;;  %v2299_v14 = vld [vmem:[#allocation11 + $0x1d58] sm:$0xff]  ;;  %v12027_v18 = vcombine.high %v2171_v52, %v2175_v13  ;;  %v12026_v48 = vcombine.low %v2171_v52, %v2175_v13 }
 0x4f6   :  { %8763 = vmatprep.subr.bf16.mxu1 %v11931_v29  ;;  %v2303_v57 = vld [vmem:[#allocation11 + $0x1d78] sm:$0xff] }
 0x4f7   :  { %v2163_v59 = vld [vmem:[#allocation11 + $0x1918] sm:$0xff] }
 0x4f8   :  { %8723 = vmatpush2.bf16.msra.mxu0 %v11802_v42  ;;  %v2167_v30 = vld [vmem:[#allocation11 + $0x1938] sm:$0xff] }
 0x4f9   :  { %8764 = vmatpush2.bf16.msra.mxu1 %v11930_v43  ;;  %8724 = vmatprep.subr.bf16.mxu0 %v11795_v54  ;;  %v2291_v26 = vld [vmem:[#allocation11 + $0x1d18] sm:$0xff]  ;;  %v12019_v6 = vcombine.high %v2163_v59, %v2167_v30  ;;  %v12018_v42 = vcombine.low %v2163_v59, %v2167_v30 }
 0x4fa   :  { %8765 = vmatprep.subr.bf16.mxu1 %v11923_v38  ;;  %v2295_v22 = vld [vmem:[#allocation11 + $0x1d38] sm:$0xff] }
 0x4fb   :  { %v12147_v29 = vcombine.high %v2291_v26, %v2295_v22  ;;  %v2155_v61 = vld [vmem:[#allocation11 + $0x18d8] sm:$0xff]  ;;  %v12146_v43 = vcombine.low %v2291_v26, %v2295_v22 }
 0x4fc   :  { %8725 = vmatpush2.bf16.msra.mxu0 %v11794_v36  ;;  %v2159_v31 = vld [vmem:[#allocation11 + $0x18f8] sm:$0xff] }
 0x4fd   :  { %8766 = vmatpush2.bf16.msra.mxu1 %v11922_v50  ;;  %8776 = vmatprep.subr.bf16.mxu0 %v12043_v63  ;;  %v2283_v5 = vld [vmem:[#allocation11 + $0x1cd8] sm:$0xff]  ;;  %v12011_v54 = vcombine.high %v2155_v61, %v2159_v31  ;;  %v12010_v36 = vcombine.low %v2155_v61, %v2159_v31 }
 0x4fe   :  { %8817 = vmatprep.subr.bf16.mxu1 %v12171_v24  ;;  %v2287_v35 = vld [vmem:[#allocation11 + $0x1cf8] sm:$0xff] }
 0x4ff   :  { %v8482_v60 = vpop.f32.mrf.mxu0  ;;  %8727 = vmatmul.mubr.bf16.vlgmr.msra.gmra.mxu0 %v13603_v55  ;;  %v12139_v38 = vcombine.high %v2283_v5, %v2287_v35  ;;  %v2147_v23 = vld [vmem:[#allocation11 + $0x1898] sm:$0xff]  ;;  %v12138_v50 = vcombine.low %v2283_v5, %v2287_v35 }
 0x500   :  { %v8483_v16 = vadd.f32 %v8482_v60, %v13725_v8  ;;  %v8523_v20 = vpop.f32.mrf.mxu1  ;;  %8768 = vmatmul.mubr.bf16.vlgmr.msra.gmra.mxu1 %v13605_v62  ;;  %8777 = vmatpush1.bf16.msra.mxu0 %v12042_v37  ;;  %v12155_v8 = vcombine.high %v2299_v14, %v2303_v57  ;;  %v2151_v3 = vld [vmem:[#allocation11 + $0x18b8] sm:$0xff] }
 0x501   :  { %8808 = vmatprep.mubr.bf16.mxu0 %v13607_v39  ;;  %8818 = vmatpush1.bf16.msra.mxu1 %v12170_v11  ;;  %v8484_v2 = vpop.f32.mrf.mxu0  ;;  %v2275_v33 = vld [vmem:[#allocation11 + $0x1c98] sm:$0xff]  ;;  %v12003_v63 = vcombine.high %v2147_v23, %v2151_v3  ;;  %v12002_v28 = vcombine.low %v2147_v23, %v2151_v3 }
 0x502   :  { %v13735_v21 = vadd.f32 %v8523_v20, %v8483_v16  ;;  %8849 = vmatprep.mubr.bf16.mxu1 %v13610_v46  ;;  %v8485_v55 = vadd.f32 %v8484_v2, %v13729_v40  ;;  %v8525_v4 = vpop.f32.mrf.mxu1  ;;  %8778 = vmatprep.subr.bf16.mxu0 %v12035_v0  ;;  %v12154_v46 = vcombine.low %v2299_v14, %v2303_v57  ;;  %v2279_v53 = vld [vmem:[#allocation11 + $0x1cb8] sm:$0xff] }
 0x503   :  { %v8486_v62 = vpop.f32.mrf.mxu0  ;;  %8819 = vmatprep.subr.bf16.mxu1 %v12163_v25  ;;  %v12131_v24 = vcombine.high %v2275_v33, %v2279_v53  ;;  %v2139_v34 = vld [vmem:[#allocation11 + $0x1858] sm:$0xff]  ;;  %v12130_v11 = vcombine.low %v2275_v33, %v2279_v53 }
 0x504   :  { %v13739_v39 = vadd.f32 %v8525_v4, %v8485_v55  ;;  %v8527_v15 = vpop.f32.mrf.mxu1  ;;  %8779 = vmatpush1.bf16.msra.mxu0 %v12034_v27  ;;  %v2143_v58 = vld [vmem:[#allocation11 + $0x1878] sm:$0xff] }
 0x505   :  { %8820 = vmatpush1.bf16.msra.mxu1 %v12162_v17  ;;  %v8487_v41 = vpop.f32.mrf.mxu0  ;;  %8780 = vmatprep.subr.bf16.mxu0 %v12027_v18  ;;  %v2267_v37 = vld [vmem:[#allocation11 + $0x1c58] sm:$0xff]  ;;  %v11995_v0 = vcombine.high %v2139_v34, %v2143_v58  ;;  %v11994_v57 = vcombine.low %v2139_v34, %v2143_v58 }
 0x506   :  { %v8528_v40 = vpop.f32.mrf.mxu1  ;;  %8821 = vmatprep.subr.bf16.mxu1 %v12155_v8  ;;  %v2271_v7 = vld [vmem:[#allocation11 + $0x1c78] sm:$0xff] }
 0x507   :  { %v12123_v52 = vcombine.high %v2267_v37, %v2271_v7  ;;  %v2131_v13 = vld [vmem:[#allocation11 + $0x1818] sm:$0xff]  ;;  %v12122_v16 = vcombine.low %v2267_v37, %v2271_v7 }
 0x508   :  { %8781 = vmatpush1.bf16.msra.mxu0 %v12026_v48  ;;  %v2135_v60 = vld [vmem:[#allocation11 + $0x1838] sm:$0xff] }
 0x509   :  { %8822 = vmatpush1.bf16.msra.mxu1 %v12154_v46  ;;  %8782 = vmatprep.subr.bf16.mxu0 %v12019_v6  ;;  %v2259_v25 = vld [vmem:[#allocation11 + $0x1c18] sm:$0xff]  ;;  %v11987_v20 = vcombine.high %v2131_v13, %v2135_v60  ;;  %v11986_v4 = vcombine.low %v2131_v13, %v2135_v60 }
 0x50a   :  { %8823 = vmatprep.subr.bf16.mxu1 %v12147_v29  ;;  %v2263_v14 = vld [vmem:[#allocation11 + $0x1c38] sm:$0xff] }
 0x50b   :  { %v12115_v27 = vcombine.high %v2259_v25, %v2263_v14  ;;  %v2251_v2 = vld [vmem:[#allocation11 + $0x1bd8] sm:$0xff]  ;;  %v12114_v8 = vcombine.low %v2259_v25, %v2263_v14 }
 0x50c   :  { %8783 = vmatpush1.bf16.msra.mxu0 %v12018_v42  ;;  %v2255_v17 = vld [vmem:[#allocation11 + $0x1bf8] sm:$0xff] }
 0x50d   :  { %8824 = vmatpush1.bf16.msra.mxu1 %v12146_v43  ;;  %8784 = vmatprep.subr.bf16.mxu0 %v12011_v54  ;;  %v2379_v18 = vld [vmem:[#allocation11 + $0x1fd8] sm:$0xff]  ;;  %v12107_v59 = vcombine.high %v2251_v2, %v2255_v17  ;;  %v12106_v48 = vcombine.low %v2251_v2, %v2255_v17 }
 0x50e   :  { %8825 = vmatprep.subr.bf16.mxu1 %v12139_v38  ;;  %v2383_v55 = vld [vmem:[#allocation11 + $0x1ff8] sm:$0xff] }
 0x50f   :  { %v12235_v30 = vcombine.high %v2379_v18, %v2383_v55  ;;  %v2243_v62 = vld [vmem:[#allocation11 + $0x1b98] sm:$0xff]  ;;  %v12234_v41 = vcombine.low %v2379_v18, %v2383_v55 }
 0x510   :  { %8785 = vmatpush1.bf16.msra.mxu0 %v12010_v36  ;;  %v2247_v26 = vld [vmem:[#allocation11 + $0x1bb8] sm:$0xff] }
 0x511   :  { %8826 = vmatpush1.bf16.msra.mxu1 %v12138_v50  ;;  %8786 = vmatprep.subr.bf16.mxu0 %v12003_v63  ;;  %v2371_v22 = vld [vmem:[#allocation11 + $0x1f98] sm:$0xff]  ;;  %v12099_v46 = vcombine.high %v2243_v62, %v2247_v26  ;;  %v12098_v5 = vcombine.low %v2243_v62, %v2247_v26 }
 0x512   :  { %8827 = vmatprep.subr.bf16.mxu1 %v12131_v24  ;;  %v2375_v15 = vld [vmem:[#allocation11 + $0x1fb8] sm:$0xff] }
 0x513   :  { %v12227_v6 = vcombine.high %v2371_v22, %v2375_v15  ;;  %v2235_v40 = vld [vmem:[#allocation11 + $0x1b58] sm:$0xff]  ;;  %v12226_v35 = vcombine.low %v2371_v22, %v2375_v15 }
 0x514   :  { %8787 = vmatpush1.bf16.msra.mxu0 %v12002_v28  ;;  %v2239_v29 = vld [vmem:[#allocation11 + $0x1b78] sm:$0xff] }
 0x515   :  { %8828 = vmatpush1.bf16.msra.mxu1 %v12130_v11  ;;  %8788 = vmatprep.subr.bf16.mxu0 %v11995_v0  ;;  %v2363_v61 = vld [vmem:[#allocation11 + $0x1f58] sm:$0xff]  ;;  %v12091_v42 = vcombine.high %v2235_v40, %v2239_v29  ;;  %v12090_v33 = vcombine.low %v2235_v40, %v2239_v29 }
 0x516   :  { %8829 = vmatprep.subr.bf16.mxu1 %v12123_v52  ;;  %v2367_v31 = vld [vmem:[#allocation11 + $0x1f78] sm:$0xff] }
 0x517   :  { %v12219_v43 = vcombine.high %v2363_v61, %v2367_v31  ;;  %v2227_v54 = vld [vmem:[#allocation11 + $0x1b18] sm:$0xff]  ;;  %v12218_v53 = vcombine.low %v2363_v61, %v2367_v31  ;;  %v8859_v61 = vmax.f32 %v13659_v32, 0.0  ;;  %v8861_v31 = vmax.f32 %v13699_v1, 0.0 }
 0x518   :  { %8789 = vmatpush1.bf16.msra.mxu0 %v11994_v57  ;;  %v2231_v38 = vld [vmem:[#allocation11 + $0x1b38] sm:$0xff] }
 0x519   :  { %8830 = vmatpush1.bf16.msra.mxu1 %v12122_v16  ;;  %8790 = vmatprep.subr.bf16.mxu0 %v11987_v20  ;;  %v2355_v23 = vld [vmem:[#allocation11 + $0x1f18] sm:$0xff]  ;;  %v12083_v36 = vcombine.high %v2227_v54, %v2231_v38  ;;  %v12082_v37 = vcombine.low %v2227_v54, %v2231_v38 }
 0x51a   :  { %8831 = vmatprep.subr.bf16.mxu1 %v12115_v27  ;;  %v2359_v3 = vld [vmem:[#allocation11 + $0x1f38] sm:$0xff] }
 0x51b   :  { %v12211_v50 = vcombine.high %v2355_v23, %v2359_v3  ;;  %v2219_v63 = vld [vmem:[#allocation11 + $0x1ad8] sm:$0xff]  ;;  %v12210_v7 = vcombine.low %v2355_v23, %v2359_v3  ;;  %v13745_v23 = vpack.c.bf16 %v8859_v61, %v8859_v61 }
 0x51c   :  { %8791 = vmatpush1.bf16.msra.mxu0 %v11986_v4  ;;  %v2223_v24 = vld [vmem:[#allocation11 + $0x1af8] sm:$0xff] }
 0x51d   :  { %8832 = vmatpush1.bf16.msra.mxu1 %v12114_v8  ;;  %8792 = vmatprep.subr.bf16.mxu0 %v12107_v59  ;;  %v2347_v34 = vld [vmem:[#allocation11 + $0x1ed8] sm:$0xff]  ;;  %v12075_v28 = vcombine.high %v2219_v63, %v2223_v24  ;;  %v12074_v25 = vcombine.low %v2219_v63, %v2223_v24 }
 0x51e   :  { %8833 = vmatprep.subr.bf16.mxu1 %v12235_v30  ;;  %v2351_v58 = vld [vmem:[#allocation11 + $0x1ef8] sm:$0xff] }
 0x51f   :  { %v12203_v11 = vcombine.high %v2347_v34, %v2351_v58  ;;  %v2211_v0 = vld [vmem:[#allocation11 + $0x1a98] sm:$0xff]  ;;  %v12202_v14 = vcombine.low %v2347_v34, %v2351_v58 }
 0x520   :  { %8793 = vmatpush2.bf16.msra.mxu0 %v12106_v48  ;;  %v2215_v52 = vld [vmem:[#allocation11 + $0x1ab8] sm:$0xff] }
 0x521   :  { %8834 = vmatpush2.bf16.msra.mxu1 %v12234_v41  ;;  %8794 = vmatprep.subr.bf16.mxu0 %v12099_v46  ;;  %v2339_v13 = vld [vmem:[#allocation11 + $0x1e98] sm:$0xff]  ;;  %v12067_v57 = vcombine.high %v2211_v0, %v2215_v52  ;;  %v12066_v18 = vcombine.low %v2211_v0, %v2215_v52 }
 0x522   :  { %8835 = vmatprep.subr.bf16.mxu1 %v12227_v6  ;;  %v2343_v60 = vld [vmem:[#allocation11 + $0x1eb8] sm:$0xff] }
 0x523   :  { %v12195_v16 = vcombine.high %v2339_v13, %v2343_v60  ;;  %v2203_v20 = vld [vmem:[#allocation11 + $0x1a58] sm:$0xff]  ;;  %v12194_v55 = vcombine.low %v2339_v13, %v2343_v60 }
 0x524   :  { %8795 = vmatpush2.bf16.msra.mxu0 %v12098_v5  ;;  %v2207_v27 = vld [vmem:[#allocation11 + $0x1a78] sm:$0xff]  ;;  %v13007_v5 = vld [vmem:[#allocation13] sm:$0xff] }
 0x525   :  { %8836 = vmatpush2.bf16.msra.mxu1 %v12226_v35  ;;  %8796 = vmatprep.subr.bf16.mxu0 %v12091_v42  ;;  %v2331_v2 = vld [vmem:[#allocation11 + $0x1e58] sm:$0xff]  ;;  %v12059_v4 = vcombine.high %v2203_v20, %v2207_v27  ;;  %v12058_v22 = vcombine.low %v2203_v20, %v2207_v27  ;;  %v2413_v35 = vrot.slane %v13007_v5, %v13495_v12 }
 0x526   :  { %8837 = vmatprep.subr.bf16.mxu1 %v12219_v43  ;;  %v2335_v17 = vld [vmem:[#allocation11 + $0x1e78] sm:$0xff]  ;;  %v2417_v54 = vrot.slane %v13007_v5, %v13499_v19 }
 0x527   :  { %v12187_v8 = vcombine.high %v2331_v2, %v2335_v17  ;;  %v2195_v59 = vld [vmem:[#allocation11 + $0x1a18] sm:$0xff]  ;;  %v12186_v15 = vcombine.low %v2331_v2, %v2335_v17 }
 0x528   :  { %8797 = vmatpush2.bf16.msra.mxu0 %v12090_v33  ;;  %v2199_v30 = vld [vmem:[#allocation11 + $0x1a38] sm:$0xff]  ;;  %v13748_v33 = vpack.c.bf16 %v8861_v31, %v8861_v31 }
 0x529   :  { %8838 = vmatpush2.bf16.msra.mxu1 %v12218_v53  ;;  %8798 = vmatprep.subr.bf16.mxu0 %v12083_v36  ;;  %v2323_v62 = vld [vmem:[#allocation11 + $0x1e18] sm:$0xff]  ;;  %v12051_v48 = vcombine.high %v2195_v59, %v2199_v30  ;;  %v12050_v46 = vcombine.low %v2195_v59, %v2199_v30 }
 0x52a   :  { %8839 = vmatprep.subr.bf16.mxu1 %v12211_v50  ;;  %v2327_v26 = vld [vmem:[#allocation11 + $0x1e38] sm:$0xff] }
 0x52b   :  { %v12179_v41 = vcombine.high %v2323_v62, %v2327_v26  ;;  %v12178_v6 = vcombine.low %v2323_v62, %v2327_v26  ;;  %v12591_v40 = vld [vmem:[#allocation14 + $0xe4] ss:$16 sps:$4 sm:$0xff]   ;;  %v12589_v42 = vld [vmem:[#allocation14 + $0xe0] ss:$16 sps:$4 sm:$0xff]  }
 0x52c   :  { %8799 = vmatpush2.bf16.msra.mxu0 %v12082_v37  ;;  %v12594_v29 = vld [vmem:[#allocation14 + $0x2e4] ss:$16 sps:$4 sm:$0xff]   ;;  %v12592_v43 = vld [vmem:[#allocation14 + $0x2e0] ss:$16 sps:$4 sm:$0xff]  }
 0x52d   :  { %8840 = vmatpush2.bf16.msra.mxu1 %v12210_v7  ;;  %8800 = vmatprep.subr.bf16.mxu0 %v12075_v28  ;;  %v12597_v38 = vld [vmem:[#allocation14 + $0xc4] ss:$16 sps:$4 sm:$0xff]   ;;  %v12595_v12 = vld [vmem:[#allocation14 + $0xc0] ss:$16 sps:$4 sm:$0xff]  }
 0x52e   :  { %8841 = vmatprep.subr.bf16.mxu1 %v12203_v11  ;;  %v12600_v32 = vld [vmem:[#allocation14 + $0x2c4] ss:$16 sps:$4 sm:$0xff]   ;;  %v12598_v19 = vld [vmem:[#allocation14 + $0x2c0] ss:$16 sps:$4 sm:$0xff]  }
 0x52f   :  { %v12603_v50 = vld [vmem:[#allocation14 + $0xa4] ss:$16 sps:$4 sm:$0xff]   ;;  %v12601_v7 = vld [vmem:[#allocation14 + $0xa0] ss:$16 sps:$4 sm:$0xff]  }
 0x530   :  { %8801 = vmatpush2.bf16.msra.mxu0 %v12074_v25  ;;  %v12606_v34 = vld [vmem:[#allocation14 + $0x2a4] ss:$16 sps:$4 sm:$0xff]   ;;  %v12604_v11 = vld [vmem:[#allocation14 + $0x2a0] ss:$16 sps:$4 sm:$0xff]  }
 0x531   :  { %8842 = vmatpush2.bf16.msra.mxu1 %v12202_v14  ;;  %8802 = vmatprep.subr.bf16.mxu0 %v12067_v57  ;;  %v12609_v0 = vld [vmem:[#allocation14 + $0x84] ss:$16 sps:$4 sm:$0xff]   ;;  %v12607_v60 = vld [vmem:[#allocation14 + $0x80] ss:$16 sps:$4 sm:$0xff]  }
 0x532   :  { %8843 = vmatprep.subr.bf16.mxu1 %v12195_v16  ;;  %v12612_v13 = vld [vmem:[#allocation14 + $0x284] ss:$16 sps:$4 sm:$0xff]   ;;  %v12610_v25 = vld [vmem:[#allocation14 + $0x280] ss:$16 sps:$4 sm:$0xff]  }
 0x533   :  { %v12615_v14 = vld [vmem:[#allocation14 + $0x64] ss:$16 sps:$4 sm:$0xff]   ;;  %v12613_v16 = vld [vmem:[#allocation14 + $0x60] ss:$16 sps:$4 sm:$0xff]  }
 0x534   :  { %8803 = vmatpush2.bf16.msra.mxu0 %v12066_v18  ;;  %v12618_v57 = vld [vmem:[#allocation14 + $0x264] ss:$16 sps:$4 sm:$0xff]   ;;  %v12616_v20 = vld [vmem:[#allocation14 + $0x260] ss:$16 sps:$4 sm:$0xff]  }
 0x535   :  { %8844 = vmatpush2.bf16.msra.mxu1 %v12194_v55  ;;  %8804 = vmatprep.subr.bf16.mxu0 %v12059_v4  ;;  %v12621_v27 = vld [vmem:[#allocation14 + $0x44] ss:$16 sps:$4 sm:$0xff]   ;;  %v12619_v17 = vld [vmem:[#allocation14 + $0x40] ss:$16 sps:$4 sm:$0xff]  }
 0x536   :  { %8845 = vmatprep.subr.bf16.mxu1 %v12187_v8  ;;  %v12624_v2 = vld [vmem:[#allocation14 + $0x244] ss:$16 sps:$4 sm:$0xff]   ;;  %v12622_v18 = vld [vmem:[#allocation14 + $0x240] ss:$16 sps:$4 sm:$0xff]  }
 0x537   :  { %v12627_v55 = vld [vmem:[#allocation14 + $0x24] ss:$16 sps:$4 sm:$0xff]   ;;  %v12625_v8 = vld [vmem:[#allocation14 + $0x20] ss:$16 sps:$4 sm:$0xff]  }
 0x538   :  { %8805 = vmatpush2.bf16.msra.mxu0 %v12058_v22  ;;  %v12630_v4 = vld [vmem:[#allocation14 + $0x224] ss:$16 sps:$4 sm:$0xff]   ;;  %v12628_v59 = vld [vmem:[#allocation14 + $0x220] ss:$16 sps:$4 sm:$0xff]  }
 0x539   :  { %8846 = vmatpush2.bf16.msra.mxu1 %v12186_v15  ;;  %8806 = vmatprep.subr.bf16.mxu0 %v12051_v48  ;;  %v12633_v30 = vld [vmem:[#allocation14 + $0x4] ss:$16 sps:$4 sm:$0xff]   ;;  %v12631_v26 = vld [vmem:[#allocation14] ss:$16 sps:$4 sm:$0xff]  }
 0x53a   :  { %8847 = vmatprep.subr.bf16.mxu1 %v12179_v41  ;;  %v12636_v62 = vld [vmem:[#allocation14 + $0x204] ss:$16 sps:$4 sm:$0xff]   ;;  %v12634_v22 = vld [vmem:[#allocation14 + $0x200] ss:$16 sps:$4 sm:$0xff]  }
 0x53b   :  { %v12639_v15 = vld [vmem:[#allocation14 + $0x1e4] ss:$16 sps:$4 sm:$0xff]   ;;  %v12637_v41 = vld [vmem:[#allocation14 + $0x1e0] ss:$16 sps:$4 sm:$0xff]  }
 0x53c   :  { %8807 = vmatpush2.bf16.msra.mxu0 %v12050_v46  ;;  %v12642_v48 = vld [vmem:[#allocation14 + $0x3e4] ss:$16 sps:$4 sm:$0xff]   ;;  %v12640_v46 = vld [vmem:[#allocation14 + $0x3e0] ss:$16 sps:$4 sm:$0xff]  }
 0x53d   :  { %8848 = vmatpush2.bf16.msra.mxu1 %v12178_v6  ;;  %10432 = vmatprep.subr.bf16.mxu0 %v12591_v40  ;;  %v12645_v6 = vld [vmem:[#allocation14 + $0x1c4] ss:$16 sps:$4 sm:$0xff]   ;;  %v12646_v61 = vld [vmem:[#allocation14 + $0x3c0] ss:$16 sps:$4 sm:$0xff]  }
 0x53e   :  { %10473 = vmatprep.subr.bf16.mxu1 %v12594_v29  ;;  %v12648_v40 = vld [vmem:[#allocation14 + $0x3c4] ss:$16 sps:$4 sm:$0xff]   ;;  %v12643_v29 = vld [vmem:[#allocation14 + $0x1c0] ss:$16 sps:$4 sm:$0xff]  }
 0x53f   :  { %v8564_v3 = vpop.f32.mrf.mxu0  ;;  %8809 = vmatmul.mubr.bf16.vlgmr.msra.gmra.mxu0 %v13618_v9  ;;  %v12651_v31 = vld [vmem:[#allocation14 + $0x1a4] ss:$16 sps:$4 sm:$0xff]  }
 0x540   :  { %v8565_v1 = vadd.f32 %v8564_v3, %v2413_v35  ;;  %v8605_v53 = vpop.f32.mrf.mxu1  ;;  %8850 = vmatmul.mubr.bf16.vlgmr.msra.gmra.mxu1 %v13620_v10  ;;  %10433 = vmatpush1.bf16.msra.mxu0 %v12589_v42  ;;  %v12654_v5 = vld [vmem:[#allocation14 + $0x3a4] ss:$16 sps:$4 sm:$0xff]   ;;  %v12649_v35 = vld [vmem:[#allocation14 + $0x1a0] ss:$16 sps:$4 sm:$0xff]  }
 0x541   :  { %10464 = vmatprep.mubr.bf16.mxu0 %v13745_v23  ;;  %10474 = vmatpush1.bf16.msra.mxu1 %v12592_v43  ;;  %v8566_v36 = vpop.f32.mrf.mxu0  ;;  %v12652_v42 = vld [vmem:[#allocation14 + $0x3a0] ss:$16 sps:$4 sm:$0xff]   ;;  %v12657_v43 = vld [vmem:[#allocation14 + $0x184] ss:$16 sps:$4 sm:$0xff]  }
 0x542   :  { %v13752_v63 = vadd.f32 %v8605_v53, %v8565_v1  ;;  %10505 = vmatprep.mubr.bf16.mxu1 %v13748_v33  ;;  %v8567_v9 = vadd.f32 %v8566_v36, %v2417_v54  ;;  %v8607_v24 = vpop.f32.mrf.mxu1  ;;  %10434 = vmatprep.subr.bf16.mxu0 %v12597_v38  ;;  %v12660_v54 = vld [vmem:[#allocation14 + $0x384] ss:$16 sps:$4 sm:$0xff]   ;;  %v12655_v38 = vld [vmem:[#allocation14 + $0x180] ss:$16 sps:$4 sm:$0xff]  }
 0x543   :  { %v8568_v58 = vpop.f32.mrf.mxu0  ;;  %10475 = vmatprep.subr.bf16.mxu1 %v12600_v32  ;;  %v12658_v3 = vld [vmem:[#allocation14 + $0x380] ss:$16 sps:$4 sm:$0xff]   ;;  %v12663_v32 = vld [vmem:[#allocation14 + $0x164] ss:$16 sps:$4 sm:$0xff]  }
 0x544   :  { %v13755_v37 = vadd.f32 %v8607_v24, %v8567_v9  ;;  %v8609_v10 = vpop.f32.mrf.mxu1  ;;  %10435 = vmatpush1.bf16.msra.mxu0 %v12595_v12  ;;  %v12666_v1 = vld [vmem:[#allocation14 + $0x364] ss:$16 sps:$4 sm:$0xff]   ;;  %v12661_v53 = vld [vmem:[#allocation14 + $0x160] ss:$16 sps:$4 sm:$0xff]  }
 0x545   :  { %10476 = vmatpush1.bf16.msra.mxu1 %v12598_v19  ;;  %v8569_v28 = vpop.f32.mrf.mxu0  ;;  %10436 = vmatprep.subr.bf16.mxu0 %v12603_v50  ;;  %v12664_v12 = vld [vmem:[#allocation14 + $0x360] ss:$16 sps:$4 sm:$0xff]   ;;  %v12669_v36 = vld [vmem:[#allocation14 + $0x144] ss:$16 sps:$4 sm:$0xff]  }
 0x546   :  { %v8610_v52 = vpop.f32.mrf.mxu1  ;;  %10477 = vmatprep.subr.bf16.mxu1 %v12606_v34  ;;  %v12672_v19 = vld [vmem:[#allocation14 + $0x344] ss:$16 sps:$4 sm:$0xff]   ;;  %v12667_v50 = vld [vmem:[#allocation14 + $0x140] ss:$16 sps:$4 sm:$0xff]  }
 0x547   :  { %v12670_v9 = vld [vmem:[#allocation14 + $0x340] ss:$16 sps:$4 sm:$0xff]   ;;  %v12675_v24 = vld [vmem:[#allocation14 + $0x124] ss:$16 sps:$4 sm:$0xff]  }
 0x548   :  { %10437 = vmatpush1.bf16.msra.mxu0 %v12601_v7  ;;  %v12678_v34 = vld [vmem:[#allocation14 + $0x324] ss:$16 sps:$4 sm:$0xff]   ;;  %v12673_v58 = vld [vmem:[#allocation14 + $0x120] ss:$16 sps:$4 sm:$0xff]  }
 0x549   :  { %10478 = vmatpush1.bf16.msra.mxu1 %v12604_v11  ;;  %10438 = vmatprep.subr.bf16.mxu0 %v12609_v0  ;;  %v12676_v10 = vld [vmem:[#allocation14 + $0x320] ss:$16 sps:$4 sm:$0xff]   ;;  %v12681_v7 = vld [vmem:[#allocation14 + $0x104] ss:$16 sps:$4 sm:$0xff]   ;;  %v8858_v0 = vmax.f32 %v13655_v56, 0.0 }
 0x54a   :  { %10479 = vmatprep.subr.bf16.mxu1 %v12612_v13  ;;  %v12684_v28 = vld [vmem:[#allocation14 + $0x304] ss:$16 sps:$4 sm:$0xff]   ;;  %v12679_v11 = vld [vmem:[#allocation14 + $0x100] ss:$16 sps:$4 sm:$0xff]  }
 0x54b   :  { %v12682_v52 = vld [vmem:[#allocation14 + $0x300] ss:$16 sps:$4 sm:$0xff]   ;;  %v12687_v13 = vld [vmem:[#allocation14 + $0x4e4] ss:$16 sps:$4 sm:$0xff]  }
 0x54c   :  { %10439 = vmatpush1.bf16.msra.mxu0 %v12607_v60  ;;  %v8860_v60 = vmax.f32 %v13695_v45, 0.0  ;;  %v12742_v56 = vld [vmem:[#allocation14 + $0x6e0] ss:$16 sps:$4 sm:$0xff]   ;;  %v12750_v45 = vld [vmem:[#allocation14 + $0x6c4] ss:$16 sps:$4 sm:$0xff]  }
 0x54d   :  { %10480 = vmatpush1.bf16.msra.mxu1 %v12610_v25  ;;  %10440 = vmatprep.subr.bf16.mxu0 %v12615_v14  ;;  %v12744_v25 = vld [vmem:[#allocation14 + $0x6e4] ss:$16 sps:$4 sm:$0xff]   ;;  %v8863_v14 = vmax.f32 %v13739_v39, 0.0 }
 0x54e   :  { %10481 = vmatprep.subr.bf16.mxu1 %v12618_v57  ;;  %v12685_v57 = vld [vmem:[#allocation14 + $0x4e0] ss:$16 sps:$4 sm:$0xff]  }
 0x550   :  { %10441 = vmatpush1.bf16.msra.mxu0 %v12613_v16  ;;  %v13760_v16 = vpack.c.bf16 %v8858_v0, %v8858_v0  ;;  %v12712_v0 = vld [vmem:[#allocation14 + $0x5c0] ss:$16 sps:$4 sm:$0xff]  }
 0x551   :  { %10482 = vmatpush1.bf16.msra.mxu1 %v12616_v20  ;;  %10442 = vmatprep.subr.bf16.mxu0 %v12621_v27  ;;  %v12690_v20 = vld [vmem:[#allocation14 + $0x4c4] ss:$16 sps:$4 sm:$0xff]   ;;  %v13762_v27 = vpack.c.bf16 %v8860_v60, %v8860_v60 }
 0x552   :  { %10483 = vmatprep.subr.bf16.mxu1 %v12624_v2  ;;  %v13764_v2 = vpack.c.bf16 %v8863_v14, %v8863_v14  ;;  %v12804_v60 = vld [vmem:[#allocation14 + $0x7a4] ss:$16 sps:$4 sm:$0xff]  }
 0x553   :  { %v12720_v14 = vld [vmem:[#allocation14 + $0x584] ss:$16 sps:$4 sm:$0xff]  }
 0x554   :  { %10443 = vmatpush1.bf16.msra.mxu0 %v12619_v17 }
 0x555   :  { %10484 = vmatpush1.bf16.msra.mxu1 %v12622_v18  ;;  %10444 = vmatprep.subr.bf16.mxu0 %v12627_v55  ;;  %v12688_v55 = vld [vmem:[#allocation14 + $0x4c0] ss:$16 sps:$4 sm:$0xff]  }
 0x556   :  { %10485 = vmatprep.subr.bf16.mxu1 %v12630_v4 }
 0x558   :  { %10445 = vmatpush1.bf16.msra.mxu0 %v12625_v8  ;;  %v12693_v8 = vld [vmem:[#allocation14 + $0x4a4] ss:$16 sps:$4 sm:$0xff]  }
 0x559   :  { %10486 = vmatpush1.bf16.msra.mxu1 %v12628_v59  ;;  %10446 = vmatprep.subr.bf16.mxu0 %v12633_v30 }
 0x55a   :  { %10487 = vmatprep.subr.bf16.mxu1 %v12636_v62 }
 0x55c   :  { %10447 = vmatpush1.bf16.msra.mxu0 %v12631_v26  ;;  %v12748_v26 = vld [vmem:[#allocation14 + $0x6c0] ss:$16 sps:$4 sm:$0xff]  }
 0x55d   :  { %10488 = vmatpush1.bf16.msra.mxu1 %v12634_v22  ;;  %10448 = vmatprep.subr.bf16.mxu0 %v12639_v15 }
 0x55e   :  { %10489 = vmatprep.subr.bf16.mxu1 %v12642_v48 }
 0x560   :  { %10449 = vmatpush2.bf16.msra.mxu0 %v12637_v41  ;;  %v12691_v41 = vld [vmem:[#allocation14 + $0x4a0] ss:$16 sps:$4 sm:$0xff]  }
 0x561   :  { %10490 = vmatpush2.bf16.msra.mxu1 %v12640_v46  ;;  %10450 = vmatprep.subr.bf16.mxu0 %v12645_v6  ;;  %v12696_v6 = vld [vmem:[#allocation14 + $0x484] ss:$16 sps:$4 sm:$0xff]  }
 0x562   :  { %10491 = vmatprep.subr.bf16.mxu1 %v12648_v40 }
 0x564   :  { %10451 = vmatpush2.bf16.msra.mxu0 %v12643_v29  ;;  %v12754_v29 = vld [vmem:[#allocation14 + $0x6a0] ss:$16 sps:$4 sm:$0xff]  }
 0x565   :  { %10492 = vmatpush2.bf16.msra.mxu1 %v12646_v61  ;;  %10452 = vmatprep.subr.bf16.mxu0 %v12651_v31  ;;  %v12762_v61 = vld [vmem:[#allocation14 + $0x684] ss:$16 sps:$4 sm:$0xff]  }
 0x566   :  { %10493 = vmatprep.subr.bf16.mxu1 %v12654_v5  ;;  %v12699_v31 = vld [vmem:[#allocation14 + $0x464] ss:$16 sps:$4 sm:$0xff]   ;;  %v12760_v5 = vld [vmem:[#allocation14 + $0x680] ss:$16 sps:$4 sm:$0xff]  }
 0x568   :  { %10453 = vmatpush2.bf16.msra.mxu0 %v12649_v35  ;;  %v12768_v35 = vld [vmem:[#allocation14 + $0x664] ss:$16 sps:$4 sm:$0xff]  }
 0x569   :  { %10494 = vmatpush2.bf16.msra.mxu1 %v12652_v42  ;;  %10454 = vmatprep.subr.bf16.mxu0 %v12657_v43  ;;  %v12697_v42 = vld [vmem:[#allocation14 + $0x460] ss:$16 sps:$4 sm:$0xff]   ;;  %v12702_v43 = vld [vmem:[#allocation14 + $0x444] ss:$16 sps:$4 sm:$0xff]  }
 0x56a   :  { %10495 = vmatprep.subr.bf16.mxu1 %v12660_v54  ;;  %v12766_v54 = vld [vmem:[#allocation14 + $0x660] ss:$16 sps:$4 sm:$0xff]  }
 0x56c   :  { %10455 = vmatpush2.bf16.msra.mxu0 %v12655_v38  ;;  %v12774_v38 = vld [vmem:[#allocation14 + $0x644] ss:$16 sps:$4 sm:$0xff]  }
 0x56d   :  { %10496 = vmatpush2.bf16.msra.mxu1 %v12658_v3  ;;  %10456 = vmatprep.subr.bf16.mxu0 %v12663_v32  ;;  %v12700_v3 = vld [vmem:[#allocation14 + $0x440] ss:$16 sps:$4 sm:$0xff]   ;;  %v12705_v32 = vld [vmem:[#allocation14 + $0x424] ss:$16 sps:$4 sm:$0xff]  }
 0x56e   :  { %10497 = vmatprep.subr.bf16.mxu1 %v12666_v1  ;;  %v12772_v1 = vld [vmem:[#allocation14 + $0x640] ss:$16 sps:$4 sm:$0xff]  }
 0x570   :  { %10457 = vmatpush2.bf16.msra.mxu0 %v12661_v53  ;;  %v12780_v53 = vld [vmem:[#allocation14 + $0x624] ss:$16 sps:$4 sm:$0xff]  }
 0x571   :  { %10498 = vmatpush2.bf16.msra.mxu1 %v12664_v12  ;;  %10458 = vmatprep.subr.bf16.mxu0 %v12669_v36  ;;  %v12703_v12 = vld [vmem:[#allocation14 + $0x420] ss:$16 sps:$4 sm:$0xff]   ;;  %v12708_v36 = vld [vmem:[#allocation14 + $0x404] ss:$16 sps:$4 sm:$0xff]  }
 0x572   :  { %10499 = vmatprep.subr.bf16.mxu1 %v12672_v19  ;;  %v12778_v19 = vld [vmem:[#allocation14 + $0x620] ss:$16 sps:$4 sm:$0xff]  }
 0x574   :  { %10459 = vmatpush2.bf16.msra.mxu0 %v12667_v50  ;;  %v12786_v50 = vld [vmem:[#allocation14 + $0x604] ss:$16 sps:$4 sm:$0xff]  }
 0x575   :  { %10500 = vmatpush2.bf16.msra.mxu1 %v12670_v9  ;;  %10460 = vmatprep.subr.bf16.mxu0 %v12675_v24  ;;  %v12706_v9 = vld [vmem:[#allocation14 + $0x400] ss:$16 sps:$4 sm:$0xff]   ;;  %v12711_v24 = vld [vmem:[#allocation14 + $0x5e4] ss:$16 sps:$4 sm:$0xff]  }
 0x576   :  { %10501 = vmatprep.subr.bf16.mxu1 %v12678_v34  ;;  %v12784_v34 = vld [vmem:[#allocation14 + $0x600] ss:$16 sps:$4 sm:$0xff]  }
 0x578   :  { %10461 = vmatpush2.bf16.msra.mxu0 %v12673_v58  ;;  %v12792_v58 = vld [vmem:[#allocation14 + $0x7e4] ss:$16 sps:$4 sm:$0xff]  }
 0x579   :  { %10502 = vmatpush2.bf16.msra.mxu1 %v12676_v10  ;;  %10462 = vmatprep.subr.bf16.mxu0 %v12681_v7  ;;  %v12709_v10 = vld [vmem:[#allocation14 + $0x5e0] ss:$16 sps:$4 sm:$0xff]   ;;  %v12714_v7 = vld [vmem:[#allocation14 + $0x5c4] ss:$16 sps:$4 sm:$0xff]  }
 0x57a   :  { %10503 = vmatprep.subr.bf16.mxu1 %v12684_v28  ;;  %v12790_v28 = vld [vmem:[#allocation14 + $0x7e0] ss:$16 sps:$4 sm:$0xff]  }
 0x57c   :  { %10463 = vmatpush2.bf16.msra.mxu0 %v12679_v11  ;;  %v12798_v11 = vld [vmem:[#allocation14 + $0x7c4] ss:$16 sps:$4 sm:$0xff]  }
 0x57d   :  { %10504 = vmatpush2.bf16.msra.mxu1 %v12682_v52  ;;  %10514 = vmatprep.subr.bf16.mxu0 %v12687_v13  ;;  %v12717_v52 = vld [vmem:[#allocation14 + $0x5a4] ss:$16 sps:$4 sm:$0xff]   ;;  %v12796_v13 = vld [vmem:[#allocation14 + $0x7c0] ss:$16 sps:$4 sm:$0xff]  }
 0x57e   :  { %10555 = vmatprep.subr.bf16.mxu1 %v12744_v25  ;;  %v12715_v25 = vld [vmem:[#allocation14 + $0x5a0] ss:$16 sps:$4 sm:$0xff]  }
 0x57f   :  { %v8646_v17 = vpop.f32.mrf.mxu0  ;;  %10465 = vmatmul.mubr.bf16.vlgmr.msra.gmra.mxu0 %v13760_v16 }
 0x580   :  { %v8647_v18 = vadd.f32 %v8646_v17, %v13752_v63  ;;  %v8687_v39 = vpop.f32.mrf.mxu1  ;;  %10506 = vmatmul.mubr.bf16.vlgmr.msra.gmra.mxu1 %v13762_v27  ;;  %10515 = vmatpush1.bf16.msra.mxu0 %v12685_v57  ;;  %v12756_v63 = vld [vmem:[#allocation14 + $0x6a4] ss:$16 sps:$4 sm:$0xff]   ;;  %v12802_v57 = vld [vmem:[#allocation14 + $0x7a0] ss:$16 sps:$4 sm:$0xff]  }
 0x581   :  { %10546 = vmatprep.mubr.bf16.mxu0 %v13764_v2  ;;  %v8648_v4 = vpop.f32.mrf.mxu0  ;;  %10516 = vmatprep.subr.bf16.mxu0 %v12690_v20  ;;  %v12810_v20 = vld [vmem:[#allocation14 + $0x784] ss:$16 sps:$4 sm:$0xff]  }
 0x582   :  { %v13770_v59 = vadd.f32 %v8687_v39, %v8647_v18  ;;  %v8649_v30 = vadd.f32 %v8648_v4, %v13755_v37  ;;  %v8689_v62 = vpop.f32.mrf.mxu1  ;;  %10556 = vmatpush1.bf16.msra.mxu1 %v12742_v56  ;;  %v12694_v37 = vld [vmem:[#allocation14 + $0x480] ss:$16 sps:$4 sm:$0xff]   ;;  %v12723_v17 = vld [vmem:[#allocation14 + $0x564] ss:$16 sps:$4 sm:$0xff]  }
 0x583   :  { %v8650_v22 = vpop.f32.mrf.mxu0  ;;  %10557 = vmatprep.subr.bf16.mxu1 %v12750_v45  ;;  %v12718_v56 = vld [vmem:[#allocation14 + $0x580] ss:$16 sps:$4 sm:$0xff]   ;;  %v12816_v18 = vld [vmem:[#allocation14 + $0x764] ss:$16 sps:$4 sm:$0xff]  }
 0x584   :  { %v13773_v15 = vadd.f32 %v8689_v62, %v8649_v30  ;;  %v8691_v48 = vpop.f32.mrf.mxu1  ;;  %10517 = vmatpush1.bf16.msra.mxu0 %v12688_v55  ;;  %v12808_v45 = vld [vmem:[#allocation14 + $0x780] ss:$16 sps:$4 sm:$0xff]   ;;  %v12726_v55 = vld [vmem:[#allocation14 + $0x544] ss:$16 sps:$4 sm:$0xff]  }
 0x585   :  { %v8651_v46 = vpop.f32.mrf.mxu0  ;;  %10518 = vmatprep.subr.bf16.mxu0 %v12693_v8  ;;  %v12721_v39 = vld [vmem:[#allocation14 + $0x560] ss:$16 sps:$4 sm:$0xff]   ;;  %v12822_v8 = vld [vmem:[#allocation14 + $0x744] ss:$16 sps:$4 sm:$0xff]  }
 0x586   :  { %v8692_v40 = vpop.f32.mrf.mxu1  ;;  %10558 = vmatpush1.bf16.msra.mxu1 %v12748_v26  ;;  %v12814_v4 = vld [vmem:[#allocation14 + $0x760] ss:$16 sps:$4 sm:$0xff]   ;;  %v12729_v62 = vld [vmem:[#allocation14 + $0x524] ss:$16 sps:$4 sm:$0xff]  }
 0x587   :  { %10559 = vmatprep.subr.bf16.mxu1 %v12756_v63  ;;  %v12724_v30 = vld [vmem:[#allocation14 + $0x540] ss:$16 sps:$4 sm:$0xff]   ;;  %v12828_v22 = vld [vmem:[#allocation14 + $0x724] ss:$16 sps:$4 sm:$0xff]   ;;  %v8862_v40 = vmax.f32 %v13735_v21, 0.0 }
 0x588   :  { %10519 = vmatpush1.bf16.msra.mxu0 %v12691_v41  ;;  %v12820_v26 = vld [vmem:[#allocation14 + $0x740] ss:$16 sps:$4 sm:$0xff]   ;;  %v12732_v48 = vld [vmem:[#allocation14 + $0x504] ss:$16 sps:$4 sm:$0xff]  }
 0x589   :  { %10520 = vmatprep.subr.bf16.mxu0 %v12696_v6  ;;  %v12727_v63 = vld [vmem:[#allocation14 + $0x520] ss:$16 sps:$4 sm:$0xff]   ;;  %v12834_v46 = vld [vmem:[#allocation14 + $0x704] ss:$16 sps:$4 sm:$0xff]  }
 0x58a   :  { %10560 = vmatpush1.bf16.msra.mxu1 %v12754_v29  ;;  %v12826_v41 = vld [vmem:[#allocation14 + $0x720] ss:$16 sps:$4 sm:$0xff]   ;;  %v12735_v29 = vld [vmem:[#allocation14 + $0xec] ss:$16 sps:$4 sm:$0xff]  }
 0x58b   :  { %10561 = vmatprep.subr.bf16.mxu1 %v12762_v61  ;;  %v12730_v6 = vld [vmem:[#allocation14 + $0x500] ss:$16 sps:$4 sm:$0xff]  }
 0x58c   :  { %10521 = vmatpush1.bf16.msra.mxu0 %v12694_v37  ;;  %v12832_v61 = vld [vmem:[#allocation14 + $0x700] ss:$16 sps:$4 sm:$0xff]   ;;  %v12840_v37 = vld [vmem:[#allocation14 + $0x2ec] ss:$16 sps:$4 sm:$0xff]  }
 0x58d   :  { %10522 = vmatprep.subr.bf16.mxu0 %v12699_v31  ;;  %v12733_v31 = vld [vmem:[#allocation14 + $0xe8] ss:$16 sps:$4 sm:$0xff]  }
 0x58e   :  { %10562 = vmatpush1.bf16.msra.mxu1 %v12760_v5  ;;  %v13776_v5 = vpack.c.bf16 %v8862_v40, %v8862_v40 }
 0x58f   :  { %10563 = vmatprep.subr.bf16.mxu1 %v12768_v35  ;;  %v12738_v35 = vld [vmem:[#allocation14 + $0xcc] ss:$16 sps:$4 sm:$0xff]  }
 0x590   :  { %10523 = vmatpush1.bf16.msra.mxu0 %v12697_v42 }
 0x591   :  { %10524 = vmatprep.subr.bf16.mxu0 %v12702_v43 }
 0x592   :  { %10564 = vmatpush1.bf16.msra.mxu1 %v12766_v54  ;;  %v12736_v54 = vld [vmem:[#allocation14 + $0xc8] ss:$16 sps:$4 sm:$0xff]  }
 0x593   :  { %10565 = vmatprep.subr.bf16.mxu1 %v12774_v38 }
 0x594   :  { %10525 = vmatpush1.bf16.msra.mxu0 %v12700_v3  ;;  %v12741_v3 = vld [vmem:[#allocation14 + $0xac] ss:$16 sps:$4 sm:$0xff]  }
 0x595   :  { %10526 = vmatprep.subr.bf16.mxu0 %v12705_v32 }
 0x596   :  { %10566 = vmatpush1.bf16.msra.mxu1 %v12772_v1 }
 0x597   :  { %10567 = vmatprep.subr.bf16.mxu1 %v12780_v53 }
 0x598   :  { %10527 = vmatpush1.bf16.msra.mxu0 %v12703_v12 }
 0x599   :  { %10528 = vmatprep.subr.bf16.mxu0 %v12708_v36  ;;  %v12739_v36 = vld [vmem:[#allocation14 + $0xa8] ss:$16 sps:$4 sm:$0xff]  }
 0x59a   :  { %10568 = vmatpush1.bf16.msra.mxu1 %v12778_v19 }
 0x59b   :  { %10569 = vmatprep.subr.bf16.mxu1 %v12786_v50 }
 0x59c   :  { %10529 = vmatpush1.bf16.msra.mxu0 %v12706_v9  ;;  %v12745_v9 = vld [vmem:[#allocation14 + $0x88] ss:$16 sps:$4 sm:$0xff]  }
 0x59d   :  { %10530 = vmatprep.subr.bf16.mxu0 %v12711_v24  ;;  %v12751_v24 = vld [vmem:[#allocation14 + $0x68] ss:$16 sps:$4 sm:$0xff]  }
 0x59e   :  { %10570 = vmatpush1.bf16.msra.mxu1 %v12784_v34  ;;  %v12759_v34 = vld [vmem:[#allocation14 + $0x4c] ss:$16 sps:$4 sm:$0xff]  }
 0x59f   :  { %10571 = vmatprep.subr.bf16.mxu1 %v12792_v58  ;;  %v12757_v58 = vld [vmem:[#allocation14 + $0x48] ss:$16 sps:$4 sm:$0xff]  }
 0x5a0   :  { %10531 = vmatpush2.bf16.msra.mxu0 %v12709_v10  ;;  %v12765_v10 = vld [vmem:[#allocation14 + $0x2c] ss:$16 sps:$4 sm:$0xff]  }
 0x5a1   :  { %10532 = vmatprep.subr.bf16.mxu0 %v12714_v7  ;;  %v12763_v7 = vld [vmem:[#allocation14 + $0x28] ss:$16 sps:$4 sm:$0xff]  }
 0x5a2   :  { %10572 = vmatpush2.bf16.msra.mxu1 %v12790_v28  ;;  %v12771_v28 = vld [vmem:[#allocation14 + $0xc] ss:$16 sps:$4 sm:$0xff]  }
 0x5a3   :  { %10573 = vmatprep.subr.bf16.mxu1 %v12798_v11  ;;  %v12769_v11 = vld [vmem:[#allocation14 + $0x8] ss:$16 sps:$4 sm:$0xff]  }
 0x5a4   :  { %10533 = vmatpush2.bf16.msra.mxu0 %v12712_v0  ;;  %v12777_v0 = vld [vmem:[#allocation14 + $0x1ec] ss:$16 sps:$4 sm:$0xff]  }
 0x5a5   :  { %10534 = vmatprep.subr.bf16.mxu0 %v12717_v52  ;;  %v12775_v52 = vld [vmem:[#allocation14 + $0x1e8] ss:$16 sps:$4 sm:$0xff]  }
 0x5a6   :  { %10574 = vmatpush2.bf16.msra.mxu1 %v12796_v13  ;;  %v12783_v13 = vld [vmem:[#allocation14 + $0x1cc] ss:$16 sps:$4 sm:$0xff]  }
 0x5a7   :  { %10575 = vmatprep.subr.bf16.mxu1 %v12804_v60  ;;  %v12781_v60 = vld [vmem:[#allocation14 + $0x1c8] ss:$16 sps:$4 sm:$0xff]  }
 0x5a8   :  { %10535 = vmatpush2.bf16.msra.mxu0 %v12715_v25  ;;  %v12789_v25 = vld [vmem:[#allocation14 + $0x1ac] ss:$16 sps:$4 sm:$0xff]  }
 0x5a9   :  { %10536 = vmatprep.subr.bf16.mxu0 %v12720_v14  ;;  %v12787_v14 = vld [vmem:[#allocation14 + $0x1a8] ss:$16 sps:$4 sm:$0xff]  }
 0x5aa   :  { %10576 = vmatpush2.bf16.msra.mxu1 %v12802_v57  ;;  %v12795_v57 = vld [vmem:[#allocation14 + $0x18c] ss:$16 sps:$4 sm:$0xff]  }
 0x5ab   :  { %10577 = vmatprep.subr.bf16.mxu1 %v12810_v20  ;;  %v12793_v20 = vld [vmem:[#allocation14 + $0x188] ss:$16 sps:$4 sm:$0xff]  }
 0x5ac   :  { %10537 = vmatpush2.bf16.msra.mxu0 %v12718_v56  ;;  %v12801_v56 = vld [vmem:[#allocation14 + $0x16c] ss:$16 sps:$4 sm:$0xff]  }
 0x5ad   :  { %10538 = vmatprep.subr.bf16.mxu0 %v12723_v17  ;;  %v12799_v17 = vld [vmem:[#allocation14 + $0x168] ss:$16 sps:$4 sm:$0xff]  }
 0x5ae   :  { %10578 = vmatpush2.bf16.msra.mxu1 %v12808_v45  ;;  %v12807_v45 = vld [vmem:[#allocation14 + $0x14c] ss:$16 sps:$4 sm:$0xff]  }
 0x5af   :  { %10579 = vmatprep.subr.bf16.mxu1 %v12816_v18  ;;  %v12805_v18 = vld [vmem:[#allocation14 + $0x148] ss:$16 sps:$4 sm:$0xff]  }
 0x5b0   :  { %10539 = vmatpush2.bf16.msra.mxu0 %v12721_v39  ;;  %v12813_v39 = vld [vmem:[#allocation14 + $0x12c] ss:$16 sps:$4 sm:$0xff]  }
 0x5b1   :  { %10540 = vmatprep.subr.bf16.mxu0 %v12726_v55  ;;  %v12811_v55 = vld [vmem:[#allocation14 + $0x128] ss:$16 sps:$4 sm:$0xff]  }
 0x5b2   :  { %10580 = vmatpush2.bf16.msra.mxu1 %v12814_v4  ;;  %v12819_v4 = vld [vmem:[#allocation14 + $0x10c] ss:$16 sps:$4 sm:$0xff]  }
 0x5b3   :  { %10581 = vmatprep.subr.bf16.mxu1 %v12822_v8  ;;  %v12817_v8 = vld [vmem:[#allocation14 + $0x108] ss:$16 sps:$4 sm:$0xff]  }
 0x5b4   :  { %10541 = vmatpush2.bf16.msra.mxu0 %v12724_v30  ;;  %v12825_v30 = vld [vmem:[#allocation14 + $0x4ec] ss:$16 sps:$4 sm:$0xff]  }
 0x5b5   :  { %10542 = vmatprep.subr.bf16.mxu0 %v12729_v62 }
 0x5b6   :  { %10582 = vmatpush2.bf16.msra.mxu1 %v12820_v26  ;;  %v12823_v26 = vld [vmem:[#allocation14 + $0x4e8] ss:$16 sps:$4 sm:$0xff]  }
 0x5b7   :  { %10583 = vmatprep.subr.bf16.mxu1 %v12828_v22  ;;  %v12831_v22 = vld [vmem:[#allocation14 + $0x4cc] ss:$16 sps:$4 sm:$0xff]  }
 0x5b8   :  { %10543 = vmatpush2.bf16.msra.mxu0 %v12727_v63 }
 0x5b9   :  { %10544 = vmatprep.subr.bf16.mxu0 %v12732_v48 }
 0x5ba   :  { %10584 = vmatpush2.bf16.msra.mxu1 %v12826_v41 }
 0x5bb   :  { %10585 = vmatprep.subr.bf16.mxu1 %v12834_v46 }
 0x5bc   :  { %10545 = vmatpush2.bf16.msra.mxu0 %v12730_v6  ;;  %v12829_v6 = vld [vmem:[#allocation14 + $0x4c8] ss:$16 sps:$4 sm:$0xff]  }
 0x5bd   :  { %10596 = vmatprep.subr.bf16.mxu0 %v12735_v29  ;;  %v12837_v29 = vld [vmem:[#allocation14 + $0x4ac] ss:$16 sps:$4 sm:$0xff]  }
 0x5be   :  { %10586 = vmatpush2.bf16.msra.mxu1 %v12832_v61 }
 0x5bf   :  { %v8728_v42 = vpop.f32.mrf.mxu0  ;;  %10547 = vmatmul.mubr.bf16.vlgmr.msra.gmra.mxu0 %v13776_v5  ;;  %10637 = vmatprep.subr.bf16.mxu1 %v12840_v37 }
 0x5c0   :  { %v8729_v43 = vadd.f32 %v8728_v42, %v13770_v59  ;;  %v8769_v21 = vpop.f32.mrf.mxu1  ;;  %10597 = vmatpush1.bf16.msra.mxu0 %v12733_v31  ;;  %10628 = vmatprep.mubr.bf16.mxu0 %v13745_v23  ;;  %v12747_v59 = vld [vmem:[#allocation14 + $0x8c] ss:$16 sps:$4 sm:$0xff]  }
 0x5c1   :  { %v13781_v38 = vpop.f32.mrf.mxu0  ;;  %10598 = vmatprep.subr.bf16.mxu0 %v12738_v35  ;;  %v12753_v23 = vld [vmem:[#allocation14 + $0x6c] ss:$16 sps:$4 sm:$0xff]  }
 0x5c2   :  { %v13783_v32 = vadd.f32 %v8769_v21, %v8729_v43  ;;  %v13785_v1 = vpop.f32.mrf.mxu1  ;;  %v8731_v62 = vadd.f32 %v13781_v38, %v13773_v15 }
 0x5c3   :  { %v8732_v53 = vpop.f32.mrf.mxu0 }
 0x5c4   :  { %v8773_v12 = vpop.f32.mrf.mxu1  ;;  %10599 = vmatpush1.bf16.msra.mxu0 %v12736_v54  ;;  %v8772_v48 = vadd.f32 %v13785_v1, %v8731_v62  ;;  %v12843_v54 = vld [vmem:[#allocation14 + $0x48c] ss:$16 sps:$4 sm:$0xff]   ;;  %v12841_v53 = vld [vmem:[#allocation14 + $0x488] ss:$16 sps:$4 sm:$0xff]  }
 0x5c5   :  { %v8733_v19 = vpop.f32.mrf.mxu0  ;;  %10600 = vmatprep.subr.bf16.mxu0 %v12741_v3  ;;  %v12846_v12 = vld [vmem:[#allocation14 + $0x2cc] ss:$16 sps:$4 sm:$0xff]  }
 0x5c6   :  { %v8774_v50 = vpop.f32.mrf.mxu1  ;;  %v12844_v19 = vld [vmem:[#allocation14 + $0x2c8] ss:$16 sps:$4 sm:$0xff]   ;;  %v12894_v62 = vld [vmem:[#allocation14 + $0x3cc] ss:$16 sps:$4 sm:$0xff]  }
 0x5c7   :  { %v12852_v50 = vld [vmem:[#allocation14 + $0x2ac] ss:$16 sps:$4 sm:$0xff]  }
 0x5c8   :  { %10601 = vmatpush1.bf16.msra.mxu0 %v12739_v36  ;;  %v12849_v36 = vld [vmem:[#allocation14 + $0x46c] ss:$16 sps:$4 sm:$0xff]  }
 0x5c9   :  { %10602 = vmatprep.subr.bf16.mxu0 %v12747_v59  ;;  %v12847_v59 = vld [vmem:[#allocation14 + $0x468] ss:$16 sps:$4 sm:$0xff]  }
 0x5cc   :  { %10603 = vmatpush1.bf16.msra.mxu0 %v12745_v9  ;;  %v12855_v9 = vld [vmem:[#allocation14 + $0x44c] ss:$16 sps:$4 sm:$0xff]  }
 0x5cd   :  { %10604 = vmatprep.subr.bf16.mxu0 %v12753_v23  ;;  %v12850_v23 = vld [vmem:[#allocation14 + $0x2a8] ss:$16 sps:$4 sm:$0xff]  }
 0x5d0   :  { %10605 = vmatpush1.bf16.msra.mxu0 %v12751_v24  ;;  %v12853_v24 = vld [vmem:[#allocation14 + $0x448] ss:$16 sps:$4 sm:$0xff]  }
 0x5d1   :  { %10606 = vmatprep.subr.bf16.mxu0 %v12759_v34  ;;  %v12858_v34 = vld [vmem:[#allocation14 + $0x28c] ss:$16 sps:$4 sm:$0xff]  }
 0x5d4   :  { %10607 = vmatpush1.bf16.msra.mxu0 %v12757_v58  ;;  %v12861_v58 = vld [vmem:[#allocation14 + $0x42c] ss:$16 sps:$4 sm:$0xff]  }
 0x5d5   :  { %10608 = vmatprep.subr.bf16.mxu0 %v12765_v10  ;;  %v12856_v10 = vld [vmem:[#allocation14 + $0x288] ss:$16 sps:$4 sm:$0xff]  }
 0x5d8   :  { %10609 = vmatpush1.bf16.msra.mxu0 %v12763_v7  ;;  %v12864_v7 = vld [vmem:[#allocation14 + $0x26c] ss:$16 sps:$4 sm:$0xff]  }
 0x5d9   :  { %10610 = vmatprep.subr.bf16.mxu0 %v12771_v28  ;;  %v12867_v28 = vld [vmem:[#allocation14 + $0x40c] ss:$16 sps:$4 sm:$0xff]  }
 0x5dc   :  { %10611 = vmatpush1.bf16.msra.mxu0 %v12769_v11  ;;  %v12862_v11 = vld [vmem:[#allocation14 + $0x268] ss:$16 sps:$4 sm:$0xff]  }
 0x5dd   :  { %10612 = vmatprep.subr.bf16.mxu0 %v12777_v0  ;;  %v12865_v0 = vld [vmem:[#allocation14 + $0x408] ss:$16 sps:$4 sm:$0xff]  }
 0x5e0   :  { %10613 = vmatpush2.bf16.msra.mxu0 %v12775_v52  ;;  %v12870_v52 = vld [vmem:[#allocation14 + $0x24c] ss:$16 sps:$4 sm:$0xff]  }
 0x5e1   :  { %10614 = vmatprep.subr.bf16.mxu0 %v12783_v13  ;;  %v12873_v13 = vld [vmem:[#allocation14 + $0x5ec] ss:$16 sps:$4 sm:$0xff]  }
 0x5e4   :  { %10615 = vmatpush2.bf16.msra.mxu0 %v12781_v60  ;;  %v12868_v60 = vld [vmem:[#allocation14 + $0x248] ss:$16 sps:$4 sm:$0xff]  }
 0x5e5   :  { %10616 = vmatprep.subr.bf16.mxu0 %v12789_v25  ;;  %v12871_v25 = vld [vmem:[#allocation14 + $0x5e8] ss:$16 sps:$4 sm:$0xff]  }
 0x5e8   :  { %10617 = vmatpush2.bf16.msra.mxu0 %v12787_v14  ;;  %v12876_v14 = vld [vmem:[#allocation14 + $0x22c] ss:$16 sps:$4 sm:$0xff]  }
 0x5e9   :  { %10618 = vmatprep.subr.bf16.mxu0 %v12795_v57  ;;  %v12879_v57 = vld [vmem:[#allocation14 + $0x5cc] ss:$16 sps:$4 sm:$0xff]  }
 0x5ec   :  { %10619 = vmatpush2.bf16.msra.mxu0 %v12793_v20  ;;  %v12874_v20 = vld [vmem:[#allocation14 + $0x228] ss:$16 sps:$4 sm:$0xff]  }
 0x5ed   :  { %10620 = vmatprep.subr.bf16.mxu0 %v12801_v56  ;;  %v12877_v56 = vld [vmem:[#allocation14 + $0x5c8] ss:$16 sps:$4 sm:$0xff]  }
 0x5f0   :  { %10621 = vmatpush2.bf16.msra.mxu0 %v12799_v17  ;;  %v12882_v17 = vld [vmem:[#allocation14 + $0x20c] ss:$16 sps:$4 sm:$0xff]  }
 0x5f1   :  { %10622 = vmatprep.subr.bf16.mxu0 %v12807_v45  ;;  %v12885_v45 = vld [vmem:[#allocation14 + $0x5ac] ss:$16 sps:$4 sm:$0xff]  }
 0x5f4   :  { %10623 = vmatpush2.bf16.msra.mxu0 %v12805_v18  ;;  %v12880_v18 = vld [vmem:[#allocation14 + $0x208] ss:$16 sps:$4 sm:$0xff]  }
 0x5f5   :  { %10624 = vmatprep.subr.bf16.mxu0 %v12813_v39  ;;  %v12883_v39 = vld [vmem:[#allocation14 + $0x5a8] ss:$16 sps:$4 sm:$0xff]  }
 0x5f8   :  { %10625 = vmatpush2.bf16.msra.mxu0 %v12811_v55  ;;  %v12888_v55 = vld [vmem:[#allocation14 + $0x3ec] ss:$16 sps:$4 sm:$0xff]  }
 0x5f9   :  { %10626 = vmatprep.subr.bf16.mxu0 %v12819_v4  ;;  %v12891_v4 = vld [vmem:[#allocation14 + $0x58c] ss:$16 sps:$4 sm:$0xff]  }
 0x5fc   :  { %10627 = vmatpush2.bf16.msra.mxu0 %v12817_v8  ;;  %v12886_v8 = vld [vmem:[#allocation14 + $0x3e8] ss:$16 sps:$4 sm:$0xff]  }
 0x5fd   :  { %10678 = vmatprep.subr.bf16.mxu0 %v12825_v30  ;;  %v12889_v30 = vld [vmem:[#allocation14 + $0x588] ss:$16 sps:$4 sm:$0xff]  }
 0x5ff   :  { %v8810_v63 = vpop.f32.mrf.mxu0  ;;  %10629 = vmatmul.mubr.bf16.vlgmr.msra.gmra.mxu0 %v13760_v16  ;;  %v12835_v16 = vld [vmem:[#allocation14 + $0x4a8] ss:$16 sps:$4 sm:$0xff]  }
 0x600   :  { %v8811_v41 = vadd.f32 %v8810_v63, %v13783_v32  ;;  %v8851_v46 = vpop.f32.mrf.mxu1  ;;  %10679 = vmatpush1.bf16.msra.mxu0 %v12823_v26  ;;  %10710 = vmatprep.mubr.bf16.mxu0 %v13764_v2  ;;  %v12838_v2 = vld [vmem:[#allocation14 + $0x2e8] ss:$16 sps:$4 sm:$0xff]   ;;  %v12897_v26 = vld [vmem:[#allocation14 + $0x56c] ss:$16 sps:$4 sm:$0xff]  }
 0x601   :  { %v8812_v40 = vpop.f32.mrf.mxu0  ;;  %10680 = vmatprep.subr.bf16.mxu0 %v12831_v22  ;;  %v12892_v22 = vld [vmem:[#allocation14 + $0x3c8] ss:$16 sps:$4 sm:$0xff]  }
 0x602   :  { %v8852_v15 = vadd.f32 %v8851_v46, %v8811_v41  ;;  %v8813_v61 = vadd.f32 %v8812_v40, %v8772_v48  ;;  %v8853_v37 = vpop.f32.mrf.mxu1  ;;  %v12895_v63 = vld [vmem:[#allocation14 + $0x568] ss:$16 sps:$4 sm:$0xff]   ;;  %v12900_v48 = vld [vmem:[#allocation14 + $0x3ac] ss:$16 sps:$4 sm:$0xff]  }
 0x603   :  { %v8814_v31 = vpop.f32.mrf.mxu0  ;;  %v12903_v41 = vld [vmem:[#allocation14 + $0x54c] ss:$16 sps:$4 sm:$0xff]   ;;  %v12898_v46 = vld [vmem:[#allocation14 + $0x3a8] ss:$16 sps:$4 sm:$0xff]  }
 0x604   :  { %v8854_v35 = vadd.f32 %v8853_v37, %v8813_v61  ;;  %v8855_v42 = vpop.f32.mrf.mxu1  ;;  %10681 = vmatpush1.bf16.msra.mxu0 %v12829_v6  ;;  %v8864_v43 = vmax.f32 %v8852_v15, 0.0  ;;  %v12901_v6 = vld [vmem:[#allocation14 + $0x548] ss:$16 sps:$4 sm:$0xff]   ;;  %v12906_v40 = vld [vmem:[#allocation14 + $0x38c] ss:$16 sps:$4 sm:$0xff]  }
 0x605   :  { %v8815_v21 = vpop.f32.mrf.mxu0  ;;  %10682 = vmatprep.subr.bf16.mxu0 %v12837_v29  ;;  %v12909_v29 = vld [vmem:[#allocation14 + $0x52c] ss:$16 sps:$4 sm:$0xff]   ;;  %v12904_v15 = vld [vmem:[#allocation14 + $0x388] ss:$16 sps:$4 sm:$0xff]  }
 0x606   :  { %v8865_v38 = vmax.f32 %v8854_v35, 0.0  ;;  %v8856_v3 = vpop.f32.mrf.mxu1  ;;  %v13795_v1 = vpack.c.bf16 %v8864_v43, %v8864_v43  ;;  %v12907_v61 = vld [vmem:[#allocation14 + $0x528] ss:$16 sps:$4 sm:$0xff]   ;;  %v12912_v37 = vld [vmem:[#allocation14 + $0x36c] ss:$16 sps:$4 sm:$0xff]  }
 0x607   :  { %v12915_v31 = vld [vmem:[#allocation14 + $0x50c] ss:$16 sps:$4 sm:$0xff]   ;;  %v12910_v35 = vld [vmem:[#allocation14 + $0x368] ss:$16 sps:$4 sm:$0xff]   ;;  %v13800_v43 = vld [vmem:[#allocation16] sm:$0xf] }
 0x608   :  { %v13793_v32 = vpack.c.bf16 %v8865_v38, %v8865_v38  ;;  %10683 = vmatpush1.bf16.msra.mxu0 %v12835_v16  ;;  %v12913_v42 = vld [vmem:[#allocation14 + $0x508] ss:$16 sps:$4 sm:$0xff]   ;;  %v12918_v16 = vld [vmem:[#allocation14 + $0x34c] ss:$16 sps:$4 sm:$0xff]   ;;  %v9135_v38 = vrot.slane %v13800_v43, %v13475_v44 }
 0x609   :  { %10684 = vmatprep.subr.bf16.mxu0 %v12843_v54  ;;  %v12973_v21 = vld [vmem:[#allocation17 + $0x78] sm:$0xff]   ;;  %v12916_v54 = vld [vmem:[#allocation14 + $0x348] ss:$16 sps:$4 sm:$0xff]  }
 0x60a   :  { %10587 = vmatprep.mubr.bf16.mxu1 %v13793_v32  ;;  %v12921_v3 = vld [vmem:[#allocation14 + $0x32c] ss:$16 sps:$4 sm:$0xff]   ;;  %v12976_v44 = vld [vmem:[#allocation17 + $0x30] sm:$0xff]  }
 0x60b   :  { %10588 = vmatmul.mubr.bf16.vlgmr.msra.gmra.mxu1 %v13795_v1 }
 0x60c   :  { %10638 = vmatpush1.bf16.msra.mxu1 %v12838_v2  ;;  %10669 = vmatprep.mubr.bf16.mxu1 %v13748_v33  ;;  %v12859_v33 = vld [vmem:[#allocation14 + $0x428] ss:$16 sps:$4 sm:$0xff]   ;;  %v12974_v2 = vld [vmem:[#allocation17 + $0x38] sm:$0xff]  }
 0x60d   :  { %10685 = vmatpush1.bf16.msra.mxu0 %v12841_v53  ;;  %10639 = vmatprep.subr.bf16.mxu1 %v12846_v12  ;;  %v9139_v53 = vrot.slane %v13800_v43, %v13481_v49  ;;  %v12975_v12 = vld [vmem:[#allocation17 + $0x70] sm:$0xff]   ;;  %v12977_v49 = vld [vmem:[#allocation17 + $0x68] sm:$0xff]  }
 0x60e   :  { %10686 = vmatprep.subr.bf16.mxu0 %v12849_v36 }
 0x610   :  { %10640 = vmatpush1.bf16.msra.mxu1 %v12844_v19 }
 0x611   :  { %10687 = vmatpush1.bf16.msra.mxu0 %v12847_v59  ;;  %10641 = vmatprep.subr.bf16.mxu1 %v12852_v50  ;;  %v12919_v50 = vld [vmem:[#allocation14 + $0x328] ss:$16 sps:$4 sm:$0xff]  }
 0x612   :  { %10688 = vmatprep.subr.bf16.mxu0 %v12855_v9 }
 0x614   :  { %10642 = vmatpush1.bf16.msra.mxu1 %v12850_v23  ;;  %v12924_v23 = vld [vmem:[#allocation14 + $0x30c] ss:$16 sps:$4 sm:$0xff]  }
 0x615   :  { %10689 = vmatpush1.bf16.msra.mxu0 %v12853_v24  ;;  %10643 = vmatprep.subr.bf16.mxu1 %v12858_v34 }
 0x616   :  { %10690 = vmatprep.subr.bf16.mxu0 %v12861_v58 }
 0x618   :  { %10644 = vmatpush1.bf16.msra.mxu1 %v12856_v10 }
 0x619   :  { %10691 = vmatpush1.bf16.msra.mxu0 %v12859_v33  ;;  %10645 = vmatprep.subr.bf16.mxu1 %v12864_v7 }
 0x61a   :  { %10692 = vmatprep.subr.bf16.mxu0 %v12867_v28  ;;  %v12922_v28 = vld [vmem:[#allocation14 + $0x308] ss:$16 sps:$4 sm:$0xff]  }
 0x61c   :  { %10646 = vmatpush1.bf16.msra.mxu1 %v12862_v11 }
 0x61d   :  { %10693 = vmatpush1.bf16.msra.mxu0 %v12865_v0  ;;  %10647 = vmatprep.subr.bf16.mxu1 %v12870_v52  ;;  %v12978_v0 = vld [vmem:[#allocation17 + $0x28] sm:$0xff]  }
 0x61e   :  { %10694 = vmatprep.subr.bf16.mxu0 %v12873_v13  ;;  %v12979_v13 = vld [vmem:[#allocation17 + $0x60] sm:$0xff]  }
 0x620   :  { %10648 = vmatpush1.bf16.msra.mxu1 %v12868_v60  ;;  %v12925_v60 = vld [vmem:[#allocation14 + $0x6e8] ss:$16 sps:$4 sm:$0xff]  }
 0x621   :  { %10695 = vmatpush2.bf16.msra.mxu0 %v12871_v25  ;;  %10649 = vmatprep.subr.bf16.mxu1 %v12876_v14  ;;  %v12930_v25 = vld [vmem:[#allocation14 + $0x6cc] ss:$16 sps:$4 sm:$0xff]   ;;  %v12980_v14 = vld [vmem:[#allocation17 + $0x20] sm:$0xff]  }
 0x622   :  { %10696 = vmatprep.subr.bf16.mxu0 %v12879_v57  ;;  %v12981_v57 = vld [vmem:[#allocation17 + $0x58] sm:$0xff]  }
 0x624   :  { %10650 = vmatpush1.bf16.msra.mxu1 %v12874_v20  ;;  %v12928_v20 = vld [vmem:[#allocation14 + $0x6c8] ss:$16 sps:$4 sm:$0xff]  }
 0x625   :  { %10697 = vmatpush2.bf16.msra.mxu0 %v12877_v56  ;;  %10651 = vmatprep.subr.bf16.mxu1 %v12882_v17  ;;  %v12933_v56 = vld [vmem:[#allocation14 + $0x6ac] ss:$16 sps:$4 sm:$0xff]  }
 0x626   :  { %10698 = vmatprep.subr.bf16.mxu0 %v12885_v45  ;;  %v12982_v17 = vld [vmem:[#allocation17 + $0x18] sm:$0xff]   ;;  %v12983_v45 = vld [vmem:[#allocation17 + $0x50] sm:$0xff]  }
 0x628   :  { %10652 = vmatpush1.bf16.msra.mxu1 %v12880_v18  ;;  %v12931_v18 = vld [vmem:[#allocation14 + $0x6a8] ss:$16 sps:$4 sm:$0xff]  }
 0x629   :  { %10699 = vmatpush2.bf16.msra.mxu0 %v12883_v39  ;;  %10653 = vmatprep.subr.bf16.mxu1 %v12888_v55  ;;  %v12936_v39 = vld [vmem:[#allocation14 + $0x68c] ss:$16 sps:$4 sm:$0xff]   ;;  %v12984_v55 = vld [vmem:[#allocation17 + $0x10] sm:$0xff]  }
 0x62a   :  { %10700 = vmatprep.subr.bf16.mxu0 %v12891_v4  ;;  %v12985_v4 = vld [vmem:[#allocation17 + $0x48] sm:$0xff]  }
 0x62c   :  { %10654 = vmatpush2.bf16.msra.mxu1 %v12886_v8  ;;  %v12939_v8 = vld [vmem:[#allocation14 + $0x66c] ss:$16 sps:$4 sm:$0xff]  }
 0x62d   :  { %10701 = vmatpush2.bf16.msra.mxu0 %v12889_v30  ;;  %10655 = vmatprep.subr.bf16.mxu1 %v12894_v62  ;;  %v12987_v30 = vld [vmem:[#allocation17 + $0x40] sm:$0xff]  }
 0x62e   :  { %10702 = vmatprep.subr.bf16.mxu0 %v12897_v26  ;;  %v12937_v62 = vld [vmem:[#allocation14 + $0x668] ss:$16 sps:$4 sm:$0xff]   ;;  %v12942_v26 = vld [vmem:[#allocation14 + $0x64c] ss:$16 sps:$4 sm:$0xff]  }
 0x630   :  { %10656 = vmatpush2.bf16.msra.mxu1 %v12892_v22  ;;  %v12988_v22 = vld [vmem:[#allocation17] sm:$0xff]  }
 0x631   :  { %10703 = vmatpush2.bf16.msra.mxu0 %v12895_v63  ;;  %10657 = vmatprep.subr.bf16.mxu1 %v12900_v48  ;;  %v12940_v63 = vld [vmem:[#allocation14 + $0x648] ss:$16 sps:$4 sm:$0xff]   ;;  %v12945_v48 = vld [vmem:[#allocation14 + $0x62c] ss:$16 sps:$4 sm:$0xff]  }
 0x632   :  { %10704 = vmatprep.subr.bf16.mxu0 %v12903_v41  ;;  %v12943_v41 = vld [vmem:[#allocation14 + $0x628] ss:$16 sps:$4 sm:$0xff]  }
 0x634   :  { %10658 = vmatpush2.bf16.msra.mxu1 %v12898_v46  ;;  %v12948_v46 = vld [vmem:[#allocation14 + $0x60c] ss:$16 sps:$4 sm:$0xff]  }
 0x635   :  { %10705 = vmatpush2.bf16.msra.mxu0 %v12901_v6  ;;  %10659 = vmatprep.subr.bf16.mxu1 %v12906_v40  ;;  %v12946_v6 = vld [vmem:[#allocation14 + $0x608] ss:$16 sps:$4 sm:$0xff]   ;;  %v12951_v40 = vld [vmem:[#allocation14 + $0x7ec] ss:$16 sps:$4 sm:$0xff]  }
 0x636   :  { %10706 = vmatprep.subr.bf16.mxu0 %v12909_v29  ;;  %v12949_v29 = vld [vmem:[#allocation14 + $0x7e8] ss:$16 sps:$4 sm:$0xff]  }
 0x638   :  { %10660 = vmatpush2.bf16.msra.mxu1 %v12904_v15  ;;  %v12954_v15 = vld [vmem:[#allocation14 + $0x7cc] ss:$16 sps:$4 sm:$0xff]  }
 0x639   :  { %10707 = vmatpush2.bf16.msra.mxu0 %v12907_v61  ;;  %10661 = vmatprep.subr.bf16.mxu1 %v12912_v37  ;;  %v12952_v61 = vld [vmem:[#allocation14 + $0x7c8] ss:$16 sps:$4 sm:$0xff]   ;;  %v12957_v37 = vld [vmem:[#allocation14 + $0x7ac] ss:$16 sps:$4 sm:$0xff]  }
 0x63a   :  { %10708 = vmatprep.subr.bf16.mxu0 %v12915_v31  ;;  %v12955_v31 = vld [vmem:[#allocation14 + $0x7a8] ss:$16 sps:$4 sm:$0xff]  }
 0x63c   :  { %10662 = vmatpush2.bf16.msra.mxu1 %v12910_v35  ;;  %v12960_v35 = vld [vmem:[#allocation14 + $0x78c] ss:$16 sps:$4 sm:$0xff]  }
 0x63d   :  { %10709 = vmatpush2.bf16.msra.mxu0 %v12913_v42  ;;  %10663 = vmatprep.subr.bf16.mxu1 %v12918_v16  ;;  %v12958_v42 = vld [vmem:[#allocation14 + $0x788] ss:$16 sps:$4 sm:$0xff]   ;;  %v12963_v16 = vld [vmem:[#allocation14 + $0x76c] ss:$16 sps:$4 sm:$0xff]  }
 0x63e   :  { %12525 = vmatprep.subr.bf16.mxu0 %v12973_v21  ;;  %v12961_v21 = vld [vmem:[#allocation14 + $0x768] ss:$16 sps:$4 sm:$0xff]  }
 0x63f   :  { %v10466_v36 = vpop.f32.mrf.mxu0 }
 0x640   :  { %v10467_v19 = vadd.f32 %v10466_v36, %v9135_v38  ;;  %v10507_v59 = vpop.f32.mrf.mxu1  ;;  %10664 = vmatpush2.bf16.msra.mxu1 %v12916_v54  ;;  %10711 = vmatmul.mubr.bf16.vlgmr.msra.gmra.mxu0 %v13776_v5  ;;  %v12927_v5 = vld [vmem:[#allocation14 + $0x6ec] ss:$16 sps:$4 sm:$0xff]   ;;  %v12964_v38 = vld [vmem:[#allocation14 + $0x748] ss:$16 sps:$4 sm:$0xff]  }
 0x641   :  { %v10468_v9 = vpop.f32.mrf.mxu0  ;;  %10665 = vmatprep.subr.bf16.mxu1 %v12921_v3  ;;  %12526 = vmatpush3.bf16.msra.mxu0 %v12974_v2  ;;  %v12966_v54 = vld [vmem:[#allocation14 + $0x74c] ss:$16 sps:$4 sm:$0xff]  }
 0x642   :  { %v13807_v24 = vadd.f32 %v10507_v59, %v10467_v19  ;;  %v10469_v34 = vadd.f32 %v10468_v9, %v9139_v53  ;;  %v10509_v58 = vpop.f32.mrf.mxu1  ;;  %12527 = vmatprep.subr.bf16.mxu0 %v12975_v12  ;;  %v12969_v3 = vld [vmem:[#allocation14 + $0x72c] ss:$16 sps:$4 sm:$0xff]   ;;  %v12967_v12 = vld [vmem:[#allocation14 + $0x728] ss:$16 sps:$4 sm:$0xff]  }
 0x643   :  { %v10470_v10 = vpop.f32.mrf.mxu0  ;;  %v12972_v19 = vld [vmem:[#allocation14 + $0x70c] ss:$16 sps:$4 sm:$0xff]   ;;  %v12970_v9 = vld [vmem:[#allocation14 + $0x708] ss:$16 sps:$4 sm:$0xff]  }
 0x644   :  { %v13809_v33 = vadd.f32 %v10509_v58, %v10469_v34  ;;  %v10511_v7 = vpop.f32.mrf.mxu1  ;;  %10666 = vmatpush2.bf16.msra.mxu1 %v12919_v50  ;;  %v12990_v34 = vld [vmem:[#allocation17 + $0xb8] sm:$0xff]   ;;  %v12991_v58 = vld [vmem:[#allocation17 + $0xf0] sm:$0xff]   ;;  %v12994_v10 = vld [vmem:[#allocation17 + $0xa8] sm:$0xff]  }
 0x645   :  { %v10471_v11 = vpop.f32.mrf.mxu0  ;;  %10667 = vmatprep.subr.bf16.mxu1 %v12924_v23  ;;  %12528 = vmatpush3.bf16.msra.mxu0 %v12976_v44  ;;  %v12989_v44 = vld [vmem:[#allocation17 + $0xf8] sm:$0xff]   ;;  %v12996_v7 = vld [vmem:[#allocation17 + $0xa0] sm:$0xff]  }
 0x646   :  { %v10512_v52 = vpop.f32.mrf.mxu1  ;;  %12529 = vmatprep.subr.bf16.mxu0 %v12977_v49  ;;  %v12993_v49 = vld [vmem:[#allocation17 + $0xe8] sm:$0xff]   ;;  %v12998_v11 = vld [vmem:[#allocation17 + $0x98] sm:$0xff]  }
 0x648   :  { %10668 = vmatpush2.bf16.msra.mxu1 %v12922_v28  ;;  %v12997_v28 = vld [vmem:[#allocation17 + $0xd8] sm:$0xff]  }
 0x649   :  { %10719 = vmatprep.subr.bf16.mxu1 %v12927_v5  ;;  %12530 = vmatpush3.bf16.msra.mxu0 %v12978_v0  ;;  %v13000_v5 = vld [vmem:[#allocation17 + $0x90] sm:$0xff]  }
 0x64a   :  { %12531 = vmatprep.subr.bf16.mxu0 %v12979_v13 }
 0x64b   :  { %10670 = vmatmul.mubr.bf16.vlgmr.msra.gmra.mxu1 %v13762_v27  ;;  %v12934_v27 = vld [vmem:[#allocation14 + $0x688] ss:$16 sps:$4 sm:$0xff]  }
 0x64c   :  { %10720 = vmatpush1.bf16.msra.mxu1 %v12925_v60  ;;  %10751 = vmatprep.mubr.bf16.mxu1 %v13793_v32  ;;  %v12986_v32 = vld [vmem:[#allocation17 + $0x8] sm:$0xff]  }
 0x64d   :  { %10721 = vmatprep.subr.bf16.mxu1 %v12930_v25  ;;  %12532 = vmatpush3.bf16.msra.mxu0 %v12980_v14 }
 0x64e   :  { %12533 = vmatprep.subr.bf16.mxu0 %v12981_v57  ;;  %v13001_v57 = vld [vmem:[#allocation17 + $0xc8] sm:$0xff]  }
 0x650   :  { %10722 = vmatpush1.bf16.msra.mxu1 %v12928_v20 }
 0x651   :  { %10723 = vmatprep.subr.bf16.mxu1 %v12933_v56  ;;  %12534 = vmatpush3.bf16.msra.mxu0 %v12982_v17  ;;  %v13002_v56 = vld [vmem:[#allocation17 + $0x88] sm:$0xff]  }
 0x652   :  { %12535 = vmatprep.subr.bf16.mxu0 %v12983_v45 }
 0x654   :  { %10724 = vmatpush1.bf16.msra.mxu1 %v12931_v18 }
 0x655   :  { %10725 = vmatprep.subr.bf16.mxu1 %v12936_v39  ;;  %12536 = vmatpush3.bf16.msra.mxu0 %v12984_v55  ;;  %v13003_v55 = vld [vmem:[#allocation17 + $0xc0] sm:$0xff]  }
 0x656   :  { %12537 = vmatprep.subr.bf16.mxu0 %v12985_v4 }
 0x658   :  { %10726 = vmatpush1.bf16.msra.mxu1 %v12934_v27  ;;  %v13004_v27 = vld [vmem:[#allocation17 + $0x80] sm:$0xff]  }
 0x659   :  { %10727 = vmatprep.subr.bf16.mxu1 %v12939_v8  ;;  %12538 = vmatpush3.bf16.msra.mxu0 %v12986_v32 }
 0x65a   :  { %12539 = vmatprep.subr.bf16.mxu0 %v12987_v30 }
 0x65c   :  { %10728 = vmatpush1.bf16.msra.mxu1 %v12937_v62 }
 0x65d   :  { %10729 = vmatprep.subr.bf16.mxu1 %v12942_v26  ;;  %12540 = vmatpush3.bf16.msra.mxu0 %v12988_v22  ;;  %v9143_v22 = vrot.slane %v13800_v43, %v13479_v47 }
 0x660   :  { %10730 = vmatpush1.bf16.msra.mxu1 %v12940_v63 }
 0x661   :  { %10731 = vmatprep.subr.bf16.mxu1 %v12945_v48  ;;  %v9147_v48 = vrot.slane %v13800_v43, %v13483_v51 }
 0x664   :  { %10732 = vmatpush1.bf16.msra.mxu1 %v12943_v41 }
 0x665   :  { %10733 = vmatprep.subr.bf16.mxu1 %v12948_v46 }
 0x668   :  { %10734 = vmatpush1.bf16.msra.mxu1 %v12946_v6 }
 0x669   :  { %10735 = vmatprep.subr.bf16.mxu1 %v12951_v40 }
 0x66c   :  { %10736 = vmatpush2.bf16.msra.mxu1 %v12949_v29 }
 0x66d   :  { %10737 = vmatprep.subr.bf16.mxu1 %v12954_v15 }
 0x670   :  { %10738 = vmatpush2.bf16.msra.mxu1 %v12952_v61 }
 0x671   :  { %10739 = vmatprep.subr.bf16.mxu1 %v12957_v37 }
 0x674   :  { %10740 = vmatpush2.bf16.msra.mxu1 %v12955_v31 }
 0x675   :  { %10741 = vmatprep.subr.bf16.mxu1 %v12960_v35 }
 0x678   :  { %10742 = vmatpush2.bf16.msra.mxu1 %v12958_v42 }
 0x679   :  { %10743 = vmatprep.subr.bf16.mxu1 %v12963_v16 }
 0x67c   :  { %10744 = vmatpush2.bf16.msra.mxu1 %v12961_v21 }
 0x67d   :  { %10745 = vmatprep.subr.bf16.mxu1 %v12966_v54 }
 0x67f   :  { %v10548_v2 = vpop.f32.mrf.mxu0 }
 0x680   :  { %v10549_v53 = vadd.f32 %v10548_v2, %v13807_v24  ;;  %10746 = vmatpush2.bf16.msra.mxu1 %v12964_v38  ;;  %v12992_v24 = vld [vmem:[#allocation17 + $0xb0] sm:$0xff]  }
 0x681   :  { %v10550_v36 = vpop.f32.mrf.mxu0  ;;  %10747 = vmatprep.subr.bf16.mxu1 %v12969_v3 }
 0x682   :  { %v10551_v59 = vadd.f32 %v10550_v36, %v13809_v33  ;;  %v12995_v33 = vld [vmem:[#allocation17 + $0xe0] sm:$0xff]  }
 0x683   :  { %v10552_v50 = vpop.f32.mrf.mxu0 }
 0x684   :  { %10748 = vmatpush2.bf16.msra.mxu1 %v12967_v12  ;;  %v12492_v50 = vld [vmem:[#allocation19] ss:$0 sm:$0xff] }
 0x685   :  { %v10553_v23 = vpop.f32.mrf.mxu0  ;;  %10749 = vmatprep.subr.bf16.mxu1 %v12972_v19 }
 0x688   :  { %10750 = vmatpush2.bf16.msra.mxu1 %v12970_v9 }
 0x689   :  { %12547 = vmatprep.subr.bf16.mxu1 %v12989_v44 }
 0x68b   :  { %10752 = vmatmul.mubr.bf16.vlgmr.msra.gmra.mxu1 %v13795_v1  ;;  %v12999_v1 = vld [vmem:[#allocation17 + $0xd0] sm:$0xff]  }
 0x68c   :  { %12548 = vmatpush3.bf16.msra.mxu1 %v12990_v34 }
 0x68d   :  { %12549 = vmatprep.subr.bf16.mxu1 %v12991_v58 }
 0x690   :  { %12550 = vmatpush3.bf16.msra.mxu1 %v12992_v24 }
 0x691   :  { %12551 = vmatprep.subr.bf16.mxu1 %v12993_v49 }
 0x694   :  { %12552 = vmatpush3.bf16.msra.mxu1 %v12994_v10 }
 0x695   :  { %12553 = vmatprep.subr.bf16.mxu1 %v12995_v33 }
 0x698   :  { %12554 = vmatpush3.bf16.msra.mxu1 %v12996_v7 }
 0x699   :  { %12555 = vmatprep.subr.bf16.mxu1 %v12997_v28 }
 0x69c   :  { %12556 = vmatpush3.bf16.msra.mxu1 %v12998_v11 }
 0x69d   :  { %12557 = vmatprep.subr.bf16.mxu1 %v12999_v1 }
 0x6a0   :  { %12558 = vmatpush3.bf16.msra.mxu1 %v13000_v5 }
 0x6a1   :  { %12559 = vmatprep.subr.bf16.mxu1 %v13001_v57 }
 0x6a4   :  { %12560 = vmatpush3.bf16.msra.mxu1 %v13002_v56 }
 0x6a5   :  { %12561 = vmatprep.subr.bf16.mxu1 %v13003_v55 }
 0x6a8   :  { %12562 = vmatpush3.bf16.msra.mxu1 %v13004_v27 }
 0x6bf   :  { %v10630_v0 = vpop.f32.mrf.mxu0 }
 0x6c0   :  { %v10631_v41 = vadd.f32 %v10630_v0, %v9143_v22 }
 0x6c1   :  { %v10632_v52 = vpop.f32.mrf.mxu0 }
 0x6c2   :  { %v10633_v6 = vadd.f32 %v10632_v52, %v9147_v48 }
 0x6c3   :  { %v10634_v13 = vpop.f32.mrf.mxu0 }
 0x6c5   :  { %v10635_v60 = vpop.f32.mrf.mxu0 }
 0x6cb   :  { %v10589_v25 = vpop.f32.mrf.mxu1 }
 0x6cc   :  { %v10590_v14 = vadd.f32 %v10589_v25, %v10549_v53 }
 0x6cd   :  { %v10591_v20 = vpop.f32.mrf.mxu1 }
 0x6ce   :  { %v10592_v17 = vadd.f32 %v10591_v20, %v10551_v59  ;;  %v10760_v45 = vmax.f32 %v10590_v14, 0.0 }
 0x6cf   :  { %v10593_v18 = vpop.f32.mrf.mxu1 }
 0x6d0   :  { %v10761_v39 = vmax.f32 %v10592_v17, 0.0  ;;  %v10764_v32 = vpack.c.bf16 %v10760_v45, %v10760_v45 }
 0x6d1   :  { %v10594_v4 = vpop.f32.mrf.mxu1 }
 0x6d2   :  { %v10765_v8 = vpack.c.bf16 %v10761_v39, %v10761_v39 }
 0x6d4   :  { %11063 = vmatprep.mubr.bf16.mxu0 %v10765_v8 }
 0x6d5   :  { %11064 = vmatmul.mubr.bf16.vlgmr.msra.gmra.mxu0 %v10764_v32 }
 0x700   :  { %v10712_v30 = vpop.f32.mrf.mxu0 }
 0x702   :  { %v10714_v62 = vpop.f32.mrf.mxu0 }
 0x704   :  { %v10716_v26 = vpop.f32.mrf.mxu0 }
 0x706   :  { %v10717_v63 = vpop.f32.mrf.mxu0 }
 0x70b   :  { %v10671_v46 = vpop.f32.mrf.mxu1 }
 0x70c   :  { %v10672_v40 = vadd.f32 %v10671_v46, %v10631_v41 }
 0x70d   :  { %v10673_v29 = vpop.f32.mrf.mxu1 }
 0x70e   :  { %v10674_v15 = vadd.f32 %v10673_v29, %v10633_v6  ;;  %v10713_v61 = vadd.f32 %v10712_v30, %v10672_v40 }
 0x70f   :  { %v10675_v37 = vpop.f32.mrf.mxu1 }
 0x710   :  { %v10715_v31 = vadd.f32 %v10714_v62, %v10674_v15 }
 0x711   :  { %v10676_v35 = vpop.f32.mrf.mxu1 }
 0x74b   :  { %v10753_v42 = vpop.f32.mrf.mxu1 }
 0x74c   :  { %v10754_v16 = vadd.f32 %v10753_v42, %v10713_v61 }
 0x74d   :  { %v10755_v21 = vpop.f32.mrf.mxu1 }
 0x74e   :  { %v10756_v54 = vadd.f32 %v10755_v21, %v10715_v31  ;;  %v10762_v38 = vmax.f32 %v10754_v16, 0.0 }
 0x74f   :  { %v10757_v47 = vpop.f32.mrf.mxu1 }
 0x750   :  { %v10763_v3 = vmax.f32 %v10756_v54, 0.0  ;;  %v10766_v51 = vpack.c.bf16 %v10762_v38, %v10762_v38 }
 0x751   :  { %v10758_v2 = vpop.f32.mrf.mxu1 }
 0x752   :  { %v10767_v53 = vpack.c.bf16 %v10763_v3, %v10763_v3 }
 0x754   :  { %11103 = vmatprep.mubr.bf16.mxu1 %v10767_v53 }
 0x755   :  { %11104 = vmatmul.mubr.bf16.vlgmr.msra.gmra.mxu1 %v10766_v51 }
 0x795   :  { %v12541_v43 = vpop.f32.mrf.mxu0 }
 0x797   :  { %v12542_v12 = vpop.f32.mrf.mxu0 }
 0x798   :  { %v12543_v36 = vadd.f32 %v12542_v12, %v12541_v43 }
 0x799   :  { %v12544_v19 = vpop.f32.mrf.mxu0 }
 0x79a   :  { %v11066_v44 = vadd.f32 %v12543_v36, %v12492_v50 }
 0x79b   :  { %v12545_v59 = vpop.f32.mrf.mxu0 }
 0x815   :  { %v12563_v9 = vpop.f32.mrf.mxu1 }
 0x817   :  { %v12564_v23 = vpop.f32.mrf.mxu1 }
 0x818   :  { %v12565_v34 = vadd.f32 %v12564_v23, %v12563_v9 }
 0x819   :  { %v12566_v58 = vpop.f32.mrf.mxu1 }
 0x81a   :  { %v11106_v24 = vadd.f32 %v12565_v34, %v11066_v44 }
 0x81b   :  { %v12567_v49 = vpop.f32.mrf.mxu1 }
 0x81c   :  { %11111 = vst [vmem:[#allocation20] sm:$0x3] %v11106_v24 }
 0x81d   :  { %13239 = shalt.err (!%p13236_p3)
}
 0x81e   :  { %11121 = dma.vmem_to_hbm [thread:$0]  %s11119_s10, 32, %s13834_s11, [#allocation4]  }
 0x81f   :  { %13260 = dma.done.wait [#allocation4], 32  }
 0x820   :  { %13261 = vsyncadd [#allocation4], 4294967264 }
 0x821   :  { %11125 = vsyncpa [#allocation3], 1 }
 0x822   :  { %11126 = vsyncpa [#allocation6], 1 }
 0x823   :  { %11127 = vsyncpa [#allocation9], 1 }
 0x824   :  { %11128 = vsyncpa [#allocation12], 1 }
 0x825   :  { %11129 = vsyncpa [#allocation15], 1 }
 0x826   :  { %11130 = vsyncpa [#allocation18], 1 }
 0x827   :  { %11131 = vsyncpa [#allocation4], 1 }

</bundles_post_ra>
